<compile_context>
chip_gen: v7x
topology: tpu7x:2x2x1
jax: 0.10.0
libtpu: 0.0.40
codegen_flags: <defaults>
</compile_context>

<pallas_src>
import functools

import jax
import jax.numpy as jnp
from jax import lax
from jax.experimental import pallas as pl
from jax.experimental.pallas import tpu as pltpu


# -----------------------------------------------------------------------------
# Hardware-aware tiling helpers
# -----------------------------------------------------------------------------
def _num_tensorcores():
    """2 on v7x-class chips (2 TensorCores / chip), else 1 (v5e/v6e)."""
    try:
        kind = jax.devices()[0].device_kind.lower().replace(" ", "")
    except Exception:
        return 1
    return 2 if ("v7" in kind or "tpu7" in kind) else 1


def _vmem_limit(need_bytes):
    """Right-sized VMEM request: 2x the estimated tiles, floored at 16 MiB."""
    return int(min(max(2 * need_bytes, 16 << 20), 56 << 20))


def _choose_tn(N, ncores):
    """Lane-dense N tile; only split N when >=2 TensorCores can use it."""
    assert N % 128 == 0, N
    if ncores >= 2:
        if N % 256 == 0 and N >= 512:
            return 256
        if N >= 256:
            return 128
    return N


# -----------------------------------------------------------------------------
# Pallas kernel: 3x3 "same" conv + bias + ReLU on a padded NHWC block
# -----------------------------------------------------------------------------
def _conv3x3_kernel(x_ref, w_ref, b_ref, o_ref, acc_ref, *, H, W, C):
    """One kh tap-row of a 3x3 conv as three kw-shifted matmuls.

    x_ref:   (bb, H+2, W+2, C)  padded NHWC feature block (VMEM resident)
    w_ref:   (1, 3*C, tn)       weight rows ordered (kw, c) for this kh
    b_ref:   (1, tn)            f32 bias
    o_ref:   (bb*H*W, tn)       output block (row order (b, h, w))
    acc_ref: (bb*H*W, tn) f32   accumulator scratch
    """
    kh = pl.program_id(2)

    @pl.when(kh == 0)
    def _():
        acc_ref[...] = jnp.zeros_like(acc_ref)

    bb = x_ref.shape[0]
    part = None
    for kw in range(3):  # static unroll: only kh is a dynamic slice start
        a = x_ref[:, pl.ds(kh, H), kw:kw + W, :].reshape(bb * H * W, C)
        wk = w_ref[0, kw * C:(kw + 1) * C, :]
        d = jnp.dot(a, wk, preferred_element_type=jnp.float32)
        part = d if part is None else part + d
    acc_ref[...] += part

    @pl.when(kh == pl.num_programs(2) - 1)
    def _():
        o_ref[...] = jnp.maximum(acc_ref[...] + b_ref[...], 0.0).astype(o_ref.dtype)


def conv3x3_bias_relu(x_pad, w_taps, bias, out_dtype=jnp.bfloat16):
    """relu(conv2d 3x3, padding=1) on an already spatially padded NHWC input.

    x_pad:  (B, H+2, W+2, C) bf16
    w_taps: (3, 3*C, N) bf16 -- per-kh slabs, rows ordered (kw, c)
    bias:   (N,) f32
    Returns (B*H*W, N) out_dtype, rows ordered (b, h, w).
    """
    B, Hp, Wp, C = x_pad.shape
    H, W = Hp - 2, Wp - 2
    kh3, threeC, N = w_taps.shape
    assert kh3 == 3 and threeC == 3 * C, (w_taps.shape, C)

    ncores = _num_tensorcores()
    tn = _choose_tn(N, ncores)
    # If N cannot be split, split the batch instead so both v7x TCs get work.
    split_batch = ncores >= 2 and (N // tn) == 1 and B >= 2
    bb = 1 if split_batch else B
    mrows = bb * H * W
    assert mrows % 8 == 0, mrows
    grid = (B // bb, N // tn, 3)

    need = (2 * bb * Hp * Wp * C * 2        # input block (double-buffered, bf16)
            + 2 * 3 * C * tn * 2            # per-kh weight block
            + 2 * tn * 4                    # bias
            + 2 * mrows * tn * 2            # output block
            + mrows * tn * 4)               # f32 accumulator scratch
    cost = pl.CostEstimate(
        flops=2 * (B * H * W) * N * (9 * C),
        transcendentals=0,
        bytes_accessed=(B * Hp * Wp * C * 2 + 9 * C * N * 2 + N * 4
                        + B * H * W * N * jnp.dtype(out_dtype).itemsize))

    kernel = functools.partial(_conv3x3_kernel, H=H, W=W, C=C)
    return pl.pallas_call(
        kernel,
        out_shape=jax.ShapeDtypeStruct((B * H * W, N), out_dtype),
        grid_spec=pltpu.PrefetchScalarGridSpec(
            num_scalar_prefetch=0,
            grid=grid,
            in_specs=[
                pl.BlockSpec((bb, Hp, Wp, C), lambda i, j, k: (i, 0, 0, 0)),
                pl.BlockSpec((1, 3 * C, tn), lambda i, j, k: (k, 0, j)),
                pl.BlockSpec((1, tn), lambda i, j, k: (0, j)),
            ],
            out_specs=pl.BlockSpec((mrows, tn), lambda i, j, k: (i, j)),
            scratch_shapes=[pltpu.VMEM((mrows, tn), jnp.float32)],
        ),
        compiler_params=pltpu.CompilerParams(
            dimension_semantics=("parallel", "parallel", "arbitrary"),
            vmem_limit_bytes=_vmem_limit(need)),
        cost_estimate=cost,
    )(x_pad, w_taps, bias.reshape(1, N))


# -----------------------------------------------------------------------------
# Pallas kernel: matmul + bias + ReLU (fcvis)
# -----------------------------------------------------------------------------
def _mm_bias_relu_acc_kernel(a_ref, w_ref, b_ref, o_ref, acc_ref):
    k = pl.program_id(2)

    @pl.when(k == 0)
    def _():
        acc_ref[...] = jnp.zeros_like(acc_ref)

    acc_ref[...] += jnp.dot(a_ref[...], w_ref[...],
                            preferred_element_type=jnp.float32)

    @pl.when(k == pl.num_programs(2) - 1)
    def _():
        o_ref[...] = jnp.maximum(acc_ref[...] + b_ref[...], 0.0).astype(o_ref.dtype)


def _mm_bias_relu_single_kernel(a_ref, w_ref, b_ref, o_ref):
    acc = jnp.dot(a_ref[...], w_ref[...], preferred_element_type=jnp.float32)
    o_ref[...] = jnp.maximum(acc + b_ref[...], 0.0).astype(o_ref.dtype)


def matmul_bias_relu(a, w, bias, out_dtype=jnp.float32):
    """relu(a @ w + bias): a (M, K) bf16, w (K, N) bf16, bias (N,) f32."""
    M, K = a.shape
    Kw, N = w.shape
    assert K == Kw, (K, Kw)
    assert M % 8 == 0 and N % 128 == 0, (M, N)

    ncores = _num_tensorcores()
    tm = 128 if (M % 128 == 0 and M > 128) else M
    tn = _choose_tn(N, ncores)

    # K tiling: >=2 steps when the tiles are big enough to be worth pipelining.
    item = a.dtype.itemsize
    budget = 8 << 20
    tk = K
    for cand in (2048, 1024, 512, 256):
        if K % cand == 0 and K // cand >= 2 and 2 * (tm * cand + cand * tn) * item <= budget:
            tk = cand
            break
    nk = K // tk

    out_item = jnp.dtype(out_dtype).itemsize
    cost = pl.CostEstimate(
        flops=2 * M * N * K, transcendentals=0,
        bytes_accessed=M * K * item + K * N * item + N * 4 + M * N * out_item)
    need = (2 * (tm * tk + tk * tn) * item + 2 * tn * 4
            + 2 * tm * tn * out_item + tm * tn * 4)
    bias2d = bias.reshape(1, N)

    if nk == 1:
        # Single K step: write directly, skip the f32 scratch and phases.
        return pl.pallas_call(
            _mm_bias_relu_single_kernel,
            out_shape=jax.ShapeDtypeStruct((M, N), out_dtype),
            grid_spec=pltpu.PrefetchScalarGridSpec(
                num_scalar_prefetch=0,
                grid=(M // tm, N // tn),
                in_specs=[
                    pl.BlockSpec((tm, K), lambda i, j: (i, 0)),
                    pl.BlockSpec((K, tn), lambda i, j: (0, j)),
                    pl.BlockSpec((1, tn), lambda i, j: (0, j)),
                ],
                out_specs=pl.BlockSpec((tm, tn), lambda i, j: (i, j)),
            ),
            compiler_params=pltpu.CompilerParams(
                dimension_semantics=("parallel", "parallel"),
                vmem_limit_bytes=_vmem_limit(need)),
            cost_estimate=cost,
        )(a, w, bias2d)

    return pl.pallas_call(
        _mm_bias_relu_acc_kernel,
        out_shape=jax.ShapeDtypeStruct((M, N), out_dtype),
        grid_spec=pltpu.PrefetchScalarGridSpec(
            num_scalar_prefetch=0,
            grid=(M // tm, N // tn, nk),
            in_specs=[
                pl.BlockSpec((tm, tk), lambda i, j, k: (i, k)),
                pl.BlockSpec((tk, tn), lambda i, j, k: (k, j)),
                pl.BlockSpec((1, tn), lambda i, j, k: (0, j)),
            ],
            out_specs=pl.BlockSpec((tm, tn), lambda i, j, k: (i, j)),
            scratch_shapes=[pltpu.VMEM((tm, tn), jnp.float32)],
        ),
        compiler_params=pltpu.CompilerParams(
            dimension_semantics=("parallel", "parallel", "arbitrary"),
            vmem_limit_bytes=_vmem_limit(need)),
        cost_estimate=cost,
    )(a, w, bias2d)


# -----------------------------------------------------------------------------
# Plain-JAX ResNet50 backbone (eval mode, BN folded, bf16 NHWC)
# -----------------------------------------------------------------------------
def conv_bn_nhwc(x, w_hwio, b, stride=1, padding=0):
    out = lax.conv_general_dilated(
        x, w_hwio, window_strides=(stride, stride),
        padding=((padding, padding), (padding, padding)),
        dimension_numbers=('NHWC', 'HWIO', 'NHWC'))
    return out + b


def maxpool3x3s2_nhwc(x):
    return lax.reduce_window(
        x, jnp.array(-jnp.inf, dtype=x.dtype), lax.max,
        window_dimensions=(1, 3, 3, 1),
        window_strides=(1, 2, 2, 1),
        padding=((0, 0), (1, 1), (1, 1), (0, 0)))


def bottleneck_forward(x, blk, stride):
    out = jax.nn.relu(conv_bn_nhwc(x, blk['w1'], blk['b1']))
    out = jax.nn.relu(conv_bn_nhwc(out, blk['w2'], blk['b2'], stride=stride, padding=1))
    out = conv_bn_nhwc(out, blk['w3'], blk['b3'])
    if 'wd' in blk:
        identity = conv_bn_nhwc(x, blk['wd'], blk['bd'], stride=stride)
    else:
        identity = x
    return jax.nn.relu(out + identity)


def resnet50_forward(p, x_nhwc):
    x = jax.nn.relu(conv_bn_nhwc(x_nhwc, p['conv1_w'], p['conv1_b'],
                                 stride=2, padding=3))
    x = maxpool3x3s2_nhwc(x)
    for li, blocks in enumerate(p['layers']):
        stride0 = 1 if li == 0 else 2
        for bi, blk in enumerate(blocks):
            x = bottleneck_forward(x, blk, stride0 if bi == 0 else 1)
    return x  # (B, H/32, W/32, 2048) bf16 NHWC


# -----------------------------------------------------------------------------
# VisualNet forward
# -----------------------------------------------------------------------------
def visualnet_forward(params, x):
    B = x.shape[0]
    # Single layout change at the network input: NCHW f32 -> NHWC bf16.
    xh = jnp.transpose(x, (0, 2, 3, 1)).astype(jnp.bfloat16)

    feat = resnet50_forward(params['resnet'], xh)            # (B, 8, 8, 2048) bf16
    _, Hf, Wf, _ = feat.shape

    # convres: pad spatially (tiny) and run the in-kernel-im2col conv kernel.
    y = conv3x3_bias_relu(jnp.pad(feat, ((0, 0), (1, 1), (1, 1), (0, 0))),
                          params['convres_w'], params['convres_b'])   # (B*Hf*Wf, 256)
    y = y.reshape(B, Hf, Wf, -1)

    # convvis: output channels zero-padded 32 -> 128 so stores are lane-dense.
    z = conv3x3_bias_relu(jnp.pad(y, ((0, 0), (1, 1), (1, 1), (0, 0))),
                          params['convvis_w'], params['convvis_b'])   # (B*Hf*Wf, 128)
    z = z.reshape(B, Hf, Wf, -1)[..., :32]                   # drop padded channels

    # fcvis: NHWC flatten (fcvis weight rows were permuted at init to match),
    # pad the batch rows to a full sublane group.
    fi = z.reshape(B, Hf * Wf * 32)
    Mp = max(8, ((B + 7) // 8) * 8)
    fi = jnp.pad(fi, ((0, Mp - B), (0, 0)))
    out = matmul_bias_relu(fi, params['fcvis_w'], params['fcvis_b'],
                           out_dtype=jnp.float32)            # (Mp, 512)
    return out[:B]


# -----------------------------------------------------------------------------
# Deterministic parameter initialization
# -----------------------------------------------------------------------------
class KeyGen:
    def __init__(self, key):
        self._key = key
        self._i = 0

    def __call__(self):
        self._i += 1
        return jax.random.fold_in(self._key, self._i)


def conv_w(key, o, c, kh, kw):
    fan_in = c * kh * kw
    return jax.random.normal(key, (o, c, kh, kw), jnp.float32) * (2.0 / fan_in) ** 0.5


def make_bn(c):
    return dict(gamma=jnp.ones((c,), jnp.float32),
                beta=jnp.zeros((c,), jnp.float32),
                mean=jnp.zeros((c,), jnp.float32),
                var=jnp.ones((c,), jnp.float32))


def init_resnet50_raw(kg):
    p = {'conv1': conv_w(kg(), 64, 3, 7, 7), 'bn1': make_bn(64)}
    inplanes = 64
    layers = []
    for planes, nblocks, stride in [(64, 3, 1), (128, 4, 2), (256, 6, 2), (512, 3, 2)]:
        blocks = []
        for bidx in range(nblocks):
            s = stride if bidx == 0 else 1
            blk = dict(
                w1=conv_w(kg(), planes, inplanes, 1, 1), bn1=make_bn(planes),
                w2=conv_w(kg(), planes, planes, 3, 3), bn2=make_bn(planes),
                w3=conv_w(kg(), planes * 4, planes, 1, 1), bn3=make_bn(planes * 4),
            )
            if s != 1 or inplanes != planes * 4:
                blk['wd'] = conv_w(kg(), planes * 4, inplanes, 1, 1)
                blk['bnd'] = make_bn(planes * 4)
            blocks.append(blk)
            inplanes = planes * 4
        layers.append(blocks)
    p['layers'] = layers
    return p


def fold_conv_bn(w_oihw, bn, eps=1e-5):
    """Fold eval-mode BN into the conv: returns (HWIO bf16 weight, bf16 bias)."""
    scale = bn['gamma'] * lax.rsqrt(bn['var'] + eps)
    shift = bn['beta'] - bn['mean'] * scale
    w = w_oihw * scale[:, None, None, None]
    return (jnp.transpose(w, (2, 3, 1, 0)).astype(jnp.bfloat16),
            shift.astype(jnp.bfloat16))


def fold_resnet50(raw):
    p = {}
    p['conv1_w'], p['conv1_b'] = fold_conv_bn(raw['conv1'], raw['bn1'])
    layers = []
    for blocks in raw['layers']:
        fb = []
        for blk in blocks:
            nb = {}
            nb['w1'], nb['b1'] = fold_conv_bn(blk['w1'], blk['bn1'])
            nb['w2'], nb['b2'] = fold_conv_bn(blk['w2'], blk['bn2'])
            nb['w3'], nb['b3'] = fold_conv_bn(blk['w3'], blk['bn3'])
            if 'wd' in blk:
                nb['wd'], nb['bd'] = fold_conv_bn(blk['wd'], blk['bnd'])
            fb.append(nb)
        layers.append(fb)
    p['layers'] = layers
    return p


def _conv3x3_w_to_taps(w_oihw):
    """OIHW (O, C, 3, 3) -> (3, 3*C, O): per-kh slabs, rows ordered (kw, c)."""
    o, c = w_oihw.shape[0], w_oihw.shape[1]
    return jnp.transpose(w_oihw, (2, 3, 1, 0)).reshape(3, 3 * c, o)


def init_params(kg, feature_dim=512):
    params = {'resnet': fold_resnet50(init_resnet50_raw(kg))}

    # Head weights are stored once in the kernel layout (tap-slab bf16); the
    # jitted forward never transposes or casts weights.
    convres_w = conv_w(kg(), 256, 2048, 3, 3)
    params['convres_w'] = _conv3x3_w_to_taps(convres_w).astype(jnp.bfloat16)
    params['convres_b'] = 0.01 * jax.random.normal(kg(), (256,), jnp.float32)

    convvis_w = conv_w(kg(), 32, 256, 3, 3)
    taps = _conv3x3_w_to_taps(convvis_w)                     # (3, 768, 32)
    params['convvis_w'] = jnp.pad(
        taps, ((0, 0), (0, 0), (0, 128 - 32))).astype(jnp.bfloat16)
    convvis_b = 0.01 * jax.random.normal(kg(), (32,), jnp.float32)
    params['convvis_b'] = jnp.pad(convvis_b, (0, 128 - 32))  # f32, zero-padded

    # fcvis: PyTorch weight (512, 2048) consumes an NCHW flatten (c, h, w).
    # Runtime flatten here is NHWC (h, w, c) with the 8x8x32 convvis output,
    # so permute the rows once at init -> runtime flatten is a free view.
    fcvis_w = jax.random.normal(kg(), (feature_dim, 2048), jnp.float32) * (1.0 / 2048) ** 0.5
    w_kn = fcvis_w.T.reshape(32, 8, 8, feature_dim)           # rows (c, h, w)
    w_kn = jnp.transpose(w_kn, (1, 2, 0, 3)).reshape(2048, feature_dim)  # rows (h, w, c)
    params['fcvis_w'] = w_kn.astype(jnp.bfloat16)
    params['fcvis_b'] = 0.01 * jax.random.normal(kg(), (feature_dim,), jnp.float32)
    return params


if __name__ == "__main__":
    key = jax.random.PRNGKey(0)
    kg = KeyGen(key)
    params = init_params(kg, feature_dim=512)

    # Input must be 256x256 so the flattened convvis output is 32*8*8 = 2048,
    # matching fcvis's in_features (as the PyTorch module requires).
    x = jax.random.normal(jax.random.fold_in(key, 12345), (2, 3, 256, 256), jnp.float32)

    fwd = jax.jit(visualnet_forward)
    out = jax.block_until_ready(fwd(params, x))

    assert out.shape == (2, 512), out.shape
    assert bool(jnp.all(jnp.isfinite(out)))
    assert bool(jnp.all(out >= 0.0))  # final ReLU
    print("KERNEL_OK")
</pallas_src>

<mosaic_0001>
module attributes {stable_mosaic.version = 11 : i64} {
  func.func @_conv3x3_kernel(%arg0: i32, %arg1: i32, %arg2: i32, %arg3: memref<2x10x10x2048xbf16, #tpu.memory_space<vmem>>, %arg4: memref<1x6144x256xbf16, #tpu.memory_space<vmem>>, %arg5: memref<1x256xf32, #tpu.memory_space<vmem>>, %arg6: memref<128x256xbf16, #tpu.memory_space<vmem>>, %arg7: memref<128x256xf32, #tpu.memory_space<vmem>>) attributes {dimension_semantics = [#tpu.dimension_semantics<parallel>, #tpu.dimension_semantics<parallel>, #tpu.dimension_semantics<arbitrary>], iteration_bounds = array<i64: 1, 1, 3>, scalar_prefetch = 0 : i64, scratch_operands = 1 : i64, tpu.core_type = #tpu.core_type<tc>, window_params = [{transform_indices = @transform_0, window_bounds = array<i64: 2, 10, 10, 2048>}, {transform_indices = @transform_1, window_bounds = array<i64: 1, 6144, 256>}, {transform_indices = @transform_2, window_bounds = array<i64: 1, 256>}, {transform_indices = @transform_3, window_bounds = array<i64: 128, 256>}]} {
    %c0_i32 = arith.constant 0 : i32
    %0 = arith.cmpi eq, %arg2, %c0_i32 : i32
    %1 = arith.extui %0 : i1 to i32
    %c0_i32_0 = arith.constant 0 : i32
    %2 = arith.cmpi ne, %1, %c0_i32_0 : i32
    scf.if %2 {
      %cst_21 = arith.constant 0.000000e+00 : f32
      %29 = vector.broadcast %cst_21 : f32 to vector<128x256xf32>
      %c0_22 = arith.constant 0 : index
      %c0_23 = arith.constant 0 : index
      %30 = vector.load %arg7[%c0_22, %c0_23] : memref<128x256xf32, #tpu.memory_space<vmem>>, vector<128x256xf32>
      tpu.vector_store %arg7[%c0_22, %c0_23], %29 {strides = array<i32>} : memref<128x256xf32, #tpu.memory_space<vmem>>, vector<128x256xf32>,
    } else {
    }
    %c0 = arith.constant 0 : index
    %3 = arith.index_cast %arg2 : i32 to index
    %c0_1 = arith.constant 0 : index
    %c0_2 = arith.constant 0 : index
    %4 = vector.load %arg3[%c0, %3, %c0_1, %c0_2] : memref<2x10x10x2048xbf16, #tpu.memory_space<vmem>>, vector<2x8x8x2048xbf16>
    %5 = vector.shape_cast %4 : vector<2x8x8x2048xbf16> to vector<128x2048xbf16>
    %c0_3 = arith.constant 0 : index
    %c0_4 = arith.constant 0 : index
    %c0_5 = arith.constant 0 : index
    %6 = vector.load %arg4[%c0_3, %c0_4, %c0_5] : memref<1x6144x256xbf16, #tpu.memory_space<vmem>>, vector<1x2048x256xbf16>
    %7 = vector.shape_cast %6 : vector<1x2048x256xbf16> to vector<2048x256xbf16>
    %cst = arith.constant dense<0.000000e+00> : vector<128x256xf32>
    %8 = tpu.matmul %5, %7, %cst {dimension_numbers = #tpu.dot_dimension_numbers<[1], [0], [0], [1], [0, 0, 1, 1], [], []>} : vector<128x2048xbf16>, vector<2048x256xbf16>, vector<128x256xf32> -> vector<128x256xf32>
    %c0_6 = arith.constant 0 : index
    %9 = arith.index_cast %arg2 : i32 to index
    %c1 = arith.constant 1 : index
    %c0_7 = arith.constant 0 : index
    %10 = vector.load %arg3[%c0_6, %9, %c1, %c0_7] : memref<2x10x10x2048xbf16, #tpu.memory_space<vmem>>, vector<2x8x8x2048xbf16>
    %11 = vector.shape_cast %10 : vector<2x8x8x2048xbf16> to vector<128x2048xbf16>
    %c0_8 = arith.constant 0 : index
    %c2048 = arith.constant 2048 : index
    %c0_9 = arith.constant 0 : index
    %12 = vector.load %arg4[%c0_8, %c2048, %c0_9] : memref<1x6144x256xbf16, #tpu.memory_space<vmem>>, vector<1x2048x256xbf16>
    %13 = vector.shape_cast %12 : vector<1x2048x256xbf16> to vector<2048x256xbf16>
    %cst_10 = arith.constant dense<0.000000e+00> : vector<128x256xf32>
    %14 = tpu.matmul %11, %13, %cst_10 {dimension_numbers = #tpu.dot_dimension_numbers<[1], [0], [0], [1], [0, 0, 1, 1], [], []>} : vector<128x2048xbf16>, vector<2048x256xbf16>, vector<128x256xf32> -> vector<128x256xf32>
    %15 = arith.addf %8, %14 : vector<128x256xf32>
    %c0_11 = arith.constant 0 : index
    %16 = arith.index_cast %arg2 : i32 to index
    %c2 = arith.constant 2 : index
    %c0_12 = arith.constant 0 : index
    %17 = vector.load %arg3[%c0_11, %16, %c2, %c0_12] : memref<2x10x10x2048xbf16, #tpu.memory_space<vmem>>, vector<2x8x8x2048xbf16>
    %18 = vector.shape_cast %17 : vector<2x8x8x2048xbf16> to vector<128x2048xbf16>
    %c0_13 = arith.constant 0 : index
    %c4096 = arith.constant 4096 : index
    %c0_14 = arith.constant 0 : index
    %19 = vector.load %arg4[%c0_13, %c4096, %c0_14] : memref<1x6144x256xbf16, #tpu.memory_space<vmem>>, vector<1x2048x256xbf16>
    %20 = vector.shape_cast %19 : vector<1x2048x256xbf16> to vector<2048x256xbf16>
    %cst_15 = arith.constant dense<0.000000e+00> : vector<128x256xf32>
    %21 = tpu.matmul %18, %20, %cst_15 {dimension_numbers = #tpu.dot_dimension_numbers<[1], [0], [0], [1], [0, 0, 1, 1], [], []>} : vector<128x2048xbf16>, vector<2048x256xbf16>, vector<128x256xf32> -> vector<128x256xf32>
    %22 = arith.addf %15, %21 : vector<128x256xf32>
    %c0_16 = arith.constant 0 : index
    %c0_17 = arith.constant 0 : index
    %23 = vector.load %arg7[%c0_16, %c0_17] : memref<128x256xf32, #tpu.memory_space<vmem>>, vector<128x256xf32>
    %24 = arith.addf %23, %22 : vector<128x256xf32>
    %c0_18 = arith.constant 0 : index
    %c0_19 = arith.constant 0 : index
    %25 = vector.load %arg7[%c0_18, %c0_19] : memref<128x256xf32, #tpu.memory_space<vmem>>, vector<128x256xf32>
    tpu.vector_store %arg7[%c0_18, %c0_19], %24 {strides = array<i32>} : memref<128x256xf32, #tpu.memory_space<vmem>>, vector<128x256xf32>,
    %c2_i32 = arith.constant 2 : i32
    %26 = arith.cmpi eq, %arg2, %c2_i32 : i32
    %27 = arith.extui %26 : i1 to i32
    %c0_i32_20 = arith.constant 0 : i32
    %28 = arith.cmpi ne, %27, %c0_i32_20 : i32
    scf.if %28 {
      %c0_21 = arith.constant 0 : index
      %c0_22 = arith.constant 0 : index
      %29 = vector.load %arg7[%c0_21, %c0_22] : memref<128x256xf32, #tpu.memory_space<vmem>>, vector<128x256xf32>
      %c0_23 = arith.constant 0 : index
      %c0_24 = arith.constant 0 : index
      %30 = vector.load %arg5[%c0_23, %c0_24] : memref<1x256xf32, #tpu.memory_space<vmem>>, vector<1x256xf32>
      %31 = vector.broadcast %30 : vector<1x256xf32> to vector<128x256xf32>
      %32 = arith.addf %29, %31 : vector<128x256xf32>
      %cst_25 = arith.constant 0.000000e+00 : f32
      %33 = vector.broadcast %cst_25 : f32 to vector<128x256xf32>
      %34 = arith.maximumf %32, %33 : vector<128x256xf32>
      %35 = arith.truncf %34 : vector<128x256xf32> to vector<128x256xbf16>
      %c0_26 = arith.constant 0 : index
      %c0_27 = arith.constant 0 : index
      %36 = vector.load %arg6[%c0_26, %c0_27] : memref<128x256xbf16, #tpu.memory_space<vmem>>, vector<128x256xbf16>
      tpu.vector_store %arg6[%c0_26, %c0_27], %35 {strides = array<i32>} : memref<128x256xbf16, #tpu.memory_space<vmem>>, vector<128x256xbf16>,
    } else {
    }
    return
  }
  func.func @transform_0(%arg0: i32, %arg1: i32, %arg2: i32) -> (i32, i32, i32, i32) {
    %c0_i32 = arith.constant 0 : i32
    %c0_i32_0 = arith.constant 0 : i32
    %c0_i32_1 = arith.constant 0 : i32
    %c0_i32_2 = arith.constant 0 : i32
    return %arg0, %c0_i32, %c0_i32_0, %c0_i32_1 : i32, i32, i32, i32
  }
  func.func @transform_1(%arg0: i32, %arg1: i32, %arg2: i32) -> (i32, i32, i32) {
    %c0_i32 = arith.constant 0 : i32
    %c0_i32_0 = arith.constant 0 : i32
    return %arg2, %c0_i32, %arg1 : i32, i32, i32
  }
  func.func @transform_2(%arg0: i32, %arg1: i32, %arg2: i32) -> (i32, i32) {
    %c0_i32 = arith.constant 0 : i32
    %c0_i32_0 = arith.constant 0 : i32
    return %c0_i32, %arg1 : i32, i32
  }
  func.func @transform_3(%arg0: i32, %arg1: i32, %arg2: i32) -> (i32, i32) {
    %c0_i32 = arith.constant 0 : i32
    return %arg0, %arg1 : i32, i32
  }
}

module attributes {stable_mosaic.version = 11 : i64} {
  func.func @_conv3x3_kernel(%arg0: i32, %arg1: i32, %arg2: i32, %arg3: memref<2x10x10x256xbf16, #tpu.memory_space<vmem>>, %arg4: memref<1x768x128xbf16, #tpu.memory_space<vmem>>, %arg5: memref<1x128xf32, #tpu.memory_space<vmem>>, %arg6: memref<128x128xbf16, #tpu.memory_space<vmem>>, %arg7: memref<128x128xf32, #tpu.memory_space<vmem>>) attributes {dimension_semantics = [#tpu.dimension_semantics<parallel>, #tpu.dimension_semantics<parallel>, #tpu.dimension_semantics<arbitrary>], iteration_bounds = array<i64: 1, 1, 3>, scalar_prefetch = 0 : i64, scratch_operands = 1 : i64, tpu.core_type = #tpu.core_type<tc>, window_params = [{transform_indices = @transform_0, window_bounds = array<i64: 2, 10, 10, 256>}, {transform_indices = @transform_1, window_bounds = array<i64: 1, 768, 128>}, {transform_indices = @transform_2, window_bounds = array<i64: 1, 128>}, {transform_indices = @transform_3, window_bounds = array<i64: 128, 128>}]} {
    %c0_i32 = arith.constant 0 : i32
    %0 = arith.cmpi eq, %arg2, %c0_i32 : i32
    %1 = arith.extui %0 : i1 to i32
    %c0_i32_0 = arith.constant 0 : i32
    %2 = arith.cmpi ne, %1, %c0_i32_0 : i32
    scf.if %2 {
      %cst_21 = arith.constant 0.000000e+00 : f32
      %29 = vector.broadcast %cst_21 : f32 to vector<128x128xf32>
      %c0_22 = arith.constant 0 : index
      %c0_23 = arith.constant 0 : index
      %30 = vector.load %arg7[%c0_22, %c0_23] : memref<128x128xf32, #tpu.memory_space<vmem>>, vector<128x128xf32>
      tpu.vector_store %arg7[%c0_22, %c0_23], %29 {strides = array<i32>} : memref<128x128xf32, #tpu.memory_space<vmem>>, vector<128x128xf32>,
    } else {
    }
    %c0 = arith.constant 0 : index
    %3 = arith.index_cast %arg2 : i32 to index
    %c0_1 = arith.constant 0 : index
    %c0_2 = arith.constant 0 : index
    %4 = vector.load %arg3[%c0, %3, %c0_1, %c0_2] : memref<2x10x10x256xbf16, #tpu.memory_space<vmem>>, vector<2x8x8x256xbf16>
    %5 = vector.shape_cast %4 : vector<2x8x8x256xbf16> to vector<128x256xbf16>
    %c0_3 = arith.constant 0 : index
    %c0_4 = arith.constant 0 : index
    %c0_5 = arith.constant 0 : index
    %6 = vector.load %arg4[%c0_3, %c0_4, %c0_5] : memref<1x768x128xbf16, #tpu.memory_space<vmem>>, vector<1x256x128xbf16>
    %7 = vector.shape_cast %6 : vector<1x256x128xbf16> to vector<256x128xbf16>
    %cst = arith.constant dense<0.000000e+00> : vector<128x128xf32>
    %8 = tpu.matmul %5, %7, %cst {dimension_numbers = #tpu.dot_dimension_numbers<[1], [0], [0], [1], [0, 0, 1, 1], [], []>} : vector<128x256xbf16>, vector<256x128xbf16>, vector<128x128xf32> -> vector<128x128xf32>
    %c0_6 = arith.constant 0 : index
    %9 = arith.index_cast %arg2 : i32 to index
    %c1 = arith.constant 1 : index
    %c0_7 = arith.constant 0 : index
    %10 = vector.load %arg3[%c0_6, %9, %c1, %c0_7] : memref<2x10x10x256xbf16, #tpu.memory_space<vmem>>, vector<2x8x8x256xbf16>
    %11 = vector.shape_cast %10 : vector<2x8x8x256xbf16> to vector<128x256xbf16>
    %c0_8 = arith.constant 0 : index
    %c256 = arith.constant 256 : index
    %c0_9 = arith.constant 0 : index
    %12 = vector.load %arg4[%c0_8, %c256, %c0_9] : memref<1x768x128xbf16, #tpu.memory_space<vmem>>, vector<1x256x128xbf16>
    %13 = vector.shape_cast %12 : vector<1x256x128xbf16> to vector<256x128xbf16>
    %cst_10 = arith.constant dense<0.000000e+00> : vector<128x128xf32>
    %14 = tpu.matmul %11, %13, %cst_10 {dimension_numbers = #tpu.dot_dimension_numbers<[1], [0], [0], [1], [0, 0, 1, 1], [], []>} : vector<128x256xbf16>, vector<256x128xbf16>, vector<128x128xf32> -> vector<128x128xf32>
    %15 = arith.addf %8, %14 : vector<128x128xf32>
    %c0_11 = arith.constant 0 : index
    %16 = arith.index_cast %arg2 : i32 to index
    %c2 = arith.constant 2 : index
    %c0_12 = arith.constant 0 : index
    %17 = vector.load %arg3[%c0_11, %16, %c2, %c0_12] : memref<2x10x10x256xbf16, #tpu.memory_space<vmem>>, vector<2x8x8x256xbf16>
    %18 = vector.shape_cast %17 : vector<2x8x8x256xbf16> to vector<128x256xbf16>
    %c0_13 = arith.constant 0 : index
    %c512 = arith.constant 512 : index
    %c0_14 = arith.constant 0 : index
    %19 = vector.load %arg4[%c0_13, %c512, %c0_14] : memref<1x768x128xbf16, #tpu.memory_space<vmem>>, vector<1x256x128xbf16>
    %20 = vector.shape_cast %19 : vector<1x256x128xbf16> to vector<256x128xbf16>
    %cst_15 = arith.constant dense<0.000000e+00> : vector<128x128xf32>
    %21 = tpu.matmul %18, %20, %cst_15 {dimension_numbers = #tpu.dot_dimension_numbers<[1], [0], [0], [1], [0, 0, 1, 1], [], []>} : vector<128x256xbf16>, vector<256x128xbf16>, vector<128x128xf32> -> vector<128x128xf32>
    %22 = arith.addf %15, %21 : vector<128x128xf32>
    %c0_16 = arith.constant 0 : index
    %c0_17 = arith.constant 0 : index
    %23 = vector.load %arg7[%c0_16, %c0_17] : memref<128x128xf32, #tpu.memory_space<vmem>>, vector<128x128xf32>
    %24 = arith.addf %23, %22 : vector<128x128xf32>
    %c0_18 = arith.constant 0 : index
    %c0_19 = arith.constant 0 : index
    %25 = vector.load %arg7[%c0_18, %c0_19] : memref<128x128xf32, #tpu.memory_space<vmem>>, vector<128x128xf32>
    tpu.vector_store %arg7[%c0_18, %c0_19], %24 {strides = array<i32>} : memref<128x128xf32, #tpu.memory_space<vmem>>, vector<128x128xf32>,
    %c2_i32 = arith.constant 2 : i32
    %26 = arith.cmpi eq, %arg2, %c2_i32 : i32
    %27 = arith.extui %26 : i1 to i32
    %c0_i32_20 = arith.constant 0 : i32
    %28 = arith.cmpi ne, %27, %c0_i32_20 : i32
    scf.if %28 {
      %c0_21 = arith.constant 0 : index
      %c0_22 = arith.constant 0 : index
      %29 = vector.load %arg7[%c0_21, %c0_22] : memref<128x128xf32, #tpu.memory_space<vmem>>, vector<128x128xf32>
      %c0_23 = arith.constant 0 : index
      %c0_24 = arith.constant 0 : index
      %30 = vector.load %arg5[%c0_23, %c0_24] : memref<1x128xf32, #tpu.memory_space<vmem>>, vector<1x128xf32>
      %31 = vector.broadcast %30 : vector<1x128xf32> to vector<128x128xf32>
      %32 = arith.addf %29, %31 : vector<128x128xf32>
      %cst_25 = arith.constant 0.000000e+00 : f32
      %33 = vector.broadcast %cst_25 : f32 to vector<128x128xf32>
      %34 = arith.maximumf %32, %33 : vector<128x128xf32>
      %35 = arith.truncf %34 : vector<128x128xf32> to vector<128x128xbf16>
      %c0_26 = arith.constant 0 : index
      %c0_27 = arith.constant 0 : index
      %36 = vector.load %arg6[%c0_26, %c0_27] : memref<128x128xbf16, #tpu.memory_space<vmem>>, vector<128x128xbf16>
      tpu.vector_store %arg6[%c0_26, %c0_27], %35 {strides = array<i32>} : memref<128x128xbf16, #tpu.memory_space<vmem>>, vector<128x128xbf16>,
    } else {
    }
    return
  }
  func.func @transform_0(%arg0: i32, %arg1: i32, %arg2: i32) -> (i32, i32, i32, i32) {
    %c0_i32 = arith.constant 0 : i32
    %c0_i32_0 = arith.constant 0 : i32
    %c0_i32_1 = arith.constant 0 : i32
    %c0_i32_2 = arith.constant 0 : i32
    return %arg0, %c0_i32, %c0_i32_0, %c0_i32_1 : i32, i32, i32, i32
  }
  func.func @transform_1(%arg0: i32, %arg1: i32, %arg2: i32) -> (i32, i32, i32) {
    %c0_i32 = arith.constant 0 : i32
    %c0_i32_0 = arith.constant 0 : i32
    return %arg2, %c0_i32, %arg1 : i32, i32, i32
  }
  func.func @transform_2(%arg0: i32, %arg1: i32, %arg2: i32) -> (i32, i32) {
    %c0_i32 = arith.constant 0 : i32
    %c0_i32_0 = arith.constant 0 : i32
    return %c0_i32, %arg1 : i32, i32
  }
  func.func @transform_3(%arg0: i32, %arg1: i32, %arg2: i32) -> (i32, i32) {
    %c0_i32 = arith.constant 0 : i32
    return %arg0, %arg1 : i32, i32
  }
}

module attributes {stable_mosaic.version = 11 : i64} {
  func.func @_mm_bias_relu_acc_kernel(%arg0: i32, %arg1: i32, %arg2: i32, %arg3: memref<8x1024xbf16, #tpu.memory_space<vmem>>, %arg4: memref<1024x512xbf16, #tpu.memory_space<vmem>>, %arg5: memref<1x512xf32, #tpu.memory_space<vmem>>, %arg6: memref<8x512xf32, #tpu.memory_space<vmem>>, %arg7: memref<8x512xf32, #tpu.memory_space<vmem>>) attributes {dimension_semantics = [#tpu.dimension_semantics<parallel>, #tpu.dimension_semantics<parallel>, #tpu.dimension_semantics<arbitrary>], iteration_bounds = array<i64: 1, 1, 2>, scalar_prefetch = 0 : i64, scratch_operands = 1 : i64, tpu.core_type = #tpu.core_type<tc>, window_params = [{transform_indices = @transform_0, window_bounds = array<i64: 8, 1024>}, {transform_indices = @transform_1, window_bounds = array<i64: 1024, 512>}, {transform_indices = @transform_2, window_bounds = array<i64: 1, 512>}, {transform_indices = @transform_3, window_bounds = array<i64: 8, 512>}]} {
    %c0_i32 = arith.constant 0 : i32
    %0 = arith.cmpi eq, %arg2, %c0_i32 : i32
    %1 = arith.extui %0 : i1 to i32
    %c0_i32_0 = arith.constant 0 : i32
    %2 = arith.cmpi ne, %1, %c0_i32_0 : i32
    scf.if %2 {
      %cst_9 = arith.constant 0.000000e+00 : f32
      %12 = vector.broadcast %cst_9 : f32 to vector<8x512xf32>
      %c0_10 = arith.constant 0 : index
      %c0_11 = arith.constant 0 : index
      %13 = vector.load %arg7[%c0_10, %c0_11] : memref<8x512xf32, #tpu.memory_space<vmem>>, vector<8x512xf32>
      tpu.vector_store %arg7[%c0_10, %c0_11], %12 {strides = array<i32>} : memref<8x512xf32, #tpu.memory_space<vmem>>, vector<8x512xf32>,
    } else {
    }
    %c0 = arith.constant 0 : index
    %c0_1 = arith.constant 0 : index
    %3 = vector.load %arg7[%c0, %c0_1] : memref<8x512xf32, #tpu.memory_space<vmem>>, vector<8x512xf32>
    %c0_2 = arith.constant 0 : index
    %c0_3 = arith.constant 0 : index
    %4 = vector.load %arg3[%c0_2, %c0_3] : memref<8x1024xbf16, #tpu.memory_space<vmem>>, vector<8x1024xbf16>
    %c0_4 = arith.constant 0 : index
    %c0_5 = arith.constant 0 : index
    %5 = vector.load %arg4[%c0_4, %c0_5] : memref<1024x512xbf16, #tpu.memory_space<vmem>>, vector<1024x512xbf16>
    %cst = arith.constant dense<0.000000e+00> : vector<8x512xf32>
    %6 = tpu.matmul %4, %5, %cst {dimension_numbers = #tpu.dot_dimension_numbers<[1], [0], [0], [1], [0, 0, 1, 1], [], []>} : vector<8x1024xbf16>, vector<1024x512xbf16>, vector<8x512xf32> -> vector<8x512xf32>
    %7 = arith.addf %3, %6 : vector<8x512xf32>
    %c0_6 = arith.constant 0 : index
    %c0_7 = arith.constant 0 : index
    %8 = vector.load %arg7[%c0_6, %c0_7] : memref<8x512xf32, #tpu.memory_space<vmem>>, vector<8x512xf32>
    tpu.vector_store %arg7[%c0_6, %c0_7], %7 {strides = array<i32>} : memref<8x512xf32, #tpu.memory_space<vmem>>, vector<8x512xf32>,
    %c1_i32 = arith.constant 1 : i32
    %9 = arith.cmpi eq, %arg2, %c1_i32 : i32
    %10 = arith.extui %9 : i1 to i32
    %c0_i32_8 = arith.constant 0 : i32
    %11 = arith.cmpi ne, %10, %c0_i32_8 : i32
    scf.if %11 {
      %c0_9 = arith.constant 0 : index
      %c0_10 = arith.constant 0 : index
      %12 = vector.load %arg7[%c0_9, %c0_10] : memref<8x512xf32, #tpu.memory_space<vmem>>, vector<8x512xf32>
      %c0_11 = arith.constant 0 : index
      %c0_12 = arith.constant 0 : index
      %13 = vector.load %arg5[%c0_11, %c0_12] : memref<1x512xf32, #tpu.memory_space<vmem>>, vector<1x512xf32>
      %14 = vector.broadcast %13 : vector<1x512xf32> to vector<8x512xf32>
      %15 = arith.addf %12, %14 : vector<8x512xf32>
      %cst_13 = arith.constant 0.000000e+00 : f32
      %16 = vector.broadcast %cst_13 : f32 to vector<8x512xf32>
      %17 = arith.maximumf %15, %16 : vector<8x512xf32>
      %c0_14 = arith.constant 0 : index
      %c0_15 = arith.constant 0 : index
      %18 = vector.load %arg6[%c0_14, %c0_15] : memref<8x512xf32, #tpu.memory_space<vmem>>, vector<8x512xf32>
      tpu.vector_store %arg6[%c0_14, %c0_15], %17 {strides = array<i32>} : memref<8x512xf32, #tpu.memory_space<vmem>>, vector<8x512xf32>,
    } else {
    }
    return
  }
  func.func @transform_0(%arg0: i32, %arg1: i32, %arg2: i32) -> (i32, i32) {
    %c0_i32 = arith.constant 0 : i32
    return %arg0, %arg2 : i32, i32
  }
  func.func @transform_1(%arg0: i32, %arg1: i32, %arg2: i32) -> (i32, i32) {
    %c0_i32 = arith.constant 0 : i32
    return %arg2, %arg1 : i32, i32
  }
  func.func @transform_2(%arg0: i32, %arg1: i32, %arg2: i32) -> (i32, i32) {
    %c0_i32 = arith.constant 0 : i32
    %c0_i32_0 = arith.constant 0 : i32
    return %c0_i32, %arg1 : i32, i32
  }
  func.func @transform_3(%arg0: i32, %arg1: i32, %arg2: i32) -> (i32, i32) {
    %c0_i32 = arith.constant 0 : i32
    return %arg0, %arg1 : i32, i32
  }
}

</mosaic_0001>

<bundles_post_ra>
// kernel: visualnet_forward.3
= control target key start
LH: loop header
LB: loop body
LE: loop exit
PB: predicated region body
PF: predicated region fallthrough
CT: control target
= control target key end

     0   :  { %s16251_s12 = smov 0   ;;  %s16253_s13 = smov 0   ;;  %s19564_s0 = inlined_call_operand.vmem [shape: bf16[2,10,10,2048], index: 0, kind: input, shape index: {}]   ;;  %s19565_s1 = inlined_call_operand.vmem [shape: bf16[3,6144,256], index: 1, kind: input, shape index: {}]   ;;  %s19566_s2 = inlined_call_operand.vmem [shape: f32[1,256], index: 2, kind: input, shape index: {}]   ;;  %s19567_s3 = inlined_call_operand.vmem [shape: bf16[128,256], index: 3, kind: output, shape index: {}]  }
   0x1   :  { %s16255_s14 = smov 0  }
   0x2 LB: > { %s25_s15 = sadd.s32 1, %s16224_s13  ;;  %p12713_p0 = scmp.ge.s32.totalorder %s16228_s14, 1  ;;  %s16228_s14 = sphi %s16255_s14, %s13_s14   ;;  %s16224_s13 = sphi %s16253_s13, %s19704_s13   ;;  %s16220_s12 = sphi %s16251_s12, %s19703_s12  }
   0x3   : > { %p26_p1 = scmp.ge.s32.totalorder %s25_s15, 3  ;;  %p187_p2 = scmp.lt.s32.totalorder %s16228_s14, 4 }
   0x5   : > { %s19706_s15 = smov (%p26_p1, %s25_s15), 0  ;;  %p188_p3 = pnand %p12713_p0, %p187_p2 }
   0x7   : > { %191 = sbr.rel (%p188_p3) target bundleno = 1104 (0x450), region = 32 }
   0xe   : > { %p238_p4 = scmp.lt.s32.totalorder %s16220_s12, 2  ;;  %p12715_p5 = scmp.ne.s32.totalorder %s16220_s12, 0 }
   0xf   : > { %v16230_v0 = vmov (!%p12715_p5), 0.0  }
  0x10   : > { %s239_s16 = scalar_select %p238_p4, %s16220_s12, 2 }
  0x11   : > { %267 = sbr.rel (%p12715_p5) target bundleno = 33 (0x21), region = 36  ;;  %268 = vst [vmem:[#allocation2] sm:$0xff] (!%p12715_p5), %v16230_v0  ;;  %269 = vst [vmem:[#allocation2 + $0x8] sm:$0xff] (!%p12715_p5), %v16230_v0 }
  0x12   : > { %s14772_s17 = smul.u32 6144, %s239_s16  ;;  %270 = vst [vmem:[#allocation2 + $0x10] sm:$0xff] (!%p12715_p5), %v16230_v0  ;;  %271 = vst [vmem:[#allocation2 + $0x18] sm:$0xff] (!%p12715_p5), %v16230_v0 }
  0x13   : > { %272 = vst [vmem:[#allocation2 + $0x20] sm:$0xff] (!%p12715_p5), %v16230_v0  ;;  %273 = vst [vmem:[#allocation2 + $0x28] sm:$0xff] (!%p12715_p5), %v16230_v0 }
  0x14   : > { %s16276_s20 = scalar_lea.vmem %s19565_s1, %s14772_s17  ;;  %274 = vst [vmem:[#allocation2 + $0x30] sm:$0xff] (!%p12715_p5), %v16230_v0  ;;  %275 = vst [vmem:[#allocation2 + $0x38] sm:$0xff] (!%p12715_p5), %v16230_v0 }
  0x15   : > { %276 = vst [vmem:[#allocation2 + $0x40] sm:$0xff] (!%p12715_p5), %v16230_v0  ;;  %277 = vst [vmem:[#allocation2 + $0x48] sm:$0xff] (!%p12715_p5), %v16230_v0 }
  0x16   : > { %278 = vst [vmem:[#allocation2 + $0x50] sm:$0xff] (!%p12715_p5), %v16230_v0  ;;  %279 = vst [vmem:[#allocation2 + $0x58] sm:$0xff] (!%p12715_p5), %v16230_v0 }
  0x17   : > { %280 = vst [vmem:[#allocation2 + $0x60] sm:$0xff] (!%p12715_p5), %v16230_v0  ;;  %281 = vst [vmem:[#allocation2 + $0x68] sm:$0xff] (!%p12715_p5), %v16230_v0 }
  0x18   : > { %282 = vst [vmem:[#allocation2 + $0x70] sm:$0xff] %v16230_v0  ;;  %283 = vst [vmem:[#allocation2 + $0x78] sm:$0xff] %v16230_v0 }
  0x19   : > { %284 = vst [vmem:[#allocation2 + $0x80] sm:$0xff] %v16230_v0  ;;  %285 = vst [vmem:[#allocation2 + $0x88] sm:$0xff] %v16230_v0 }
  0x1a   : > { %286 = vst [vmem:[#allocation2 + $0x90] sm:$0xff] %v16230_v0  ;;  %287 = vst [vmem:[#allocation2 + $0x98] sm:$0xff] %v16230_v0 }
  0x1b   : > { %288 = vst [vmem:[#allocation2 + $0xa0] sm:$0xff] %v16230_v0  ;;  %289 = vst [vmem:[#allocation2 + $0xa8] sm:$0xff] %v16230_v0 }
  0x1c   : > { %290 = vst [vmem:[#allocation2 + $0xb0] sm:$0xff] %v16230_v0  ;;  %291 = vst [vmem:[#allocation2 + $0xb8] sm:$0xff] %v16230_v0 }
  0x1d   : > { %292 = vst [vmem:[#allocation2 + $0xc0] sm:$0xff] %v16230_v0  ;;  %293 = vst [vmem:[#allocation2 + $0xc8] sm:$0xff] %v16230_v0 }
  0x1e   : > { %294 = vst [vmem:[#allocation2 + $0xd0] sm:$0xff] %v16230_v0  ;;  %295 = vst [vmem:[#allocation2 + $0xd8] sm:$0xff] %v16230_v0 }
  0x1f   : > { %296 = vst [vmem:[#allocation2 + $0xe0] sm:$0xff] %v16230_v0  ;;  %297 = vst [vmem:[#allocation2 + $0xe8] sm:$0xff] %v16230_v0 }
  0x20   : > { %298 = vst [vmem:[#allocation2 + $0xf0] sm:$0xff] %v16230_v0  ;;  %299 = vst [vmem:[#allocation2 + $0xf8] sm:$0xff] %v16230_v0 }
  0x21 PF: > { %v14798_v1 = vld [vmem:[%s16276_s20 + $0x804] ss:$8 sps:$4 sm:$0xff]   ;;  %v14802_v3 = vld [vmem:[%s16276_s20 + $0x800] ss:$8 sps:$4 sm:$0xff]   ;;  %v14804_v5 = vld [vmem:[%s16276_s20 + $0x814] ss:$8 sps:$4 sm:$0xff]  }
  0x22   : > { %v14800_v2 = vld [vmem:[%s16276_s20 + $0x404] ss:$8 sps:$4 sm:$0xff]   ;;  %4658 = vmatprep.subr.bf16.mxu1 %v14798_v1  ;;  %v14803_v4 = vld [vmem:[%s16276_s20 + $0x400] ss:$8 sps:$4 sm:$0xff]   ;;  %v14806_v6 = vld [vmem:[%s16276_s20 + $0x414] ss:$8 sps:$4 sm:$0xff]  }
  0x23   : > { %7934 = vmatprep.subr.bf16.mxu0 %v14800_v2  ;;  %4659 = vmatpush1.bf16.msra.mxu1 %v14802_v3  ;;  %v14808_v7 = vld [vmem:[%s16276_s20 + $0x810] ss:$8 sps:$4 sm:$0xff]   ;;  %v14810_v9 = vld [vmem:[%s16276_s20 + $0x824] ss:$8 sps:$4 sm:$0xff]   ;;  %v14814_v11 = vld [vmem:[%s16276_s20 + $0x820] ss:$8 sps:$4 sm:$0xff]  }
  0x24   : > { %7935 = vmatpush1.bf16.msra.mxu0 %v14803_v4  ;;  %4660 = vmatprep.subr.bf16.mxu1 %v14804_v5  ;;  %v14809_v8 = vld [vmem:[%s16276_s20 + $0x410] ss:$8 sps:$4 sm:$0xff]   ;;  %v14812_v10 = vld [vmem:[%s16276_s20 + $0x424] ss:$8 sps:$4 sm:$0xff]   ;;  %v14815_v12 = vld [vmem:[%s16276_s20 + $0x420] ss:$8 sps:$4 sm:$0xff]  }
  0x25   : > { %7936 = vmatprep.subr.bf16.mxu0 %v14806_v6  ;;  %v14816_v13 = vld [vmem:[%s16276_s20 + $0x834] ss:$8 sps:$4 sm:$0xff]   ;;  %v14820_v15 = vld [vmem:[%s16276_s20 + $0x830] ss:$8 sps:$4 sm:$0xff]   ;;  %v14822_v17 = vld [vmem:[%s16276_s20 + $0x844] ss:$8 sps:$4 sm:$0xff]  }
  0x26   : > { %v14818_v14 = vld [vmem:[%s16276_s20 + $0x434] ss:$8 sps:$4 sm:$0xff]   ;;  %v14821_v16 = vld [vmem:[%s16276_s20 + $0x430] ss:$8 sps:$4 sm:$0xff]   ;;  %v14824_v18 = vld [vmem:[%s16276_s20 + $0x444] ss:$8 sps:$4 sm:$0xff]  }
  0x27   : > { %4661 = vmatpush1.bf16.msra.mxu1 %v14808_v7  ;;  %v14826_v19 = vld [vmem:[%s16276_s20 + $0x840] ss:$8 sps:$4 sm:$0xff]   ;;  %v14828_v21 = vld [vmem:[%s16276_s20 + $0x854] ss:$8 sps:$4 sm:$0xff]   ;;  %v14832_v23 = vld [vmem:[%s16276_s20 + $0x850] ss:$8 sps:$4 sm:$0xff]  }
  0x28   : > { %7937 = vmatpush1.bf16.msra.mxu0 %v14809_v8  ;;  %4662 = vmatprep.subr.bf16.mxu1 %v14810_v9  ;;  %v14827_v20 = vld [vmem:[%s16276_s20 + $0x440] ss:$8 sps:$4 sm:$0xff]   ;;  %v14830_v22 = vld [vmem:[%s16276_s20 + $0x454] ss:$8 sps:$4 sm:$0xff]   ;;  %v14833_v24 = vld [vmem:[%s16276_s20 + $0x450] ss:$8 sps:$4 sm:$0xff]  }
  0x29   : > { %7938 = vmatprep.subr.bf16.mxu0 %v14812_v10  ;;  %v14834_v25 = vld [vmem:[%s16276_s20 + $0x864] ss:$8 sps:$4 sm:$0xff]   ;;  %v14838_v27 = vld [vmem:[%s16276_s20 + $0x860] ss:$8 sps:$4 sm:$0xff]   ;;  %v14840_v29 = vld [vmem:[%s16276_s20 + $0x874] ss:$8 sps:$4 sm:$0xff]  }
  0x2a   : > { %v14836_v26 = vld [vmem:[%s16276_s20 + $0x464] ss:$8 sps:$4 sm:$0xff]   ;;  %v14839_v28 = vld [vmem:[%s16276_s20 + $0x460] ss:$8 sps:$4 sm:$0xff]   ;;  %v14842_v30 = vld [vmem:[%s16276_s20 + $0x474] ss:$8 sps:$4 sm:$0xff]  }
  0x2b   : > { %4663 = vmatpush1.bf16.msra.mxu1 %v14814_v11  ;;  %v14844_v31 = vld [vmem:[%s16276_s20 + $0x870] ss:$8 sps:$4 sm:$0xff]   ;;  %v14846_v33 = vld [vmem:[%s16276_s20 + $0x884] ss:$8 sps:$4 sm:$0xff]   ;;  %v14850_v35 = vld [vmem:[%s16276_s20 + $0x880] ss:$8 sps:$4 sm:$0xff]  }
  0x2c   : > { %7939 = vmatpush1.bf16.msra.mxu0 %v14815_v12  ;;  %4664 = vmatprep.subr.bf16.mxu1 %v14816_v13  ;;  %v14845_v32 = vld [vmem:[%s16276_s20 + $0x470] ss:$8 sps:$4 sm:$0xff]   ;;  %v14848_v34 = vld [vmem:[%s16276_s20 + $0x484] ss:$8 sps:$4 sm:$0xff]   ;;  %v14851_v36 = vld [vmem:[%s16276_s20 + $0x480] ss:$8 sps:$4 sm:$0xff]  }
  0x2d   : > { %7940 = vmatprep.subr.bf16.mxu0 %v14818_v14  ;;  %v14852_v37 = vld [vmem:[%s16276_s20 + $0x894] ss:$8 sps:$4 sm:$0xff]   ;;  %v14856_v39 = vld [vmem:[%s16276_s20 + $0x890] ss:$8 sps:$4 sm:$0xff]   ;;  %v14858_v41 = vld [vmem:[%s16276_s20 + $0x8a4] ss:$8 sps:$4 sm:$0xff]  }
  0x2e   : > { %v14854_v38 = vld [vmem:[%s16276_s20 + $0x494] ss:$8 sps:$4 sm:$0xff]   ;;  %v14857_v40 = vld [vmem:[%s16276_s20 + $0x490] ss:$8 sps:$4 sm:$0xff]   ;;  %s14019_s21 = sshll.u32 %s16220_s12, 7  ;;  %vm8770_vm3 = vcmask 1042432  }
  0x2f   : > { %4665 = vmatpush1.bf16.msra.mxu1 %v14820_v15  ;;  %v14860_v42 = vld [vmem:[%s16276_s20 + $0x4a4] ss:$8 sps:$4 sm:$0xff]   ;;  %v14862_v43 = vld [vmem:[%s16276_s20 + $0x8a0] ss:$8 sps:$4 sm:$0xff]   ;;  %s16327_s24 = scalar_lea.vmem %s19564_s0, %s14019_s21  ;;  %v14864_v45 = vld [vmem:[%s16276_s20 + $0x8b4] ss:$8 sps:$4 sm:$0xff]  }
  0x30   : > { %7941 = vmatpush1.bf16.msra.mxu0 %v14821_v16  ;;  %4666 = vmatprep.subr.bf16.mxu1 %v14822_v17  ;;  %v14863_v44 = vld [vmem:[%s16276_s20 + $0x4a0] ss:$8 sps:$4 sm:$0xff]   ;;  %v14866_v46 = vld [vmem:[%s16276_s20 + $0x4b4] ss:$8 sps:$4 sm:$0xff]   ;;  %vm815_vm0 = vsmask.f32 3328 }
  0x31   : > { %7942 = vmatprep.subr.bf16.mxu0 %v14824_v18  ;;  %v14868_v47 = vld [vmem:[%s16276_s20 + $0x8b0] ss:$8 sps:$4 sm:$0xff]   ;;  %v303_v49 = vld [vmem:[%s16327_s24] sm:$0xff]  ;;  %vm816_vm1 = vsmask.f32 7440  ;;  %vm8771_vm4 = vcmask 1046532  }
  0x32   : > { %v14869_v48 = vld [vmem:[%s16276_s20 + $0x4b0] ss:$8 sps:$4 sm:$0xff]   ;;  %v14870_v50 = vld [vmem:[%s16276_s20 + $0x8c4] ss:$8 sps:$4 sm:$0xff]   ;;  %v819_v55 = vshrl.u32 %v303_v49, 16  ;;  %v822_v56 = vshll.u32 %v303_v49, 16  ;;  %vm16353_vm2 = vmor %vm815_vm0, %vm816_vm1 }
  0x33   : > { %4667 = vmatpush1.bf16.msra.mxu1 %v14826_v19  ;;  %v14872_v51 = vld [vmem:[%s16276_s20 + $0x4c4] ss:$8 sps:$4 sm:$0xff]   ;;  %v14874_v3 = vld [vmem:[%s16276_s20 + $0x8c0] ss:$8 sps:$4 sm:$0xff]   ;;  %v14876_v6 = vld [vmem:[%s16276_s20 + $0x8d4] ss:$8 sps:$4 sm:$0xff]  }
  0x34   : > { %7943 = vmatpush1.bf16.msra.mxu0 %v14827_v20  ;;  %4668 = vmatprep.subr.bf16.mxu1 %v14828_v21  ;;  %v311_v52 = vld [vmem:[%s16327_s24 + $0x80] sm:$0xff]  ;;  %v821_v61 = vrot.slane %v819_v55, 4  ;;  %v824_v0 = vrot.slane %v822_v56, 5  ;;  %v14878_v11 = vld [vmem:[%s16276_s20 + $0x4d4] ss:$8 sps:$4 sm:$0xff]   ;;  %vm17284_vm5 = vmor %vm8770_vm3, %vm8771_vm4  ;;  %p13998_p6 = scmp.ne.s32.totalorder %s16220_s12, 2 }
  0x35   : > { %7944 = vmatprep.subr.bf16.mxu0 %v14830_v22  ;;  %v687_v53 = vld [vmem:[%s16327_s24 + $0x40] sm:$0x11]  ;;  %v931_v58 = vshrl.u32 %v311_v52, 16  ;;  %v934_v59 = vshll.u32 %v311_v52, 16  ;;  %v14880_v13 = vld [vmem:[%s16276_s20 + $0x8d0] ss:$8 sps:$4 sm:$0xff]  }
  0x36   : > { %v695_v54 = vld [vmem:[%s16327_s24 + $0xc0] sm:$0x11]  ;;  %v828_v57 = vshll.u32 %v687_v53, 16  ;;  %v825_v7 = vor.u32 %v824_v0, %v821_v61  ;;  %v14881_v16 = vld [vmem:[%s16276_s20 + $0x4d0] ss:$8 sps:$4 sm:$0xff]  }
  0x37   : > { %4669 = vmatpush1.bf16.msra.mxu1 %v14832_v23  ;;  %v16340_v60 = vld [vmem:[%s16327_s24 + $0x20] sm:$0xff]  ;;  %v940_v62 = vshll.u32 %v695_v54, 16  ;;  %v933_v1 = vrot.slane %v931_v58, 4  ;;  %v936_v2 = vrot.slane %v934_v59, 5 }
  0x38   : > { %7945 = vmatpush1.bf16.msra.mxu0 %v14833_v24  ;;  %4670 = vmatprep.subr.bf16.mxu1 %v14834_v25  ;;  %v16343_v63 = vld [vmem:[%s16327_s24 + $0xa0] sm:$0xff]  ;;  %v830_v5 = vrot.slane %v828_v57, 5  ;;  %v826_v14 = vrot.slane %v825_v7, 4 }
  0x39   : > { %7946 = vmatprep.subr.bf16.mxu0 %v14836_v26  ;;  %v14875_v4 = vld [vmem:[%s16276_s20 + $0x4c0] ss:$8 sps:$4 sm:$0xff]   ;;  %v937_v8 = vor.u32 %v936_v2, %v933_v1  ;;  %v942_v9 = vrot.slane %v940_v62, 5  ;;  %v13111_v10 = vcombine.high %v16340_v60, %v16343_v63  ;;  %v14882_v17 = vld [vmem:[%s16276_s20 + $0x8e4] ss:$8 sps:$4 sm:$0xff]   ;;  %v13110_v53 = vcombine.low %v16340_v60, %v16343_v63 }
  0x3a   : > { %v14884_v18 = vld [vmem:[%s16276_s20 + $0x4e4] ss:$8 sps:$4 sm:$0xff]   ;;  %v16363_v19 = vsel %vm16353_vm2, %v826_v14, %v830_v5  ;;  %v14894_v52 = vld [vmem:[%s16276_s20 + $0x900] ss:$8 sps:$4 sm:$0xff]   ;;  %v14902_v5 = vld [vmem:[%s16276_s20 + $0x914] ss:$8 sps:$4 sm:$0xff]  }
  0x3b   : > { %4671 = vmatpush1.bf16.msra.mxu1 %v14838_v27  ;;  %v938_v15 = vrot.slane %v937_v8, 4  ;;  %7966 = vmatprep.mubr.bf16.mxu0 %v13111_v10  ;;  %v319_v21 = vld [vmem:[%s16327_s24 + $0x100] sm:$0xff]  ;;  %v14903_v14 = vld [vmem:[%s16276_s20 + $0x510] ss:$8 sps:$4 sm:$0xff]  }
  0x3c   : > { %7947 = vmatpush1.bf16.msra.mxu0 %v14839_v28  ;;  %4672 = vmatprep.subr.bf16.mxu1 %v14840_v29  ;;  %v327_v23 = vld [vmem:[%s16327_s24 + $0x180] sm:$0xff]  ;;  %v1043_v26 = vshrl.u32 %v319_v21, 16  ;;  %v1046_v28 = vshll.u32 %v319_v21, 16 }
  0x3d   : > { %7948 = vmatprep.subr.bf16.mxu0 %v14842_v30  ;;  %v16367_v20 = vsel %vm16353_vm2, %v938_v15, %v942_v9  ;;  %v703_v24 = vld [vmem:[%s16327_s24 + $0x140] sm:$0x11]  ;;  %v1155_v29 = vshrl.u32 %v327_v23, 16  ;;  %v1158_v30 = vshll.u32 %v327_v23, 16 }
  0x3e   : > { %v12719_v22 = vcombine.high %v16363_v19, %v16367_v20  ;;  %v711_v25 = vld [vmem:[%s16327_s24 + $0x1c0] sm:$0x11] }
  0x3f   : > { %4673 = vmatpush1.bf16.msra.mxu1 %v14844_v31  ;;  %v14886_v27 = vld [vmem:[%s16276_s20 + $0x8e0] ss:$8 sps:$4 sm:$0xff]   ;;  %v1045_v31 = vrot.slane %v1043_v26, 4  ;;  %v14899_v49 = vld [vmem:[%s16276_s20 + $0x504] ss:$8 sps:$4 sm:$0xff]  }
  0x40   : > { %7949 = vmatpush1.bf16.msra.mxu0 %v14845_v32  ;;  %4674 = vmatprep.subr.bf16.mxu1 %v14846_v33  ;;  %v1052_v32 = vshll.u32 %v703_v24, 16  ;;  %v1164_v33 = vshll.u32 %v711_v25, 16  ;;  %v14897_v54 = vld [vmem:[%s16276_s20 + $0x500] ss:$8 sps:$4 sm:$0xff]  }
  0x41   : > { %7950 = vmatprep.subr.bf16.mxu0 %v14848_v34  ;;  %4690 = vmatprep.mubr.bf16.mxu1 %v12719_v22  ;;  %v14887_v34 = vld [vmem:[%s16276_s20 + $0x4e0] ss:$8 sps:$4 sm:$0xff]  }
  0x42   : > { %v343_v55 = vld [vmem:[%s16327_s24 + $0x280] sm:$0xff] }
  0x43   : > { %4675 = vmatpush1.bf16.msra.mxu1 %v14850_v35  ;;  %v1048_v35 = vrot.slane %v1046_v28, 5  ;;  %v719_v56 = vld [vmem:[%s16327_s24 + $0x240] sm:$0x11]  ;;  %v1379_v2 = vshrl.u32 %v343_v55, 16 }
  0x44   : > { %7951 = vmatpush1.bf16.msra.mxu0 %v14851_v36  ;;  %4676 = vmatprep.subr.bf16.mxu1 %v14852_v37  ;;  %v1157_v36 = vrot.slane %v1155_v29, 4  ;;  %v1160_v37 = vrot.slane %v1158_v30, 5  ;;  %v727_v57 = vld [vmem:[%s16327_s24 + $0x2c0] sm:$0x11]  ;;  %v1276_v63 = vshll.u32 %v719_v56, 16 }
  0x45   : > { %7952 = vmatprep.subr.bf16.mxu0 %v14854_v38  ;;  %v14888_v38 = vld [vmem:[%s16276_s20 + $0x8f4] ss:$8 sps:$4 sm:$0xff]   ;;  %v16402_v62 = vld [vmem:[%s16327_s24 + $0x120] sm:$0xff]  ;;  %v1381_v10 = vrot.slane %v1379_v2, 4 }
  0x46   : > { %v16405_v0 = vld [vmem:[%s16327_s24 + $0x1a0] sm:$0xff] }
  0x47   : > { %4677 = vmatpush1.bf16.msra.mxu1 %v14856_v39  ;;  %v14890_v39 = vld [vmem:[%s16276_s20 + $0x4f4] ss:$8 sps:$4 sm:$0xff]   ;;  %v13127_v9 = vcombine.high %v16402_v62, %v16405_v0  ;;  %v14906_v22 = vld [vmem:[%s16276_s20 + $0x920] ss:$8 sps:$4 sm:$0xff]   ;;  %v13126_v29 = vcombine.low %v16402_v62, %v16405_v0 }
  0x48   : > { %7953 = vmatpush1.bf16.msra.mxu0 %v14857_v40  ;;  %4678 = vmatprep.subr.bf16.mxu1 %v14858_v41  ;;  %v1049_v40 = vor.u32 %v1048_v35, %v1045_v31  ;;  %v1161_v41 = vor.u32 %v1160_v37, %v1157_v36  ;;  %v14909_v23 = vld [vmem:[%s16276_s20 + $0x520] ss:$8 sps:$4 sm:$0xff]   ;;  %v14914_v35 = vld [vmem:[%s16276_s20 + $0x934] ss:$8 sps:$4 sm:$0xff]  }
  0x49   : > { %7954 = vmatprep.subr.bf16.mxu0 %v14860_v42  ;;  %v14892_v42 = vld [vmem:[%s16276_s20 + $0x8f0] ss:$8 sps:$4 sm:$0xff]   ;;  %v16420_v25 = vld [vmem:[%s16327_s24 + $0x220] sm:$0xff] }
  0x4a   : > { %v16423_v26 = vld [vmem:[%s16327_s24 + $0x2a0] sm:$0xff] }
  0x4b   : > { %4679 = vmatpush1.bf16.msra.mxu1 %v14862_v43  ;;  %v1054_v43 = vrot.slane %v1052_v32, 5  ;;  %v359_v31 = vld [vmem:[%s16327_s24 + $0x380] sm:$0xff]  ;;  %v13142_v0 = vcombine.low %v16420_v25, %v16423_v26 }
  0x4c   : > { %7955 = vmatpush1.bf16.msra.mxu0 %v14863_v44  ;;  %4680 = vmatprep.subr.bf16.mxu1 %v14864_v45  ;;  %v1166_v44 = vrot.slane %v1164_v33, 5  ;;  %v14893_v45 = vld [vmem:[%s16276_s20 + $0x4f0] ss:$8 sps:$4 sm:$0xff]   ;;  %v735_v32 = vld [vmem:[%s16327_s24 + $0x340] sm:$0x11] }
  0x4d   : > { %7956 = vmatprep.subr.bf16.mxu0 %v14866_v46  ;;  %v1050_v46 = vrot.slane %v1049_v40, 4  ;;  %v743_v33 = vld [vmem:[%s16327_s24 + $0x3c0] sm:$0x11]  ;;  %v14917_v40 = vld [vmem:[%s16276_s20 + $0x534] ss:$8 sps:$4 sm:$0xff]  }
  0x4e   : > { %v367_v2 = vld [vmem:[%s16327_s24 + $0x500] sm:$0xff] }
  0x4f   : > { %4681 = vmatpush1.bf16.msra.mxu1 %v14868_v47  ;;  %v1162_v47 = vrot.slane %v1161_v41, 4  ;;  %v16395_v59 = vsel %vm16353_vm2, %v1050_v46, %v1054_v43  ;;  %v13143_v41 = vcombine.high %v16420_v25, %v16423_v26  ;;  %v1606_v43 = vshll.u32 %v359_v31, 16  ;;  %v15626_v12 = vld [vmem:[%s16276_s20 + $0xa0] ss:$8 sps:$4 sm:$0xff]  }
  0x50   : > { %7957 = vmatpush1.bf16.msra.mxu0 %v14869_v48  ;;  %4682 = vmatprep.subr.bf16.mxu1 %v14870_v50  ;;  %v14896_v48 = vld [vmem:[%s16276_s20 + $0x904] ss:$8 sps:$4 sm:$0xff]  }
  0x51   : > { %7958 = vmatprep.subr.bf16.mxu0 %v14872_v51  ;;  %v335_v50 = vld [vmem:[%s16327_s24 + $0x200] sm:$0xff]  ;;  %v12718_v51 = vcombine.low %v16363_v19, %v16367_v20  ;;  %v16399_v61 = vsel %vm16353_vm2, %v1162_v47, %v1166_v44  ;;  %v1612_v47 = vshll.u32 %v743_v33, 16 }
  0x52   : > { %v1267_v58 = vshrl.u32 %v335_v50, 16  ;;  %v1270_v60 = vshll.u32 %v335_v50, 16  ;;  %v12735_v8 = vcombine.high %v16395_v59, %v16399_v61  ;;  %v14911_v20 = vld [vmem:[%s16276_s20 + $0x524] ss:$8 sps:$4 sm:$0xff]   ;;  %v12734_v28 = vcombine.low %v16395_v59, %v16399_v61  ;;  %v14915_v50 = vld [vmem:[%s16276_s20 + $0x530] ss:$8 sps:$4 sm:$0xff]  }
  0x53   : > { %4683 = vmatpush1.bf16.msra.mxu1 %v14874_v3  ;;  %v1382_v3 = vshll.u32 %v343_v55, 16  ;;  %v1614_v56 = vrot.slane %v1612_v47, 5  ;;  %v16451_v61 = vld [vmem:[%s16327_s24 + $0x320] sm:$0xff] }
  0x54   : > { %7959 = vmatpush1.bf16.msra.mxu0 %v14875_v4  ;;  %4684 = vmatprep.subr.bf16.mxu1 %v14876_v6  ;;  %v1269_v1 = vrot.slane %v1267_v58, 4  ;;  %v1388_v4 = vshll.u32 %v727_v57, 16  ;;  %v14905_v6 = vld [vmem:[%s16276_s20 + $0x514] ss:$8 sps:$4 sm:$0xff]   ;;  %v1272_v7 = vrot.slane %v1270_v60, 5 }
  0x55   : > { %7960 = vmatprep.subr.bf16.mxu0 %v14878_v11  ;;  %v1384_v11 = vrot.slane %v1382_v3, 5  ;;  %v14918_v57 = vld [vmem:[%s16276_s20 + $0x940] ss:$8 sps:$4 sm:$0xff]   ;;  %v14926_v60 = vld [vmem:[%s16276_s20 + $0x954] ss:$8 sps:$4 sm:$0xff]  }
  0x56   : > { %v1273_v15 = vor.u32 %v1272_v7, %v1269_v1  ;;  %v1390_v19 = vrot.slane %v1388_v4, 5  ;;  %v14921_v58 = vld [vmem:[%s16276_s20 + $0x540] ss:$8 sps:$4 sm:$0xff]   ;;  %v1715_v7 = vshrl.u32 %v367_v2, 16 }
  0x57   : > { %4685 = vmatpush1.bf16.msra.mxu1 %v14880_v13  ;;  %v14900_v13 = vld [vmem:[%s16276_s20 + $0x910] ss:$8 sps:$4 sm:$0xff]   ;;  %v16458_v1 = vld [vmem:[%s16327_s24 + $0x3a0] sm:$0xff] }
  0x58   : > { %7961 = vmatpush1.bf16.msra.mxu0 %v14881_v16  ;;  %4686 = vmatprep.subr.bf16.mxu1 %v14882_v17  ;;  %v1278_v16 = vrot.slane %v1276_v63, 5  ;;  %v14908_v17 = vld [vmem:[%s16276_s20 + $0x924] ss:$8 sps:$4 sm:$0xff]   ;;  %v1274_v21 = vrot.slane %v1273_v15, 4 }
  0x59   : > { %7962 = vmatprep.subr.bf16.mxu0 %v14884_v18  ;;  %v1385_v18 = vor.u32 %v1384_v11, %v1381_v10  ;;  %v375_v3 = vld [vmem:[%s16327_s24 + $0x580] sm:$0xff] }
  0x5a   : > { %v16432_v30 = vsel %vm16353_vm2, %v1274_v21, %v1278_v16  ;;  %v13159_v16 = vcombine.high %v16451_v61, %v16458_v1 }
  0x5b   : > { %4687 = vmatpush1.bf16.msra.mxu1 %v14886_v27  ;;  %v1386_v24 = vrot.slane %v1385_v18, 4  ;;  %v351_v27 = vld [vmem:[%s16327_s24 + $0x300] sm:$0xff] }
  0x5c   : > { %7963 = vmatpush1.bf16.msra.mxu0 %v14887_v34  ;;  %4688 = vmatprep.subr.bf16.mxu1 %v14888_v38  ;;  %v1491_v34 = vshrl.u32 %v351_v27, 16  ;;  %v1494_v37 = vshll.u32 %v351_v27, 16  ;;  %v1500_v38 = vshll.u32 %v735_v32, 16  ;;  %v14935_v27 = vld [vmem:[%s16276_s20 + $0x564] ss:$8 sps:$4 sm:$0xff]  }
  0x5d   : > { %7964 = vmatprep.subr.bf16.mxu0 %v14890_v39  ;;  %v1391_v36 = vsel %vm16353_vm2, %v1386_v24, %v1390_v19  ;;  %v1603_v39 = vshrl.u32 %v359_v31, 16  ;;  %v14924_v19 = vld [vmem:[%s16276_s20 + $0x950] ss:$8 sps:$4 sm:$0xff]   ;;  %v14932_v24 = vld [vmem:[%s16276_s20 + $0x964] ss:$8 sps:$4 sm:$0xff]  }
  0x5e   : > { %v12751_v44 = vcombine.high %v16432_v30, %v1391_v36  ;;  %v12750_v62 = vcombine.low %v16432_v30, %v1391_v36  ;;  %v14930_v30 = vld [vmem:[%s16276_s20 + $0x960] ss:$8 sps:$4 sm:$0xff]   ;;  %v14941_v36 = vld [vmem:[%s16276_s20 + $0x574] ss:$8 sps:$4 sm:$0xff]  }
  0x5f   : > { %4689 = vmatpush1.bf16.msra.mxu1 %v14892_v42  ;;  %v1493_v42 = vrot.slane %v1491_v34, 4  ;;  %v1605_v46 = vrot.slane %v1603_v39, 4  ;;  %v14933_v31 = vld [vmem:[%s16276_s20 + $0x560] ss:$8 sps:$4 sm:$0xff]   ;;  %v13158_v34 = vcombine.low %v16451_v61, %v16458_v1 }
  0x60   : > { %7965 = vmatpush1.bf16.msra.mxu0 %v14893_v45  ;;  %4771 = vmatprep.subr.bf16.mxu1 %v14896_v48  ;;  %v1496_v45 = vrot.slane %v1494_v37, 5  ;;  %v1608_v48 = vrot.slane %v1606_v43, 5  ;;  %v16489_v39 = vld [vmem:[%s16327_s24 + $0x5a0] sm:$0xff] }
  0x61   : > { %8047 = vmatprep.subr.bf16.mxu0 %v14899_v49  ;;  %v14912_v49 = vld [vmem:[%s16276_s20 + $0x930] ss:$8 sps:$4 sm:$0xff]   ;;  %v767_v43 = vld [vmem:[%s16327_s24 + $0x640] sm:$0x11] }
  0x62   : > { %4691 = vmatmul.mubr.bf16.vlgmr.msra.gmra.mrb[0].mxu1 %v12718_v51  ;;  %v1497_v51 = vor.u32 %v1496_v45, %v1493_v42  ;;  %v1609_v55 = vor.u32 %v1608_v48, %v1605_v46  ;;  %v391_v42 = vld [vmem:[%s16327_s24 + $0x680] sm:$0xff]  ;;  %v1948_v48 = vshll.u32 %v767_v43, 16 }
  0x63   : > { %7967 = vmatmul.mubr.bf16.vlgmr.msra.gmra.mrb[0].mxu0 %v13110_v53  ;;  %4772 = vmatpush1.bf16.msra.mxu1 %v14894_v52  ;;  %v1502_v52 = vrot.slane %v1500_v38, 5  ;;  %v14920_v53 = vld [vmem:[%s16276_s20 + $0x944] ss:$8 sps:$4 sm:$0xff]   ;;  %v14954_v43 = vld [vmem:[%s16276_s20 + $0x9a0] ss:$8 sps:$4 sm:$0xff]  }
  0x64   : > { %8048 = vmatpush1.bf16.msra.mxu0 %v14897_v54  ;;  %4773 = vmatprep.subr.bf16.mxu1 %v14902_v5  ;;  %v14923_v54 = vld [vmem:[%s16276_s20 + $0x544] ss:$8 sps:$4 sm:$0xff]   ;;  %v1498_v59 = vrot.slane %v1497_v51, 4  ;;  %v1610_v63 = vrot.slane %v1609_v55, 4 }
  0x65   : > { %8049 = vmatprep.subr.bf16.mxu0 %v14905_v6  ;;  %4700 = vmatprep.mubr.bf16.mxu1 %v12735_v8  ;;  %v751_v5 = vld [vmem:[%s16327_s24 + $0x540] sm:$0x11]  ;;  %v1718_v8 = vshll.u32 %v367_v2, 16 }
  0x66   : > { %7976 = vmatprep.mubr.bf16.mxu0 %v13127_v9  ;;  %v16464_v4 = vsel %vm16353_vm2, %v1498_v59, %v1502_v52  ;;  %v759_v6 = vld [vmem:[%s16327_s24 + $0x5c0] sm:$0x11]  ;;  %v14929_v9 = vld [vmem:[%s16276_s20 + $0x554] ss:$8 sps:$4 sm:$0xff]   ;;  %v1615_v10 = vsel %vm16353_vm2, %v1610_v63, %v1614_v56  ;;  %v1724_v11 = vshll.u32 %v751_v5, 16  ;;  %v2051_v52 = vshrl.u32 %v391_v42, 16 }
  0x67   : > { %4774 = vmatpush1.bf16.msra.mxu1 %v14900_v13  ;;  %v1827_v13 = vshrl.u32 %v375_v3, 16  ;;  %v12767_v15 = vcombine.high %v16464_v4, %v1615_v10  ;;  %v1720_v18 = vrot.slane %v1718_v8, 5  ;;  %v12766_v33 = vcombine.low %v16464_v4, %v1615_v10  ;;  %v16486_v38 = vld [vmem:[%s16327_s24 + $0x520] sm:$0xff]  ;;  %v14953_v10 = vld [vmem:[%s16276_s20 + $0x594] ss:$8 sps:$4 sm:$0xff]  }
  0x68   : > { %8050 = vmatpush1.bf16.msra.mxu0 %v14903_v14  ;;  %4775 = vmatprep.subr.bf16.mxu1 %v14908_v17  ;;  %v1830_v14 = vshll.u32 %v375_v3, 16  ;;  %v1717_v17 = vrot.slane %v1715_v7, 4  ;;  %v1726_v26 = vrot.slane %v1724_v11, 5  ;;  %v775_v45 = vld [vmem:[%s16327_s24 + $0x6c0] sm:$0x11]  ;;  %v13175_v51 = vcombine.high %v16486_v38, %v16489_v39 }
  0x69   : > { %8051 = vmatprep.subr.bf16.mxu0 %v14911_v20  ;;  %v1829_v20 = vrot.slane %v1827_v13, 4  ;;  %v14947_v59 = vld [vmem:[%s16276_s20 + $0x584] ss:$8 sps:$4 sm:$0xff]   ;;  %v2053_v61 = vrot.slane %v2051_v52, 4  ;;  %v14942_v5 = vld [vmem:[%s16276_s20 + $0x980] ss:$8 sps:$4 sm:$0xff]  }
  0x6a   : > { %4701 = vmatmul.mubr.bf16.gmra.mrb[4].mxu1 %v12734_v28  ;;  %v1832_v21 = vrot.slane %v1830_v14, 5  ;;  %v1721_v25 = vor.u32 %v1720_v18, %v1717_v17  ;;  %v16506_v2 = vld [vmem:[%s16327_s24 + $0x620] sm:$0xff] }
  0x6b   : > { %7977 = vmatmul.mubr.bf16.gmra.mrb[4].mxu0 %v13126_v29  ;;  %4776 = vmatpush1.bf16.msra.mxu1 %v14906_v22  ;;  %v1836_v22 = vshll.u32 %v759_v6, 16  ;;  %v16509_v3 = vld [vmem:[%s16327_s24 + $0x6a0] sm:$0xff]  ;;  %v13174_v6 = vcombine.low %v16486_v38, %v16489_v39 }
  0x6c   : > { %8052 = vmatpush1.bf16.msra.mxu0 %v14909_v23  ;;  %4777 = vmatprep.subr.bf16.mxu1 %v14914_v35  ;;  %v14927_v23 = vld [vmem:[%s16276_s20 + $0x550] ss:$8 sps:$4 sm:$0xff]   ;;  %v1833_v28 = vor.u32 %v1832_v21, %v1829_v20  ;;  %v1722_v32 = vrot.slane %v1721_v25, 4  ;;  %v14938_v35 = vld [vmem:[%s16276_s20 + $0x974] ss:$8 sps:$4 sm:$0xff]   ;;  %v13191_v14 = vcombine.high %v16506_v2, %v16509_v3  ;;  %v13190_v38 = vcombine.low %v16506_v2, %v16509_v3 }
  0x6d   : > { %8053 = vmatprep.subr.bf16.mxu0 %v14917_v40  ;;  %4710 = vmatprep.mubr.bf16.mxu1 %v12751_v44  ;;  %v1838_v29 = vrot.slane %v1836_v22, 5  ;;  %v14945_v7 = vld [vmem:[%s16276_s20 + $0x580] ss:$8 sps:$4 sm:$0xff]  }
  0x6e   : > { %7986 = vmatprep.mubr.bf16.mxu0 %v13143_v41  ;;  %v1834_v37 = vrot.slane %v1833_v28, 4  ;;  %v1727_v40 = vsel %vm16353_vm2, %v1722_v32, %v1726_v26  ;;  %v383_v41 = vld [vmem:[%s16327_s24 + $0x600] sm:$0xff] }
  0x6f   : > { %4778 = vmatpush1.bf16.msra.mxu1 %v14912_v49  ;;  %v1939_v46 = vshrl.u32 %v383_v41, 16  ;;  %v1942_v47 = vshll.u32 %v383_v41, 16  ;;  %v14936_v49 = vld [vmem:[%s16276_s20 + $0x970] ss:$8 sps:$4 sm:$0xff]   ;;  %v783_v17 = vld [vmem:[%s16327_s24 + $0x740] sm:$0x11] }
  0x70   : > { %8054 = vmatpush1.bf16.msra.mxu0 %v14915_v50  ;;  %4779 = vmatprep.subr.bf16.mxu1 %v14920_v53  ;;  %v1839_v44 = vsel %vm16353_vm2, %v1834_v37, %v1838_v29  ;;  %v2054_v53 = vshll.u32 %v391_v42, 16  ;;  %v2172_v22 = vshll.u32 %v783_v17, 16  ;;  %v14959_v32 = vld [vmem:[%s16276_s20 + $0x5a4] ss:$8 sps:$4 sm:$0xff]  }
  0x71   : > { %8055 = vmatprep.subr.bf16.mxu0 %v14923_v54  ;;  %v12783_v50 = vcombine.high %v1727_v40, %v1839_v44  ;;  %v14939_v54 = vld [vmem:[%s16276_s20 + $0x570] ss:$8 sps:$4 sm:$0xff]   ;;  %v1941_v55 = vrot.slane %v1939_v46, 4  ;;  %v1944_v56 = vrot.slane %v1942_v47, 5  ;;  %v12782_v4 = vcombine.low %v1727_v40, %v1839_v44  ;;  %v16534_v41 = vld [vmem:[%s16327_s24 + $0x720] sm:$0xff] }
  0x72   : > { %4711 = vmatmul.mubr.bf16.gmra.mrb[8].mxu1 %v12750_v62  ;;  %v2056_v62 = vrot.slane %v2054_v53, 5  ;;  %v16537_v42 = vld [vmem:[%s16327_s24 + $0x7a0] sm:$0xff]  ;;  %v14962_v46 = vld [vmem:[%s16276_s20 + $0x9b4] ss:$8 sps:$4 sm:$0xff]  }
  0x73   : > { %7987 = vmatmul.mubr.bf16.gmra.mrb[8].mxu0 %v13142_v0  ;;  %4780 = vmatpush1.bf16.msra.mxu1 %v14918_v57  ;;  %v2060_v57 = vshll.u32 %v775_v45, 16  ;;  %v1945_v0 = vor.u32 %v1944_v56, %v1941_v55  ;;  %v14957_v44 = vld [vmem:[%s16276_s20 + $0x5a0] ss:$8 sps:$4 sm:$0xff]   ;;  %v14965_v47 = vld [vmem:[%s16276_s20 + $0x5b4] ss:$8 sps:$4 sm:$0xff]   ;;  %v13207_v52 = vcombine.high %v16534_v41, %v16537_v42 }
  0x74   : > { %8056 = vmatpush1.bf16.msra.mxu0 %v14921_v58  ;;  %4781 = vmatprep.subr.bf16.mxu1 %v14926_v60  ;;  %v14944_v58 = vld [vmem:[%s16276_s20 + $0x984] ss:$8 sps:$4 sm:$0xff]   ;;  %v1950_v60 = vrot.slane %v1948_v48, 5  ;;  %v2057_v63 = vor.u32 %v2056_v62, %v2053_v61 }
  0x75   : > { %8057 = vmatprep.subr.bf16.mxu0 %v14929_v9  ;;  %4720 = vmatprep.mubr.bf16.mxu1 %v12767_v15  ;;  %v2062_v1 = vrot.slane %v2060_v57, 5  ;;  %v1946_v8 = vrot.slane %v1945_v0, 4  ;;  %v14950_v9 = vld [vmem:[%s16276_s20 + $0x994] ss:$8 sps:$4 sm:$0xff]   ;;  %v399_v15 = vld [vmem:[%s16327_s24 + $0x700] sm:$0xff] }
  0x76   : > { %7996 = vmatprep.mubr.bf16.mxu0 %v13159_v16  ;;  %v2058_v11 = vrot.slane %v2057_v63, 4  ;;  %v407_v16 = vld [vmem:[%s16327_s24 + $0x780] sm:$0xff]  ;;  %v2163_v20 = vshrl.u32 %v399_v15, 16  ;;  %v2166_v21 = vshll.u32 %v399_v15, 16 }
  0x77   : > { %4782 = vmatpush1.bf16.msra.mxu1 %v14924_v19  ;;  %v1951_v13 = vsel %vm16353_vm2, %v1946_v8, %v1950_v60  ;;  %v791_v19 = vld [vmem:[%s16327_s24 + $0x7c0] sm:$0x11]  ;;  %v2275_v25 = vshrl.u32 %v407_v16, 16  ;;  %v2278_v26 = vshll.u32 %v407_v16, 16 }
  0x78   : > { %8058 = vmatpush1.bf16.msra.mxu0 %v14927_v23  ;;  %4783 = vmatprep.subr.bf16.mxu1 %v14932_v24  ;;  %v2063_v18 = vsel %vm16353_vm2, %v2058_v11, %v2062_v1  ;;  %v14948_v23 = vld [vmem:[%s16276_s20 + $0x990] ss:$8 sps:$4 sm:$0xff]   ;;  %v2165_v28 = vrot.slane %v2163_v20, 4  ;;  %v2168_v29 = vrot.slane %v2166_v21, 5  ;;  %v415_v53 = vld [vmem:[%s16327_s24 + $0x800] sm:$0xff] }
  0x79   : > { %8059 = vmatprep.subr.bf16.mxu0 %v14935_v27  ;;  %v12799_v24 = vcombine.high %v1951_v13, %v2063_v18  ;;  %v14951_v27 = vld [vmem:[%s16276_s20 + $0x590] ss:$8 sps:$4 sm:$0xff]   ;;  %v12798_v37 = vcombine.low %v1951_v13, %v2063_v18  ;;  %v799_v55 = vld [vmem:[%s16327_s24 + $0x840] sm:$0x11]  ;;  %v14974_v18 = vld [vmem:[%s16276_s20 + $0x9d4] ss:$8 sps:$4 sm:$0xff]  }
  0x7a   : > { %4721 = vmatmul.mubr.bf16.gmra.mrb[12].mxu1 %v12766_v33  ;;  %v2277_v33 = vrot.slane %v2275_v25, 4  ;;  %v807_v57 = vld [vmem:[%s16327_s24 + $0x8c0] sm:$0x11]  ;;  %v2396_v61 = vshll.u32 %v799_v55, 16  ;;  %v14972_v21 = vld [vmem:[%s16276_s20 + $0x9d0] ss:$8 sps:$4 sm:$0xff]  }
  0x7b   : > { %7997 = vmatmul.mubr.bf16.gmra.mrb[12].mxu0 %v13158_v34  ;;  %4784 = vmatpush1.bf16.msra.mxu1 %v14930_v30  ;;  %v2284_v30 = vshll.u32 %v791_v19, 16  ;;  %v2280_v34 = vrot.slane %v2278_v26, 5  ;;  %v14968_v0 = vld [vmem:[%s16276_s20 + $0x9c4] ss:$8 sps:$4 sm:$0xff]   ;;  %v14969_v15 = vld [vmem:[%s16276_s20 + $0x5c0] ss:$8 sps:$4 sm:$0xff]  }
  0x7c   : > { %8060 = vmatpush1.bf16.msra.mxu0 %v14933_v31  ;;  %4785 = vmatprep.subr.bf16.mxu1 %v14938_v35  ;;  %v14956_v31 = vld [vmem:[%s16276_s20 + $0x9a4] ss:$8 sps:$4 sm:$0xff]   ;;  %v2169_v35 = vor.u32 %v2168_v29, %v2165_v28  ;;  %v2398_v13 = vrot.slane %v2396_v61, 5  ;;  %v14977_v19 = vld [vmem:[%s16276_s20 + $0x5d4] ss:$8 sps:$4 sm:$0xff]  }
  0x7d   : > { %8061 = vmatprep.subr.bf16.mxu0 %v14941_v36  ;;  %4730 = vmatprep.mubr.bf16.mxu1 %v12783_v50  ;;  %v2174_v36 = vrot.slane %v2172_v22, 5  ;;  %v2281_v39 = vor.u32 %v2280_v34, %v2277_v33  ;;  %v2286_v40 = vrot.slane %v2284_v30, 5  ;;  %v14963_v50 = vld [vmem:[%s16276_s20 + $0x5b0] ss:$8 sps:$4 sm:$0xff]   ;;  %v14971_v1 = vld [vmem:[%s16276_s20 + $0x5c4] ss:$8 sps:$4 sm:$0xff]  }
  0x7e   : > { %8006 = vmatprep.mubr.bf16.mxu0 %v13175_v51  ;;  %v2170_v45 = vrot.slane %v2169_v35, 4  ;;  %v16561_v8 = vld [vmem:[%s16327_s24 + $0x8a0] sm:$0xff]  ;;  %v14975_v22 = vld [vmem:[%s16276_s20 + $0x5d0] ss:$8 sps:$4 sm:$0xff]   ;;  %v312_v28 = vld [vmem:[%s16327_s24 + $0x88] sm:$0xff] }
  0x7f   : > { %4786 = vmatpush1.bf16.msra.mxu1 %v14936_v49  ;;  %v2282_v48 = vrot.slane %v2281_v39, 4  ;;  %v14960_v49 = vld [vmem:[%s16276_s20 + $0x9b0] ss:$8 sps:$4 sm:$0xff]   ;;  %v14980_v26 = vld [vmem:[%s16276_s20 + $0x9e4] ss:$8 sps:$4 sm:$0xff]  }
  0x80   : > { %8062 = vmatpush1.bf16.msra.mxu0 %v14939_v54  ;;  %4787 = vmatprep.subr.bf16.mxu1 %v14944_v58  ;;  %v2175_v51 = vsel %vm16353_vm2, %v2170_v45, %v2174_v36  ;;  %v423_v54 = vld [vmem:[%s16327_s24 + $0x880] sm:$0xff]  ;;  %v2387_v58 = vshrl.u32 %v415_v53, 16  ;;  %v688_v29 = vld [vmem:[%s16327_s24 + $0x48] sm:$0x11] }
  0x81   : > { %8063 = vmatprep.subr.bf16.mxu0 %v14947_v59  ;;  %v2287_v56 = vsel %vm16353_vm2, %v2282_v48, %v2286_v40  ;;  %v2390_v59 = vshll.u32 %v415_v53, 16  ;;  %v2499_v60 = vshrl.u32 %v423_v54, 16  ;;  %v2502_v63 = vshll.u32 %v423_v54, 16  ;;  %v14983_v36 = vld [vmem:[%s16276_s20 + $0x5e4] ss:$8 sps:$4 sm:$0xff]  }
  0x82   : > { %4731 = vmatmul.mubr.bf16.gmra.mrb[16].mxu1 %v12782_v4  ;;  %v12815_v62 = vcombine.high %v2175_v51, %v2287_v56  ;;  %v2389_v2 = vrot.slane %v2387_v58, 4  ;;  %v2508_v4 = vshll.u32 %v807_v57, 16  ;;  %v842_v34 = vshll.u32 %v688_v29, 16  ;;  %v14978_v39 = vld [vmem:[%s16276_s20 + $0x9e0] ss:$8 sps:$4 sm:$0xff]  }
  0x83   : > { %8007 = vmatmul.mubr.bf16.gmra.mrb[16].mxu0 %v13174_v6  ;;  %4788 = vmatpush1.bf16.msra.mxu1 %v14942_v5  ;;  %v2392_v3 = vrot.slane %v2390_v59, 5  ;;  %v2501_v5 = vrot.slane %v2499_v60, 4  ;;  %v2504_v6 = vrot.slane %v2502_v63, 5  ;;  %v14981_v45 = vld [vmem:[%s16276_s20 + $0x5e0] ss:$8 sps:$4 sm:$0xff]  }
  0x84   : > { %8064 = vmatpush1.bf16.msra.mxu0 %v14945_v7  ;;  %4789 = vmatprep.subr.bf16.mxu1 %v14950_v9  ;;  %v16558_v7 = vld [vmem:[%s16327_s24 + $0x820] sm:$0xff]  ;;  %v12814_v9 = vcombine.low %v2175_v51, %v2287_v56  ;;  %v2510_v17 = vrot.slane %v2508_v4, 5  ;;  %v308_v48 = vld [vmem:[%s16327_s24 + $0x28] sm:$0xff]  ;;  %v844_v51 = vrot.slane %v842_v34, 5  ;;  %v14989_v53 = vld [vmem:[%s16276_s20 + $0x5f4] ss:$8 sps:$4 sm:$0xff]  }
  0x85   : > { %8065 = vmatprep.subr.bf16.mxu0 %v14953_v10  ;;  %4740 = vmatprep.mubr.bf16.mxu1 %v12799_v24  ;;  %v13206_v10 = vcombine.low %v16534_v41, %v16537_v42  ;;  %v2393_v11 = vor.u32 %v2392_v3, %v2389_v2  ;;  %v2505_v16 = vor.u32 %v2504_v6, %v2501_v5  ;;  %v14984_v56 = vld [vmem:[%s16276_s20 + $0x9f0] ss:$8 sps:$4 sm:$0xff]   ;;  %v320_v60 = vld [vmem:[%s16327_s24 + $0x108] sm:$0xff] }
  0x86   : > { %8016 = vmatprep.mubr.bf16.mxu0 %v13191_v14  ;;  %v14966_v14 = vld [vmem:[%s16276_s20 + $0x9c0] ss:$8 sps:$4 sm:$0xff]   ;;  %v13223_v24 = vcombine.high %v16558_v7, %v16561_v8  ;;  %v14987_v59 = vld [vmem:[%s16276_s20 + $0x5f0] ss:$8 sps:$4 sm:$0xff]   ;;  %v1057_v4 = vshrl.u32 %v320_v60, 16  ;;  %v1060_v5 = vshll.u32 %v320_v60, 16 }
  0x87   : > { %4790 = vmatpush1.bf16.msra.mxu1 %v14948_v23  ;;  %v2394_v20 = vrot.slane %v2393_v11, 4  ;;  %v2506_v23 = vrot.slane %v2505_v16, 4  ;;  %v328_v63 = vld [vmem:[%s16327_s24 + $0x188] sm:$0xff] }
  0x88   : > { %8066 = vmatpush1.bf16.msra.mxu0 %v14951_v27  ;;  %4791 = vmatprep.subr.bf16.mxu1 %v14956_v31  ;;  %v304_v27 = vld [vmem:[%s16327_s24 + $0x8] sm:$0xff]  ;;  %v1059_v16 = vrot.slane %v1057_v4, 4 }
  0x89   : > { %8067 = vmatprep.subr.bf16.mxu0 %v14959_v32  ;;  %v2399_v25 = vsel %vm16353_vm2, %v2394_v20, %v2398_v13  ;;  %v2511_v30 = vsel %vm16353_vm2, %v2506_v23, %v2510_v17  ;;  %v696_v31 = vld [vmem:[%s16327_s24 + $0xc8] sm:$0x11]  ;;  %v833_v32 = vshrl.u32 %v304_v27, 16  ;;  %v836_v33 = vshll.u32 %v304_v27, 16 }
  0x8a   : > { %4741 = vmatmul.mubr.bf16.gmra.mrb[20].mxu1 %v12798_v37  ;;  %v12831_v35 = vcombine.high %v2399_v25, %v2511_v30  ;;  %v945_v37 = vshrl.u32 %v312_v28, 16  ;;  %v954_v42 = vshll.u32 %v696_v31, 16  ;;  %v712_v3 = vld [vmem:[%s16327_s24 + $0x1c8] sm:$0x11]  ;;  %v1169_v13 = vshrl.u32 %v328_v63, 16 }
  0x8b   : > { %8017 = vmatmul.mubr.bf16.gmra.mrb[20].mxu0 %v13190_v38  ;;  %4792 = vmatpush1.bf16.msra.mxu1 %v14954_v43  ;;  %v948_v38 = vshll.u32 %v312_v28, 16  ;;  %v835_v40 = vrot.slane %v833_v32, 4  ;;  %v838_v41 = vrot.slane %v836_v33, 5  ;;  %v12830_v43 = vcombine.low %v2399_v25, %v2511_v30  ;;  %v14995_v11 = vld [vmem:[%s16276_s20 + $0x604] ss:$8 sps:$4 sm:$0xff]  }
  0x8c   : > { %8068 = vmatpush1.bf16.msra.mxu0 %v14957_v44  ;;  %4793 = vmatprep.subr.bf16.mxu1 %v14962_v46  ;;  %v13222_v44 = vcombine.low %v16558_v7, %v16561_v8  ;;  %v947_v46 = vrot.slane %v945_v37, 4  ;;  %v956_v55 = vrot.slane %v954_v42, 5  ;;  %v14990_v8 = vld [vmem:[%s16276_s20 + $0xa00] ss:$8 sps:$4 sm:$0xff]   ;;  %v1062_v17 = vrot.slane %v1060_v5, 5 }
  0x8d   : > { %8069 = vmatprep.subr.bf16.mxu0 %v14965_v47  ;;  %4750 = vmatprep.mubr.bf16.mxu1 %v12815_v62  ;;  %v950_v47 = vrot.slane %v948_v38, 5  ;;  %v14992_v62 = vld [vmem:[%s16276_s20 + $0xa04] ss:$8 sps:$4 sm:$0xff]   ;;  %v1171_v23 = vrot.slane %v1169_v13, 4  ;;  %v14996_v30 = vld [vmem:[%s16276_s20 + $0xa10] ss:$8 sps:$4 sm:$0xff]  }
  0x8e   : > { %8026 = vmatprep.mubr.bf16.mxu0 %v13207_v52  ;;  %v14986_v52 = vld [vmem:[%s16276_s20 + $0x9f4] ss:$8 sps:$4 sm:$0xff]   ;;  %v332_v20 = vld [vmem:[%s16327_s24 + $0x1a8] sm:$0xff]  ;;  %v1063_v25 = vor.u32 %v1062_v17, %v1059_v16  ;;  %v14999_v31 = vld [vmem:[%s16276_s20 + $0x610] ss:$8 sps:$4 sm:$0xff]  }
  0x8f   : > { %4794 = vmatpush1.bf16.msra.mxu1 %v14960_v49  ;;  %v316_v49 = vld [vmem:[%s16327_s24 + $0xa8] sm:$0xff]  ;;  %v951_v54 = vor.u32 %v950_v47, %v947_v46  ;;  %v15022_v17 = vld [vmem:[%s16276_s20 + $0xa54] ss:$8 sps:$4 sm:$0xff]  }
  0x90   : > { %8070 = vmatpush1.bf16.msra.mxu0 %v14963_v50  ;;  %4795 = vmatprep.subr.bf16.mxu1 %v14968_v0  ;;  %v839_v50 = vor.u32 %v838_v41, %v835_v40  ;;  %v13113_v58 = vcombine.high %v308_v48, %v316_v49  ;;  %v1064_v32 = vrot.slane %v1063_v25, 4  ;;  %v15004_v34 = vld [vmem:[%s16276_s20 + $0xa24] ss:$8 sps:$4 sm:$0xff]   ;;  %v15002_v42 = vld [vmem:[%s16276_s20 + $0xa20] ss:$8 sps:$4 sm:$0xff]  }
  0x91   : > { %8071 = vmatprep.subr.bf16.mxu0 %v14971_v1  ;;  %v952_v61 = vrot.slane %v951_v54, 4  ;;  %v704_v1 = vld [vmem:[%s16327_s24 + $0x148] sm:$0x11] }
  0x92   : > { %4751 = vmatmul.mubr.bf16.gmra.mrb[24].mxu1 %v12814_v9  ;;  %v840_v57 = vrot.slane %v839_v50, 4  ;;  %v1066_v6 = vshll.u32 %v704_v1, 16  ;;  %v13112_v9 = vcombine.low %v308_v48, %v316_v49  ;;  %v336_v38 = vld [vmem:[%s16327_s24 + $0x208] sm:$0xff] }
  0x93   : > { %8027 = vmatmul.mubr.bf16.gmra.mrb[24].mxu0 %v13206_v10  ;;  %4796 = vmatpush1.bf16.msra.mxu1 %v14966_v14  ;;  %v957_v2 = vsel %vm16353_vm2, %v952_v61, %v956_v55  ;;  %v14993_v10 = vld [vmem:[%s16276_s20 + $0x600] ss:$8 sps:$4 sm:$0xff]   ;;  %v1172_v14 = vshll.u32 %v328_v63, 16 }
  0x94   : > { %8072 = vmatpush1.bf16.msra.mxu0 %v14969_v15  ;;  %4797 = vmatprep.subr.bf16.mxu1 %v14974_v18  ;;  %v845_v0 = vsel %vm16353_vm2, %v840_v57, %v844_v51  ;;  %v1178_v18 = vshll.u32 %v712_v3, 16  ;;  %v720_v40 = vld [vmem:[%s16327_s24 + $0x248] sm:$0x11]  ;;  %v15010_v57 = vld [vmem:[%s16276_s20 + $0xa34] ss:$8 sps:$4 sm:$0xff]  }
  0x95   : > { %8073 = vmatprep.subr.bf16.mxu0 %v14977_v19  ;;  %8036 = vmatprep.mubr.bf16.mxu0 %v13223_v24  ;;  %v12721_v7 = vcombine.high %v845_v0, %v957_v2  ;;  %v12720_v15 = vcombine.low %v845_v0, %v957_v2  ;;  %v324_v19 = vld [vmem:[%s16327_s24 + $0x128] sm:$0xff]  ;;  %v1174_v24 = vrot.slane %v1172_v14, 5  ;;  %v1290_v46 = vshll.u32 %v720_v40, 16  ;;  %v15008_v2 = vld [vmem:[%s16276_s20 + $0xa30] ss:$8 sps:$4 sm:$0xff]  }
  0x96   : > { %4760 = vmatprep.mubr.bf16.mxu1 %v12831_v35  ;;  %v1180_v28 = vrot.slane %v1178_v18, 5  ;;  %v13129_v29 = vcombine.high %v324_v19, %v332_v20  ;;  %v15007_v35 = vld [vmem:[%s16276_s20 + $0x624] ss:$8 sps:$4 sm:$0xff]   ;;  %v13128_v37 = vcombine.low %v324_v19, %v332_v20  ;;  %v15005_v49 = vld [vmem:[%s16276_s20 + $0x620] ss:$8 sps:$4 sm:$0xff]  }
  0x97   : > { %4798 = vmatpush1.bf16.msra.mxu1 %v14972_v21  ;;  %v14998_v21 = vld [vmem:[%s16276_s20 + $0xa14] ss:$8 sps:$4 sm:$0xff]   ;;  %v1175_v27 = vor.u32 %v1174_v24, %v1171_v23  ;;  %v340_v55 = vld [vmem:[%s16327_s24 + $0x228] sm:$0xff]  ;;  %v1292_v0 = vrot.slane %v1290_v46, 5  ;;  %v15011_v3 = vld [vmem:[%s16276_s20 + $0x630] ss:$8 sps:$4 sm:$0xff]  }
  0x98   : > { %8074 = vmatpush1.bf16.msra.mxu0 %v14975_v22  ;;  %4799 = vmatprep.subr.bf16.mxu1 %v14980_v26  ;;  %v15001_v22 = vld [vmem:[%s16276_s20 + $0x614] ss:$8 sps:$4 sm:$0xff]   ;;  %v1068_v26 = vrot.slane %v1066_v6, 5  ;;  %v15016_v6 = vld [vmem:[%s16276_s20 + $0xa44] ss:$8 sps:$4 sm:$0xff]  }
  0x99   : > { %8075 = vmatprep.subr.bf16.mxu0 %v14983_v36  ;;  %v1176_v33 = vrot.slane %v1175_v27, 4  ;;  %v352_v13 = vld [vmem:[%s16327_s24 + $0x308] sm:$0xff]  ;;  %v15025_v24 = vld [vmem:[%s16276_s20 + $0x654] ss:$8 sps:$4 sm:$0xff]  }
  0x9a   : > { %4761 = vmatmul.mubr.bf16.gmra.mrb[28].mxu1 %v12830_v43  ;;  %v1069_v36 = vsel %vm16353_vm2, %v1064_v32, %v1068_v26  ;;  %v728_v43 = vld [vmem:[%s16327_s24 + $0x2c8] sm:$0x11]  ;;  %v1505_v19 = vshrl.u32 %v352_v13, 16  ;;  %v1508_v20 = vshll.u32 %v352_v13, 16 }
  0x9b   : > { %8037 = vmatmul.mubr.bf16.gmra.mrb[28].mxu0 %v13222_v44  ;;  %4800 = vmatpush1.bf16.msra.mxu1 %v14978_v39  ;;  %v344_v39 = vld [vmem:[%s16327_s24 + $0x288] sm:$0xff]  ;;  %v1181_v41 = vsel %vm16353_vm2, %v1176_v33, %v1180_v28  ;;  %v1281_v44 = vshrl.u32 %v336_v38, 16  ;;  %v1402_v54 = vshll.u32 %v728_v43, 16 }
  0x9c   : > { %8076 = vmatpush1.bf16.msra.mxu0 %v14981_v45  ;;  %4801 = vmatprep.subr.bf16.mxu1 %v14986_v52  ;;  %v1284_v45 = vshll.u32 %v336_v38, 16  ;;  %v12737_v47 = vcombine.high %v1069_v36, %v1181_v41  ;;  %v12736_v48 = vcombine.low %v1069_v36, %v1181_v41  ;;  %v1393_v50 = vshrl.u32 %v344_v39, 16  ;;  %v360_v14 = vld [vmem:[%s16327_s24 + $0x388] sm:$0xff]  ;;  %v15020_v36 = vld [vmem:[%s16276_s20 + $0xa50] ss:$8 sps:$4 sm:$0xff]  }
  0x9d   : > { %8077 = vmatprep.subr.bf16.mxu0 %v14989_v53  ;;  %8079 = vmatprep.mubr.bf16.mxu0 %v13113_v58  ;;  %v1396_v51 = vshll.u32 %v344_v39, 16  ;;  %v1283_v52 = vrot.slane %v1281_v44, 4  ;;  %v15013_v58 = vld [vmem:[%s16276_s20 + $0x634] ss:$8 sps:$4 sm:$0xff]   ;;  %v1404_v63 = vrot.slane %v1402_v54, 5  ;;  %v1617_v25 = vshrl.u32 %v360_v14, 16 }
  0x9e   : > { %4803 = vmatprep.mubr.bf16.mxu1 %v12721_v7  ;;  %v1286_v53 = vrot.slane %v1284_v45, 5  ;;  %v15019_v7 = vld [vmem:[%s16276_s20 + $0x644] ss:$8 sps:$4 sm:$0xff]   ;;  %v1620_v26 = vshll.u32 %v360_v14, 16  ;;  %v1507_v27 = vrot.slane %v1505_v19, 4  ;;  %v1510_v28 = vrot.slane %v1508_v20, 5 }
  0x9f   : > { %4802 = vmatpush1.bf16.msra.mxu1 %v14984_v56  ;;  %v348_v56 = vld [vmem:[%s16327_s24 + $0x2a8] sm:$0xff]  ;;  %v1398_v61 = vrot.slane %v1396_v51, 5  ;;  %v1619_v32 = vrot.slane %v1617_v25, 4  ;;  %v15049_v20 = vld [vmem:[%s16276_s20 + $0x694] ss:$8 sps:$4 sm:$0xff]  }
  0xa0   : > { %8078 = vmatpush1.bf16.msra.mxu0 %v14987_v59  ;;  %4884 = vmatprep.subr.bf16.mxu1 %v14992_v62  ;;  %v1395_v59 = vrot.slane %v1393_v50, 4  ;;  %v1287_v62 = vor.u32 %v1286_v53, %v1283_v52  ;;  %v13145_v1 = vcombine.high %v340_v55, %v348_v56  ;;  %v744_v18 = vld [vmem:[%s16327_s24 + $0x3c8] sm:$0x11]  ;;  %v1622_v33 = vrot.slane %v1620_v26, 5  ;;  %v15034_v53 = vld [vmem:[%s16276_s20 + $0xa74] ss:$8 sps:$4 sm:$0xff]  }
  0xa1   : > { %8160 = vmatprep.subr.bf16.mxu0 %v14995_v11  ;;  %v15017_v11 = vld [vmem:[%s16276_s20 + $0x640] ss:$8 sps:$4 sm:$0xff]   ;;  %v15031_v43 = vld [vmem:[%s16276_s20 + $0x664] ss:$8 sps:$4 sm:$0xff]  }
  0xa2   : > { %4804 = vmatmul.mubr.bf16.vlgmr.msra.gmra.mrb[0].mxu1 %v12720_v15  ;;  %v1399_v60 = vor.u32 %v1398_v61, %v1395_v59  ;;  %v1288_v4 = vrot.slane %v1287_v62, 4  ;;  %v736_v15 = vld [vmem:[%s16327_s24 + $0x348] sm:$0x11]  ;;  %v1623_v38 = vor.u32 %v1622_v33, %v1619_v32  ;;  %v15037_v61 = vld [vmem:[%s16276_s20 + $0x674] ss:$8 sps:$4 sm:$0xff]  }
  0xa3   : > { %8080 = vmatmul.mubr.bf16.vlgmr.msra.gmra.mrb[0].mxu0 %v13112_v9  ;;  %4885 = vmatpush1.bf16.msra.mxu1 %v14990_v8  ;;  %v15014_v9 = vld [vmem:[%s16276_s20 + $0xa40] ss:$8 sps:$4 sm:$0xff]   ;;  %v15043_v14 = vld [vmem:[%s16276_s20 + $0x684] ss:$8 sps:$4 sm:$0xff]   ;;  %v15046_v33 = vld [vmem:[%s16276_s20 + $0xa94] ss:$8 sps:$4 sm:$0xff]  }
  0xa4   : > { %8161 = vmatpush1.bf16.msra.mxu0 %v14993_v10  ;;  %4886 = vmatprep.subr.bf16.mxu1 %v14998_v21  ;;  %v1400_v5 = vrot.slane %v1399_v60, 4  ;;  %v1293_v8 = vsel %vm16353_vm2, %v1288_v4, %v1292_v0  ;;  %v13144_v10 = vcombine.low %v340_v55, %v348_v56  ;;  %v1514_v21 = vshll.u32 %v736_v15, 16  ;;  %v15029_v45 = vld [vmem:[%s16276_s20 + $0x660] ss:$8 sps:$4 sm:$0xff]   ;;  %v15035_v4 = vld [vmem:[%s16276_s20 + $0x670] ss:$8 sps:$4 sm:$0xff]  }
  0xa5   : > { %8162 = vmatprep.subr.bf16.mxu0 %v15001_v22  ;;  %8089 = vmatprep.mubr.bf16.mxu0 %v13129_v29  ;;  %v1626_v29 = vshll.u32 %v744_v18, 16  ;;  %v1624_v44 = vrot.slane %v1623_v38, 4  ;;  %v376_v50 = vld [vmem:[%s16327_s24 + $0x588] sm:$0xff] }
  0xa6   : > { %4813 = vmatprep.mubr.bf16.mxu1 %v12737_v47  ;;  %v1405_v16 = vsel %vm16353_vm2, %v1400_v5, %v1404_v63  ;;  %v15026_v47 = vld [vmem:[%s16276_s20 + $0xa60] ss:$8 sps:$4 sm:$0xff]   ;;  %v1841_v62 = vshrl.u32 %v376_v50, 16  ;;  %v1844_v0 = vshll.u32 %v376_v50, 16  ;;  %v15055_v50 = vld [vmem:[%s16276_s20 + $0x6a4] ss:$8 sps:$4 sm:$0xff]  }
  0xa7   : > { %4887 = vmatpush1.bf16.msra.mxu1 %v14996_v30  ;;  %v12753_v22 = vcombine.high %v1293_v8, %v1405_v16  ;;  %v12752_v23 = vcombine.low %v1293_v8, %v1405_v16  ;;  %v356_v30 = vld [vmem:[%s16327_s24 + $0x328] sm:$0xff]  ;;  %v1628_v39 = vrot.slane %v1626_v29, 5 }
  0xa8   : > { %8163 = vmatpush1.bf16.msra.mxu0 %v14999_v31  ;;  %4888 = vmatprep.subr.bf16.mxu1 %v15004_v34  ;;  %v364_v31 = vld [vmem:[%s16327_s24 + $0x3a8] sm:$0xff]  ;;  %v1511_v34 = vor.u32 %v1510_v28, %v1507_v27  ;;  %v1843_v5 = vrot.slane %v1841_v62, 4 }
  0xa9   : > { %8164 = vmatprep.subr.bf16.mxu0 %v15007_v35  ;;  %v1516_v35 = vrot.slane %v1514_v21, 5  ;;  %v13161_v40 = vcombine.high %v356_v30, %v364_v31  ;;  %v752_v51 = vld [vmem:[%s16327_s24 + $0x548] sm:$0x11]  ;;  %v1629_v52 = vsel %vm16353_vm2, %v1624_v44, %v1628_v39 }
  0xaa   : > { %4814 = vmatmul.mubr.bf16.gmra.mrb[4].mxu1 %v12736_v48  ;;  %v1512_v41 = vrot.slane %v1511_v34, 4  ;;  %v13160_v48 = vcombine.low %v356_v30, %v364_v31  ;;  %v760_v54 = vld [vmem:[%s16327_s24 + $0x5c8] sm:$0x11] }
  0xab   : > { %8090 = vmatmul.mubr.bf16.gmra.mrb[4].mxu0 %v13128_v37  ;;  %4889 = vmatpush1.bf16.msra.mxu1 %v15002_v42  ;;  %v15023_v37 = vld [vmem:[%s16276_s20 + $0x650] ss:$8 sps:$4 sm:$0xff]   ;;  %v15028_v42 = vld [vmem:[%s16276_s20 + $0xa64] ss:$8 sps:$4 sm:$0xff]   ;;  %v15041_v19 = vld [vmem:[%s16276_s20 + $0x680] ss:$8 sps:$4 sm:$0xff]  }
  0xac   : > { %8165 = vmatpush1.bf16.msra.mxu0 %v15005_v49  ;;  %4890 = vmatprep.subr.bf16.mxu1 %v15010_v57  ;;  %v1517_v46 = vsel %vm16353_vm2, %v1512_v41, %v1516_v35  ;;  %v368_v49 = vld [vmem:[%s16327_s24 + $0x508] sm:$0xff]  ;;  %v1738_v57 = vshll.u32 %v752_v51, 16  ;;  %v15047_v41 = vld [vmem:[%s16276_s20 + $0x690] ss:$8 sps:$4 sm:$0xff]  }
  0xad   : > { %8166 = vmatprep.subr.bf16.mxu0 %v15013_v58  ;;  %8099 = vmatprep.mubr.bf16.mxu0 %v13145_v1  ;;  %v1729_v55 = vshrl.u32 %v368_v49, 16  ;;  %v1732_v56 = vshll.u32 %v368_v49, 16  ;;  %v12769_v58 = vcombine.high %v1517_v46, %v1629_v52  ;;  %v12768_v59 = vcombine.low %v1517_v46, %v1629_v52  ;;  %v15040_v16 = vld [vmem:[%s16276_s20 + $0xa84] ss:$8 sps:$4 sm:$0xff]   ;;  %v15044_v46 = vld [vmem:[%s16276_s20 + $0xa90] ss:$8 sps:$4 sm:$0xff]  }
  0xae   : > { %4823 = vmatprep.mubr.bf16.mxu1 %v12753_v22  ;;  %v1850_v1 = vshll.u32 %v760_v54, 16  ;;  %v1740_v8 = vrot.slane %v1738_v57, 5  ;;  %v15038_v22 = vld [vmem:[%s16276_s20 + $0xa80] ss:$8 sps:$4 sm:$0xff]   ;;  %v15052_v52 = vld [vmem:[%s16276_s20 + $0xaa4] ss:$8 sps:$4 sm:$0xff]  }
  0xaf   : > { %4891 = vmatpush1.bf16.msra.mxu1 %v15008_v2  ;;  %v1731_v60 = vrot.slane %v1729_v55, 4  ;;  %v1734_v63 = vrot.slane %v1732_v56, 5  ;;  %v372_v2 = vld [vmem:[%s16327_s24 + $0x528] sm:$0xff]  ;;  %v15061_v56 = vld [vmem:[%s16276_s20 + $0x6b4] ss:$8 sps:$4 sm:$0xff]  }
  0xb0   : > { %8167 = vmatpush1.bf16.msra.mxu0 %v15011_v3  ;;  %4892 = vmatprep.subr.bf16.mxu1 %v15016_v6  ;;  %v380_v3 = vld [vmem:[%s16327_s24 + $0x5a8] sm:$0xff]  ;;  %v1846_v6 = vrot.slane %v1844_v0, 5 }
  0xb1   : > { %8168 = vmatprep.subr.bf16.mxu0 %v15019_v7  ;;  %v1735_v7 = vor.u32 %v1734_v63, %v1731_v60  ;;  %v13177_v13 = vcombine.high %v372_v2, %v380_v3  ;;  %v13176_v18 = vcombine.low %v372_v2, %v380_v3  ;;  %v768_v25 = vld [vmem:[%s16327_s24 + $0x648] sm:$0x11]  ;;  %v15058_v60 = vld [vmem:[%s16276_s20 + $0xab4] ss:$8 sps:$4 sm:$0xff]  }
  0xb2   : > { %4824 = vmatmul.mubr.bf16.gmra.mrb[8].mxu1 %v12752_v23  ;;  %v384_v23 = vld [vmem:[%s16327_s24 + $0x608] sm:$0xff]  ;;  %v1962_v30 = vshll.u32 %v768_v25, 16 }
  0xb3   : > { %8100 = vmatmul.mubr.bf16.gmra.mrb[8].mxu0 %v13144_v10  ;;  %4893 = vmatpush1.bf16.msra.mxu1 %v15014_v9  ;;  %v15032_v9 = vld [vmem:[%s16276_s20 + $0xa70] ss:$8 sps:$4 sm:$0xff]   ;;  %v1847_v10 = vor.u32 %v1846_v6, %v1843_v5  ;;  %v1736_v15 = vrot.slane %v1735_v7, 4  ;;  %v776_v27 = vld [vmem:[%s16327_s24 + $0x6c8] sm:$0x11]  ;;  %v1953_v28 = vshrl.u32 %v384_v23, 16 }
  0xb4   : > { %8169 = vmatpush1.bf16.msra.mxu0 %v15017_v11  ;;  %4894 = vmatprep.subr.bf16.mxu1 %v15022_v17  ;;  %v1852_v11 = vrot.slane %v1850_v1, 5  ;;  %v1956_v29 = vshll.u32 %v384_v23, 16  ;;  %v2074_v38 = vshll.u32 %v776_v27, 16  ;;  %v388_v39 = vld [vmem:[%s16327_s24 + $0x628] sm:$0xff]  ;;  %v15059_v6 = vld [vmem:[%s16276_s20 + $0x6b0] ss:$8 sps:$4 sm:$0xff]  }
  0xb5   : > { %8170 = vmatprep.subr.bf16.mxu0 %v15025_v24  ;;  %8109 = vmatprep.mubr.bf16.mxu0 %v13161_v40  ;;  %v1848_v17 = vrot.slane %v1847_v10, 4  ;;  %v1741_v21 = vsel %vm16353_vm2, %v1736_v15, %v1740_v8  ;;  %v392_v24 = vld [vmem:[%s16327_s24 + $0x688] sm:$0xff] }
  0xb6   : > { %4833 = vmatprep.mubr.bf16.mxu1 %v12769_v58  ;;  %v2065_v34 = vshrl.u32 %v392_v24, 16  ;;  %v2068_v35 = vshll.u32 %v392_v24, 16  ;;  %v396_v40 = vld [vmem:[%s16327_s24 + $0x6a8] sm:$0xff] }
  0xb7   : > { %4895 = vmatpush1.bf16.msra.mxu1 %v15020_v36  ;;  %v1853_v26 = vsel %vm16353_vm2, %v1848_v17, %v1852_v11  ;;  %v1955_v36 = vrot.slane %v1953_v28, 4  ;;  %v13193_v49 = vcombine.high %v388_v39, %v396_v40  ;;  %v15053_v55 = vld [vmem:[%s16276_s20 + $0x6a0] ss:$8 sps:$4 sm:$0xff]   ;;  %v15067_v24 = vld [vmem:[%s16276_s20 + $0x6c4] ss:$8 sps:$4 sm:$0xff]  }
  0xb8   : > { %8171 = vmatpush1.bf16.msra.mxu0 %v15023_v37  ;;  %4896 = vmatprep.subr.bf16.mxu1 %v15028_v42  ;;  %v12785_v31 = vcombine.high %v1741_v21, %v1853_v26  ;;  %v12784_v32 = vcombine.low %v1741_v21, %v1853_v26  ;;  %v1958_v37 = vrot.slane %v1956_v29, 5  ;;  %v2067_v42 = vrot.slane %v2065_v34, 4  ;;  %v15050_v58 = vld [vmem:[%s16276_s20 + $0xaa0] ss:$8 sps:$4 sm:$0xff]   ;;  %v15064_v26 = vld [vmem:[%s16276_s20 + $0xac4] ss:$8 sps:$4 sm:$0xff]  }
  0xb9   : > { %8172 = vmatprep.subr.bf16.mxu0 %v15031_v43  ;;  %v2070_v43 = vrot.slane %v2068_v35, 5  ;;  %v784_v62 = vld [vmem:[%s16327_s24 + $0x748] sm:$0x11]  ;;  %v15073_v29 = vld [vmem:[%s16276_s20 + $0x6d4] ss:$8 sps:$4 sm:$0xff]  }
  0xba   : > { %4834 = vmatmul.mubr.bf16.gmra.mrb[12].mxu1 %v12768_v59  ;;  %v1959_v44 = vor.u32 %v1958_v37, %v1955_v36  ;;  %v400_v59 = vld [vmem:[%s16327_s24 + $0x708] sm:$0xff]  ;;  %v2186_v3 = vshll.u32 %v784_v62, 16  ;;  %v15070_v36 = vld [vmem:[%s16276_s20 + $0xad4] ss:$8 sps:$4 sm:$0xff]  }
  0xbb   : > { %8110 = vmatmul.mubr.bf16.gmra.mrb[12].mxu0 %v13160_v48  ;;  %4897 = vmatpush1.bf16.msra.mxu1 %v15026_v47  ;;  %v2071_v47 = vor.u32 %v2070_v43, %v2067_v42  ;;  %v2076_v48 = vrot.slane %v2074_v38, 5  ;;  %v792_v63 = vld [vmem:[%s16327_s24 + $0x7c8] sm:$0x11]  ;;  %v2177_v1 = vshrl.u32 %v400_v59, 16  ;;  %v2180_v2 = vshll.u32 %v400_v59, 16 }
  0xbc   : > { %8173 = vmatpush1.bf16.msra.mxu0 %v15029_v45  ;;  %4898 = vmatprep.subr.bf16.mxu1 %v15034_v53  ;;  %v1964_v45 = vrot.slane %v1962_v30, 5  ;;  %v1960_v51 = vrot.slane %v1959_v44, 4  ;;  %v13192_v53 = vcombine.low %v388_v39, %v396_v40  ;;  %v2298_v11 = vshll.u32 %v792_v63, 16  ;;  %v15065_v27 = vld [vmem:[%s16276_s20 + $0x6c0] ss:$8 sps:$4 sm:$0xff]  }
  0xbd   : > { %8174 = vmatprep.subr.bf16.mxu0 %v15037_v61  ;;  %8119 = vmatprep.mubr.bf16.mxu0 %v13177_v13  ;;  %v2072_v54 = vrot.slane %v2071_v47, 4  ;;  %v408_v61 = vld [vmem:[%s16327_s24 + $0x788] sm:$0xff]  ;;  %v2182_v10 = vrot.slane %v2180_v2, 5  ;;  %v15071_v43 = vld [vmem:[%s16276_s20 + $0x6d0] ss:$8 sps:$4 sm:$0xff]  }
  0xbe   : > { %4843 = vmatprep.mubr.bf16.mxu1 %v12785_v31  ;;  %v1965_v57 = vsel %vm16353_vm2, %v1960_v51, %v1964_v45  ;;  %v2289_v7 = vshrl.u32 %v408_v61, 16  ;;  %v2292_v8 = vshll.u32 %v408_v61, 16  ;;  %v404_v13 = vld [vmem:[%s16327_s24 + $0x728] sm:$0xff]  ;;  %v2300_v21 = vrot.slane %v2298_v11, 5  ;;  %v15068_v51 = vld [vmem:[%s16276_s20 + $0xad0] ss:$8 sps:$4 sm:$0xff]  }
  0xbf   : > { %4899 = vmatpush1.bf16.msra.mxu1 %v15032_v9  ;;  %v2077_v0 = vsel %vm16353_vm2, %v2072_v54, %v2076_v48  ;;  %v2179_v9 = vrot.slane %v2177_v1, 4  ;;  %v15062_v31 = vld [vmem:[%s16276_s20 + $0xac0] ss:$8 sps:$4 sm:$0xff]   ;;  %v15079_v62 = vld [vmem:[%s16276_s20 + $0x6e4] ss:$8 sps:$4 sm:$0xff]  }
  0xc0   : > { %8175 = vmatpush1.bf16.msra.mxu0 %v15035_v4  ;;  %4900 = vmatprep.subr.bf16.mxu1 %v15040_v16  ;;  %v12801_v4 = vcombine.high %v1965_v57, %v2077_v0  ;;  %v12800_v5 = vcombine.low %v1965_v57, %v2077_v0  ;;  %v2291_v15 = vrot.slane %v2289_v7, 4  ;;  %v2294_v16 = vrot.slane %v2292_v8, 5  ;;  %v800_v34 = vld [vmem:[%s16327_s24 + $0x848] sm:$0x11]  ;;  %v15083_v1 = vld [vmem:[%s16276_s20 + $0x6f0] ss:$8 sps:$4 sm:$0xff]  }
  0xc1   : > { %8176 = vmatprep.subr.bf16.mxu0 %v15043_v14  ;;  %v412_v14 = vld [vmem:[%s16327_s24 + $0x7a8] sm:$0xff]  ;;  %v2183_v17 = vor.u32 %v2182_v10, %v2179_v9  ;;  %v2410_v40 = vshll.u32 %v800_v34, 16  ;;  %v15085_v2 = vld [vmem:[%s16276_s20 + $0x6f4] ss:$8 sps:$4 sm:$0xff]  }
  0xc2   : > { %4844 = vmatmul.mubr.bf16.gmra.mrb[16].mxu1 %v12784_v32  ;;  %v13208_v23 = vcombine.low %v404_v13, %v412_v14  ;;  %v416_v32 = vld [vmem:[%s16327_s24 + $0x808] sm:$0xff]  ;;  %v689_v7 = vld [vmem:[%s16327_s24 + $0x50] sm:$0x11] }
  0xc3   : > { %8120 = vmatmul.mubr.bf16.gmra.mrb[16].mxu0 %v13176_v18  ;;  %4901 = vmatpush1.bf16.msra.mxu1 %v15038_v22  ;;  %v2188_v18 = vrot.slane %v2186_v3, 5  ;;  %v13209_v22 = vcombine.high %v404_v13, %v412_v14  ;;  %v2184_v25 = vrot.slane %v2183_v17, 4  ;;  %v808_v37 = vld [vmem:[%s16327_s24 + $0x8c8] sm:$0x11]  ;;  %v2401_v38 = vshrl.u32 %v416_v32, 16 }
  0xc4   : > { %8177 = vmatpush1.bf16.msra.mxu0 %v15041_v19  ;;  %4902 = vmatprep.subr.bf16.mxu1 %v15046_v33  ;;  %v15056_v19 = vld [vmem:[%s16276_s20 + $0xab0] ss:$8 sps:$4 sm:$0xff]   ;;  %v424_v33 = vld [vmem:[%s16327_s24 + $0x888] sm:$0xff]  ;;  %v2404_v39 = vshll.u32 %v416_v32, 16  ;;  %v2522_v48 = vshll.u32 %v808_v37, 16  ;;  %v856_v13 = vshll.u32 %v689_v7, 16 }
  0xc5   : > { %8178 = vmatprep.subr.bf16.mxu0 %v15049_v20  ;;  %8129 = vmatprep.mubr.bf16.mxu0 %v13193_v49  ;;  %v2295_v20 = vor.u32 %v2294_v16, %v2291_v15  ;;  %v2189_v30 = vsel %vm16353_vm2, %v2184_v25, %v2188_v18  ;;  %v2513_v44 = vshrl.u32 %v424_v33, 16  ;;  %v2516_v45 = vshll.u32 %v424_v33, 16  ;;  %v420_v49 = vld [vmem:[%s16327_s24 + $0x828] sm:$0xff]  ;;  %v697_v9 = vld [vmem:[%s16327_s24 + $0xd0] sm:$0x11] }
  0xc6   : > { %4853 = vmatprep.mubr.bf16.mxu1 %v12801_v4  ;;  %v2406_v47 = vrot.slane %v2404_v39, 5  ;;  %v2524_v57 = vrot.slane %v2522_v48, 5  ;;  %v15077_v61 = vld [vmem:[%s16276_s20 + $0x6e0] ss:$8 sps:$4 sm:$0xff]   ;;  %v15082_v16 = vld [vmem:[%s16276_s20 + $0xaf4] ss:$8 sps:$4 sm:$0xff]  }
  0xc7   : > { %4903 = vmatpush1.bf16.msra.mxu1 %v15044_v46  ;;  %v2296_v28 = vrot.slane %v2295_v20, 4  ;;  %v2403_v46 = vrot.slane %v2401_v38, 4  ;;  %v15074_v4 = vld [vmem:[%s16276_s20 + $0xae0] ss:$8 sps:$4 sm:$0xff]   ;;  %v15091_v34 = vld [vmem:[%s16276_s20 + $0x704] ss:$8 sps:$4 sm:$0xff]  }
  0xc8   : > { %8179 = vmatpush1.bf16.msra.mxu0 %v15047_v41  ;;  %4904 = vmatprep.subr.bf16.mxu1 %v15052_v52  ;;  %v2515_v52 = vrot.slane %v2513_v44, 4  ;;  %v15089_v33 = vld [vmem:[%s16276_s20 + $0x700] ss:$8 sps:$4 sm:$0xff]   ;;  %v15095_v38 = vld [vmem:[%s16276_s20 + $0x710] ss:$8 sps:$4 sm:$0xff]  }
  0xc9   : > { %8180 = vmatprep.subr.bf16.mxu0 %v15055_v50  ;;  %v2301_v35 = vsel %vm16353_vm2, %v2296_v28, %v2300_v21  ;;  %v428_v50 = vld [vmem:[%s16327_s24 + $0x8a8] sm:$0xff]  ;;  %v2407_v54 = vor.u32 %v2406_v47, %v2403_v46  ;;  %v968_v21 = vshll.u32 %v697_v9, 16  ;;  %v858_v28 = vrot.slane %v856_v13, 5  ;;  %v15097_v39 = vld [vmem:[%s16276_s20 + $0x714] ss:$8 sps:$4 sm:$0xff]  }
  0xca   : > { %4854 = vmatmul.mubr.bf16.gmra.mrb[20].mxu1 %v12800_v5  ;;  %v12817_v41 = vcombine.high %v2189_v30, %v2301_v35  ;;  %v12816_v42 = vcombine.low %v2189_v30, %v2301_v35  ;;  %v13224_v59 = vcombine.low %v420_v49, %v428_v50  ;;  %v305_v5 = vld [vmem:[%s16327_s24 + $0x10] sm:$0xff] }
  0xcb   : > { %8130 = vmatmul.mubr.bf16.gmra.mrb[20].mxu0 %v13192_v53  ;;  %4905 = vmatpush1.bf16.msra.mxu1 %v15050_v58  ;;  %v2518_v53 = vrot.slane %v2516_v45, 5  ;;  %v13225_v58 = vcombine.high %v420_v49, %v428_v50  ;;  %v2408_v0 = vrot.slane %v2407_v54, 4  ;;  %v847_v10 = vshrl.u32 %v305_v5, 16  ;;  %v705_v44 = vld [vmem:[%s16327_s24 + $0x150] sm:$0x11] }
  0xcc   : > { %8181 = vmatpush1.bf16.msra.mxu0 %v15053_v55  ;;  %4906 = vmatprep.subr.bf16.mxu1 %v15058_v60  ;;  %v2412_v55 = vrot.slane %v2410_v40, 5  ;;  %v15076_v60 = vld [vmem:[%s16276_s20 + $0xae4] ss:$8 sps:$4 sm:$0xff]   ;;  %v850_v11 = vshll.u32 %v305_v5, 16  ;;  %v970_v30 = vrot.slane %v968_v21, 5  ;;  %v1080_v49 = vshll.u32 %v705_v44, 16 }
  0xcd   : > { %8182 = vmatprep.subr.bf16.mxu0 %v15061_v56  ;;  %8139 = vmatprep.mubr.bf16.mxu0 %v13209_v22  ;;  %v2519_v56 = vor.u32 %v2518_v53, %v2515_v52  ;;  %v309_v22 = vld [vmem:[%s16327_s24 + $0x30] sm:$0xff]  ;;  %v15101_v5 = vld [vmem:[%s16276_s20 + $0x720] ss:$8 sps:$4 sm:$0xff]  }
  0xce   : > { %4863 = vmatprep.mubr.bf16.mxu1 %v12817_v41  ;;  %v2413_v3 = vsel %vm16353_vm2, %v2408_v0, %v2412_v55  ;;  %v852_v20 = vrot.slane %v850_v11, 5  ;;  %v15086_v41 = vld [vmem:[%s16276_s20 + $0xb00] ss:$8 sps:$4 sm:$0xff]   ;;  %v713_v46 = vld [vmem:[%s16327_s24 + $0x1d0] sm:$0x11] }
  0xcf   : > { %4907 = vmatpush1.bf16.msra.mxu1 %v15056_v19  ;;  %v2520_v63 = vrot.slane %v2519_v56, 4  ;;  %v849_v19 = vrot.slane %v847_v10, 4  ;;  %v15094_v52 = vld [vmem:[%s16276_s20 + $0xb14] ss:$8 sps:$4 sm:$0xff]   ;;  %v15107_v10 = vld [vmem:[%s16276_s20 + $0x730] ss:$8 sps:$4 sm:$0xff]  }
  0xd0   : > { %8183 = vmatpush1.bf16.msra.mxu0 %v15059_v6  ;;  %4908 = vmatprep.subr.bf16.mxu1 %v15064_v26  ;;  %v313_v6 = vld [vmem:[%s16327_s24 + $0x90] sm:$0xff] }
  0xd1   : > { %8184 = vmatprep.subr.bf16.mxu0 %v15067_v24  ;;  %v2525_v8 = vsel %vm16353_vm2, %v2520_v63, %v2524_v57  ;;  %v959_v17 = vshrl.u32 %v313_v6, 16  ;;  %v962_v18 = vshll.u32 %v313_v6, 16  ;;  %v15080_v24 = vld [vmem:[%s16276_s20 + $0xaf0] ss:$8 sps:$4 sm:$0xff]   ;;  %v1192_v57 = vshll.u32 %v713_v46, 16 }
  0xd2   : > { %4864 = vmatmul.mubr.bf16.gmra.mrb[24].mxu1 %v12816_v42  ;;  %v12833_v14 = vcombine.high %v2413_v3, %v2525_v8  ;;  %v12832_v15 = vcombine.low %v2413_v3, %v2525_v8  ;;  %v321_v42 = vld [vmem:[%s16327_s24 + $0x110] sm:$0xff]  ;;  %v1082_v63 = vrot.slane %v1080_v49, 5  ;;  %v15103_v6 = vld [vmem:[%s16276_s20 + $0x724] ss:$8 sps:$4 sm:$0xff]  }
  0xd3   : > { %8140 = vmatmul.mubr.bf16.gmra.mrb[24].mxu0 %v13208_v23  ;;  %4909 = vmatpush1.bf16.msra.mxu1 %v15062_v31  ;;  %v317_v23 = vld [vmem:[%s16327_s24 + $0xb0] sm:$0xff]  ;;  %v961_v25 = vrot.slane %v959_v17, 4  ;;  %v964_v26 = vrot.slane %v962_v18, 5  ;;  %v1071_v47 = vshrl.u32 %v321_v42, 16  ;;  %v1074_v48 = vshll.u32 %v321_v42, 16 }
  0xd4   : > { %8185 = vmatpush1.bf16.msra.mxu0 %v15065_v27  ;;  %4910 = vmatprep.subr.bf16.mxu1 %v15070_v36  ;;  %v853_v27 = vor.u32 %v852_v20, %v849_v19  ;;  %v13115_v31 = vcombine.high %v309_v22, %v317_v23  ;;  %v13114_v32 = vcombine.low %v309_v22, %v317_v23  ;;  %v15088_v36 = vld [vmem:[%s16276_s20 + $0xb04] ss:$8 sps:$4 sm:$0xff]   ;;  %v15109_v11 = vld [vmem:[%s16276_s20 + $0x734] ss:$8 sps:$4 sm:$0xff]   ;;  %v15113_v42 = vld [vmem:[%s16276_s20 + $0x740] ss:$8 sps:$4 sm:$0xff]  }
  0xd5   : > { %8186 = vmatprep.subr.bf16.mxu0 %v15073_v29  ;;  %8149 = vmatprep.mubr.bf16.mxu0 %v13225_v58  ;;  %v965_v29 = vor.u32 %v964_v26, %v961_v25  ;;  %v1073_v55 = vrot.slane %v1071_v47, 4  ;;  %v1076_v56 = vrot.slane %v1074_v48, 5  ;;  %v325_v58 = vld [vmem:[%s16327_s24 + $0x130] sm:$0xff]  ;;  %v15100_v8 = vld [vmem:[%s16276_s20 + $0xb24] ss:$8 sps:$4 sm:$0xff]  }
  0xd6   : > { %4873 = vmatprep.mubr.bf16.mxu1 %v12833_v14  ;;  %v854_v35 = vrot.slane %v853_v27, 4  ;;  %v15098_v14 = vld [vmem:[%s16276_s20 + $0xb20] ss:$8 sps:$4 sm:$0xff]   ;;  %v721_v17 = vld [vmem:[%s16327_s24 + $0x250] sm:$0x11] }
  0xd7   : > { %4911 = vmatpush1.bf16.msra.mxu1 %v15068_v51  ;;  %v966_v37 = vrot.slane %v965_v29, 4  ;;  %v729_v19 = vld [vmem:[%s16327_s24 + $0x2d0] sm:$0x11]  ;;  %v1304_v22 = vshll.u32 %v721_v17, 16  ;;  %v15950_v17 = vld [vmem:[%s16327_s24 + $0x20] sm:$0xff] }
  0xd8   : > { %8187 = vmatpush1.bf16.msra.mxu0 %v15071_v43  ;;  %4912 = vmatprep.subr.bf16.mxu1 %v15076_v60  ;;  %v859_v40 = vsel %vm16353_vm2, %v854_v35, %v858_v28  ;;  %v329_v43 = vld [vmem:[%s16327_s24 + $0x190] sm:$0xff]  ;;  %v1077_v60 = vor.u32 %v1076_v56, %v1073_v55 }
  0xd9   : > { %8188 = vmatprep.subr.bf16.mxu0 %v15079_v62  ;;  %v971_v45 = vsel %vm16353_vm2, %v966_v37, %v970_v30  ;;  %v1183_v53 = vshrl.u32 %v329_v43, 16  ;;  %v1186_v54 = vshll.u32 %v329_v43, 16  ;;  %v15106_v25 = vld [vmem:[%s16276_s20 + $0xb34] ss:$8 sps:$4 sm:$0xff]   ;;  %v1416_v30 = vshll.u32 %v729_v19, 16 }
  0xda   : > { %4874 = vmatmul.mubr.bf16.gmra.mrb[28].mxu1 %v12832_v15  ;;  %v12722_v50 = vcombine.low %v859_v40, %v971_v45  ;;  %v12723_v51 = vcombine.high %v859_v40, %v971_v45  ;;  %v1078_v7 = vrot.slane %v1077_v60, 4  ;;  %v337_v15 = vld [vmem:[%s16327_s24 + $0x210] sm:$0xff]  ;;  %v1306_v37 = vrot.slane %v1304_v22, 5  ;;  %v15115_v43 = vld [vmem:[%s16276_s20 + $0x744] ss:$8 sps:$4 sm:$0xff]  }
  0xdb   : > { %8150 = vmatmul.mubr.bf16.gmra.mrb[28].mxu0 %v13224_v59  ;;  %4913 = vmatpush1.bf16.msra.mxu1 %v15074_v4  ;;  %v333_v59 = vld [vmem:[%s16327_s24 + $0x1b0] sm:$0xff]  ;;  %v1185_v62 = vrot.slane %v1183_v53, 4  ;;  %v1188_v0 = vrot.slane %v1186_v54, 5  ;;  %v1295_v20 = vshrl.u32 %v337_v15, 16  ;;  %v1298_v21 = vshll.u32 %v337_v15, 16 }
  0xdc   : > { %8189 = vmatpush1.bf16.msra.mxu0 %v15077_v61  ;;  %4914 = vmatprep.subr.bf16.mxu1 %v15082_v16  ;;  %v15092_v61 = vld [vmem:[%s16276_s20 + $0xb10] ss:$8 sps:$4 sm:$0xff]   ;;  %v13131_v3 = vcombine.high %v325_v58, %v333_v59  ;;  %v13130_v4 = vcombine.low %v325_v58, %v333_v59  ;;  %v1083_v13 = vsel %vm16353_vm2, %v1078_v7, %v1082_v63  ;;  %v15112_v45 = vld [vmem:[%s16276_s20 + $0xb44] ss:$8 sps:$4 sm:$0xff]   ;;  %v15121_v48 = vld [vmem:[%s16276_s20 + $0x754] ss:$8 sps:$4 sm:$0xff]  }
  0xdd   : > { %8190 = vmatprep.subr.bf16.mxu0 %v15085_v2  ;;  %8192 = vmatprep.mubr.bf16.mxu0 %v13115_v31  ;;  %v1194_v2 = vrot.slane %v1192_v57, 5  ;;  %v345_v16 = vld [vmem:[%s16327_s24 + $0x290] sm:$0xff]  ;;  %v1297_v28 = vrot.slane %v1295_v20, 4  ;;  %v1300_v29 = vrot.slane %v1298_v21, 5  ;;  %v15125_v15 = vld [vmem:[%s16276_s20 + $0x760] ss:$8 sps:$4 sm:$0xff]  }
  0xde   : > { %4916 = vmatprep.mubr.bf16.mxu1 %v12723_v51  ;;  %v1407_v26 = vshrl.u32 %v345_v16, 16  ;;  %v1410_v27 = vshll.u32 %v345_v16, 16  ;;  %v341_v31 = vld [vmem:[%s16327_s24 + $0x230] sm:$0xff]  ;;  %v15127_v16 = vld [vmem:[%s16276_s20 + $0x764] ss:$8 sps:$4 sm:$0xff]  }
  0xdf   : > { %4915 = vmatpush1.bf16.msra.mxu1 %v15080_v24  ;;  %v15119_v47 = vld [vmem:[%s16276_s20 + $0x750] ss:$8 sps:$4 sm:$0xff]   ;;  %v15124_v20 = vld [vmem:[%s16276_s20 + $0xb64] ss:$8 sps:$4 sm:$0xff]  }
  0xe0   : > { %8191 = vmatpush1.bf16.msra.mxu0 %v15083_v1  ;;  %4997 = vmatprep.subr.bf16.mxu1 %v15088_v36  ;;  %v1189_v1 = vor.u32 %v1188_v0, %v1185_v62  ;;  %v1412_v35 = vrot.slane %v1410_v27, 5  ;;  %v1301_v36 = vor.u32 %v1300_v29, %v1297_v28  ;;  %v353_v51 = vld [vmem:[%s16327_s24 + $0x310] sm:$0xff]  ;;  %v15122_v28 = vld [vmem:[%s16276_s20 + $0xb60] ss:$8 sps:$4 sm:$0xff]  }
  0xe1   : > { %8273 = vmatprep.subr.bf16.mxu0 %v15091_v34  ;;  %v1409_v34 = vrot.slane %v1407_v26, 4  ;;  %v737_v53 = vld [vmem:[%s16327_s24 + $0x350] sm:$0x11]  ;;  %v1519_v56 = vshrl.u32 %v353_v51, 16  ;;  %v1522_v57 = vshll.u32 %v353_v51, 16  ;;  %v17030_v51 = vld [vmem:[%s16327_s24 + $0x528] sm:$0xff] }
  0xe2   : > { %4917 = vmatmul.mubr.bf16.vlgmr.msra.gmra.mrb[0].mxu1 %v12722_v50  ;;  %v1190_v9 = vrot.slane %v1189_v1, 4  ;;  %v1302_v44 = vrot.slane %v1301_v36, 4  ;;  %v15110_v50 = vld [vmem:[%s16276_s20 + $0xb40] ss:$8 sps:$4 sm:$0xff]   ;;  %v745_v55 = vld [vmem:[%s16327_s24 + $0x3d0] sm:$0x11] }
  0xe3   : > { %8193 = vmatmul.mubr.bf16.vlgmr.msra.gmra.mrb[0].mxu0 %v13114_v32  ;;  %4998 = vmatpush1.bf16.msra.mxu1 %v15086_v41  ;;  %v349_v32 = vld [vmem:[%s16327_s24 + $0x2b0] sm:$0xff]  ;;  %v1528_v58 = vshll.u32 %v737_v53, 16  ;;  %v1521_v63 = vrot.slane %v1519_v56, 4  ;;  %v1524_v1 = vrot.slane %v1522_v57, 5 }
  0xe4   : > { %8274 = vmatpush1.bf16.msra.mxu0 %v15089_v33  ;;  %4999 = vmatprep.subr.bf16.mxu1 %v15094_v52  ;;  %v1195_v18 = vsel %vm16353_vm2, %v1190_v9, %v1194_v2  ;;  %v15104_v33 = vld [vmem:[%s16276_s20 + $0xb30] ss:$8 sps:$4 sm:$0xff]   ;;  %v13147_v40 = vcombine.high %v341_v31, %v349_v32  ;;  %v13146_v41 = vcombine.low %v341_v31, %v349_v32  ;;  %v15118_v62 = vld [vmem:[%s16276_s20 + $0xb54] ss:$8 sps:$4 sm:$0xff]   ;;  %v1640_v2 = vshll.u32 %v745_v55, 16 }
  0xe5   : > { %8275 = vmatprep.subr.bf16.mxu0 %v15097_v39  ;;  %8202 = vmatprep.mubr.bf16.mxu0 %v13131_v3  ;;  %v12739_v23 = vcombine.high %v1083_v13, %v1195_v18  ;;  %v12738_v24 = vcombine.low %v1083_v13, %v1195_v18  ;;  %v1418_v39 = vrot.slane %v1416_v30, 5  ;;  %v1307_v49 = vsel %vm16353_vm2, %v1302_v44, %v1306_v37  ;;  %v361_v52 = vld [vmem:[%s16327_s24 + $0x390] sm:$0xff] }
  0xe6   : > { %v1631_v0 = vshrl.u32 %v361_v52, 16  ;;  %v1634_v60 = vshll.u32 %v361_v52, 16  ;;  %v357_v3 = vld [vmem:[%s16327_s24 + $0x330] sm:$0xff]  ;;  %v1530_v9 = vrot.slane %v1528_v58, 5  ;;  %v875_v18 = vshrl.u32 %v15950_v17, 16 }
  0xe7   : > { %5000 = vmatpush1.bf16.msra.mxu1 %v15092_v61  ;;  %4926 = vmatprep.mubr.bf16.mxu1 %v12739_v23  ;;  %v15131_v22 = vld [vmem:[%s16276_s20 + $0x770] ss:$8 sps:$4 sm:$0xff]   ;;  %v15133_v23 = vld [vmem:[%s16276_s20 + $0x774] ss:$8 sps:$4 sm:$0xff]  }
  0xe8   : > { %8276 = vmatpush1.bf16.msra.mxu0 %v15095_v38  ;;  %5001 = vmatprep.subr.bf16.mxu1 %v15100_v8  ;;  %v1413_v38 = vor.u32 %v1412_v35, %v1409_v34  ;;  %v1636_v7 = vrot.slane %v1634_v60, 5  ;;  %v1525_v8 = vor.u32 %v1524_v1, %v1521_v63  ;;  %v369_v29 = vld [vmem:[%s16327_s24 + $0x510] sm:$0xff]  ;;  %v16819_v55 = vrot.slane %v875_v18, 4  ;;  %v15137_v60 = vld [vmem:[%s16276_s20 + $0x780] ss:$8 sps:$4 sm:$0xff]  }
  0xe9   : > { %8277 = vmatprep.subr.bf16.mxu0 %v15103_v6  ;;  %v1633_v6 = vrot.slane %v1631_v0, 4  ;;  %v377_v30 = vld [vmem:[%s16327_s24 + $0x590] sm:$0xff]  ;;  %v1743_v34 = vshrl.u32 %v369_v29, 16  ;;  %v1746_v35 = vshll.u32 %v369_v29, 16  ;;  %v15139_v63 = vld [vmem:[%s16276_s20 + $0x784] ss:$8 sps:$4 sm:$0xff]  }
  0xea   : > { %4927 = vmatmul.mubr.bf16.gmra.mrb[4].mxu1 %v12738_v24  ;;  %v1414_v46 = vrot.slane %v1413_v38, 4  ;;  %v1526_v19 = vrot.slane %v1525_v8, 4  ;;  %v878_v24 = vshll.u32 %v15950_v17, 16  ;;  %v753_v31 = vld [vmem:[%s16327_s24 + $0x550] sm:$0x11]  ;;  %v16833_v8 = vld [vmem:[%s16327_s24 + $0x120] sm:$0xff] }
  0xeb   : > { %8203 = vmatmul.mubr.bf16.gmra.mrb[4].mxu0 %v13130_v4  ;;  %5002 = vmatpush1.bf16.msra.mxu1 %v15098_v14  ;;  %v365_v4 = vld [vmem:[%s16327_s24 + $0x3b0] sm:$0xff]  ;;  %v1752_v36 = vshll.u32 %v753_v31, 16  ;;  %v1748_v44 = vrot.slane %v1746_v35, 5  ;;  %v16855_v35 = vld [vmem:[%s16327_s24 + $0x220] sm:$0xff] }
  0xec   : > { %8278 = vmatpush1.bf16.msra.mxu0 %v15101_v5  ;;  %5003 = vmatprep.subr.bf16.mxu1 %v15106_v25  ;;  %v1419_v54 = vsel %vm16353_vm2, %v1414_v46, %v1418_v39  ;;  %v15116_v5 = vld [vmem:[%s16276_s20 + $0xb50] ss:$8 sps:$4 sm:$0xff]   ;;  %v13163_v13 = vcombine.high %v357_v3, %v365_v4  ;;  %v13162_v14 = vcombine.low %v357_v3, %v365_v4  ;;  %v15951_v25 = vld [vmem:[%s16327_s24 + $0xa0] sm:$0xff]  ;;  %v15130_v39 = vld [vmem:[%s16276_s20 + $0xb74] ss:$8 sps:$4 sm:$0xff]   ;;  %v16821_v56 = vrot.slane %v878_v24, 5 }
  0xed   : > { %8279 = vmatprep.subr.bf16.mxu0 %v15109_v11  ;;  %8212 = vmatprep.mubr.bf16.mxu0 %v13147_v40  ;;  %v12755_v59 = vcombine.high %v1307_v49, %v1419_v54  ;;  %v12754_v61 = vcombine.low %v1307_v49, %v1419_v54  ;;  %v1642_v11 = vrot.slane %v1640_v2, 5  ;;  %v987_v26 = vshrl.u32 %v15951_v25, 16  ;;  %v373_v46 = vld [vmem:[%s16327_s24 + $0x530] sm:$0xff]  ;;  %v15136_v4 = vld [vmem:[%s16276_s20 + $0xb84] ss:$8 sps:$4 sm:$0xff]   ;;  %v342_v49 = vld [vmem:[%s16327_s24 + $0x238] sm:$0xff] }
  0xee   : > { %v1531_v27 = vsel %vm16353_vm2, %v1526_v19, %v1530_v9  ;;  %v1855_v40 = vshrl.u32 %v377_v30, 16  ;;  %v15128_v52 = vld [vmem:[%s16276_s20 + $0xb70] ss:$8 sps:$4 sm:$0xff]   ;;  %v1754_v58 = vrot.slane %v1752_v36, 5  ;;  %v15142_v24 = vld [vmem:[%s16276_s20 + $0xb94] ss:$8 sps:$4 sm:$0xff]  }
  0xef   : > { %5004 = vmatpush1.bf16.msra.mxu1 %v15104_v33  ;;  %4936 = vmatprep.mubr.bf16.mxu1 %v12755_v59  ;;  %v761_v33 = vld [vmem:[%s16327_s24 + $0x5d0] sm:$0x11]  ;;  %v16825_v1 = vrot.slane %v987_v26, 4  ;;  %v17098_v36 = vld [vmem:[%s16327_s24 + $0x8a8] sm:$0xff]  ;;  %v382_v9 = vld [vmem:[%s16327_s24 + $0x5b8] sm:$0xff] }
  0xf0   : > { %8280 = vmatpush1.bf16.msra.mxu0 %v15107_v10  ;;  %5005 = vmatprep.subr.bf16.mxu1 %v15112_v45  ;;  %v1637_v10 = vor.u32 %v1636_v7, %v1633_v6  ;;  %v1864_v45 = vshll.u32 %v761_v33, 16  ;;  %v1857_v53 = vrot.slane %v1855_v40, 4  ;;  %v15143_v6 = vld [vmem:[%s16276_s20 + $0x790] ss:$8 sps:$4 sm:$0xff]   ;;  %v15145_v7 = vld [vmem:[%s16276_s20 + $0x794] ss:$8 sps:$4 sm:$0xff]  }
  0xf1   : > { %8281 = vmatprep.subr.bf16.mxu0 %v15115_v43  ;;  %v1745_v43 = vrot.slane %v1743_v34, 4  ;;  %v777_v18 = vld [vmem:[%s16327_s24 + $0x6d0] sm:$0x11]  ;;  %v358_v40 = vld [vmem:[%s16327_s24 + $0x338] sm:$0xff]  ;;  %v15223_v34 = vld [vmem:[%s16276_s20 + $0x1064] ss:$8 sps:$4 sm:$0xff]  }
  0xf2   : > { %4937 = vmatmul.mubr.bf16.gmra.mrb[8].mxu1 %v12754_v61  ;;  %v1638_v21 = vrot.slane %v1637_v10, 4  ;;  %v1866_v61 = vrot.slane %v1864_v45, 5  ;;  %v2088_v31 = vshll.u32 %v777_v18, 16  ;;  %v397_v33 = vld [vmem:[%s16327_s24 + $0x6b0] sm:$0xff]  ;;  %v374_v10 = vld [vmem:[%s16327_s24 + $0x538] sm:$0xff] }
  0xf3   : > { %8213 = vmatmul.mubr.bf16.gmra.mrb[8].mxu0 %v13146_v41  ;;  %5006 = vmatpush1.bf16.msra.mxu1 %v15110_v50  ;;  %v1858_v41 = vshll.u32 %v377_v30, 16  ;;  %v16815_v50 = vld [vmem:[%s16327_s24 + $0xc0] sm:$0x11]  ;;  %v1749_v57 = vor.u32 %v1748_v44, %v1745_v43 }
  0xf4   : > { %8282 = vmatpush1.bf16.msra.mxu0 %v15113_v42  ;;  %5007 = vmatprep.subr.bf16.mxu1 %v15118_v62  ;;  %v1643_v32 = vsel %vm16353_vm2, %v1638_v21, %v1642_v11  ;;  %v990_v42 = vshll.u32 %v15951_v25, 16 }
  0xf5   : > { %8283 = vmatprep.subr.bf16.mxu0 %v15121_v48  ;;  %8222 = vmatprep.mubr.bf16.mxu0 %v13163_v13  ;;  %v12771_v37 = vcombine.high %v1531_v27, %v1643_v32  ;;  %v12770_v38 = vcombine.low %v1531_v27, %v1643_v32  ;;  %v16811_v48 = vld [vmem:[%s16327_s24 + $0x40] sm:$0x11]  ;;  %v1860_v54 = vrot.slane %v1858_v41, 5  ;;  %v1750_v3 = vrot.slane %v1749_v57, 4  ;;  %v389_v32 = vld [vmem:[%s16327_s24 + $0x630] sm:$0xff]  ;;  %v17068_v57 = vld [vmem:[%s16327_s24 + $0x728] sm:$0xff] }
  0xf6   : > { %v16827_v2 = vrot.slane %v990_v42, 5  ;;  %v15134_v13 = vld [vmem:[%s16276_s20 + $0xb80] ss:$8 sps:$4 sm:$0xff]  }
  0xf7   : > { %5008 = vmatpush1.bf16.msra.mxu1 %v15116_v5  ;;  %4946 = vmatprep.mubr.bf16.mxu1 %v12771_v37  ;;  %v1861_v59 = vor.u32 %v1860_v54, %v1857_v53  ;;  %v1755_v11 = vsel %vm16353_vm2, %v1750_v3, %v1754_v58  ;;  %v16848_v27 = vld [vmem:[%s16327_s24 + $0x1a0] sm:$0xff]  ;;  %v15140_v37 = vld [vmem:[%s16276_s20 + $0xb90] ss:$8 sps:$4 sm:$0xff]  }
  0xf8   : > { %8284 = vmatpush1.bf16.msra.mxu0 %v15119_v47  ;;  %5009 = vmatprep.subr.bf16.mxu1 %v15124_v20  ;;  %v381_v47 = vld [vmem:[%s16327_s24 + $0x5b0] sm:$0xff]  ;;  %v16861_v41 = vld [vmem:[%s16327_s24 + $0x2a0] sm:$0xff]  ;;  %v350_v3 = vld [vmem:[%s16327_s24 + $0x2b8] sm:$0xff] }
  0xf9   : > { %8285 = vmatprep.subr.bf16.mxu0 %v15127_v16  ;;  %v13179_v62 = vcombine.high %v373_v46, %v381_v47  ;;  %v13178_v0 = vcombine.low %v373_v46, %v381_v47  ;;  %v1862_v5 = vrot.slane %v1861_v59, 4  ;;  %v769_v16 = vld [vmem:[%s16327_s24 + $0x650] sm:$0x11]  ;;  %v2090_v46 = vrot.slane %v2088_v31, 5  ;;  %v15149_v53 = vld [vmem:[%s16276_s20 + $0x7a0] ss:$8 sps:$4 sm:$0xff]  }
  0xfa   : > { %4947 = vmatmul.mubr.bf16.gmra.mrb[12].mxu1 %v12770_v38  ;;  %v1976_v21 = vshll.u32 %v769_v16, 16  ;;  %v13195_v47 = vcombine.high %v389_v32, %v397_v33  ;;  %v15151_v54 = vld [vmem:[%s16276_s20 + $0x7a4] ss:$8 sps:$4 sm:$0xff]   ;;  %v793_v16 = vld [vmem:[%s16327_s24 + $0x7d0] sm:$0x11] }
  0xfb   : > { %8223 = vmatmul.mubr.bf16.gmra.mrb[12].mxu0 %v13162_v14  ;;  %5010 = vmatpush1.bf16.msra.mxu1 %v15122_v28  ;;  %v385_v14 = vld [vmem:[%s16327_s24 + $0x610] sm:$0xff]  ;;  %v1867_v17 = vsel %vm16353_vm2, %v1862_v5, %v1866_v61  ;;  %v16868_v58 = vld [vmem:[%s16327_s24 + $0x320] sm:$0xff]  ;;  %v17055_v59 = vld [vmem:[%s16327_s24 + $0x628] sm:$0xff] }
  0xfc   : > { %8286 = vmatpush1.bf16.msra.mxu0 %v15125_v15  ;;  %5011 = vmatprep.subr.bf16.mxu1 %v15130_v39  ;;  %v393_v15 = vld [vmem:[%s16327_s24 + $0x690] sm:$0xff]  ;;  %v1967_v19 = vshrl.u32 %v385_v14, 16  ;;  %v1970_v20 = vshll.u32 %v385_v14, 16  ;;  %v1978_v44 = vrot.slane %v1976_v21, 5  ;;  %v15199_v5 = vld [vmem:[%s16276_s20 + $0x1024] ss:$8 sps:$4 sm:$0xff]  }
  0xfd   : > { %8287 = vmatprep.subr.bf16.mxu0 %v15133_v23  ;;  %8232 = vmatprep.mubr.bf16.mxu0 %v13179_v62  ;;  %v12786_v23 = vcombine.low %v1755_v11, %v1867_v17  ;;  %v2079_v25 = vshrl.u32 %v393_v15, 16  ;;  %v2082_v26 = vshll.u32 %v393_v15, 16  ;;  %v15148_v62 = vld [vmem:[%s16276_s20 + $0xba4] ss:$8 sps:$4 sm:$0xff]   ;;  %v785_v14 = vld [vmem:[%s16327_s24 + $0x750] sm:$0x11] }
  0xfe   : > { %v1969_v29 = vrot.slane %v1967_v19, 4  ;;  %v1972_v30 = vrot.slane %v1970_v20, 5  ;;  %v2200_v19 = vshll.u32 %v785_v14, 16  ;;  %v405_v31 = vld [vmem:[%s16327_s24 + $0x730] sm:$0xff]  ;;  %v15160_v14 = vld [vmem:[%s16276_s20 + $0xbc4] ss:$8 sps:$4 sm:$0xff]  }
  0xff   : > { %5012 = vmatpush1.bf16.msra.mxu1 %v15128_v52  ;;  %v2081_v38 = vrot.slane %v2079_v25, 4  ;;  %v2084_v39 = vrot.slane %v2082_v26, 5  ;;  %v13194_v52 = vcombine.low %v389_v32, %v397_v33  ;;  %v413_v32 = vld [vmem:[%s16327_s24 + $0x7b0] sm:$0xff]  ;;  %v16893_v33 = vld [vmem:[%s16327_s24 + $0x520] sm:$0xff]  ;;  %v17017_v25 = vld [vmem:[%s16327_s24 + $0x328] sm:$0xff] }
 0x100   : > { %8288 = vmatpush1.bf16.msra.mxu0 %v15131_v22  ;;  %v12787_v22 = vcombine.high %v1755_v11, %v1867_v17  ;;  %5013 = vmatprep.subr.bf16.mxu1 %v15136_v4  ;;  %v1973_v43 = vor.u32 %v1972_v30, %v1969_v29  ;;  %v16876_v4 = vld [vmem:[%s16327_s24 + $0x3a0] sm:$0xff]  ;;  %v401_v11 = vld [vmem:[%s16327_s24 + $0x710] sm:$0xff]  ;;  %v2312_v30 = vshll.u32 %v793_v16, 16 }
 0x101   : > { %8289 = vmatprep.subr.bf16.mxu0 %v15139_v63  ;;  %v2085_v45 = vor.u32 %v2084_v39, %v2081_v38  ;;  %v15157_v63 = vld [vmem:[%s16276_s20 + $0x7b4] ss:$8 sps:$4 sm:$0xff]   ;;  %v2191_v17 = vshrl.u32 %v401_v11, 16  ;;  %v2194_v18 = vshll.u32 %v401_v11, 16  ;;  %v15152_v39 = vld [vmem:[%s16276_s20 + $0xbb0] ss:$8 sps:$4 sm:$0xff]  }
 0x102   : > { %4956 = vmatprep.mubr.bf16.mxu1 %v12787_v22  ;;  %v1974_v61 = vrot.slane %v1973_v43, 4  ;;  %v15154_v22 = vld [vmem:[%s16276_s20 + $0xbb4] ss:$8 sps:$4 sm:$0xff]   ;;  %v16906_v11 = vld [vmem:[%s16327_s24 + $0x620] sm:$0xff]  ;;  %v15167_v16 = vld [vmem:[%s16276_s20 + $0x7d0] ss:$8 sps:$4 sm:$0xff]  }
 0x103   : > { %8233 = vmatmul.mubr.bf16.gmra.mrb[16].mxu0 %v13178_v0  ;;  %4957 = vmatmul.mubr.bf16.gmra.mrb[16].mxu1 %v12786_v23  ;;  %v2086_v0 = vrot.slane %v2085_v45, 4  ;;  %v2193_v26 = vrot.slane %v2191_v17, 4  ;;  %v2196_v29 = vrot.slane %v2194_v18, 5  ;;  %v16899_v45 = vld [vmem:[%s16327_s24 + $0x5a0] sm:$0xff]  ;;  %v15169_v17 = vld [vmem:[%s16276_s20 + $0x7d4] ss:$8 sps:$4 sm:$0xff]  }
 0x104   : > { %8290 = vmatpush1.bf16.msra.mxu0 %v15137_v60  ;;  %5014 = vmatpush1.bf16.msra.mxu1 %v15134_v13  ;;  %v15155_v60 = vld [vmem:[%s16276_s20 + $0x7b0] ss:$8 sps:$4 sm:$0xff]   ;;  %v16914_v18 = vld [vmem:[%s16327_s24 + $0x6a0] sm:$0xff] }
 0x105   : > { %8291 = vmatprep.subr.bf16.mxu0 %v15145_v7  ;;  %5015 = vmatprep.subr.bf16.mxu1 %v15142_v24  ;;  %v15146_v7 = vld [vmem:[%s16276_s20 + $0xba0] ss:$8 sps:$4 sm:$0xff]   ;;  %v409_v13 = vld [vmem:[%s16327_s24 + $0x790] sm:$0xff]  ;;  %v2091_v15 = vsel %vm16353_vm2, %v2086_v0, %v2090_v46  ;;  %v13210_v0 = vcombine.low %v405_v31, %v413_v32 }
 0x106   : > { %8242 = vmatprep.mubr.bf16.mxu0 %v13195_v47  ;;  %v2303_v23 = vshrl.u32 %v409_v13, 16  ;;  %v2306_v24 = vshll.u32 %v409_v13, 16  ;;  %v318_v13 = vld [vmem:[%s16327_s24 + $0xb8] sm:$0xff]  ;;  %v16974_v47 = vld [vmem:[%s16327_s24 + $0xa8] sm:$0xff]  ;;  %v17111_v28 = vld [vmem:[%s16327_s24 + $0xb0] sm:$0xff] }
 0x107   : > { %v16987_v46 = vld [vmem:[%s16327_s24 + $0x1a8] sm:$0xff]  ;;  %19589 = vst [vmem:[#allocation4_spill] sm:$0xff] %v17111_v28  ;;  %v17136_v28 = vld [vmem:[%s16327_s24 + $0x1b0] sm:$0xff] }
 0x108   : > { %8292 = vmatpush1.bf16.msra.mxu0 %v15143_v6  ;;  %v1979_v6 = vsel %vm16353_vm2, %v1974_v61, %v1978_v44  ;;  %5016 = vmatpush1.bf16.msra.mxu1 %v15140_v37  ;;  %v2305_v43 = vrot.slane %v2303_v23, 4  ;;  %v2308_v44 = vrot.slane %v2306_v24, 5  ;;  %v2314_v61 = vrot.slane %v2312_v30, 5  ;;  %v417_v23 = vld [vmem:[%s16327_s24 + $0x810] sm:$0xff]  ;;  %v326_v37 = vld [vmem:[%s16327_s24 + $0x138] sm:$0xff]  ;;  %19591 = vst [vmem:[#allocation6_spill] sm:$0xff] %v17136_v28 }
 0x109   : > { %8293 = vmatprep.subr.bf16.mxu0 %v15151_v54  ;;  %v12803_v20 = vcombine.high %v1979_v6, %v2091_v15  ;;  %v12802_v21 = vcombine.low %v1979_v6, %v2091_v15  ;;  %5017 = vmatprep.subr.bf16.mxu1 %v15148_v62  ;;  %v13211_v62 = vcombine.high %v405_v31, %v413_v32  ;;  %v15163_v6 = vld [vmem:[%s16276_s20 + $0x7c4] ss:$8 sps:$4 sm:$0xff]   ;;  %v425_v24 = vld [vmem:[%s16327_s24 + $0x890] sm:$0xff]  ;;  %v2415_v31 = vshrl.u32 %v417_v23, 16 }
 0x10a   : > { %v2309_v54 = vor.u32 %v2308_v44, %v2305_v43  ;;  %v809_v30 = vld [vmem:[%s16327_s24 + $0x8d0] sm:$0x11]  ;;  %v2418_v32 = vshll.u32 %v417_v23, 16 }
 0x10b   : > { %8243 = vmatmul.mubr.bf16.gmra.mrb[20].mxu0 %v13194_v52  ;;  %4966 = vmatprep.mubr.bf16.mxu1 %v12803_v20  ;;  %v2197_v52 = vor.u32 %v2196_v29, %v2193_v26  ;;  %v801_v26 = vld [vmem:[%s16327_s24 + $0x850] sm:$0x11]  ;;  %v15175_v20 = vld [vmem:[%s16276_s20 + $0x7e4] ss:$8 sps:$4 sm:$0xff]  }
 0x10c   : > { %8294 = vmatpush1.bf16.msra.mxu0 %v15149_v53  ;;  %4967 = vmatmul.mubr.bf16.gmra.mrb[20].mxu1 %v12802_v21  ;;  %v2202_v53 = vrot.slane %v2200_v19, 5  ;;  %v2310_v15 = vrot.slane %v2309_v54, 4  ;;  %v2424_v43 = vshll.u32 %v801_v26, 16  ;;  %v2527_v54 = vshrl.u32 %v425_v24, 16  ;;  %v16936_v26 = vld [vmem:[%s16327_s24 + $0x7a0] sm:$0xff] }
 0x10d   : > { %8295 = vmatprep.subr.bf16.mxu0 %v15157_v63  ;;  %5018 = vmatpush1.bf16.msra.mxu1 %v15146_v7  ;;  %v15161_v63 = vld [vmem:[%s16276_s20 + $0x7c0] ss:$8 sps:$4 sm:$0xff]   ;;  %v2198_v7 = vrot.slane %v2197_v52, 4 }
 0x10e   : > { %5019 = vmatprep.subr.bf16.mxu1 %v15154_v22  ;;  %8252 = vmatprep.mubr.bf16.mxu0 %v13211_v62  ;;  %v15158_v22 = vld [vmem:[%s16276_s20 + $0xbc0] ss:$8 sps:$4 sm:$0xff]   ;;  %v2315_v29 = vsel %vm16353_vm2, %v2310_v15, %v2314_v61  ;;  %v2530_v62 = vshll.u32 %v425_v24, 16  ;;  %v429_v15 = vld [vmem:[%s16327_s24 + $0x8b0] sm:$0xff]  ;;  %v2426_v23 = vrot.slane %v2424_v43, 5 }
 0x10f   : > { %v2203_v21 = vsel %vm16353_vm2, %v2198_v7, %v2202_v53  ;;  %v15166_v53 = vld [vmem:[%s16276_s20 + $0xbd4] ss:$8 sps:$4 sm:$0xff]   ;;  %v16949_v19 = vld [vmem:[%s16327_s24 + $0x8a0] sm:$0xff] }
 0x110   : > { %8296 = vmatpush1.bf16.msra.mxu0 %v15155_v60  ;;  %v12819_v44 = vcombine.high %v2203_v21, %v2315_v29  ;;  %v12818_v52 = vcombine.low %v2203_v21, %v2315_v29  ;;  %v421_v7 = vld [vmem:[%s16327_s24 + $0x830] sm:$0xff]  ;;  %v2529_v21 = vrot.slane %v2527_v54, 4  ;;  %v2532_v24 = vrot.slane %v2530_v62, 5  ;;  %v15173_v62 = vld [vmem:[%s16276_s20 + $0x7e0] ss:$8 sps:$4 sm:$0xff]   ;;  %v310_v60 = vld [vmem:[%s16327_s24 + $0x38] sm:$0xff] }
 0x111   : > { %8297 = vmatprep.subr.bf16.mxu0 %v15163_v6  ;;  %5020 = vmatpush1.bf16.msra.mxu1 %v15152_v39  ;;  %v16929_v39 = vld [vmem:[%s16327_s24 + $0x720] sm:$0xff]  ;;  %v2536_v6 = vshll.u32 %v809_v30, 16  ;;  %v13227_v61 = vcombine.high %v421_v7, %v429_v15  ;;  %v13226_v54 = vcombine.low %v421_v7, %v429_v15  ;;  %v16957_v7 = vld [vmem:[%s16327_s24 + $0x28] sm:$0xff] }
 0x112   : > { %5021 = vmatprep.subr.bf16.mxu1 %v15160_v14  ;;  %4976 = vmatprep.mubr.bf16.mxu1 %v12819_v44  ;;  %v2533_v44 = vor.u32 %v2532_v24, %v2529_v21  ;;  %v15172_v43 = vld [vmem:[%s16276_s20 + $0xbe4] ss:$8 sps:$4 sm:$0xff]   ;;  %v306_v24 = vld [vmem:[%s16327_s24 + $0x18] sm:$0xff] }
 0x113   : > { %8253 = vmatmul.mubr.bf16.gmra.mrb[24].mxu0 %v13210_v0  ;;  %v2417_v0 = vrot.slane %v2415_v31, 4  ;;  %v16942_v31 = vld [vmem:[%s16327_s24 + $0x820] sm:$0xff]  ;;  %v2538_v14 = vrot.slane %v2536_v6, 5  ;;  %v861_v6 = vshrl.u32 %v306_v24, 16  ;;  %v864_v15 = vshll.u32 %v306_v24, 16 }
 0x114   : > { %8298 = vmatpush1.bf16.msra.mxu0 %v15161_v63  ;;  %v2420_v63 = vrot.slane %v2418_v32, 5  ;;  %4977 = vmatmul.mubr.bf16.gmra.mrb[24].mxu1 %v12818_v52  ;;  %v2534_v52 = vrot.slane %v2533_v44, 4  ;;  %v690_v44 = vld [vmem:[%s16327_s24 + $0x58] sm:$0x11]  ;;  %v13116_v24 = vcombine.low %v310_v60, %v318_v13  ;;  %v15187_v30 = vld [vmem:[%s16276_s20 + $0x1004] ss:$8 sps:$4 sm:$0xff]  }
 0x115   : > { %8299 = vmatprep.subr.bf16.mxu0 %v15169_v17  ;;  %v15164_v17 = vld [vmem:[%s16276_s20 + $0xbd0] ss:$8 sps:$4 sm:$0xff]   ;;  %5022 = vmatpush1.bf16.msra.mxu1 %v15158_v22 }
 0x116   : > { %v2421_v32 = vor.u32 %v2420_v63, %v2417_v0  ;;  %5023 = vmatprep.subr.bf16.mxu1 %v15166_v53  ;;  %8262 = vmatprep.mubr.bf16.mxu0 %v13227_v61  ;;  %v15179_v0 = vld [vmem:[%s16276_s20 + $0x7f0] ss:$8 sps:$4 sm:$0xff]   ;;  %v15181_v63 = vld [vmem:[%s16276_s20 + $0x7f4] ss:$8 sps:$4 sm:$0xff]   ;;  %v15170_v53 = vld [vmem:[%s16276_s20 + $0xbe0] ss:$8 sps:$4 sm:$0xff]  }
 0x117   : > { %v698_v61 = vld [vmem:[%s16327_s24 + $0xd8] sm:$0x11] }
 0x118   : > { %8300 = vmatpush1.bf16.msra.mxu0 %v15167_v16  ;;  %v2422_v22 = vrot.slane %v2421_v32, 4  ;;  %v314_v32 = vld [vmem:[%s16327_s24 + $0x98] sm:$0xff]  ;;  %v870_v16 = vshll.u32 %v690_v44, 16  ;;  %v16980_v44 = vld [vmem:[%s16327_s24 + $0x128] sm:$0xff] }
 0x119   : > { %8301 = vmatprep.subr.bf16.mxu0 %v15175_v20  ;;  %5024 = vmatpush1.bf16.msra.mxu1 %v15164_v17  ;;  %v2539_v20 = vsel %vm16353_vm2, %v2534_v52, %v2538_v14  ;;  %v976_v17 = vshll.u32 %v314_v32, 16  ;;  %v863_v14 = vrot.slane %v861_v6, 4  ;;  %v982_v52 = vshll.u32 %v698_v61, 16 }
 0x11a   : > { %v2427_v21 = vsel %vm16353_vm2, %v2422_v22, %v2426_v23  ;;  %5025 = vmatprep.subr.bf16.mxu1 %v15172_v43  ;;  %v973_v22 = vshrl.u32 %v314_v32, 16  ;;  %v15176_v43 = vld [vmem:[%s16276_s20 + $0xbf0] ss:$8 sps:$4 sm:$0xff]   ;;  %v872_v61 = vrot.slane %v870_v16, 5 }
 0x11b   : > { %8263 = vmatmul.mubr.bf16.gmra.mrb[28].mxu0 %v13226_v54  ;;  %v12835_v29 = vcombine.high %v2427_v21, %v2539_v20  ;;  %v12834_v23 = vcombine.low %v2427_v21, %v2539_v20  ;;  %v15178_v54 = vld [vmem:[%s16276_s20 + $0xbf4] ss:$8 sps:$4 sm:$0xff]   ;;  %v978_v32 = vrot.slane %v976_v17, 5  ;;  %v984_v21 = vrot.slane %v982_v52, 5  ;;  %v15185_v17 = vld [vmem:[%s16276_s20 + $0x1000] ss:$8 sps:$4 sm:$0xff]  }
 0x11c   : > { %8302 = vmatpush1.bf16.msra.mxu0 %v15173_v62  ;;  %v866_v62 = vrot.slane %v864_v15, 5 }
 0x11d   : > { %8303 = vmatprep.subr.bf16.mxu0 %v15181_v63  ;;  %4986 = vmatprep.mubr.bf16.mxu1 %v12835_v29  ;;  %v975_v63 = vrot.slane %v973_v22, 4  ;;  %v13117_v22 = vcombine.high %v310_v60, %v318_v13  ;;  %v15191_v13 = vld [vmem:[%s16276_s20 + $0x1010] ss:$8 sps:$4 sm:$0xff]   ;;  %v15193_v60 = vld [vmem:[%s16276_s20 + $0x1014] ss:$8 sps:$4 sm:$0xff]  }
 0x11e   : > { %4987 = vmatmul.mubr.bf16.gmra.mrb[28].mxu1 %v12834_v23  ;;  %v867_v20 = vor.u32 %v866_v62, %v863_v14  ;;  %v16995_v14 = vld [vmem:[%s16327_s24 + $0x228] sm:$0xff] }
 0x11f   : > { %5026 = vmatpush1.bf16.msra.mxu1 %v15170_v53  ;;  %v979_v29 = vor.u32 %v978_v32, %v975_v63  ;;  %v15184_v53 = vld [vmem:[%s16276_s20 + $0xc04] ss:$8 sps:$4 sm:$0xff]   ;;  %8305 = vmatprep.mubr.bf16.mxu0 %v13117_v22  ;;  %v322_v32 = vld [vmem:[%s16327_s24 + $0x118] sm:$0xff] }
 0x120   : > { %8304 = vmatpush1.bf16.msra.mxu0 %v15179_v0  ;;  %5027 = vmatprep.subr.bf16.mxu1 %v15178_v54  ;;  %v868_v16 = vrot.slane %v867_v20, 4  ;;  %v15182_v54 = vld [vmem:[%s16276_s20 + $0xc00] ss:$8 sps:$4 sm:$0xff]   ;;  %v330_v20 = vld [vmem:[%s16327_s24 + $0x198] sm:$0xff]  ;;  %v1085_v62 = vshrl.u32 %v322_v32, 16  ;;  %v1088_v52 = vshll.u32 %v322_v32, 16 }
 0x121   : > { %v980_v23 = vrot.slane %v979_v29, 4  ;;  %11333 = vmatprep.subr.bf16.mxu0 %v15187_v30  ;;  %v706_v29 = vld [vmem:[%s16327_s24 + $0x158] sm:$0x11]  ;;  %v1197_v15 = vshrl.u32 %v330_v20, 16  ;;  %v1200_v6 = vshll.u32 %v330_v20, 16 }
 0x122   : > { %v873_v63 = vsel %vm16353_vm2, %v868_v16, %v872_v61  ;;  %v714_v22 = vld [vmem:[%s16327_s24 + $0x1d8] sm:$0x11]  ;;  %v1094_v0 = vshll.u32 %v706_v29, 16 }
 0x123   : > { %8306 = vmatmul.mubr.bf16.vlgmr.msra.gmra.mrb[0].mxu0 %v13116_v24  ;;  %5028 = vmatpush1.bf16.msra.mxu1 %v15176_v43  ;;  %v985_v30 = vsel %vm16353_vm2, %v980_v23, %v984_v21  ;;  %v15190_v24 = vld [vmem:[%s16276_s20 + $0xc14] ss:$8 sps:$4 sm:$0xff]   ;;  %v17010_v43 = vld [vmem:[%s16327_s24 + $0x2a8] sm:$0xff]  ;;  %v1090_v23 = vrot.slane %v1088_v52, 5  ;;  %v1206_v38 = vshll.u32 %v714_v22, 16  ;;  %v1202_v20 = vrot.slane %v1200_v6, 5 }
 0x124   : > { %11334 = vmatpush1.bf16.msra.mxu0 %v15185_v17  ;;  %v12724_v61 = vcombine.low %v873_v63, %v985_v30  ;;  %v12725_v16 = vcombine.high %v873_v63, %v985_v30  ;;  %5110 = vmatprep.subr.bf16.mxu1 %v15184_v53  ;;  %v1087_v17 = vrot.slane %v1085_v62, 4  ;;  %v334_v32 = vld [vmem:[%s16327_s24 + $0x1b8] sm:$0xff]  ;;  %v1199_v63 = vrot.slane %v1197_v15, 4  ;;  %v17023_v62 = vld [vmem:[%s16327_s24 + $0x3a8] sm:$0xff] }
 0x125   : > { %11335 = vmatprep.subr.bf16.mxu0 %v15193_v60  ;;  %v15188_v60 = vld [vmem:[%s16276_s20 + $0xc10] ss:$8 sps:$4 sm:$0xff]   ;;  %v1096_v29 = vrot.slane %v1094_v0, 5  ;;  %v1208_v53 = vrot.slane %v1206_v38, 5  ;;  %v13133_v21 = vcombine.high %v326_v37, %v334_v32  ;;  %v13132_v6 = vcombine.low %v326_v37, %v334_v32  ;;  %v15197_v15 = vld [vmem:[%s16276_s20 + $0x1020] ss:$8 sps:$4 sm:$0xff]  }
 0x126   : > { %5029 = vmatprep.mubr.bf16.mxu1 %v12725_v16  ;;  %v1091_v22 = vor.u32 %v1090_v23, %v1087_v17  ;;  %v1203_v16 = vor.u32 %v1202_v20, %v1199_v63  ;;  %v15203_v37 = vld [vmem:[%s16276_s20 + $0x1030] ss:$8 sps:$4 sm:$0xff]   ;;  %v15205_v38 = vld [vmem:[%s16276_s20 + $0x1034] ss:$8 sps:$4 sm:$0xff]   ;;  %v17038_v23 = vld [vmem:[%s16327_s24 + $0x5a8] sm:$0xff] }
 0x127   : > { %5030 = vmatmul.mubr.bf16.vlgmr.msra.gmra.mrb[0].mxu1 %v12724_v61  ;;  %8315 = vmatprep.mubr.bf16.mxu0 %v13133_v21  ;;  %v338_v20 = vld [vmem:[%s16327_s24 + $0x218] sm:$0xff]  ;;  %v15211_v52 = vld [vmem:[%s16276_s20 + $0x1044] ss:$8 sps:$4 sm:$0xff]  }
 0x128   : > { %11336 = vmatpush1.bf16.msra.mxu0 %v15191_v13  ;;  %5111 = vmatpush1.bf16.msra.mxu1 %v15182_v54  ;;  %v1092_v0 = vrot.slane %v1091_v22, 4  ;;  %v15196_v54 = vld [vmem:[%s16276_s20 + $0xc24] ss:$8 sps:$4 sm:$0xff]   ;;  %v1204_v61 = vrot.slane %v1203_v16, 4  ;;  %v346_v22 = vld [vmem:[%s16327_s24 + $0x298] sm:$0xff]  ;;  %v1309_v17 = vshrl.u32 %v338_v20, 16 }
 0x129   : > { %5112 = vmatprep.subr.bf16.mxu1 %v15190_v24  ;;  %11337 = vmatprep.subr.bf16.mxu0 %v15199_v5  ;;  %v15194_v24 = vld [vmem:[%s16276_s20 + $0xc20] ss:$8 sps:$4 sm:$0xff]   ;;  %v722_v16 = vld [vmem:[%s16327_s24 + $0x258] sm:$0x11]  ;;  %v1312_v32 = vshll.u32 %v338_v20, 16  ;;  %v13148_v20 = vcombine.low %v342_v49, %v350_v3 }
 0x12a   : > { %v1097_v63 = vsel %vm16353_vm2, %v1092_v0, %v1096_v29  ;;  %v1209_v5 = vsel %vm16353_vm2, %v1204_v61, %v1208_v53  ;;  %v730_v21 = vld [vmem:[%s16327_s24 + $0x2d8] sm:$0x11]  ;;  %v1318_v13 = vshll.u32 %v722_v16, 16  ;;  %v1421_v0 = vshrl.u32 %v346_v22, 16  ;;  %v17061_v16 = vld [vmem:[%s16327_s24 + $0x6a8] sm:$0xff] }
 0x12b   : > { %8316 = vmatmul.mubr.bf16.gmra.mrb[4].mxu0 %v13132_v6  ;;  %v12741_v30 = vcombine.high %v1097_v63, %v1209_v5  ;;  %v12740_v29 = vcombine.low %v1097_v63, %v1209_v5  ;;  %v15202_v6 = vld [vmem:[%s16276_s20 + $0xc34] ss:$8 sps:$4 sm:$0xff]   ;;  %v1311_v53 = vrot.slane %v1309_v17, 4  ;;  %v1430_v61 = vshll.u32 %v730_v21, 16 }
 0x12c   : > { %5113 = vmatpush1.bf16.msra.mxu1 %v15188_v60  ;;  %11338 = vmatpush1.bf16.msra.mxu0 %v15197_v15  ;;  %v1424_v60 = vshll.u32 %v346_v22, 16  ;;  %v1314_v15 = vrot.slane %v1312_v32, 5  ;;  %v1320_v21 = vrot.slane %v1318_v13, 5 }
 0x12d   : > { %5114 = vmatprep.subr.bf16.mxu1 %v15196_v54  ;;  %11339 = vmatprep.subr.bf16.mxu0 %v15205_v38  ;;  %v15200_v54 = vld [vmem:[%s16276_s20 + $0xc30] ss:$8 sps:$4 sm:$0xff]   ;;  %v1423_v38 = vrot.slane %v1421_v0, 4  ;;  %v1432_v63 = vrot.slane %v1430_v61, 5  ;;  %v13149_v0 = vcombine.high %v342_v49, %v350_v3  ;;  %v15217_v3 = vld [vmem:[%s16276_s20 + $0x1054] ss:$8 sps:$4 sm:$0xff]  }
 0x12e   : > { %5039 = vmatprep.mubr.bf16.mxu1 %v12741_v30  ;;  %v1426_v22 = vrot.slane %v1424_v60, 5  ;;  %v1315_v5 = vor.u32 %v1314_v15, %v1311_v53  ;;  %v15209_v60 = vld [vmem:[%s16276_s20 + $0x1040] ss:$8 sps:$4 sm:$0xff]   ;;  %v15215_v49 = vld [vmem:[%s16276_s20 + $0x1050] ss:$8 sps:$4 sm:$0xff]  }
 0x12f   : > { %5040 = vmatmul.mubr.bf16.gmra.mrb[4].mxu1 %v12740_v29  ;;  %8325 = vmatprep.mubr.bf16.mxu0 %v13149_v0  ;;  %v17076_v53 = vld [vmem:[%s16327_s24 + $0x7a8] sm:$0xff]  ;;  %v746_v0 = vld [vmem:[%s16327_s24 + $0x3d8] sm:$0x11] }
 0x130   : > { %11340 = vmatpush1.bf16.msra.mxu0 %v15203_v37  ;;  %5115 = vmatpush1.bf16.msra.mxu1 %v15194_v24  ;;  %v1427_v30 = vor.u32 %v1426_v22, %v1423_v38  ;;  %v1316_v13 = vrot.slane %v1315_v5, 4  ;;  %v15208_v24 = vld [vmem:[%s16276_s20 + $0xc44] ss:$8 sps:$4 sm:$0xff]   ;;  %v354_v22 = vld [vmem:[%s16327_s24 + $0x318] sm:$0xff]  ;;  %v1654_v42 = vshll.u32 %v746_v0, 16 }
 0x131   : > { %5116 = vmatprep.subr.bf16.mxu1 %v15202_v6  ;;  %11341 = vmatprep.subr.bf16.mxu0 %v15211_v52  ;;  %v15206_v6 = vld [vmem:[%s16276_s20 + $0xc40] ss:$8 sps:$4 sm:$0xff]   ;;  %v362_v5 = vld [vmem:[%s16327_s24 + $0x398] sm:$0xff]  ;;  %v1533_v15 = vshrl.u32 %v354_v22, 16  ;;  %v1536_v61 = vshll.u32 %v354_v22, 16 }
 0x132   : > { %v1428_v29 = vrot.slane %v1427_v30, 4  ;;  %v1321_v38 = vsel %vm16353_vm2, %v1316_v13, %v1320_v21  ;;  %v738_v30 = vld [vmem:[%s16327_s24 + $0x358] sm:$0x11]  ;;  %v1645_v32 = vshrl.u32 %v362_v5, 16  ;;  %v1648_v17 = vshll.u32 %v362_v5, 16 }
 0x133   : > { %8326 = vmatmul.mubr.bf16.gmra.mrb[8].mxu0 %v13148_v20  ;;  %v1542_v37 = vshll.u32 %v738_v30, 16  ;;  %v15214_v20 = vld [vmem:[%s16276_s20 + $0xc54] ss:$8 sps:$4 sm:$0xff]  }
 0x134   : > { %5117 = vmatpush1.bf16.msra.mxu1 %v15200_v54  ;;  %v1433_v52 = vsel %vm16353_vm2, %v1428_v29, %v1432_v63  ;;  %11342 = vmatpush1.bf16.msra.mxu0 %v15209_v60  ;;  %v17091_v54 = vld [vmem:[%s16327_s24 + $0x828] sm:$0xff]  ;;  %v1535_v60 = vrot.slane %v1533_v15, 4  ;;  %v1538_v29 = vrot.slane %v1536_v61, 5  ;;  %v366_v22 = vld [vmem:[%s16327_s24 + $0x3b8] sm:$0xff]  ;;  %v1650_v5 = vrot.slane %v1648_v17, 5  ;;  %v17104_v15 = vld [vmem:[%s16327_s24 + $0x30] sm:$0xff] }
 0x135   : > { %v12757_v21 = vcombine.high %v1321_v38, %v1433_v52  ;;  %v12756_v13 = vcombine.low %v1321_v38, %v1433_v52  ;;  %5118 = vmatprep.subr.bf16.mxu1 %v15208_v24  ;;  %11343 = vmatprep.subr.bf16.mxu0 %v15217_v3  ;;  %v15212_v3 = vld [vmem:[%s16276_s20 + $0xc50] ss:$8 sps:$4 sm:$0xff]   ;;  %v1647_v38 = vrot.slane %v1645_v32, 4  ;;  %19588 = vst [vmem:[#allocation3_spill] sm:$0xff] %v17104_v15  ;;  %v1544_v30 = vrot.slane %v1542_v37, 5 }
 0x136   : > { %v1539_v0 = vor.u32 %v1538_v29, %v1535_v60  ;;  %v1656_v24 = vrot.slane %v1654_v42, 5  ;;  %v13165_v63 = vcombine.high %v358_v40, %v366_v22  ;;  %v13164_v17 = vcombine.low %v358_v40, %v366_v22  ;;  %v15221_v32 = vld [vmem:[%s16276_s20 + $0x1060] ss:$8 sps:$4 sm:$0xff]   ;;  %v15227_v40 = vld [vmem:[%s16276_s20 + $0x1070] ss:$8 sps:$4 sm:$0xff]  }
 0x137   : > { %5049 = vmatprep.mubr.bf16.mxu1 %v12757_v21  ;;  %v1651_v21 = vor.u32 %v1650_v5, %v1647_v38  ;;  %v15229_v42 = vld [vmem:[%s16276_s20 + $0x1074] ss:$8 sps:$4 sm:$0xff]   ;;  %v15235_v61 = vld [vmem:[%s16276_s20 + $0x1084] ss:$8 sps:$4 sm:$0xff]  }
 0x138   : > { %5050 = vmatmul.mubr.bf16.gmra.mrb[8].mxu1 %v12756_v13  ;;  %11344 = vmatpush1.bf16.msra.mxu0 %v15215_v49  ;;  %v1540_v37 = vrot.slane %v1539_v0, 4  ;;  %v17119_v29 = vld [vmem:[%s16327_s24 + $0x130] sm:$0xff]  ;;  %v370_v5 = vld [vmem:[%s16327_s24 + $0x518] sm:$0xff] }
 0x139   : > { %5119 = vmatpush1.bf16.msra.mxu1 %v15206_v6  ;;  %v15220_v6 = vld [vmem:[%s16276_s20 + $0xc64] ss:$8 sps:$4 sm:$0xff]   ;;  %v1652_v13 = vrot.slane %v1651_v21, 4  ;;  %8335 = vmatprep.mubr.bf16.mxu0 %v13165_v63  ;;  %19590 = vst [vmem:[#allocation5_spill] sm:$0xff] %v17119_v29  ;;  %v378_v0 = vld [vmem:[%s16327_s24 + $0x598] sm:$0xff]  ;;  %v1757_v60 = vshrl.u32 %v370_v5, 16 }
 0x13a   : > { %5120 = vmatprep.subr.bf16.mxu1 %v15214_v20  ;;  %11345 = vmatprep.subr.bf16.mxu0 %v15223_v34  ;;  %v1545_v38 = vsel %vm16353_vm2, %v1540_v37, %v1544_v30  ;;  %v15218_v20 = vld [vmem:[%s16276_s20 + $0xc60] ss:$8 sps:$4 sm:$0xff]   ;;  %v754_v21 = vld [vmem:[%s16327_s24 + $0x558] sm:$0x11]  ;;  %v1760_v22 = vshll.u32 %v370_v5, 16  ;;  %v1869_v37 = vshrl.u32 %v378_v0, 16 }
 0x13b   : > { %8336 = vmatmul.mubr.bf16.gmra.mrb[12].mxu0 %v13164_v17  ;;  %v1657_v34 = vsel %vm16353_vm2, %v1652_v13, %v1656_v24  ;;  %v762_v63 = vld [vmem:[%s16327_s24 + $0x5d8] sm:$0x11]  ;;  %v1766_v49 = vshll.u32 %v754_v21, 16  ;;  %v1759_v24 = vrot.slane %v1757_v60, 4  ;;  %v15233_v5 = vld [vmem:[%s16276_s20 + $0x1080] ss:$8 sps:$4 sm:$0xff]  }
 0x13c   : > { %11346 = vmatpush1.bf16.msra.mxu0 %v15221_v32  ;;  %v12773_v52 = vcombine.high %v1545_v38, %v1657_v34  ;;  %v12772_v30 = vcombine.low %v1545_v38, %v1657_v34  ;;  %v15226_v17 = vld [vmem:[%s16276_s20 + $0xc74] ss:$8 sps:$4 sm:$0xff]   ;;  %v1762_v32 = vrot.slane %v1760_v22, 5  ;;  %v1878_v13 = vshll.u32 %v762_v63, 16 }
 0x13d   : > { %5121 = vmatpush1.bf16.msra.mxu1 %v15212_v3  ;;  %11347 = vmatprep.subr.bf16.mxu0 %v15229_v42  ;;  %v1872_v3 = vshll.u32 %v378_v0, 16  ;;  %v1871_v42 = vrot.slane %v1869_v37, 4  ;;  %v17142_v0 = vld [vmem:[%s16327_s24 + $0x230] sm:$0xff]  ;;  %v1768_v34 = vrot.slane %v1766_v49, 5  ;;  %v881_v63 = vor.u32 %v16821_v56, %v16819_v55  ;;  %v15232_v56 = vld [vmem:[%s16276_s20 + $0xc84] ss:$8 sps:$4 sm:$0xff]  }
 0x13e   : > { %5122 = vmatprep.subr.bf16.mxu1 %v15220_v6  ;;  %5059 = vmatprep.mubr.bf16.mxu1 %v12773_v52  ;;  %v15224_v6 = vld [vmem:[%s16276_s20 + $0xc70] ss:$8 sps:$4 sm:$0xff]   ;;  %19592 = vst [vmem:[#allocation7_spill] sm:$0xff] %v17142_v0  ;;  %v1763_v22 = vor.u32 %v1762_v32, %v1759_v24  ;;  %v1880_v38 = vrot.slane %v1878_v13, 5  ;;  %v13181_v37 = vcombine.high %v374_v10, %v382_v9  ;;  %v15230_v13 = vld [vmem:[%s16276_s20 + $0xc80] ss:$8 sps:$4 sm:$0xff]  }
 0x13f   : > { %v1874_v21 = vrot.slane %v1872_v3, 5  ;;  %v13180_v3 = vcombine.low %v374_v10, %v382_v9  ;;  %v15239_v9 = vld [vmem:[%s16276_s20 + $0x1090] ss:$8 sps:$4 sm:$0xff]   ;;  %v15241_v10 = vld [vmem:[%s16276_s20 + $0x1094] ss:$8 sps:$4 sm:$0xff]  }
 0x140   : > { %5060 = vmatmul.mubr.bf16.gmra.mrb[12].mxu1 %v12772_v30  ;;  %11348 = vmatpush1.bf16.msra.mxu0 %v15227_v40  ;;  %v17151_v40 = vld [vmem:[%s16327_s24 + $0x2b0] sm:$0xff]  ;;  %v1764_v55 = vrot.slane %v1763_v22, 4  ;;  %v993_v30 = vor.u32 %v16827_v2, %v16825_v1  ;;  %v17166_v22 = vrot.slane %v881_v63, 4  ;;  %v778_v1 = vld [vmem:[%s16327_s24 + $0x6d8] sm:$0x11] }
 0x141   : > { %5123 = vmatpush1.bf16.msra.mxu1 %v15218_v20  ;;  %v1875_v52 = vor.u32 %v1874_v21, %v1871_v42  ;;  %19593 = vst [vmem:[#allocation8_spill] sm:$0xff] %v17151_v40  ;;  %8345 = vmatprep.mubr.bf16.mxu0 %v13181_v37  ;;  %v394_v42 = vld [vmem:[%s16327_s24 + $0x698] sm:$0xff]  ;;  %v2102_v60 = vshll.u32 %v778_v1, 16  ;;  %v17177_v40 = vld [vmem:[%s16327_s24 + $0x330] sm:$0xff] }
 0x142   : > { %5124 = vmatprep.subr.bf16.mxu1 %v15226_v17  ;;  %11349 = vmatprep.subr.bf16.mxu0 %v15235_v61  ;;  %v1769_v32 = vsel %vm16353_vm2, %v1764_v55, %v1768_v34  ;;  %v386_v17 = vld [vmem:[%s16327_s24 + $0x618] sm:$0xff]  ;;  %v2093_v63 = vshrl.u32 %v394_v42, 16  ;;  %v2096_v24 = vshll.u32 %v394_v42, 16  ;;  %19594 = vst [vmem:[#allocation9_spill] sm:$0xff] %v17177_v40 }
 0x143   : > { %v1876_v20 = vrot.slane %v1875_v52, 4  ;;  %8346 = vmatmul.mubr.bf16.gmra.mrb[16].mxu0 %v13180_v3  ;;  %v770_v21 = vld [vmem:[%s16327_s24 + $0x658] sm:$0x11]  ;;  %v1981_v2 = vshrl.u32 %v386_v17, 16  ;;  %v1984_v52 = vshll.u32 %v386_v17, 16 }
 0x144   : > { %11350 = vmatpush1.bf16.msra.mxu0 %v15233_v5  ;;  %v1990_v34 = vshll.u32 %v770_v21, 16  ;;  %v15238_v3 = vld [vmem:[%s16276_s20 + $0xc94] ss:$8 sps:$4 sm:$0xff]   ;;  %v17174_v5 = vrot.slane %v993_v30, 4  ;;  %v19595_v30 = vshrl.u32 %v16833_v8, 16 }
 0x145   : > { %5125 = vmatpush1.bf16.msra.mxu1 %v15224_v6  ;;  %v1881_v61 = vsel %vm16353_vm2, %v1876_v20, %v1880_v38  ;;  %11351 = vmatprep.subr.bf16.mxu0 %v15241_v10  ;;  %v1983_v6 = vrot.slane %v1981_v2, 4  ;;  %v1986_v49 = vrot.slane %v1984_v52, 5  ;;  %v390_v38 = vld [vmem:[%s16327_s24 + $0x638] sm:$0xff]  ;;  %v2095_v10 = vrot.slane %v2093_v63, 4 }
 0x146   : > { %v12789_v37 = vcombine.high %v1769_v32, %v1881_v61  ;;  %v12788_v55 = vcombine.low %v1769_v32, %v1881_v61  ;;  %5126 = vmatprep.subr.bf16.mxu1 %v15232_v56  ;;  %v398_v20 = vld [vmem:[%s16327_s24 + $0x6b8] sm:$0xff]  ;;  %v2098_v32 = vrot.slane %v2096_v24, 5  ;;  %v1992_v61 = vrot.slane %v1990_v34, 5  ;;  %v15244_v34 = vld [vmem:[%s16276_s20 + $0xca4] ss:$8 sps:$4 sm:$0xff]  }
 0x147   : > { %v15236_v56 = vld [vmem:[%s16276_s20 + $0xc90] ss:$8 sps:$4 sm:$0xff]   ;;  %v1987_v42 = vor.u32 %v1986_v49, %v1983_v6  ;;  %v17184_v1 = vrot.slane %v19595_v30, 4  ;;  %v19596_v2 = vshll.u32 %v16833_v8, 16  ;;  %v2104_v63 = vrot.slane %v2102_v60, 5 }
 0x148   : > { %5069 = vmatprep.mubr.bf16.mxu1 %v12789_v37  ;;  %11352 = vmatpush1.bf16.msra.mxu0 %v15239_v9  ;;  %v2099_v37 = vor.u32 %v2098_v32, %v2095_v10  ;;  %v13197_v24 = vcombine.high %v390_v38, %v398_v20  ;;  %v13196_v21 = vcombine.low %v390_v38, %v398_v20  ;;  %v15247_v49 = vld [vmem:[%s16276_s20 + $0x10a4] ss:$8 sps:$4 sm:$0xff]   ;;  %v19597_v8 = vshrl.u32 %v16848_v27, 16  ;;  %v15251_v60 = vld [vmem:[%s16276_s20 + $0x10b0] ss:$8 sps:$4 sm:$0xff]  }
 0x149   : > { %5070 = vmatmul.mubr.bf16.gmra.mrb[16].mxu1 %v12788_v55  ;;  %v17188_v52 = vrot.slane %v19596_v2, 5  ;;  %v15245_v55 = vld [vmem:[%s16276_s20 + $0x10a0] ss:$8 sps:$4 sm:$0xff]   ;;  %v1988_v9 = vrot.slane %v1987_v42, 4  ;;  %11353 = vmatprep.subr.bf16.mxu0 %v15247_v49  ;;  %v15253_v38 = vld [vmem:[%s16276_s20 + $0x10b4] ss:$8 sps:$4 sm:$0xff]  }
 0x14a   : > { %5127 = vmatpush1.bf16.msra.mxu1 %v15230_v13  ;;  %v17195_v6 = vrot.slane %v19597_v8, 4  ;;  %v19598_v13 = vshll.u32 %v16848_v27, 16  ;;  %v2100_v32 = vrot.slane %v2099_v37, 4  ;;  %8355 = vmatprep.mubr.bf16.mxu0 %v13197_v24  ;;  %v17202_v20 = vld [vmem:[%s16327_s24 + $0x3b0] sm:$0xff]  ;;  %v15242_v2 = vld [vmem:[%s16276_s20 + $0xca0] ss:$8 sps:$4 sm:$0xff]  }
 0x14b   : > { %5128 = vmatprep.subr.bf16.mxu1 %v15238_v3  ;;  %19599 = vst [vmem:[#allocation10_spill] sm:$0xff] %v17202_v20  ;;  %v1993_v30 = vsel %vm16353_vm2, %v1988_v9, %v1992_v61  ;;  %8356 = vmatmul.mubr.bf16.gmra.mrb[20].mxu0 %v13196_v21  ;;  %v402_v27 = vld [vmem:[%s16327_s24 + $0x718] sm:$0xff]  ;;  %v1105_v24 = vor.u32 %v17188_v52, %v17184_v1 }
 0x14c   : > { %v1216_v10 = vrot.slane %v19598_v13, 5  ;;  %v410_v8 = vld [vmem:[%s16327_s24 + $0x798] sm:$0xff]  ;;  %v2105_v49 = vsel %vm16353_vm2, %v2100_v32, %v2104_v63  ;;  %11354 = vmatpush1.bf16.msra.mxu0 %v15245_v55  ;;  %v2205_v42 = vshrl.u32 %v402_v27, 16  ;;  %v2208_v3 = vshll.u32 %v402_v27, 16 }
 0x14d   : > { %v786_v37 = vld [vmem:[%s16327_s24 + $0x758] sm:$0x11]  ;;  %v12805_v9 = vcombine.high %v1993_v30, %v2105_v49  ;;  %v12804_v21 = vcombine.low %v1993_v30, %v2105_v49  ;;  %11355 = vmatprep.subr.bf16.mxu0 %v15253_v38  ;;  %v2317_v20 = vshrl.u32 %v410_v8, 16  ;;  %v2320_v1 = vshll.u32 %v410_v8, 16  ;;  %v17227_v8 = vld [vmem:[%s16327_s24 + $0x530] sm:$0xff] }
 0x14e   : > { %5129 = vmatpush1.bf16.msra.mxu1 %v15236_v56  ;;  %v794_v13 = vld [vmem:[%s16327_s24 + $0x7d8] sm:$0x11]  ;;  %v2214_v61 = vshll.u32 %v786_v37, 16  ;;  %v2207_v56 = vrot.slane %v2205_v42, 4  ;;  %v2210_v52 = vrot.slane %v2208_v3, 5  ;;  %v1217_v55 = vor.u32 %v1216_v10, %v17195_v6  ;;  %19602 = vst [vmem:[#allocation11_spill] sm:$0xff] %v17227_v8 }
 0x14f   : > { %5130 = vmatprep.subr.bf16.mxu1 %v15244_v34  ;;  %v15250_v17 = vld [vmem:[%s16276_s20 + $0xcb4] ss:$8 sps:$4 sm:$0xff]   ;;  %v2326_v40 = vshll.u32 %v794_v13, 16  ;;  %5079 = vmatprep.mubr.bf16.mxu1 %v12805_v9  ;;  %v15248_v0 = vld [vmem:[%s16276_s20 + $0xcb0] ss:$8 sps:$4 sm:$0xff]   ;;  %v2319_v27 = vrot.slane %v2317_v20, 4 }
 0x150   : > { %v406_v63 = vld [vmem:[%s16327_s24 + $0x738] sm:$0xff]  ;;  %v2322_v28 = vrot.slane %v2320_v1, 5  ;;  %v19600_v37 = vshrl.u32 %v16855_v35, 16  ;;  %v19601_v34 = vshll.u32 %v16855_v35, 16  ;;  %11356 = vmatpush1.bf16.msra.mxu0 %v15251_v60  ;;  %v2211_v6 = vor.u32 %v2210_v52, %v2207_v56  ;;  %v15257_v9 = vld [vmem:[%s16276_s20 + $0x10c0] ss:$8 sps:$4 sm:$0xff]  }
 0x151   : > { %v414_v32 = vld [vmem:[%s16327_s24 + $0x7b8] sm:$0xff]  ;;  %5080 = vmatmul.mubr.bf16.gmra.mrb[20].mxu1 %v12804_v21  ;;  %v2216_v10 = vrot.slane %v2214_v61, 5  ;;  %v2328_v20 = vrot.slane %v2326_v40, 5  ;;  %v15259_v1 = vld [vmem:[%s16276_s20 + $0x10c4] ss:$8 sps:$4 sm:$0xff]   ;;  %v17234_v61 = vrot.slane %v1105_v24, 4 }
 0x152   : > { %v1325_v30 = vrot.slane %v19600_v37, 4  ;;  %v1328_v38 = vrot.slane %v19601_v34, 5  ;;  %5131 = vmatpush1.bf16.msra.mxu1 %v15242_v2  ;;  %v2323_v35 = vor.u32 %v2322_v28, %v2319_v27  ;;  %v13213_v49 = vcombine.high %v406_v63, %v414_v32  ;;  %v15256_v60 = vld [vmem:[%s16276_s20 + $0xcc4] ss:$8 sps:$4 sm:$0xff]   ;;  %11357 = vmatprep.subr.bf16.mxu0 %v15259_v1  ;;  %v15263_v28 = vld [vmem:[%s16276_s20 + $0x10d0] ss:$8 sps:$4 sm:$0xff]  }
 0x153   : > { %v13212_v13 = vcombine.low %v406_v63, %v414_v32  ;;  %5132 = vmatprep.subr.bf16.mxu1 %v15250_v17  ;;  %v2212_v21 = vrot.slane %v2211_v6, 4  ;;  %v17236_v56 = vrot.slane %v1217_v55, 4  ;;  %v15265_v40 = vld [vmem:[%s16276_s20 + $0x10d4] ss:$8 sps:$4 sm:$0xff]   ;;  %v15254_v17 = vld [vmem:[%s16276_s20 + $0xcc0] ss:$8 sps:$4 sm:$0xff]  }
 0x154   : > { %v2324_v2 = vrot.slane %v2323_v35, 4  ;;  %8365 = vmatprep.mubr.bf16.mxu0 %v13213_v49  ;;  %v1329_v52 = vor.u32 %v1328_v38, %v1325_v30  ;;  %v418_v32 = vld [vmem:[%s16327_s24 + $0x818] sm:$0xff]  ;;  %v17247_v37 = vld [vmem:[%s16327_s24 + $0x140] sm:$0x11]  ;;  %11358 = vmatpush1.bf16.msra.mxu0 %v15257_v9 }
 0x155   : > { %v2217_v63 = vsel %vm16353_vm2, %v2212_v21, %v2216_v10  ;;  %8366 = vmatmul.mubr.bf16.gmra.mrb[24].mxu0 %v13212_v13  ;;  %v426_v27 = vld [vmem:[%s16327_s24 + $0x898] sm:$0xff]  ;;  %v17251_v34 = vld [vmem:[%s16327_s24 + $0x1c0] sm:$0x11]  ;;  %v2429_v10 = vshrl.u32 %v418_v32, 16  ;;  %v2432_v35 = vshll.u32 %v418_v32, 16  ;;  %11359 = vmatprep.subr.bf16.mxu0 %v15265_v40  ;;  %v19604_v40 = vshll.u32 %v16861_v41, 16 }
 0x156   : > { %v802_v24 = vld [vmem:[%s16327_s24 + $0x858] sm:$0x11]  ;;  %5133 = vmatpush1.bf16.msra.mxu1 %v15248_v0  ;;  %v2329_v30 = vsel %vm16353_vm2, %v2324_v2, %v2328_v20  ;;  %v2541_v42 = vshrl.u32 %v426_v27, 16  ;;  %v2544_v3 = vshll.u32 %v426_v27, 16  ;;  %v17260_v2 = vrot.slane %v1329_v52, 4 }
 0x157   : > { %v810_v38 = vld [vmem:[%s16327_s24 + $0x8d8] sm:$0x11]  ;;  %v2438_v49 = vshll.u32 %v802_v24, 16  ;;  %v12821_v13 = vcombine.high %v2217_v63, %v2329_v30  ;;  %v12820_v1 = vcombine.low %v2217_v63, %v2329_v30  ;;  %5134 = vmatprep.subr.bf16.mxu1 %v15256_v60  ;;  %v2431_v6 = vrot.slane %v2429_v10, 4  ;;  %v699_v10 = vld [vmem:[%s16327_s24 + $0xe0] sm:$0x11] }
 0x158   : > { %v15262_v21 = vld [vmem:[%s16276_s20 + $0xcd4] ss:$8 sps:$4 sm:$0xff]   ;;  %v2434_v0 = vrot.slane %v2432_v35, 5  ;;  %v2550_v55 = vshll.u32 %v810_v38, 16  ;;  %v15260_v32 = vld [vmem:[%s16276_s20 + $0xcd0] ss:$8 sps:$4 sm:$0xff]   ;;  %11360 = vmatpush1.bf16.msra.mxu0 %v15263_v28 }
 0x159   : > { %v422_v20 = vld [vmem:[%s16327_s24 + $0x838] sm:$0xff]  ;;  %5089 = vmatprep.mubr.bf16.mxu1 %v12821_v13  ;;  %v2543_v8 = vrot.slane %v2541_v42, 4  ;;  %v2546_v24 = vrot.slane %v2544_v3, 5  ;;  %v19603_v63 = vshrl.u32 %v16861_v41, 16  ;;  %v17269_v27 = vrot.slane %v19604_v40, 5 }
 0x15a   : > { %v430_v9 = vld [vmem:[%s16327_s24 + $0x8b8] sm:$0xff]  ;;  %5090 = vmatmul.mubr.bf16.gmra.mrb[24].mxu1 %v12820_v1  ;;  %v2435_v30 = vor.u32 %v2434_v0, %v2431_v6  ;;  %v2440_v52 = vrot.slane %v2438_v49, 5  ;;  %v17272_v38 = vld [vmem:[%s16327_s24 + $0x240] sm:$0x11]  ;;  %v2552_v41 = vrot.slane %v2550_v55, 5  ;;  %v19608_v55 = vshll.u32 %v16868_v58, 16 }
 0x15b   : > { %v17265_v60 = vrot.slane %v19603_v63, 4  ;;  %v17276_v3 = vld [vmem:[%s16327_s24 + $0x2c0] sm:$0x11]  ;;  %5135 = vmatpush1.bf16.msra.mxu1 %v15254_v17  ;;  %v2547_v35 = vor.u32 %v2546_v24, %v2543_v8  ;;  %v13229_v13 = vcombine.high %v422_v20, %v430_v9  ;;  %v13228_v63 = vcombine.low %v422_v20, %v430_v9  ;;  %v15275_v24 = vld [vmem:[%s16276_s20 + $0x10f0] ss:$8 sps:$4 sm:$0xff]  }
 0x15c   : > { %v15269_v28 = vld [vmem:[%s16276_s20 + $0x10e0] ss:$8 sps:$4 sm:$0xff]   ;;  %v15271_v6 = vld [vmem:[%s16276_s20 + $0x10e4] ss:$8 sps:$4 sm:$0xff]   ;;  %5136 = vmatprep.subr.bf16.mxu1 %v15262_v21  ;;  %v2436_v49 = vrot.slane %v2435_v30, 4  ;;  %v19607_v8 = vshrl.u32 %v16868_v58, 16 }
 0x15d   : > { %v15268_v1 = vld [vmem:[%s16276_s20 + $0xce4] ss:$8 sps:$4 sm:$0xff]   ;;  %v1552_v20 = vrot.slane %v19608_v55, 5  ;;  %v2548_v9 = vrot.slane %v2547_v35, 4  ;;  %8375 = vmatprep.mubr.bf16.mxu0 %v13229_v13  ;;  %11361 = vmatprep.subr.bf16.mxu0 %v15271_v6  ;;  %v15277_v21 = vld [vmem:[%s16276_s20 + $0x10f4] ss:$8 sps:$4 sm:$0xff]  }
 0x15e   : > { %v1549_v17 = vrot.slane %v19607_v8, 4  ;;  %v2441_v40 = vsel %vm16353_vm2, %v2436_v49, %v2440_v52  ;;  %8376 = vmatmul.mubr.bf16.gmra.mrb[28].mxu0 %v13228_v63  ;;  %v691_v30 = vld [vmem:[%s16327_s24 + $0x60] sm:$0x11]  ;;  %v8386_v42 = vld [vmem:[%s16327_s24] sm:$0xee]  ;;  %v1441_v8 = vor.u32 %v17269_v27, %v17265_v60  ;;  %v996_v13 = vshll.u32 %v699_v10, 16 }
 0x15f   : > { %5137 = vmatpush1.bf16.msra.mxu1 %v15260_v32  ;;  %v2553_v58 = vsel %vm16353_vm2, %v2548_v9, %v2552_v41  ;;  %11362 = vmatpush1.bf16.msra.mxu0 %v15269_v28  ;;  %v884_v35 = vshll.u32 %v691_v30, 16  ;;  %v8394_v6 = vld [vmem:[%s16327_s24 + $0x80] sm:$0xee]  ;;  %v13486_v55 = vrot.slane %v8386_v42, 9  ;;  %v15274_v60 = vld [vmem:[%s16276_s20 + $0xcf4] ss:$8 sps:$4 sm:$0xff]  }
 0x160   : > { %v12837_v29 = vcombine.high %v2441_v40, %v2553_v58  ;;  %v12836_v52 = vcombine.low %v2441_v40, %v2553_v58  ;;  %v15266_v63 = vld [vmem:[%s16276_s20 + $0xce0] ss:$8 sps:$4 sm:$0xff]   ;;  %5138 = vmatprep.subr.bf16.mxu1 %v15268_v1  ;;  %11363 = vmatprep.subr.bf16.mxu0 %v15277_v21  ;;  %v13494_v49 = vrot.slane %v8394_v6, 9  ;;  %v1553_v15 = vor.u32 %v1552_v20, %v1549_v17  ;;  %v15283_v1 = vld [vmem:[%s16276_s20 + $0x1104] ss:$8 sps:$4 sm:$0xff]  }
 0x161   : > { %v886_v32 = vrot.slane %v884_v35, 5  ;;  %v998_v27 = vrot.slane %v996_v13, 5  ;;  %v19609_v41 = vrot.slane %v16811_v48, 5  ;;  %v19610_v42 = vrot.slane %v16815_v50, 5  ;;  %v15272_v48 = vld [vmem:[%s16276_s20 + $0xcf0] ss:$8 sps:$4 sm:$0xff]  }
 0x162   : > { %5099 = vmatprep.mubr.bf16.mxu1 %v12837_v29  ;;  %v19611_v9 = vshrl.u32 %v16876_v4, 16  ;;  %v19612_v20 = vshll.u32 %v16876_v4, 16  ;;  %v15280_v30 = vld [vmem:[%s16276_s20 + $0xd04] ss:$8 sps:$4 sm:$0xff]   ;;  %v17327_v58 = vrot.slane %v1441_v8, 4 }
 0x163   : > { %v8776_v10 = vsel %vm17284_vm5, %v13486_v55, %v19609_v41  ;;  %v8808_v28 = vsel %vm17284_vm5, %v13494_v49, %v19610_v42  ;;  %5100 = vmatmul.mubr.bf16.gmra.mrb[28].mxu1 %v12836_v52  ;;  %11364 = vmatpush1.bf16.msra.mxu0 %v15275_v24  ;;  %v887_v50 = vsel %vm16353_vm2, %v17166_v22, %v886_v32  ;;  %v15281_v24 = vld [vmem:[%s16276_s20 + $0x1100] ss:$8 sps:$4 sm:$0xff]   ;;  %v15289_v6 = vld [vmem:[%s16276_s20 + $0x1114] ss:$8 sps:$4 sm:$0xff]   ;;  %v17331_v55 = vrot.slane %v1553_v15, 4 }
 0x164   : > { %v1661_v17 = vrot.slane %v19611_v9, 4  ;;  %v1664_v21 = vrot.slane %v19612_v20, 5  ;;  %v999_v29 = vsel %vm16353_vm2, %v17174_v5, %v998_v27  ;;  %v13614_v40 = vcombine.low %v8776_v10, %v8808_v28  ;;  %5139 = vmatpush1.bf16.msra.mxu1 %v15266_v63  ;;  %11446 = vmatprep.subr.bf16.mxu0 %v15283_v1  ;;  %v707_v22 = vld [vmem:[%s16327_s24 + $0x160] sm:$0x11]  ;;  %v8402_v5 = vld [vmem:[%s16327_s24 + $0x100] sm:$0xee] }
 0x165   : > { %v12726_v4 = vcombine.low %v887_v50, %v999_v29  ;;  %v12727_v35 = vcombine.high %v887_v50, %v999_v29  ;;  %v13615_v13 = vcombine.high %v8776_v10, %v8808_v28  ;;  %5140 = vmatprep.subr.bf16.mxu1 %v15274_v60  ;;  %v715_v52 = vld [vmem:[%s16327_s24 + $0x1e0] sm:$0x11]  ;;  %v1108_v8 = vshll.u32 %v707_v22, 16  ;;  %v8410_v63 = vld [vmem:[%s16327_s24 + $0x180] sm:$0xee] }
 0x166   : > { %v1220_v49 = vshll.u32 %v715_v52, 16  ;;  %v13502_v32 = vrot.slane %v8402_v5, 9  ;;  %v1665_v27 = vor.u32 %v1664_v21, %v1661_v17  ;;  %v15278_v41 = vld [vmem:[%s16276_s20 + $0xd00] ss:$8 sps:$4 sm:$0xff]   ;;  %v13510_v10 = vrot.slane %v8410_v63, 9 }
 0x167   : > { %5142 = vmatprep.mubr.bf16.mxu1 %v12727_v35  ;;  %11365 = vmatprep.mubr.bf16.mxu0 %v13615_v13  ;;  %v19613_v15 = vshrl.u32 %v16893_v33, 16  ;;  %v19614_v42 = vshll.u32 %v16893_v33, 16  ;;  %v15287_v1 = vld [vmem:[%s16276_s20 + $0x1110] ss:$8 sps:$4 sm:$0xff]   ;;  %v1110_v9 = vrot.slane %v1108_v8, 5  ;;  %v19615_v17 = vrot.slane %v17247_v37, 5 }
 0x168   : > { %11366 = vmatmul.mubr.bf16.vlgmr.msra.gmra.mrb[0].mxu0 %v13614_v40  ;;  %5141 = vmatpush1.bf16.msra.mxu1 %v15272_v48  ;;  %v1222_v20 = vrot.slane %v1220_v49, 5  ;;  %v15286_v50 = vld [vmem:[%s16276_s20 + $0xd14] ss:$8 sps:$4 sm:$0xff]   ;;  %v19616_v29 = vrot.slane %v17251_v34, 5  ;;  %v17353_v48 = vld [vmem:[%s16327_s24 + $0x340] sm:$0x11] }
 0x169   : > { %v1773_v60 = vrot.slane %v19613_v15, 4  ;;  %v1776_v28 = vrot.slane %v19614_v42, 5  ;;  %11447 = vmatpush1.bf16.msra.mxu0 %v15281_v24  ;;  %v8840_v21 = vsel %vm17284_vm5, %v13502_v32, %v19615_v17  ;;  %5223 = vmatprep.subr.bf16.mxu1 %v15280_v30  ;;  %v8967_v40 = vrot.slane %v17353_v48, 5  ;;  %v17357_v35 = vld [vmem:[%s16327_s24 + $0x3c0] sm:$0x11] }
 0x16a   : > { %11448 = vmatprep.subr.bf16.mxu0 %v15289_v6  ;;  %v8872_v33 = vsel %vm17284_vm5, %v13510_v10, %v19616_v29  ;;  %v8999_v37 = vrot.slane %v17357_v35, 5  ;;  %v15284_v13 = vld [vmem:[%s16276_s20 + $0xd10] ss:$8 sps:$4 sm:$0xff]   ;;  %v1111_v30 = vsel %vm16353_vm2, %v17234_v61, %v1110_v9  ;;  %v1223_v34 = vsel %vm16353_vm2, %v17236_v56, %v1222_v20  ;;  %v15295_v6 = vld [vmem:[%s16276_s20 + $0x1124] ss:$8 sps:$4 sm:$0xff]  }
 0x16b   : > { %v13631_v24 = vcombine.high %v8840_v21, %v8872_v33  ;;  %v17368_v22 = vrot.slane %v1665_v27, 4  ;;  %5143 = vmatmul.mubr.bf16.vlgmr.msra.gmra.mrb[0].mxu1 %v12726_v4  ;;  %v12743_v52 = vcombine.high %v1111_v30, %v1223_v34  ;;  %v12742_v5 = vcombine.low %v1111_v30, %v1223_v34  ;;  %v15292_v8 = vld [vmem:[%s16276_s20 + $0xd24] ss:$8 sps:$4 sm:$0xff]   ;;  %v15293_v63 = vld [vmem:[%s16276_s20 + $0x1120] ss:$8 sps:$4 sm:$0xff]  }
 0x16c   : > { %v13630_v49 = vcombine.low %v8840_v21, %v8872_v33  ;;  %v15301_v32 = vld [vmem:[%s16276_s20 + $0x1134] ss:$8 sps:$4 sm:$0xff]   ;;  %v19617_v61 = vshrl.u32 %v16899_v45, 16  ;;  %5224 = vmatpush1.bf16.msra.mxu1 %v15278_v41  ;;  %v723_v56 = vld [vmem:[%s16327_s24 + $0x260] sm:$0x11]  ;;  %v1777_v27 = vor.u32 %v1776_v28, %v1773_v60  ;;  %v19618_v29 = vshll.u32 %v16899_v45, 16 }
 0x16d   : > { %11449 = vmatpush1.bf16.msra.mxu0 %v15287_v1  ;;  %v731_v15 = vld [vmem:[%s16327_s24 + $0x2e0] sm:$0x11]  ;;  %v8418_v42 = vld [vmem:[%s16327_s24 + $0x200] sm:$0xee]  ;;  %5225 = vmatprep.subr.bf16.mxu1 %v15286_v50  ;;  %v1332_v4 = vshll.u32 %v723_v56, 16  ;;  %v19619_v1 = vshrl.u32 %v16906_v11, 16 }
 0x16e   : > { %v17375_v10 = vrot.slane %v19617_v61, 4  ;;  %5152 = vmatprep.mubr.bf16.mxu1 %v12743_v52  ;;  %v1444_v9 = vshll.u32 %v731_v15, 16  ;;  %v8426_v20 = vld [vmem:[%s16327_s24 + $0x280] sm:$0xee]  ;;  %v13518_v17 = vrot.slane %v8418_v42, 9  ;;  %11375 = vmatprep.mubr.bf16.mxu0 %v13631_v24  ;;  %v1888_v41 = vrot.slane %v19618_v29, 5 }
 0x16f   : > { %11450 = vmatprep.subr.bf16.mxu0 %v15295_v6  ;;  %v13526_v21 = vrot.slane %v8426_v20, 9  ;;  %v1997_v33 = vrot.slane %v19619_v1, 4  ;;  %v19620_v30 = vshll.u32 %v16906_v11, 16  ;;  %v15290_v28 = vld [vmem:[%s16276_s20 + $0xd20] ss:$8 sps:$4 sm:$0xff]   ;;  %v1334_v50 = vrot.slane %v1332_v4, 5 }
 0x170   : > { %11376 = vmatmul.mubr.bf16.gmra.mrb[4].mxu0 %v13630_v49  ;;  %v1446_v34 = vrot.slane %v1444_v9, 5  ;;  %v19621_v52 = vrot.slane %v17272_v38, 5  ;;  %5226 = vmatpush1.bf16.msra.mxu1 %v15284_v13  ;;  %v15299_v45 = vld [vmem:[%s16276_s20 + $0x1130] ss:$8 sps:$4 sm:$0xff]   ;;  %v19622_v6 = vrot.slane %v17276_v3, 5  ;;  %v17397_v49 = vrot.slane %v1777_v27, 4 }
 0x171   : > { %v2000_v60 = vrot.slane %v19620_v30, 5  ;;  %11451 = vmatpush1.bf16.msra.mxu0 %v15293_v63  ;;  %v19623_v61 = vshrl.u32 %v16914_v18, 16  ;;  %5227 = vmatprep.subr.bf16.mxu1 %v15292_v8  ;;  %v15298_v38 = vld [vmem:[%s16276_s20 + $0xd34] ss:$8 sps:$4 sm:$0xff]   ;;  %v1335_v13 = vsel %vm16353_vm2, %v17260_v2, %v1334_v50  ;;  %v19624_v15 = vshll.u32 %v16914_v18, 16 }
 0x172   : > { %v8904_v24 = vsel %vm17284_vm5, %v13518_v17, %v19621_v52  ;;  %v8936_v11 = vsel %vm17284_vm5, %v13526_v21, %v19622_v6  ;;  %11452 = vmatprep.subr.bf16.mxu0 %v15301_v32  ;;  %v1447_v3 = vsel %vm16353_vm2, %v17327_v58, %v1446_v34  ;;  %v15296_v27 = vld [vmem:[%s16276_s20 + $0xd30] ss:$8 sps:$4 sm:$0xff]   ;;  %v15305_v9 = vld [vmem:[%s16276_s20 + $0x1140] ss:$8 sps:$4 sm:$0xff]   ;;  %v15307_v32 = vld [vmem:[%s16276_s20 + $0x1144] ss:$8 sps:$4 sm:$0xff]   ;;  %v1889_v18 = vor.u32 %v1888_v41, %v17375_v10 }
 0x173   : > { %v2109_v56 = vrot.slane %v19623_v61, 4  ;;  %v13647_v63 = vcombine.high %v8904_v24, %v8936_v11  ;;  %v2112_v42 = vrot.slane %v19624_v15, 5  ;;  %v12759_v4 = vcombine.high %v1335_v13, %v1447_v3  ;;  %v17414_v20 = vld [vmem:[%s16327_s24 + $0x540] sm:$0x11]  ;;  %5153 = vmatmul.mubr.bf16.gmra.mrb[4].mxu1 %v12742_v5  ;;  %v8434_v29 = vld [vmem:[%s16327_s24 + $0x300] sm:$0xee] }
 0x174   : > { %v12758_v8 = vcombine.low %v1335_v13, %v1447_v3  ;;  %v9031_v17 = vrot.slane %v17414_v20, 5  ;;  %v13646_v2 = vcombine.low %v8904_v24, %v8936_v11  ;;  %v739_v58 = vld [vmem:[%s16327_s24 + $0x360] sm:$0x11]  ;;  %v2001_v1 = vor.u32 %v2000_v60, %v1997_v33  ;;  %5228 = vmatpush1.bf16.msra.mxu1 %v15290_v28  ;;  %v8442_v34 = vld [vmem:[%s16327_s24 + $0x380] sm:$0xee] }
 0x175   : > { %11385 = vmatprep.mubr.bf16.mxu0 %v13647_v63  ;;  %v747_v21 = vld [vmem:[%s16327_s24 + $0x3e0] sm:$0x11]  ;;  %11453 = vmatpush1.bf16.msra.mxu0 %v15299_v45  ;;  %v1556_v30 = vshll.u32 %v739_v58, 16  ;;  %v13534_v52 = vrot.slane %v8434_v29, 9  ;;  %v15313_v6 = vld [vmem:[%s16276_s20 + $0x1154] ss:$8 sps:$4 sm:$0xff]   ;;  %v2113_v24 = vor.u32 %v2112_v42, %v2109_v56 }
 0x176   : > { %v1668_v50 = vshll.u32 %v747_v21, 16  ;;  %5229 = vmatprep.subr.bf16.mxu1 %v15298_v38  ;;  %5162 = vmatprep.mubr.bf16.mxu1 %v12759_v4  ;;  %v15304_v5 = vld [vmem:[%s16276_s20 + $0xd44] ss:$8 sps:$4 sm:$0xff]   ;;  %v13542_v61 = vrot.slane %v8442_v34, 9  ;;  %v1890_v28 = vrot.slane %v1889_v18, 4  ;;  %v17433_v45 = vrot.slane %v2001_v1, 4 }
 0x177   : > { %11454 = vmatprep.subr.bf16.mxu0 %v15307_v32  ;;  %v1558_v11 = vrot.slane %v1556_v30, 5  ;;  %v8968_v10 = vsel %vm17284_vm5, %v13534_v52, %v8967_v40  ;;  %v16000_v41 = vld [vmem:[%s16327_s24 + $0x5c0] sm:$0x11]  ;;  %v19625_v56 = vshrl.u32 %v16929_v39, 16  ;;  %v15311_v40 = vld [vmem:[%s16276_s20 + $0x1150] ss:$8 sps:$4 sm:$0xff]  }
 0x178   : > { %v1670_v13 = vrot.slane %v1668_v50, 5  ;;  %v9063_v33 = vrot.slane %v16000_v41, 5  ;;  %11386 = vmatmul.mubr.bf16.gmra.mrb[8].mxu0 %v13646_v2  ;;  %v9000_v60 = vsel %vm17284_vm5, %v13542_v61, %v8999_v37  ;;  %5230 = vmatpush1.bf16.msra.mxu1 %v15296_v27  ;;  %v15302_v48 = vld [vmem:[%s16276_s20 + $0xd40] ss:$8 sps:$4 sm:$0xff]   ;;  %v19626_v63 = vshll.u32 %v16929_v39, 16 }
 0x179   : > { %v2221_v38 = vrot.slane %v19625_v56, 4  ;;  %11455 = vmatpush1.bf16.msra.mxu0 %v15305_v9  ;;  %v17442_v35 = vsel %vm16353_vm2, %v17331_v55, %v1558_v11  ;;  %v13663_v3 = vcombine.high %v8968_v10, %v9000_v60  ;;  %5231 = vmatprep.subr.bf16.mxu1 %v15304_v5  ;;  %v15310_v42 = vld [vmem:[%s16276_s20 + $0xd54] ss:$8 sps:$4 sm:$0xff]   ;;  %v15319_v4 = vld [vmem:[%s16276_s20 + $0x1164] ss:$8 sps:$4 sm:$0xff]   ;;  %v17457_v9 = vrot.slane %v2113_v24, 4 }
 0x17a   : > { %v17447_v37 = vsel %vm16353_vm2, %v17368_v22, %v1670_v13  ;;  %v2224_v15 = vrot.slane %v19626_v63, 5  ;;  %11456 = vmatprep.subr.bf16.mxu0 %v15313_v6  ;;  %v15308_v22 = vld [vmem:[%s16276_s20 + $0xd50] ss:$8 sps:$4 sm:$0xff]   ;;  %v755_v32 = vld [vmem:[%s16327_s24 + $0x560] sm:$0x11]  ;;  %v13662_v58 = vcombine.low %v8968_v10, %v9000_v60  ;;  %v19627_v10 = vshrl.u32 %v16936_v26, 16 }
 0x17b   : > { %v12775_v27 = vcombine.high %v17442_v35, %v17447_v37  ;;  %v12774_v55 = vcombine.low %v17442_v35, %v17447_v37  ;;  %11395 = vmatprep.mubr.bf16.mxu0 %v13663_v3  ;;  %v763_v39 = vld [vmem:[%s16327_s24 + $0x5e0] sm:$0x11]  ;;  %v8450_v2 = vld [vmem:[%s16327_s24 + $0x500] sm:$0xee]  ;;  %5163 = vmatmul.mubr.bf16.gmra.mrb[8].mxu1 %v12758_v8  ;;  %v1780_v21 = vshll.u32 %v755_v32, 16  ;;  %v19628_v60 = vshll.u32 %v16936_v26, 16 }
 0x17c   : > { %v1892_v29 = vshll.u32 %v763_v39, 16  ;;  %v8458_v18 = vld [vmem:[%s16327_s24 + $0x580] sm:$0xee]  ;;  %v13550_v1 = vrot.slane %v8450_v2, 9  ;;  %5232 = vmatpush1.bf16.msra.mxu1 %v15302_v48  ;;  %v2225_v52 = vor.u32 %v2224_v15, %v2221_v38  ;;  %v15325_v5 = vld [vmem:[%s16276_s20 + $0x1174] ss:$8 sps:$4 sm:$0xff]  }
 0x17d   : > { %11457 = vmatpush1.bf16.msra.mxu0 %v15311_v40  ;;  %v15316_v30 = vld [vmem:[%s16276_s20 + $0xd64] ss:$8 sps:$4 sm:$0xff]   ;;  %v15317_v50 = vld [vmem:[%s16276_s20 + $0x1160] ss:$8 sps:$4 sm:$0xff]   ;;  %v13558_v34 = vrot.slane %v8458_v18, 9  ;;  %5233 = vmatprep.subr.bf16.mxu1 %v15310_v42  ;;  %v1782_v6 = vrot.slane %v1780_v21, 5 }
 0x17e   : > { %5172 = vmatprep.mubr.bf16.mxu1 %v12775_v27  ;;  %v1894_v8 = vrot.slane %v1892_v29, 5  ;;  %v9032_v61 = vsel %vm17284_vm5, %v13550_v1, %v9031_v17  ;;  %11458 = vmatprep.subr.bf16.mxu0 %v15319_v4  ;;  %v16001_v11 = vld [vmem:[%s16327_s24 + $0x640] sm:$0x11]  ;;  %v2333_v41 = vrot.slane %v19627_v10, 4  ;;  %v2336_v56 = vrot.slane %v19628_v60, 5 }
 0x17f   : > { %v9064_v24 = vsel %vm17284_vm5, %v13558_v34, %v9063_v33  ;;  %v9095_v13 = vrot.slane %v16001_v11, 5  ;;  %v15314_v38 = vld [vmem:[%s16276_s20 + $0xd60] ss:$8 sps:$4 sm:$0xff]   ;;  %v15322_v20 = vld [vmem:[%s16276_s20 + $0xd74] ss:$8 sps:$4 sm:$0xff]   ;;  %v17483_v17 = vsel %vm16353_vm2, %v17397_v49, %v1782_v6  ;;  %v17496_v63 = vrot.slane %v2225_v52, 4 }
 0x180   : > { %11396 = vmatmul.mubr.bf16.gmra.mrb[12].mxu0 %v13662_v58  ;;  %v17487_v33 = vsel %vm16353_vm2, %v1890_v28, %v1894_v8  ;;  %v13679_v48 = vcombine.high %v9032_v61, %v9064_v24  ;;  %v16002_v40 = vld [vmem:[%s16327_s24 + $0x6c0] sm:$0x11]  ;;  %5234 = vmatpush1.bf16.msra.mxu1 %v15308_v22  ;;  %v15323_v35 = vld [vmem:[%s16276_s20 + $0x1170] ss:$8 sps:$4 sm:$0xff]   ;;  %v8466_v42 = vld [vmem:[%s16327_s24 + $0x600] sm:$0xee]  ;;  %v2337_v2 = vor.u32 %v2336_v56, %v2333_v41 }
 0x181   : > { %v9127_v26 = vrot.slane %v16002_v40, 5  ;;  %11459 = vmatpush1.bf16.msra.mxu0 %v15317_v50  ;;  %v12791_v37 = vcombine.high %v17483_v17, %v17487_v33  ;;  %v12790_v49 = vcombine.low %v17483_v17, %v17487_v33  ;;  %v15331_v3 = vld [vmem:[%s16276_s20 + $0x1184] ss:$8 sps:$4 sm:$0xff]   ;;  %5235 = vmatprep.subr.bf16.mxu1 %v15316_v30  ;;  %v15320_v27 = vld [vmem:[%s16276_s20 + $0xd70] ss:$8 sps:$4 sm:$0xff]   ;;  %v13566_v39 = vrot.slane %v8466_v42, 9 }
 0x182   : > { %11460 = vmatprep.subr.bf16.mxu0 %v15325_v5  ;;  %v771_v28 = vld [vmem:[%s16327_s24 + $0x660] sm:$0x11]  ;;  %11405 = vmatprep.mubr.bf16.mxu0 %v13679_v48  ;;  %v8474_v32 = vld [vmem:[%s16327_s24 + $0x680] sm:$0xee]  ;;  %v13678_v21 = vcombine.low %v9032_v61, %v9064_v24  ;;  %v19629_v50 = vshrl.u32 %v16942_v31, 16  ;;  %v19631_v41 = vshrl.u32 %v16949_v19, 16 }
 0x183   : > { %v779_v15 = vld [vmem:[%s16327_s24 + $0x6e0] sm:$0x11]  ;;  %v2004_v4 = vshll.u32 %v771_v28, 16  ;;  %5173 = vmatmul.mubr.bf16.gmra.mrb[12].mxu1 %v12774_v55  ;;  %v13574_v18 = vrot.slane %v8474_v32, 9  ;;  %v17510_v6 = vsel %vm17284_vm5, %v13566_v39, %v9095_v13  ;;  %v19630_v55 = vshll.u32 %v16942_v31, 16 }
 0x184   : > { %v2116_v22 = vshll.u32 %v779_v15, 16  ;;  %v15328_v58 = vld [vmem:[%s16276_s20 + $0xd84] ss:$8 sps:$4 sm:$0xff]   ;;  %v15329_v29 = vld [vmem:[%s16276_s20 + $0x1180] ss:$8 sps:$4 sm:$0xff]   ;;  %v2445_v34 = vrot.slane %v19629_v50, 4  ;;  %5236 = vmatpush1.bf16.msra.mxu1 %v15314_v38  ;;  %5182 = vmatprep.mubr.bf16.mxu1 %v12791_v37 }
 0x185   : > { %v16003_v1 = vld [vmem:[%s16327_s24 + $0x740] sm:$0x11]  ;;  %11461 = vmatpush1.bf16.msra.mxu0 %v15323_v35  ;;  %v2006_v52 = vrot.slane %v2004_v4, 5  ;;  %v2448_v8 = vrot.slane %v19630_v55, 5  ;;  %5237 = vmatprep.subr.bf16.mxu1 %v15322_v20  ;;  %v15337_v61 = vld [vmem:[%s16276_s20 + $0x1194] ss:$8 sps:$4 sm:$0xff]   ;;  %v9128_v24 = vsel %vm17284_vm5, %v13574_v18, %v9127_v26 }
 0x186   : > { %v9159_v30 = vrot.slane %v16003_v1, 5  ;;  %v2118_v5 = vrot.slane %v2116_v22, 5  ;;  %v16004_v11 = vld [vmem:[%s16327_s24 + $0x7c0] sm:$0x11]  ;;  %v2557_v60 = vrot.slane %v19631_v41, 4  ;;  %11462 = vmatprep.subr.bf16.mxu0 %v15331_v3  ;;  %v13695_v38 = vcombine.high %v17510_v6, %v9128_v24  ;;  %v17556_v50 = vld [vmem:[%s16327_s24 + $0x5b0] sm:$0xff] }
 0x187   : > { %v9191_v10 = vrot.slane %v16004_v11, 5  ;;  %v15326_v13 = vld [vmem:[%s16276_s20 + $0xd80] ss:$8 sps:$4 sm:$0xff]   ;;  %v17524_v31 = vsel %vm16353_vm2, %v17433_v45, %v2006_v52  ;;  %v2338_v20 = vrot.slane %v2337_v2, 4  ;;  %v15334_v48 = vld [vmem:[%s16276_s20 + $0xd94] ss:$8 sps:$4 sm:$0xff]   ;;  %v2449_v15 = vor.u32 %v2448_v8, %v2445_v34 }
 0x188   : > { %v17529_v56 = vsel %vm16353_vm2, %v17457_v9, %v2118_v5  ;;  %11406 = vmatmul.mubr.bf16.gmra.mrb[16].mxu0 %v13678_v21  ;;  %v15335_v40 = vld [vmem:[%s16276_s20 + $0x1190] ss:$8 sps:$4 sm:$0xff]   ;;  %v19632_v35 = vshll.u32 %v16949_v19, 16  ;;  %5238 = vmatpush1.bf16.msra.mxu1 %v15320_v27  ;;  %v787_v9 = vld [vmem:[%s16327_s24 + $0x760] sm:$0x11]  ;;  %v1911_v34 = vshrl.u32 %v17556_v50, 16 }
 0x189   : > { %v12807_v26 = vcombine.high %v17524_v31, %v17529_v56  ;;  %v12806_v45 = vcombine.low %v17524_v31, %v17529_v56  ;;  %11463 = vmatpush1.bf16.msra.mxu0 %v15329_v29  ;;  %v795_v3 = vld [vmem:[%s16327_s24 + $0x7e0] sm:$0x11]  ;;  %v8482_v28 = vld [vmem:[%s16327_s24 + $0x700] sm:$0xee]  ;;  %5239 = vmatprep.subr.bf16.mxu1 %v15328_v58  ;;  %v2228_v42 = vshll.u32 %v787_v9, 16  ;;  %v13694_v58 = vcombine.low %v17510_v6, %v9128_v24 }
 0x18a   : > { %v2560_v37 = vrot.slane %v19632_v35, 5  ;;  %11464 = vmatprep.subr.bf16.mxu0 %v15337_v61  ;;  %v2340_v4 = vshll.u32 %v795_v3, 16  ;;  %v8490_v22 = vld [vmem:[%s16327_s24 + $0x780] sm:$0xee]  ;;  %v13582_v32 = vrot.slane %v8482_v28, 9  ;;  %11415 = vmatprep.mubr.bf16.mxu0 %v13695_v38 }
 0x18b   : > { %v15332_v2 = vld [vmem:[%s16276_s20 + $0xd90] ss:$8 sps:$4 sm:$0xff]   ;;  %v15343_v19 = vld [vmem:[%s16276_s20 + $0x11a4] ss:$8 sps:$4 sm:$0xff]   ;;  %v13590_v21 = vrot.slane %v8490_v22, 9  ;;  %5183 = vmatmul.mubr.bf16.gmra.mrb[16].mxu1 %v12790_v49  ;;  %v2230_v29 = vrot.slane %v2228_v42, 5 }
 0x18c   : > { %v2561_v39 = vor.u32 %v2560_v37, %v2557_v60  ;;  %v15340_v27 = vld [vmem:[%s16276_s20 + $0xda4] ss:$8 sps:$4 sm:$0xff]   ;;  %v2342_v18 = vrot.slane %v2340_v4, 5  ;;  %v17553_v1 = vsel %vm17284_vm5, %v13582_v32, %v9159_v30  ;;  %5240 = vmatpush1.bf16.msra.mxu1 %v15326_v13  ;;  %v15341_v17 = vld [vmem:[%s16276_s20 + $0x11a0] ss:$8 sps:$4 sm:$0xff]   ;;  %v2450_v49 = vrot.slane %v2449_v15, 4  ;;  %5192 = vmatprep.mubr.bf16.mxu1 %v12807_v26 }
 0x18d   : > { %11465 = vmatpush1.bf16.msra.mxu0 %v15335_v40  ;;  %v17562_v33 = vsel %vm17284_vm5, %v13590_v21, %v9191_v10  ;;  %5241 = vmatprep.subr.bf16.mxu1 %v15334_v48  ;;  %v15349_v30 = vld [vmem:[%s16276_s20 + $0x11b4] ss:$8 sps:$4 sm:$0xff]   ;;  %v17568_v52 = vsel %vm16353_vm2, %v17496_v63, %v2230_v29  ;;  %v16006_v55 = vld [vmem:[%s16327_s24 + $0x840] sm:$0x11]  ;;  %v15347_v24 = vld [vmem:[%s16276_s20 + $0x11b0] ss:$8 sps:$4 sm:$0xff]  }
 0x18e   : > { %v17572_v5 = vsel %vm16353_vm2, %v2338_v20, %v2342_v18  ;;  %v2562_v6 = vrot.slane %v2561_v39, 4  ;;  %v9223_v8 = vrot.slane %v16006_v55, 5  ;;  %v15338_v61 = vld [vmem:[%s16276_s20 + $0xda0] ss:$8 sps:$4 sm:$0xff]   ;;  %11466 = vmatprep.subr.bf16.mxu0 %v15343_v19  ;;  %v13711_v63 = vcombine.high %v17553_v1, %v17562_v33  ;;  %v15346_v37 = vld [vmem:[%s16276_s20 + $0xdb4] ss:$8 sps:$4 sm:$0xff]  }
 0x18f   : > { %v12823_v11 = vcombine.high %v17568_v52, %v17572_v5  ;;  %v12822_v10 = vcombine.low %v17568_v52, %v17572_v5  ;;  %v16007_v41 = vld [vmem:[%s16327_s24 + $0x8c0] sm:$0x11]  ;;  %v8498_v20 = vld [vmem:[%s16327_s24 + $0x800] sm:$0xee]  ;;  %v13710_v28 = vcombine.low %v17553_v1, %v17562_v33  ;;  %v19633_v4 = vshrl.u32 %v16957_v7, 16 }
 0x190   : > { %v9255_v60 = vrot.slane %v16007_v41, 5  ;;  %11416 = vmatmul.mubr.bf16.gmra.mrb[20].mxu0 %v13694_v58  ;;  %v803_v13 = vld [vmem:[%s16327_s24 + $0x860] sm:$0x11]  ;;  %5242 = vmatpush1.bf16.msra.mxu1 %v15332_v2  ;;  %v8506_v26 = vld [vmem:[%s16327_s24 + $0x880] sm:$0xee]  ;;  %v13598_v35 = vrot.slane %v8498_v20, 9 }
 0x191   : > { %v811_v38 = vld [vmem:[%s16327_s24 + $0x8e0] sm:$0x11]  ;;  %11467 = vmatpush1.bf16.msra.mxu0 %v15341_v17  ;;  %v2452_v48 = vshll.u32 %v803_v13, 16  ;;  %5243 = vmatprep.subr.bf16.mxu1 %v15340_v27  ;;  %v13606_v3 = vrot.slane %v8506_v26, 9  ;;  %v891_v22 = vrot.slane %v19633_v4, 4  ;;  %v19634_v2 = vshll.u32 %v16957_v7, 16 }
 0x192   : > { %v2564_v40 = vshll.u32 %v811_v38, 16  ;;  %11468 = vmatprep.subr.bf16.mxu0 %v15349_v30  ;;  %v15355_v9 = vld [vmem:[%s16276_s20 + $0x11c4] ss:$8 sps:$4 sm:$0xff]   ;;  %11425 = vmatprep.mubr.bf16.mxu0 %v13711_v63  ;;  %v17599_v32 = vsel %vm17284_vm5, %v13598_v35, %v9223_v8  ;;  %v19635_v21 = vshrl.u32 %v16974_v47, 16  ;;  %v15344_v31 = vld [vmem:[%s16276_s20 + $0xdb0] ss:$8 sps:$4 sm:$0xff]  }
 0x193   : > { %v2454_v15 = vrot.slane %v2452_v48, 5  ;;  %5193 = vmatmul.mubr.bf16.gmra.mrb[20].mxu1 %v12806_v45  ;;  %v17603_v39 = vsel %vm17284_vm5, %v13606_v3, %v9255_v60  ;;  %v894_v19 = vrot.slane %v19634_v2, 5  ;;  %v15353_v56 = vld [vmem:[%s16276_s20 + $0x11c0] ss:$8 sps:$4 sm:$0xff]   ;;  %v19636_v58 = vshll.u32 %v16974_v47, 16 }
 0x194   : > { %v2566_v42 = vrot.slane %v2564_v40, 5  ;;  %v1003_v27 = vrot.slane %v19635_v21, 4  ;;  %5244 = vmatpush1.bf16.msra.mxu1 %v15338_v61  ;;  %5202 = vmatprep.mubr.bf16.mxu1 %v12823_v11  ;;  %v15352_v18 = vld [vmem:[%s16276_s20 + $0xdc4] ss:$8 sps:$4 sm:$0xff]   ;;  %v15361_v1 = vld [vmem:[%s16276_s20 + $0x11d4] ss:$8 sps:$4 sm:$0xff]   ;;  %v13727_v47 = vcombine.high %v17599_v32, %v17603_v39 }
 0x195   : > { %11469 = vmatpush1.bf16.msra.mxu0 %v15347_v24  ;;  %v17613_v45 = vsel %vm16353_vm2, %v2450_v49, %v2454_v15  ;;  %v1006_v29 = vrot.slane %v19636_v58, 5  ;;  %5245 = vmatprep.subr.bf16.mxu1 %v15346_v37  ;;  %v16008_v49 = vld [vmem:[%s16327_s24 + $0x48] sm:$0x11]  ;;  %v15359_v55 = vld [vmem:[%s16276_s20 + $0x11d0] ss:$8 sps:$4 sm:$0xff]   ;;  %v895_v24 = vor.u32 %v894_v19, %v891_v22  ;;  %v1914_v37 = vshll.u32 %v17556_v50, 16 }
 0x196   : > { %v17617_v7 = vsel %vm16353_vm2, %v2562_v6, %v2566_v42  ;;  %v8779_v30 = vrot.slane %v16008_v49, 5  ;;  %v15350_v6 = vld [vmem:[%s16276_s20 + $0xdc0] ss:$8 sps:$4 sm:$0xff]   ;;  %11470 = vmatprep.subr.bf16.mxu0 %v15355_v9  ;;  %v17639_v9 = vld [vmem:[%s16327_s24 + $0x630] sm:$0xff]  ;;  %v13726_v19 = vcombine.low %v17599_v32, %v17603_v39  ;;  %v15367_v21 = vld [vmem:[%s16276_s20 + $0x11e4] ss:$8 sps:$4 sm:$0xff]  }
 0x197   : > { %v12839_v17 = vcombine.high %v17613_v45, %v17617_v7  ;;  %v12838_v33 = vcombine.low %v17613_v45, %v17617_v7  ;;  %v692_v8 = vld [vmem:[%s16327_s24 + $0x68] sm:$0x11]  ;;  %v1007_v11 = vor.u32 %v1006_v29, %v1003_v27  ;;  %v8387_v63 = vld [vmem:[%s16327_s24 + $0x8] sm:$0xee]  ;;  %v896_v40 = vrot.slane %v895_v24, 4  ;;  %v17645_v22 = vld [vmem:[%s16327_s24 + $0x6b0] sm:$0xff] }
 0x198   : > { %v700_v61 = vld [vmem:[%s16327_s24 + $0xe8] sm:$0x11]  ;;  %11426 = vmatmul.mubr.bf16.gmra.mrb[24].mxu0 %v13710_v28  ;;  %v898_v41 = vshll.u32 %v692_v8, 16  ;;  %v8395_v13 = vld [vmem:[%s16327_s24 + $0x88] sm:$0xee]  ;;  %v13487_v38 = vrot.slane %v8387_v63, 9  ;;  %5246 = vmatpush1.bf16.msra.mxu1 %v15344_v31 }
 0x199   : > { %v1010_v60 = vshll.u32 %v700_v61, 16  ;;  %v16009_v20 = vld [vmem:[%s16327_s24 + $0xc8] sm:$0x11]  ;;  %11471 = vmatpush1.bf16.msra.mxu0 %v15353_v56  ;;  %v1008_v26 = vrot.slane %v1007_v11, 4  ;;  %v13495_v35 = vrot.slane %v8395_v13, 9  ;;  %v2023_v3 = vshrl.u32 %v17639_v9, 16  ;;  %5247 = vmatprep.subr.bf16.mxu1 %v15352_v18 }
 0x19a   : > { %v8811_v48 = vrot.slane %v16009_v20, 5  ;;  %v15358_v28 = vld [vmem:[%s16276_s20 + $0xdd4] ss:$8 sps:$4 sm:$0xff]   ;;  %11472 = vmatprep.subr.bf16.mxu0 %v15361_v1  ;;  %v900_v15 = vrot.slane %v898_v41, 5  ;;  %v2026_v4 = vshll.u32 %v17639_v9, 16  ;;  %v2135_v2 = vshrl.u32 %v17645_v22, 16  ;;  %11435 = vmatprep.mubr.bf16.mxu0 %v13727_v47 }
 0x19b   : > { %v1012_v42 = vrot.slane %v1010_v60, 5  ;;  %v19637_v27 = vshrl.u32 %v16980_v44, 16  ;;  %5203 = vmatmul.mubr.bf16.gmra.mrb[24].mxu1 %v12822_v10  ;;  %v15356_v56 = vld [vmem:[%s16276_s20 + $0xdd0] ss:$8 sps:$4 sm:$0xff]   ;;  %v17667_v39 = vsel %vm17284_vm5, %v13487_v38, %v8779_v30  ;;  %v15365_v5 = vld [vmem:[%s16276_s20 + $0x11e0] ss:$8 sps:$4 sm:$0xff]  }
 0x19c   : > { %v17659_v58 = vsel %vm16353_vm2, %v896_v40, %v900_v15  ;;  %v17671_v52 = vsel %vm17284_vm5, %v13495_v35, %v8811_v48  ;;  %5248 = vmatpush1.bf16.msra.mxu1 %v15350_v6  ;;  %v19638_v18 = vshll.u32 %v16980_v44, 16  ;;  %v19639_v49 = vshrl.u32 %v16987_v46, 16  ;;  %5212 = vmatprep.mubr.bf16.mxu1 %v12839_v17  ;;  %v15364_v6 = vld [vmem:[%s16276_s20 + $0xde4] ss:$8 sps:$4 sm:$0xff]   ;;  %v15362_v8 = vld [vmem:[%s16276_s20 + $0xde0] ss:$8 sps:$4 sm:$0xff]  }
 0x19d   : > { %v1115_v31 = vrot.slane %v19637_v27, 4  ;;  %v17663_v32 = vsel %vm16353_vm2, %v1008_v26, %v1012_v42  ;;  %11473 = vmatpush1.bf16.msra.mxu0 %v15359_v55  ;;  %5249 = vmatprep.subr.bf16.mxu1 %v15358_v28  ;;  %v15373_v55 = vld [vmem:[%s16276_s20 + $0x11f4] ss:$8 sps:$4 sm:$0xff]   ;;  %v708_v47 = vld [vmem:[%s16327_s24 + $0x168] sm:$0x11]  ;;  %v13617_v24 = vcombine.high %v17667_v39, %v17671_v52  ;;  %v19640_v41 = vshll.u32 %v16987_v46, 16 }
 0x19e   : > { %v12728_v10 = vcombine.low %v17659_v58, %v17663_v32  ;;  %v12729_v29 = vcombine.high %v17659_v58, %v17663_v32  ;;  %v1118_v1 = vrot.slane %v19638_v18, 5  ;;  %v1227_v30 = vrot.slane %v19639_v49, 4  ;;  %11474 = vmatprep.subr.bf16.mxu0 %v15367_v21  ;;  %v15371_v61 = vld [vmem:[%s16276_s20 + $0x11f0] ss:$8 sps:$4 sm:$0xff]   ;;  %v716_v44 = vld [vmem:[%s16327_s24 + $0x1e8] sm:$0x11] }
 0x19f   : > { %v1122_v63 = vshll.u32 %v708_v47, 16  ;;  %v1230_v60 = vrot.slane %v19640_v41, 5  ;;  %v8403_v13 = vld [vmem:[%s16327_s24 + $0x108] sm:$0xee]  ;;  %v1234_v17 = vshll.u32 %v716_v44, 16  ;;  %v2138_v21 = vshll.u32 %v17645_v22, 16 }
 0x1a0   : > { %v1119_v11 = vor.u32 %v1118_v1, %v1115_v31  ;;  %11436 = vmatmul.mubr.bf16.gmra.mrb[28].mxu0 %v13726_v19  ;;  %v8411_v38 = vld [vmem:[%s16327_s24 + $0x188] sm:$0xee]  ;;  %v13503_v20 = vrot.slane %v8403_v13, 9  ;;  %v16012_v48 = vld [vmem:[%s16327_s24 + $0x148] sm:$0x11]  ;;  %5250 = vmatpush1.bf16.msra.mxu1 %v15356_v56  ;;  %v17698_v19 = vld [vmem:[%s16327_s24 + $0x730] sm:$0xff] }
 0x1a1   : > { %v8843_v40 = vrot.slane %v16012_v48, 5  ;;  %v16013_v26 = vld [vmem:[%s16327_s24 + $0x1c8] sm:$0x11]  ;;  %11475 = vmatpush1.bf16.msra.mxu0 %v15365_v5  ;;  %v1124_v15 = vrot.slane %v1122_v63, 5  ;;  %v1231_v42 = vor.u32 %v1230_v60, %v1227_v30  ;;  %v13511_v46 = vrot.slane %v8411_v38, 9  ;;  %5251 = vmatprep.subr.bf16.mxu1 %v15364_v6 }
 0x1a2   : > { %v8875_v35 = vrot.slane %v16013_v26, 5  ;;  %v1120_v28 = vrot.slane %v1119_v11, 4  ;;  %v2247_v27 = vshrl.u32 %v17698_v19, 16  ;;  %v15370_v31 = vld [vmem:[%s16276_s20 + $0xdf4] ss:$8 sps:$4 sm:$0xff]   ;;  %11476 = vmatprep.subr.bf16.mxu0 %v15373_v55  ;;  %v1236_v18 = vrot.slane %v1234_v17, 5  ;;  %11478 = vmatprep.mubr.bf16.mxu0 %v13617_v24 }
 0x1a3   : > { %v15379_v56 = vld [vmem:[%s16276_s20 + $0x1204] ss:$8 sps:$4 sm:$0xff]   ;;  %v1232_v1 = vrot.slane %v1231_v42, 4  ;;  %v17709_v49 = vsel %vm17284_vm5, %v13503_v20, %v8843_v40  ;;  %5213 = vmatmul.mubr.bf16.gmra.mrb[28].mxu1 %v12838_v33  ;;  %v15368_v6 = vld [vmem:[%s16276_s20 + $0xdf0] ss:$8 sps:$4 sm:$0xff]   ;;  %v13616_v55 = vcombine.low %v17667_v39, %v17671_v52  ;;  %v19641_v24 = vshrl.u32 %v16995_v14, 16 }
 0x1a4   : > { %v17705_v5 = vsel %vm16353_vm2, %v1120_v28, %v1124_v15  ;;  %v17713_v30 = vsel %vm17284_vm5, %v13511_v46, %v8875_v35  ;;  %v15376_v47 = vld [vmem:[%s16276_s20 + $0xe04] ss:$8 sps:$4 sm:$0xff]   ;;  %5252 = vmatpush1.bf16.msra.mxu1 %v15362_v8  ;;  %v15377_v11 = vld [vmem:[%s16276_s20 + $0x1200] ss:$8 sps:$4 sm:$0xff]   ;;  %v19642_v45 = vshll.u32 %v16995_v14, 16  ;;  %v19643_v33 = vshrl.u32 %v17010_v43, 16  ;;  %5255 = vmatprep.mubr.bf16.mxu1 %v12729_v29 }
 0x1a5   : > { %v1339_v44 = vrot.slane %v19641_v24, 4  ;;  %11477 = vmatpush1.bf16.msra.mxu0 %v15371_v61  ;;  %v17727_v63 = vsel %vm16353_vm2, %v1232_v1, %v1236_v18  ;;  %5253 = vmatprep.subr.bf16.mxu1 %v15370_v31  ;;  %v15385_v52 = vld [vmem:[%s16276_s20 + $0x1214] ss:$8 sps:$4 sm:$0xff]   ;;  %v13633_v61 = vcombine.high %v17709_v49, %v17713_v30  ;;  %v724_v41 = vld [vmem:[%s16327_s24 + $0x268] sm:$0x11]  ;;  %v19644_v29 = vshll.u32 %v17010_v43, 16 }
 0x1a6   : > { %v1342_v7 = vrot.slane %v19642_v45, 5  ;;  %v1451_v39 = vrot.slane %v19643_v33, 4  ;;  %v12745_v8 = vcombine.high %v17705_v5, %v17727_v63  ;;  %v12744_v14 = vcombine.low %v17705_v5, %v17727_v63  ;;  %v732_v60 = vld [vmem:[%s16327_s24 + $0x2e8] sm:$0x11]  ;;  %11559 = vmatprep.subr.bf16.mxu0 %v15379_v56  ;;  %v8419_v40 = vld [vmem:[%s16327_s24 + $0x208] sm:$0xee] }
 0x1a7   : > { %v15374_v13 = vld [vmem:[%s16276_s20 + $0xe00] ss:$8 sps:$4 sm:$0xff]   ;;  %v1346_v38 = vshll.u32 %v724_v41, 16  ;;  %v1454_v20 = vrot.slane %v19644_v29, 5  ;;  %v1458_v48 = vshll.u32 %v732_v60, 16  ;;  %v13519_v35 = vrot.slane %v8419_v40, 9 }
 0x1a8   : > { %v1343_v17 = vor.u32 %v1342_v7, %v1339_v44  ;;  %11479 = vmatmul.mubr.bf16.vlgmr.msra.gmra.mrb[0].mxu0 %v13616_v55  ;;  %v8427_v26 = vld [vmem:[%s16327_s24 + $0x288] sm:$0xee]  ;;  %v16015_v28 = vld [vmem:[%s16327_s24 + $0x248] sm:$0x11]  ;;  %5254 = vmatpush1.bf16.msra.mxu1 %v15368_v6  ;;  %v15383_v31 = vld [vmem:[%s16276_s20 + $0x1210] ss:$8 sps:$4 sm:$0xff]  }
 0x1a9   : > { %v8907_v15 = vrot.slane %v16015_v28, 5  ;;  %v16016_v42 = vld [vmem:[%s16327_s24 + $0x2c8] sm:$0x11]  ;;  %11560 = vmatpush1.bf16.msra.mxu0 %v15377_v11  ;;  %v1348_v56 = vrot.slane %v1346_v38, 5  ;;  %v1455_v43 = vor.u32 %v1454_v20, %v1451_v39  ;;  %v1460_v1 = vrot.slane %v1458_v48, 5  ;;  %v17752_v55 = vld [vmem:[%s16327_s24 + $0x7b0] sm:$0xff]  ;;  %5336 = vmatprep.subr.bf16.mxu1 %v15376_v47 }
 0x1aa   : > { %v8939_v46 = vrot.slane %v16016_v42, 5  ;;  %v1344_v18 = vrot.slane %v1343_v17, 4  ;;  %v2250_v24 = vshll.u32 %v17698_v19, 16  ;;  %v2359_v44 = vshrl.u32 %v17752_v55, 16  ;;  %v15382_v45 = vld [vmem:[%s16276_s20 + $0xe14] ss:$8 sps:$4 sm:$0xff]   ;;  %11561 = vmatprep.subr.bf16.mxu0 %v15385_v52  ;;  %11488 = vmatprep.mubr.bf16.mxu0 %v13633_v61 }
 0x1ab   : > { %v13527_v7 = vrot.slane %v8427_v26, 9  ;;  %v15391_v6 = vld [vmem:[%s16276_s20 + $0x1224] ss:$8 sps:$4 sm:$0xff]   ;;  %v1456_v33 = vrot.slane %v1455_v43, 4  ;;  %v19645_v39 = vshrl.u32 %v17017_v25, 16  ;;  %5256 = vmatmul.mubr.bf16.vlgmr.msra.gmra.mrb[0].mxu1 %v12728_v10  ;;  %v13632_v61 = vcombine.low %v17709_v49, %v17713_v30 }
 0x1ac   : > { %v17759_v11 = vsel %vm16353_vm2, %v1344_v18, %v1348_v56  ;;  %v15380_v47 = vld [vmem:[%s16276_s20 + $0xe10] ss:$8 sps:$4 sm:$0xff]   ;;  %v15388_v52 = vld [vmem:[%s16276_s20 + $0xe24] ss:$8 sps:$4 sm:$0xff]   ;;  %v17772_v60 = vsel %vm17284_vm5, %v13519_v35, %v8907_v15  ;;  %v19646_v38 = vshll.u32 %v17017_v25, 16  ;;  %5337 = vmatpush1.bf16.msra.mxu1 %v15374_v13  ;;  %v19647_v49 = vshrl.u32 %v17023_v62, 16  ;;  %5265 = vmatprep.mubr.bf16.mxu1 %v12745_v8 }
 0x1ad   : > { %v1563_v41 = vrot.slane %v19645_v39, 4  ;;  %v17776_v17 = vsel %vm17284_vm5, %v13527_v7, %v8939_v46  ;;  %11562 = vmatpush1.bf16.msra.mxu0 %v15383_v31  ;;  %v15389_v58 = vld [vmem:[%s16276_s20 + $0x1220] ss:$8 sps:$4 sm:$0xff]   ;;  %v15397_v32 = vld [vmem:[%s16276_s20 + $0x1234] ss:$8 sps:$4 sm:$0xff]   ;;  %v17784_v10 = vsel %vm16353_vm2, %v1456_v33, %v1460_v1  ;;  %5338 = vmatprep.subr.bf16.mxu1 %v15382_v45  ;;  %v19648_v26 = vshll.u32 %v17023_v62, 16 }
 0x1ae   : > { %v1566_v29 = vrot.slane %v19646_v38, 5  ;;  %v1675_v30 = vrot.slane %v19647_v49, 4  ;;  %v12761_v25 = vcombine.high %v17759_v11, %v17784_v10  ;;  %v12760_v13 = vcombine.low %v17759_v11, %v17784_v10  ;;  %v740_v20 = vld [vmem:[%s16327_s24 + $0x368] sm:$0x11]  ;;  %11563 = vmatprep.subr.bf16.mxu0 %v15391_v6  ;;  %v8435_v42 = vld [vmem:[%s16327_s24 + $0x308] sm:$0xee] }
 0x1af   : > { %v748_v48 = vld [vmem:[%s16327_s24 + $0x3e8] sm:$0x11]  ;;  %v1678_v35 = vrot.slane %v19648_v26, 5  ;;  %v13649_v28 = vcombine.high %v17772_v60, %v17776_v17  ;;  %v1570_v15 = vshll.u32 %v740_v20, 16  ;;  %v8443_v46 = vld [vmem:[%s16327_s24 + $0x388] sm:$0xee] }
 0x1b0   : > { %v1567_v40 = vor.u32 %v1566_v29, %v1563_v41  ;;  %v1682_v8 = vshll.u32 %v748_v48, 16  ;;  %v15386_v31 = vld [vmem:[%s16276_s20 + $0xe20] ss:$8 sps:$4 sm:$0xff]   ;;  %11489 = vmatmul.mubr.bf16.gmra.mrb[4].mxu0 %v13632_v61  ;;  %v13535_v43 = vrot.slane %v8435_v42, 9  ;;  %5339 = vmatpush1.bf16.msra.mxu1 %v15380_v47  ;;  %v15395_v62 = vld [vmem:[%s16276_s20 + $0x1230] ss:$8 sps:$4 sm:$0xff]  }
 0x1b1   : > { %v1679_v56 = vor.u32 %v1678_v35, %v1675_v30  ;;  %v16018_v1 = vld [vmem:[%s16327_s24 + $0x348] sm:$0x11]  ;;  %11564 = vmatpush1.bf16.msra.mxu0 %v15389_v58  ;;  %v1572_v7 = vrot.slane %v1570_v15, 5  ;;  %v13543_v33 = vrot.slane %v8443_v46, 9  ;;  %5340 = vmatprep.subr.bf16.mxu1 %v15388_v52  ;;  %v15394_v38 = vld [vmem:[%s16276_s20 + $0xe34] ss:$8 sps:$4 sm:$0xff]  }
 0x1b2   : > { %v1568_v18 = vrot.slane %v1567_v40, 4  ;;  %v8971_v45 = vrot.slane %v16018_v1, 5  ;;  %v1684_v6 = vrot.slane %v1682_v8, 5  ;;  %v16019_v39 = vld [vmem:[%s16327_s24 + $0x3c8] sm:$0x11]  ;;  %11565 = vmatprep.subr.bf16.mxu0 %v15397_v32  ;;  %v19649_v49 = vshrl.u32 %v17030_v51, 16  ;;  %11498 = vmatprep.mubr.bf16.mxu0 %v13649_v28 }
 0x1b3   : > { %v9003_v41 = vrot.slane %v16019_v39, 5  ;;  %v1680_v61 = vrot.slane %v1679_v56, 4  ;;  %v15403_v58 = vld [vmem:[%s16276_s20 + $0x1244] ss:$8 sps:$4 sm:$0xff]   ;;  %v19650_v32 = vshll.u32 %v17030_v51, 16  ;;  %v19651_v48 = vshrl.u32 %v17038_v23, 16  ;;  %5266 = vmatmul.mubr.bf16.gmra.mrb[4].mxu1 %v12744_v14 }
 0x1b4   : > { %v17807_v29 = vsel %vm17284_vm5, %v13535_v43, %v8971_v45  ;;  %v1787_v47 = vrot.slane %v19649_v49, 4  ;;  %v17814_v30 = vsel %vm16353_vm2, %v1568_v18, %v1572_v7  ;;  %v15392_v26 = vld [vmem:[%s16276_s20 + $0xe30] ss:$8 sps:$4 sm:$0xff]   ;;  %v15400_v35 = vld [vmem:[%s16276_s20 + $0xe44] ss:$8 sps:$4 sm:$0xff]   ;;  %v13648_v28 = vcombine.low %v17772_v60, %v17776_v17  ;;  %5341 = vmatpush1.bf16.msra.mxu1 %v15386_v31  ;;  %5275 = vmatprep.mubr.bf16.mxu1 %v12761_v25 }
 0x1b5   : > { %v17818_v52 = vsel %vm17284_vm5, %v13543_v33, %v9003_v41  ;;  %v1790_v20 = vrot.slane %v19650_v32, 5  ;;  %v1899_v40 = vrot.slane %v19651_v48, 4  ;;  %v17833_v15 = vsel %vm16353_vm2, %v1680_v61, %v1684_v6  ;;  %11566 = vmatpush1.bf16.msra.mxu0 %v15395_v62  ;;  %v15401_v42 = vld [vmem:[%s16276_s20 + $0x1240] ss:$8 sps:$4 sm:$0xff]   ;;  %v15409_v5 = vld [vmem:[%s16276_s20 + $0x1254] ss:$8 sps:$4 sm:$0xff]   ;;  %5342 = vmatprep.subr.bf16.mxu1 %v15394_v38 }
 0x1b6   : > { %v19652_v51 = vshll.u32 %v17038_v23, 16  ;;  %v12777_v63 = vcombine.high %v17814_v30, %v17833_v15  ;;  %v12776_v14 = vcombine.low %v17814_v30, %v17833_v15  ;;  %v16020_v17 = vld [vmem:[%s16327_s24 + $0x548] sm:$0x11]  ;;  %v13665_v23 = vcombine.high %v17807_v29, %v17818_v52  ;;  %v8451_v43 = vld [vmem:[%s16327_s24 + $0x508] sm:$0xee]  ;;  %11567 = vmatprep.subr.bf16.mxu0 %v15403_v58  ;;  %v17855_v32 = vld [vmem:[%s16327_s24 + $0x830] sm:$0xff] }
 0x1b7   : > { %v1791_v60 = vor.u32 %v1790_v20, %v1787_v47  ;;  %v9035_v46 = vrot.slane %v16020_v17, 5  ;;  %v756_v31 = vld [vmem:[%s16327_s24 + $0x568] sm:$0x11]  ;;  %v8459_v7 = vld [vmem:[%s16327_s24 + $0x588] sm:$0xee]  ;;  %v13551_v6 = vrot.slane %v8451_v43, 9 }
 0x1b8   : > { %v1902_v8 = vrot.slane %v19652_v51, 5  ;;  %v764_v18 = vld [vmem:[%s16327_s24 + $0x5e8] sm:$0x11]  ;;  %v1794_v45 = vshll.u32 %v756_v31, 16  ;;  %11499 = vmatmul.mubr.bf16.gmra.mrb[8].mxu0 %v13648_v28  ;;  %v13559_v25 = vrot.slane %v8459_v7, 9  ;;  %5343 = vmatpush1.bf16.msra.mxu1 %v15392_v26  ;;  %v2362_v58 = vshll.u32 %v17752_v55, 16 }
 0x1b9   : > { %v1792_v1 = vrot.slane %v1791_v60, 4  ;;  %v1906_v62 = vshll.u32 %v764_v18, 16  ;;  %v16021_v39 = vld [vmem:[%s16327_s24 + $0x5c8] sm:$0x11]  ;;  %11568 = vmatpush1.bf16.msra.mxu0 %v15401_v42  ;;  %v15407_v61 = vld [vmem:[%s16276_s20 + $0x1250] ss:$8 sps:$4 sm:$0xff]   ;;  %5344 = vmatprep.subr.bf16.mxu1 %v15400_v35 }
 0x1ba   : > { %v1903_v56 = vor.u32 %v1902_v8, %v1899_v40  ;;  %v9067_v41 = vrot.slane %v16021_v39, 5  ;;  %v15398_v38 = vld [vmem:[%s16276_s20 + $0xe40] ss:$8 sps:$4 sm:$0xff]   ;;  %v1796_v49 = vrot.slane %v1794_v45, 5  ;;  %v2471_v20 = vshrl.u32 %v17855_v32, 16  ;;  %11569 = vmatprep.subr.bf16.mxu0 %v15409_v5  ;;  %11508 = vmatprep.mubr.bf16.mxu0 %v13665_v23 }
 0x1bb   : > { %v1908_v47 = vrot.slane %v1906_v62, 5  ;;  %v15406_v48 = vld [vmem:[%s16276_s20 + $0xe54] ss:$8 sps:$4 sm:$0xff]   ;;  %v13664_v40 = vcombine.low %v17807_v29, %v17818_v52  ;;  %v19653_v26 = vshrl.u32 %v17055_v59, 16  ;;  %v15404_v51 = vld [vmem:[%s16276_s20 + $0xe50] ss:$8 sps:$4 sm:$0xff]   ;;  %v17875_v29 = vsel %vm17284_vm5, %v13551_v6, %v9035_v46  ;;  %5276 = vmatmul.mubr.bf16.gmra.mrb[8].mxu1 %v12760_v13 }
 0x1bc   : > { %v1904_v33 = vrot.slane %v1903_v56, 4  ;;  %v15415_v8 = vld [vmem:[%s16276_s20 + $0x1264] ss:$8 sps:$4 sm:$0xff]   ;;  %v17867_v42 = vsel %vm16353_vm2, %v1792_v1, %v1796_v49  ;;  %v17879_v52 = vsel %vm17284_vm5, %v13559_v25, %v9067_v41  ;;  %v19654_v46 = vshll.u32 %v17055_v59, 16  ;;  %5345 = vmatpush1.bf16.msra.mxu1 %v15398_v38  ;;  %v15413_v11 = vld [vmem:[%s16276_s20 + $0x1260] ss:$8 sps:$4 sm:$0xff]   ;;  %5285 = vmatprep.mubr.bf16.mxu1 %v12777_v63 }
 0x1bd   : > { %v2011_v28 = vrot.slane %v19653_v26, 4  ;;  %v15412_v5 = vld [vmem:[%s16276_s20 + $0xe64] ss:$8 sps:$4 sm:$0xff]   ;;  %v19655_v31 = vshrl.u32 %v17061_v16, 16  ;;  %11570 = vmatpush1.bf16.msra.mxu0 %v15407_v61  ;;  %v15421_v10 = vld [vmem:[%s16276_s20 + $0x1274] ss:$8 sps:$4 sm:$0xff]   ;;  %5346 = vmatprep.subr.bf16.mxu1 %v15406_v48  ;;  %v13681_v56 = vcombine.high %v17875_v29, %v17879_v52 }
 0x1be   : > { %v17871_v35 = vsel %vm16353_vm2, %v1904_v33, %v1908_v47  ;;  %v2014_v23 = vrot.slane %v19654_v46, 5  ;;  %v772_v13 = vld [vmem:[%s16327_s24 + $0x668] sm:$0x11]  ;;  %v19656_v45 = vshll.u32 %v17061_v16, 16  ;;  %v8467_v7 = vld [vmem:[%s16327_s24 + $0x608] sm:$0xee]  ;;  %11571 = vmatprep.subr.bf16.mxu0 %v15415_v8 }
 0x1bf   : > { %v12793_v60 = vcombine.high %v17867_v42, %v17871_v35  ;;  %v12792_v17 = vcombine.low %v17867_v42, %v17871_v35  ;;  %v2123_v18 = vrot.slane %v19655_v31, 4  ;;  %v780_v43 = vld [vmem:[%s16327_s24 + $0x6e8] sm:$0x11]  ;;  %v2018_v59 = vshll.u32 %v772_v13, 16  ;;  %v8475_v33 = vld [vmem:[%s16327_s24 + $0x688] sm:$0xee] }
 0x1c0   : > { %v2015_v1 = vor.u32 %v2014_v23, %v2011_v28  ;;  %v2126_v62 = vrot.slane %v19656_v45, 5  ;;  %v2130_v6 = vshll.u32 %v780_v43, 16  ;;  %v13567_v25 = vrot.slane %v8467_v7, 9  ;;  %v16023_v39 = vld [vmem:[%s16327_s24 + $0x648] sm:$0x11]  ;;  %11509 = vmatmul.mubr.bf16.gmra.mrb[12].mxu0 %v13664_v40  ;;  %5347 = vmatpush1.bf16.msra.mxu1 %v15404_v51  ;;  %v17909_v46 = vld [vmem:[%s16327_s24 + $0x8b0] sm:$0xff] }
 0x1c1   : > { %v9099_v41 = vrot.slane %v16023_v39, 5  ;;  %v16024_v63 = vld [vmem:[%s16327_s24 + $0x6c8] sm:$0x11]  ;;  %v2020_v49 = vrot.slane %v2018_v59, 5  ;;  %v13575_v16 = vrot.slane %v8475_v33, 9  ;;  %11572 = vmatpush1.bf16.msra.mxu0 %v15413_v11  ;;  %v2474_v8 = vshll.u32 %v17855_v32, 16  ;;  %5348 = vmatprep.subr.bf16.mxu1 %v15412_v5 }
 0x1c2   : > { %v9131_v38 = vrot.slane %v16024_v63, 5  ;;  %v2016_v61 = vrot.slane %v2015_v1, 4  ;;  %v2127_v47 = vor.u32 %v2126_v62, %v2123_v18  ;;  %v15410_v48 = vld [vmem:[%s16276_s20 + $0xe60] ss:$8 sps:$4 sm:$0xff]   ;;  %v15419_v26 = vld [vmem:[%s16276_s20 + $0x1270] ss:$8 sps:$4 sm:$0xff]   ;;  %11573 = vmatprep.subr.bf16.mxu0 %v15421_v10  ;;  %11518 = vmatprep.mubr.bf16.mxu0 %v13681_v56  ;;  %v13680_v11 = vcombine.low %v17875_v29, %v17879_v52 }
 0x1c3   : > { %v2132_v28 = vrot.slane %v2130_v6, 5  ;;  %v2583_v23 = vshrl.u32 %v17909_v46, 16  ;;  %v15418_v40 = vld [vmem:[%s16276_s20 + $0xe74] ss:$8 sps:$4 sm:$0xff]   ;;  %v15416_v18 = vld [vmem:[%s16276_s20 + $0xe70] ss:$8 sps:$4 sm:$0xff]   ;;  %v17923_v43 = vsel %vm17284_vm5, %v13567_v25, %v9099_v41  ;;  %5286 = vmatmul.mubr.bf16.gmra.mrb[12].mxu1 %v12776_v14 }
 0x1c4   : > { %v17915_v31 = vsel %vm16353_vm2, %v2016_v61, %v2020_v49  ;;  %v2128_v51 = vrot.slane %v2127_v47, 4  ;;  %v15427_v13 = vld [vmem:[%s16276_s20 + $0x1284] ss:$8 sps:$4 sm:$0xff]   ;;  %v19657_v5 = vshrl.u32 %v17068_v57, 16  ;;  %v15425_v59 = vld [vmem:[%s16276_s20 + $0x1280] ss:$8 sps:$4 sm:$0xff]   ;;  %v17938_v29 = vsel %vm17284_vm5, %v13575_v16, %v9131_v38  ;;  %5349 = vmatpush1.bf16.msra.mxu1 %v15410_v48  ;;  %5295 = vmatprep.mubr.bf16.mxu1 %v12793_v60 }
 0x1c5   : > { %v15424_v1 = vld [vmem:[%s16276_s20 + $0xe84] ss:$8 sps:$4 sm:$0xff]   ;;  %v19658_v52 = vshll.u32 %v17068_v57, 16  ;;  %v19659_v62 = vshrl.u32 %v17076_v53, 16  ;;  %11574 = vmatpush1.bf16.msra.mxu0 %v15419_v26  ;;  %v15433_v30 = vld [vmem:[%s16276_s20 + $0x1294] ss:$8 sps:$4 sm:$0xff]   ;;  %5350 = vmatprep.subr.bf16.mxu1 %v15418_v40  ;;  %v13697_v61 = vcombine.high %v17923_v43, %v17938_v29 }
 0x1c6   : > { %v2235_v10 = vrot.slane %v19657_v5, 4  ;;  %v17934_v56 = vsel %vm16353_vm2, %v2128_v51, %v2132_v28  ;;  %v788_v6 = vld [vmem:[%s16327_s24 + $0x768] sm:$0x11]  ;;  %v19660_v39 = vshll.u32 %v17076_v53, 16  ;;  %v8483_v38 = vld [vmem:[%s16327_s24 + $0x708] sm:$0xee]  ;;  %11575 = vmatprep.subr.bf16.mxu0 %v15427_v13 }
 0x1c7   : > { %v2238_v45 = vrot.slane %v19658_v52, 5  ;;  %v2347_v7 = vrot.slane %v19659_v62, 4  ;;  %v12809_v15 = vcombine.high %v17915_v31, %v17934_v56  ;;  %v12808_v14 = vcombine.low %v17915_v31, %v17934_v56  ;;  %v796_v33 = vld [vmem:[%s16327_s24 + $0x7e8] sm:$0x11]  ;;  %v8491_v49 = vld [vmem:[%s16327_s24 + $0x788] sm:$0xee] }
 0x1c8   : > { %v2242_v25 = vshll.u32 %v788_v6, 16  ;;  %v2350_v41 = vrot.slane %v19660_v39, 5  ;;  %v2354_v63 = vshll.u32 %v796_v33, 16  ;;  %v13583_v47 = vrot.slane %v8483_v38, 9  ;;  %v16026_v16 = vld [vmem:[%s16327_s24 + $0x748] sm:$0x11]  ;;  %11519 = vmatmul.mubr.bf16.gmra.mrb[16].mxu0 %v13680_v11  ;;  %5351 = vmatpush1.bf16.msra.mxu1 %v15416_v18 }
 0x1c9   : > { %v2239_v57 = vor.u32 %v2238_v45, %v2235_v10  ;;  %v9163_v48 = vrot.slane %v16026_v16, 5  ;;  %v16027_v26 = vld [vmem:[%s16327_s24 + $0x7c8] sm:$0x11]  ;;  %11576 = vmatpush1.bf16.msra.mxu0 %v15425_v59  ;;  %v15431_v5 = vld [vmem:[%s16276_s20 + $0x1290] ss:$8 sps:$4 sm:$0xff]   ;;  %v13591_v10 = vrot.slane %v8491_v49, 9  ;;  %5352 = vmatprep.subr.bf16.mxu1 %v15424_v1 }
 0x1ca   : > { %v9195_v60 = vrot.slane %v16027_v26, 5  ;;  %v2244_v53 = vrot.slane %v2242_v25, 5  ;;  %v2351_v40 = vor.u32 %v2350_v41, %v2347_v7  ;;  %v2356_v51 = vrot.slane %v2354_v63, 5  ;;  %v15422_v13 = vld [vmem:[%s16276_s20 + $0xe80] ss:$8 sps:$4 sm:$0xff]   ;;  %11577 = vmatprep.subr.bf16.mxu0 %v15433_v30  ;;  %11528 = vmatprep.mubr.bf16.mxu0 %v13697_v61 }
 0x1cb   : > { %v2240_v28 = vrot.slane %v2239_v57, 4  ;;  %v15430_v52 = vld [vmem:[%s16276_s20 + $0xe94] ss:$8 sps:$4 sm:$0xff]   ;;  %v19661_v62 = vshrl.u32 %v17091_v54, 16  ;;  %v15428_v6 = vld [vmem:[%s16276_s20 + $0xe90] ss:$8 sps:$4 sm:$0xff]   ;;  %v17975_v59 = vsel %vm17284_vm5, %v13583_v47, %v9163_v48  ;;  %5296 = vmatmul.mubr.bf16.gmra.mrb[16].mxu1 %v12792_v17  ;;  %v13696_v25 = vcombine.low %v17923_v43, %v17938_v29 }
 0x1cc   : > { %v2352_v45 = vrot.slane %v2351_v40, 4  ;;  %v15439_v18 = vld [vmem:[%s16276_s20 + $0x12a4] ss:$8 sps:$4 sm:$0xff]   ;;  %v17979_v1 = vsel %vm17284_vm5, %v13591_v10, %v9195_v60  ;;  %v19662_v30 = vshll.u32 %v17091_v54, 16  ;;  %v15437_v39 = vld [vmem:[%s16276_s20 + $0x12a0] ss:$8 sps:$4 sm:$0xff]   ;;  %5353 = vmatpush1.bf16.msra.mxu1 %v15422_v13  ;;  %5305 = vmatprep.mubr.bf16.mxu1 %v12809_v15 }
 0x1cd   : > { %v17967_v11 = vsel %vm16353_vm2, %v2240_v28, %v2244_v53  ;;  %v2459_v7 = vrot.slane %v19661_v62, 4  ;;  %v15436_v57 = vld [vmem:[%s16276_s20 + $0xea4] ss:$8 sps:$4 sm:$0xff]   ;;  %v15445_v41 = vld [vmem:[%s16276_s20 + $0x12b4] ss:$8 sps:$4 sm:$0xff]   ;;  %v19663_v38 = vshrl.u32 %v17098_v36, 16  ;;  %11578 = vmatpush1.bf16.msra.mxu0 %v15431_v5  ;;  %5354 = vmatprep.subr.bf16.mxu1 %v15430_v52  ;;  %v13713_v47 = vcombine.high %v17975_v59, %v17979_v1 }
 0x1ce   : > { %v2462_v33 = vrot.slane %v19662_v30, 5  ;;  %v17993_v63 = vsel %vm16353_vm2, %v2352_v45, %v2356_v51  ;;  %v804_v17 = vld [vmem:[%s16327_s24 + $0x868] sm:$0x11]  ;;  %v19664_v61 = vshll.u32 %v17098_v36, 16  ;;  %v8499_v26 = vld [vmem:[%s16327_s24 + $0x808] sm:$0xee]  ;;  %11579 = vmatprep.subr.bf16.mxu0 %v15439_v18 }
 0x1cf   : > { %v2571_v54 = vrot.slane %v19663_v38, 4  ;;  %v12825_v42 = vcombine.high %v17967_v11, %v17993_v63  ;;  %v12824_v35 = vcombine.low %v17967_v11, %v17993_v63  ;;  %v812_v43 = vld [vmem:[%s16327_s24 + $0x8e8] sm:$0x11]  ;;  %v2466_v16 = vshll.u32 %v804_v17, 16  ;;  %v8507_v60 = vld [vmem:[%s16327_s24 + $0x888] sm:$0xee] }
 0x1d0   : > { %v2463_v29 = vor.u32 %v2462_v33, %v2459_v7  ;;  %v2574_v49 = vrot.slane %v19664_v61, 5  ;;  %v2578_v48 = vshll.u32 %v812_v43, 16  ;;  %v13599_v40 = vrot.slane %v8499_v26, 9  ;;  %v16028_v51 = vld [vmem:[%s16327_s24 + $0x848] sm:$0x11]  ;;  %11529 = vmatmul.mubr.bf16.gmra.mrb[20].mxu0 %v13696_v25  ;;  %5355 = vmatpush1.bf16.msra.mxu1 %v15428_v6  ;;  %v19665_v18 = vld [vmem:[#allocation3_spill] sm:$0xff] }
 0x1d1   : > { %v9227_v13 = vrot.slane %v16028_v51, 5  ;;  %v15434_v36 = vld [vmem:[%s16276_s20 + $0xea0] ss:$8 sps:$4 sm:$0xff]   ;;  %v2468_v5 = vrot.slane %v2466_v16, 5  ;;  %v13607_v10 = vrot.slane %v8507_v60, 9  ;;  %11580 = vmatpush1.bf16.msra.mxu0 %v15437_v39  ;;  %v19666_v30 = vshrl.u32 %v19665_v18, 16  ;;  %5356 = vmatprep.subr.bf16.mxu1 %v15436_v57 }
 0x1d2   : > { %v2464_v28 = vrot.slane %v2463_v29, 4  ;;  %v2575_v53 = vor.u32 %v2574_v49, %v2571_v54  ;;  %v2580_v15 = vrot.slane %v2578_v48, 5  ;;  %v16029_v52 = vld [vmem:[%s16327_s24 + $0x8c8] sm:$0x11]  ;;  %v15443_v62 = vld [vmem:[%s16276_s20 + $0x12b0] ss:$8 sps:$4 sm:$0xff]   ;;  %11581 = vmatprep.subr.bf16.mxu0 %v15445_v41  ;;  %v13712_v25 = vcombine.low %v17975_v59, %v17979_v1  ;;  %11538 = vmatprep.mubr.bf16.mxu0 %v13713_v47 }
 0x1d3   : > { %v9259_v45 = vrot.slane %v16029_v52, 5  ;;  %v905_v33 = vrot.slane %v19666_v30, 4  ;;  %v15442_v38 = vld [vmem:[%s16276_s20 + $0xeb4] ss:$8 sps:$4 sm:$0xff]   ;;  %v19667_v6 = vshll.u32 %v19665_v18, 16  ;;  %v19668_v17 = vld [vmem:[#allocation4_spill] sm:$0xff]  ;;  %v18034_v59 = vsel %vm17284_vm5, %v13599_v40, %v9227_v13  ;;  %5306 = vmatmul.mubr.bf16.gmra.mrb[20].mxu1 %v12808_v14 }
 0x1d4   : > { %v2576_v7 = vrot.slane %v2575_v53, 4  ;;  %v18020_v54 = vsel %vm16353_vm2, %v2464_v28, %v2468_v5  ;;  %v19669_v43 = vshrl.u32 %v19668_v17, 16  ;;  %v15440_v61 = vld [vmem:[%s16276_s20 + $0xeb0] ss:$8 sps:$4 sm:$0xff]   ;;  %v15451_v57 = vld [vmem:[%s16276_s20 + $0x12c4] ss:$8 sps:$4 sm:$0xff]   ;;  %5357 = vmatpush1.bf16.msra.mxu1 %v15434_v36  ;;  %5315 = vmatprep.mubr.bf16.mxu1 %v12825_v42 }
 0x1d5   : > { %v908_v39 = vrot.slane %v19667_v6, 5  ;;  %v18038_v1 = vsel %vm17284_vm5, %v13607_v10, %v9259_v45  ;;  %v19670_v49 = vshll.u32 %v19668_v17, 16  ;;  %v15448_v47 = vld [vmem:[%s16276_s20 + $0xec4] ss:$8 sps:$4 sm:$0xff]   ;;  %v15449_v48 = vld [vmem:[%s16276_s20 + $0x12c0] ss:$8 sps:$4 sm:$0xff]   ;;  %11582 = vmatpush1.bf16.msra.mxu0 %v15443_v62  ;;  %5358 = vmatprep.subr.bf16.mxu1 %v15442_v38 }
 0x1d6   : > { %v1017_v29 = vrot.slane %v19669_v43, 4  ;;  %v18030_v41 = vsel %vm16353_vm2, %v2576_v7, %v2580_v15  ;;  %v15457_v26 = vld [vmem:[%s16276_s20 + $0x12d4] ss:$8 sps:$4 sm:$0xff]   ;;  %11583 = vmatprep.subr.bf16.mxu0 %v15451_v57  ;;  %v13729_v36 = vcombine.high %v18034_v59, %v18038_v1  ;;  %v15446_v17 = vld [vmem:[%s16276_s20 + $0xec0] ss:$8 sps:$4 sm:$0xff]   ;;  %v2585_v32 = vrot.slane %v2583_v23, 4 }
 0x1d7   : > { %v1020_v16 = vrot.slane %v19670_v49, 5  ;;  %v12841_v60 = vcombine.high %v18020_v54, %v18030_v41  ;;  %v12840_v28 = vcombine.low %v18020_v54, %v18030_v41  ;;  %v909_v53 = vor.u32 %v908_v39, %v905_v33  ;;  %v16030_v40 = vld [vmem:[%s16327_s24 + $0x50] sm:$0x11]  ;;  %v8388_v56 = vld [vmem:[%s16327_s24 + $0x10] sm:$0xee]  ;;  %v18062_v38 = vld [vmem:[%s16327_s24 + $0x38] sm:$0xff] }
 0x1d8   : > { %v8783_v51 = vrot.slane %v16030_v40, 5  ;;  %v693_v13 = vld [vmem:[%s16327_s24 + $0x70] sm:$0x11]  ;;  %v8396_v52 = vld [vmem:[%s16327_s24 + $0x90] sm:$0xee]  ;;  %v13488_v45 = vrot.slane %v8388_v56, 9  ;;  %11539 = vmatmul.mubr.bf16.gmra.mrb[24].mxu0 %v13712_v25  ;;  %5359 = vmatpush1.bf16.msra.mxu1 %v15440_v61 }
 0x1d9   : > { %v701_v5 = vld [vmem:[%s16327_s24 + $0xf0] sm:$0x11]  ;;  %v1021_v31 = vor.u32 %v1020_v16, %v1017_v29  ;;  %v910_v14 = vrot.slane %v909_v53, 4  ;;  %v912_v15 = vshll.u32 %v693_v13, 16  ;;  %v13496_v7 = vrot.slane %v8396_v52, 9  ;;  %11584 = vmatpush1.bf16.msra.mxu0 %v15449_v48  ;;  %5360 = vmatprep.subr.bf16.mxu1 %v15448_v47  ;;  %v19674_v56 = vld [vmem:[#allocation6_spill] sm:$0xff] }
 0x1da   : > { %v1024_v10 = vshll.u32 %v701_v5, 16  ;;  %v16031_v18 = vld [vmem:[%s16327_s24 + $0xd0] sm:$0x11]  ;;  %v18069_v29 = vsel %vm17284_vm5, %v13488_v45, %v8783_v51  ;;  %11585 = vmatprep.subr.bf16.mxu0 %v15457_v26  ;;  %11548 = vmatprep.mubr.bf16.mxu0 %v13729_v36  ;;  %v15463_v13 = vld [vmem:[%s16276_s20 + $0x12e4] ss:$8 sps:$4 sm:$0xff]   ;;  %v13728_v52 = vcombine.low %v18034_v59, %v18038_v1  ;;  %v19676_v11 = vshll.u32 %v19674_v56, 16 }
 0x1db   : > { %v1022_v62 = vrot.slane %v1021_v31, 4  ;;  %v8815_v30 = vrot.slane %v16031_v18, 5  ;;  %v914_v6 = vrot.slane %v912_v15, 5  ;;  %v15455_v43 = vld [vmem:[%s16276_s20 + $0x12d0] ss:$8 sps:$4 sm:$0xff]   ;;  %5316 = vmatmul.mubr.bf16.gmra.mrb[24].mxu1 %v12824_v35  ;;  %v19689_v33 = vld [vmem:[#allocation11_spill] sm:$0xff] }
 0x1dc   : > { %v1026_v39 = vrot.slane %v1024_v10, 5  ;;  %v19671_v57 = vld [vmem:[#allocation5_spill] sm:$0xff]  ;;  %v15460_v10 = vld [vmem:[%s16276_s20 + $0xee4] ss:$8 sps:$4 sm:$0xff]   ;;  %v15461_v45 = vld [vmem:[%s16276_s20 + $0x12e0] ss:$8 sps:$4 sm:$0xff]   ;;  %5361 = vmatpush1.bf16.msra.mxu1 %v15446_v17  ;;  %5325 = vmatprep.mubr.bf16.mxu1 %v12841_v60 }
 0x1dd   : > { %v19672_v49 = vshrl.u32 %v19671_v57, 16  ;;  %v15454_v53 = vld [vmem:[%s16276_s20 + $0xed4] ss:$8 sps:$4 sm:$0xff]   ;;  %v18076_v25 = vsel %vm16353_vm2, %v910_v14, %v914_v6  ;;  %v18084_v48 = vsel %vm17284_vm5, %v13496_v7, %v8815_v30  ;;  %v19673_v40 = vshll.u32 %v19671_v57, 16  ;;  %v15452_v26 = vld [vmem:[%s16276_s20 + $0xed0] ss:$8 sps:$4 sm:$0xff]   ;;  %11586 = vmatpush1.bf16.msra.mxu0 %v15455_v43 }
 0x1de   : > { %v18080_v61 = vsel %vm16353_vm2, %v1022_v62, %v1026_v39  ;;  %v19675_v14 = vshrl.u32 %v19674_v56, 16  ;;  %v15469_v36 = vld [vmem:[%s16276_s20 + $0x12f4] ss:$8 sps:$4 sm:$0xff]   ;;  %v13619_v18 = vcombine.high %v18069_v29, %v18084_v48  ;;  %v1244_v63 = vrot.slane %v19676_v11, 5  ;;  %5362 = vmatprep.subr.bf16.mxu1 %v15454_v53  ;;  %11587 = vmatprep.subr.bf16.mxu0 %v15463_v13  ;;  %v15470_v51 = vld [vmem:[%s16276_s20 + $0xf00] ss:$8 sps:$4 sm:$0xff]  }
 0x1df   : > { %v1129_v16 = vrot.slane %v19672_v49, 4  ;;  %v1132_v47 = vrot.slane %v19673_v40, 5  ;;  %v12730_v5 = vcombine.low %v18076_v25, %v18080_v61  ;;  %v12731_v31 = vcombine.high %v18076_v25, %v18080_v61  ;;  %v709_v62 = vld [vmem:[%s16327_s24 + $0x170] sm:$0x11]  ;;  %v8404_v35 = vld [vmem:[%s16327_s24 + $0x110] sm:$0xee] }
 0x1e0   : > { %v1241_v15 = vrot.slane %v19675_v14, 4  ;;  %v717_v30 = vld [vmem:[%s16327_s24 + $0x1f0] sm:$0x11]  ;;  %v1136_v6 = vshll.u32 %v709_v62, 16  ;;  %v8412_v39 = vld [vmem:[%s16327_s24 + $0x190] sm:$0xee]  ;;  %11549 = vmatmul.mubr.bf16.gmra.mrb[28].mxu0 %v13728_v52  ;;  %5363 = vmatpush1.bf16.msra.mxu1 %v15452_v26 }
 0x1e1   : > { %v1133_v7 = vor.u32 %v1132_v47, %v1129_v16  ;;  %v1248_v1 = vshll.u32 %v717_v30, 16  ;;  %v13504_v17 = vrot.slane %v8404_v35, 9  ;;  %v16033_v43 = vld [vmem:[%s16327_s24 + $0x150] sm:$0x11]  ;;  %v13512_v40 = vrot.slane %v8412_v39, 9  ;;  %v18119_v56 = vld [vmem:[%s16327_s24 + $0xb8] sm:$0xff]  ;;  %11588 = vmatpush1.bf16.msra.mxu0 %v15461_v45  ;;  %5364 = vmatprep.subr.bf16.mxu1 %v15460_v10 }
 0x1e2   : > { %v8847_v57 = vrot.slane %v16033_v43, 5  ;;  %v1138_v49 = vrot.slane %v1136_v6, 5  ;;  %v1245_v16 = vor.u32 %v1244_v63, %v1241_v15  ;;  %v16034_v47 = vld [vmem:[%s16327_s24 + $0x1d0] sm:$0x11]  ;;  %v18124_v62 = vld [vmem:[%s16327_s24 + $0x138] sm:$0xff]  ;;  %11589 = vmatprep.subr.bf16.mxu0 %v15469_v36  ;;  %v19677_v45 = vld [vmem:[#allocation7_spill] sm:$0xff]  ;;  %11591 = vmatprep.mubr.bf16.mxu0 %v13619_v18  ;;  %v13618_v18 = vcombine.low %v18069_v29, %v18084_v48 }
 0x1e3   : > { %v1134_v59 = vrot.slane %v1133_v7, 4  ;;  %v8879_v53 = vrot.slane %v16034_v47, 5  ;;  %v1250_v13 = vrot.slane %v1248_v1, 5  ;;  %v15458_v15 = vld [vmem:[%s16276_s20 + $0xee0] ss:$8 sps:$4 sm:$0xff]   ;;  %v18135_v35 = vld [vmem:[%s16327_s24 + $0x1b8] sm:$0xff]  ;;  %5326 = vmatmul.mubr.bf16.gmra.mrb[28].mxu1 %v12840_v28 }
 0x1e4   : > { %v15467_v30 = vld [vmem:[%s16276_s20 + $0x12f0] ss:$8 sps:$4 sm:$0xff]   ;;  %v1246_v11 = vrot.slane %v1245_v16, 4  ;;  %v15466_v26 = vld [vmem:[%s16276_s20 + $0xef4] ss:$8 sps:$4 sm:$0xff]   ;;  %v18141_v52 = vsel %vm17284_vm5, %v13504_v17, %v8847_v57  ;;  %v19678_v1 = vshrl.u32 %v19677_v45, 16  ;;  %5365 = vmatpush1.bf16.msra.mxu1 %v15458_v15  ;;  %5368 = vmatprep.mubr.bf16.mxu1 %v12731_v31 }
 0x1e5   : > { %v18131_v6 = vsel %vm16353_vm2, %v1134_v59, %v1138_v49  ;;  %v15464_v43 = vld [vmem:[%s16276_s20 + $0xef0] ss:$8 sps:$4 sm:$0xff]   ;;  %v15473_v49 = vld [vmem:[%s16276_s20 + $0x1300] ss:$8 sps:$4 sm:$0xff]   ;;  %v15475_v16 = vld [vmem:[%s16276_s20 + $0x1304] ss:$8 sps:$4 sm:$0xff]   ;;  %v18154_v10 = vsel %vm17284_vm5, %v13512_v40, %v8879_v53  ;;  %11590 = vmatpush1.bf16.msra.mxu0 %v15467_v30  ;;  %5366 = vmatprep.subr.bf16.mxu1 %v15466_v26 }
 0x1e6   : > { %v1353_v59 = vrot.slane %v19678_v1, 4  ;;  %v18150_v47 = vsel %vm16353_vm2, %v1246_v11, %v1250_v13  ;;  %v19679_v36 = vshll.u32 %v19677_v45, 16  ;;  %v19680_v57 = vld [vmem:[#allocation8_spill] sm:$0xff]  ;;  %v15481_v11 = vld [vmem:[%s16276_s20 + $0x1314] ss:$8 sps:$4 sm:$0xff]   ;;  %v13635_v63 = vcombine.high %v18141_v52, %v18154_v10  ;;  %11672 = vmatprep.subr.bf16.mxu0 %v15475_v16 }
 0x1e7   : > { %v19681_v39 = vshrl.u32 %v19680_v57, 16  ;;  %v15472_v13 = vld [vmem:[%s16276_s20 + $0xf04] ss:$8 sps:$4 sm:$0xff]   ;;  %v12747_v40 = vcombine.high %v18131_v6, %v18150_v47  ;;  %v12746_v53 = vcombine.low %v18131_v6, %v18150_v47  ;;  %v725_v45 = vld [vmem:[%s16327_s24 + $0x270] sm:$0x11]  ;;  %v19682_v28 = vshll.u32 %v19680_v57, 16 }
 0x1e8   : > { %v1356_v17 = vrot.slane %v19679_v36, 5  ;;  %v1360_v41 = vshll.u32 %v725_v45, 16  ;;  %v8420_v36 = vld [vmem:[%s16327_s24 + $0x210] sm:$0xee]  ;;  %v16038_v30 = vld [vmem:[%s16327_s24 + $0x250] sm:$0x11]  ;;  %11592 = vmatmul.mubr.bf16.vlgmr.msra.gmra.mrb[0].mxu0 %v13618_v18  ;;  %5367 = vmatpush1.bf16.msra.mxu1 %v15464_v43 }
 0x1e9   : > { %v1465_v1 = vrot.slane %v19681_v39, 4  ;;  %v733_v39 = vld [vmem:[%s16327_s24 + $0x2f0] sm:$0x11]  ;;  %v1468_v29 = vrot.slane %v19682_v28, 5  ;;  %v8428_v7 = vld [vmem:[%s16327_s24 + $0x290] sm:$0xee]  ;;  %11673 = vmatpush1.bf16.msra.mxu0 %v15473_v49  ;;  %5449 = vmatprep.subr.bf16.mxu1 %v15472_v13  ;;  %v13634_v13 = vcombine.low %v18141_v52, %v18154_v10 }
 0x1ea   : > { %v1357_v54 = vor.u32 %v1356_v17, %v1353_v59  ;;  %v1472_v48 = vshll.u32 %v733_v39, 16  ;;  %v13520_v15 = vrot.slane %v8420_v36, 9  ;;  %v8911_v59 = vrot.slane %v16038_v30, 5  ;;  %v16039_v17 = vld [vmem:[%s16327_s24 + $0x2d0] sm:$0x11]  ;;  %v18186_v31 = vld [vmem:[%s16327_s24 + $0x238] sm:$0xff]  ;;  %11674 = vmatprep.subr.bf16.mxu0 %v15481_v11  ;;  %11601 = vmatprep.mubr.bf16.mxu0 %v13635_v63 }
 0x1eb   : > { %v8943_v57 = vrot.slane %v16039_v17, 5  ;;  %v1362_v39 = vrot.slane %v1360_v41, 5  ;;  %v1469_v28 = vor.u32 %v1468_v29, %v1465_v1  ;;  %v13528_v36 = vrot.slane %v8428_v7, 9  ;;  %v15479_v16 = vld [vmem:[%s16276_s20 + $0x1310] ss:$8 sps:$4 sm:$0xff]   ;;  %5369 = vmatmul.mubr.bf16.vlgmr.msra.gmra.mrb[0].mxu1 %v12730_v5 }
 0x1ec   : > { %v1358_v45 = vrot.slane %v1357_v54, 4  ;;  %v1474_v26 = vrot.slane %v1472_v48, 5  ;;  %v19683_v41 = vld [vmem:[#allocation9_spill] sm:$0xff]  ;;  %v18201_v7 = vsel %vm17284_vm5, %v13520_v15, %v8911_v59  ;;  %v19686_v15 = vld [vmem:[#allocation10_spill] sm:$0xff]  ;;  %5450 = vmatpush1.bf16.msra.mxu1 %v15470_v51  ;;  %5378 = vmatprep.mubr.bf16.mxu1 %v12747_v40  ;;  %v19690_v40 = vshrl.u32 %v19689_v33, 16 }
 0x1ed   : > { %v1470_v54 = vrot.slane %v1469_v28, 4  ;;  %v19684_v29 = vshrl.u32 %v19683_v41, 16  ;;  %v15478_v17 = vld [vmem:[%s16276_s20 + $0xf14] ss:$8 sps:$4 sm:$0xff]   ;;  %v18205_v43 = vsel %vm17284_vm5, %v13528_v36, %v8943_v57  ;;  %v19685_v49 = vshll.u32 %v19683_v41, 16  ;;  %11675 = vmatpush1.bf16.msra.mxu0 %v15479_v16 }
 0x1ee   : > { %v18193_v1 = vsel %vm16353_vm2, %v1358_v45, %v1362_v39  ;;  %v15476_v45 = vld [vmem:[%s16276_s20 + $0xf10] ss:$8 sps:$4 sm:$0xff]   ;;  %v15485_v39 = vld [vmem:[%s16276_s20 + $0x1320] ss:$8 sps:$4 sm:$0xff]   ;;  %v15487_v28 = vld [vmem:[%s16276_s20 + $0x1324] ss:$8 sps:$4 sm:$0xff]   ;;  %v13651_v25 = vcombine.high %v18201_v7, %v18205_v43  ;;  %5451 = vmatprep.subr.bf16.mxu1 %v15478_v17 }
 0x1ef   : > { %v1577_v48 = vrot.slane %v19684_v29, 4  ;;  %v1580_v18 = vrot.slane %v19685_v49, 5  ;;  %v18216_v11 = vsel %vm16353_vm2, %v1470_v54, %v1474_v26  ;;  %v19687_v59 = vshrl.u32 %v19686_v15, 16  ;;  %v15484_v36 = vld [vmem:[%s16276_s20 + $0xf24] ss:$8 sps:$4 sm:$0xff]   ;;  %11676 = vmatprep.subr.bf16.mxu0 %v15487_v28 }
 0x1f0   : > { %v12763_v63 = vcombine.high %v18193_v1, %v18216_v11  ;;  %v12762_v52 = vcombine.low %v18193_v1, %v18216_v11  ;;  %v741_v10 = vld [vmem:[%s16327_s24 + $0x370] sm:$0x11]  ;;  %v19688_v54 = vshll.u32 %v19686_v15, 16  ;;  %v8436_v49 = vld [vmem:[%s16327_s24 + $0x310] sm:$0xee]  ;;  %11602 = vmatmul.mubr.bf16.gmra.mrb[4].mxu0 %v13634_v13  ;;  %5452 = vmatpush1.bf16.msra.mxu1 %v15476_v45  ;;  %v18255_v13 = vld [vmem:[%s16327_s24 + $0x2b8] sm:$0xff] }
 0x1f1   : > { %v1689_v57 = vrot.slane %v19687_v59, 4  ;;  %v749_v41 = vld [vmem:[%s16327_s24 + $0x3f0] sm:$0x11]  ;;  %v1581_v26 = vor.u32 %v1580_v18, %v1577_v48  ;;  %v1584_v61 = vshll.u32 %v741_v10, 16  ;;  %v8444_v59 = vld [vmem:[%s16327_s24 + $0x390] sm:$0xee]  ;;  %11677 = vmatpush1.bf16.msra.mxu0 %v15485_v39  ;;  %5453 = vmatprep.subr.bf16.mxu1 %v15484_v36 }
 0x1f2   : > { %v1692_v29 = vrot.slane %v19688_v54, 5  ;;  %v1696_v5 = vshll.u32 %v749_v41, 16  ;;  %v15493_v48 = vld [vmem:[%s16276_s20 + $0x1334] ss:$8 sps:$4 sm:$0xff]   ;;  %v13536_v51 = vrot.slane %v8436_v49, 9  ;;  %v13544_v41 = vrot.slane %v8444_v59, 9  ;;  %11611 = vmatprep.mubr.bf16.mxu0 %v13651_v25 }
 0x1f3   : > { %v1582_v18 = vrot.slane %v1581_v26, 4  ;;  %v16041_v16 = vld [vmem:[%s16327_s24 + $0x350] sm:$0x11]  ;;  %v1586_v10 = vrot.slane %v1584_v61, 5  ;;  %v15482_v17 = vld [vmem:[%s16276_s20 + $0xf20] ss:$8 sps:$4 sm:$0xff]   ;;  %11678 = vmatprep.subr.bf16.mxu0 %v15493_v48  ;;  %5379 = vmatmul.mubr.bf16.gmra.mrb[4].mxu1 %v12746_v53 }
 0x1f4   : > { %v1693_v15 = vor.u32 %v1692_v29, %v1689_v57  ;;  %v8975_v54 = vrot.slane %v16041_v16, 5  ;;  %v1698_v30 = vrot.slane %v1696_v5, 5  ;;  %v16042_v60 = vld [vmem:[%s16327_s24 + $0x3d0] sm:$0x11]  ;;  %v1801_v26 = vrot.slane %v19690_v40, 4  ;;  %5454 = vmatpush1.bf16.msra.mxu1 %v15482_v17  ;;  %5388 = vmatprep.mubr.bf16.mxu1 %v12763_v63 }
 0x1f5   : > { %v9007_v14 = vrot.slane %v16042_v60, 5  ;;  %v15491_v57 = vld [vmem:[%s16276_s20 + $0x1330] ss:$8 sps:$4 sm:$0xff]   ;;  %v18248_v28 = vsel %vm16353_vm2, %v1582_v18, %v1586_v10  ;;  %v19691_v29 = vshll.u32 %v19689_v33, 16  ;;  %v1913_v60 = vrot.slane %v1911_v34, 4 }
 0x1f6   : > { %v1694_v42 = vrot.slane %v1693_v15, 4  ;;  %v1477_v5 = vshrl.u32 %v18255_v13, 16  ;;  %v15490_v45 = vld [vmem:[%s16276_s20 + $0xf34] ss:$8 sps:$4 sm:$0xff]   ;;  %v18265_v33 = vsel %vm17284_vm5, %v13536_v51, %v8975_v54  ;;  %v1916_v34 = vrot.slane %v1914_v37, 5  ;;  %11679 = vmatpush1.bf16.msra.mxu0 %v15491_v57 }
 0x1f7   : > { %v1804_v61 = vrot.slane %v19691_v29, 5  ;;  %v15488_v49 = vld [vmem:[%s16276_s20 + $0xf30] ss:$8 sps:$4 sm:$0xff]   ;;  %v15497_v36 = vld [vmem:[%s16276_s20 + $0x1340] ss:$8 sps:$4 sm:$0xff]   ;;  %v13650_v37 = vcombine.low %v18201_v7, %v18205_v43  ;;  %v1480_v54 = vshll.u32 %v18255_v13, 16  ;;  %5455 = vmatprep.subr.bf16.mxu1 %v15490_v45 }
 0x1f8   : > { %v18261_v39 = vsel %vm16353_vm2, %v1694_v42, %v1698_v30  ;;  %v15499_v59 = vld [vmem:[%s16276_s20 + $0x1344] ss:$8 sps:$4 sm:$0xff]   ;;  %v18276_v42 = vsel %vm17284_vm5, %v13544_v41, %v9007_v14  ;;  %v15505_v25 = vld [vmem:[%s16276_s20 + $0x1354] ss:$8 sps:$4 sm:$0xff]   ;;  %v1917_v16 = vor.u32 %v1916_v34, %v1913_v60  ;;  %5456 = vmatpush1.bf16.msra.mxu1 %v15488_v49  ;;  %v15509_v9 = vld [vmem:[%s16276_s20 + $0x1360] ss:$8 sps:$4 sm:$0xff]  }
 0x1f9   : > { %v12779_v48 = vcombine.high %v18248_v28, %v18261_v39  ;;  %v12778_v30 = vcombine.low %v18248_v28, %v18261_v39  ;;  %v1805_v18 = vor.u32 %v1804_v61, %v1801_v26  ;;  %v15496_v50 = vld [vmem:[%s16276_s20 + $0xf44] ss:$8 sps:$4 sm:$0xff]   ;;  %v757_v15 = vld [vmem:[%s16327_s24 + $0x570] sm:$0x11]  ;;  %v8452_v14 = vld [vmem:[%s16327_s24 + $0x510] sm:$0xee]  ;;  %v13667_v53 = vcombine.high %v18265_v33, %v18276_v42  ;;  %11680 = vmatprep.subr.bf16.mxu0 %v15499_v59 }
 0x1fa   : > { %v765_v51 = vld [vmem:[%s16327_s24 + $0x5f0] sm:$0x11]  ;;  %v1808_v41 = vshll.u32 %v757_v15, 16  ;;  %v8460_v47 = vld [vmem:[%s16327_s24 + $0x590] sm:$0xee]  ;;  %v1918_v7 = vrot.slane %v1917_v16, 4  ;;  %11612 = vmatmul.mubr.bf16.gmra.mrb[8].mxu0 %v13650_v37  ;;  %5457 = vmatprep.subr.bf16.mxu1 %v15496_v50 }
 0x1fb   : > { %v1806_v10 = vrot.slane %v1805_v18, 4  ;;  %v1920_v6 = vshll.u32 %v765_v51, 16  ;;  %v13552_v43 = vrot.slane %v8452_v14, 9  ;;  %v16044_v17 = vld [vmem:[%s16327_s24 + $0x550] sm:$0x11]  ;;  %v13560_v29 = vrot.slane %v8460_v47, 9  ;;  %11681 = vmatpush1.bf16.msra.mxu0 %v15497_v36  ;;  %11621 = vmatprep.mubr.bf16.mxu0 %v13667_v53 }
 0x1fc   : > { %v9039_v40 = vrot.slane %v16044_v17, 5  ;;  %v1810_v26 = vrot.slane %v1808_v41, 5  ;;  %v16045_v61 = vld [vmem:[%s16327_s24 + $0x5d0] sm:$0x11]  ;;  %v18300_v45 = vld [vmem:[%s16327_s24 + $0x338] sm:$0xff]  ;;  %v2025_v15 = vrot.slane %v2023_v3, 4  ;;  %11682 = vmatprep.subr.bf16.mxu0 %v15505_v25  ;;  %5389 = vmatmul.mubr.bf16.gmra.mrb[8].mxu1 %v12762_v52  ;;  %v13666_v53 = vcombine.low %v18265_v33, %v18276_v42 }
 0x1fd   : > { %v1922_v57 = vrot.slane %v1920_v6, 5  ;;  %v9071_v60 = vrot.slane %v16045_v61, 5  ;;  %v1589_v63 = vshrl.u32 %v18300_v45, 16  ;;  %v1592_v34 = vshll.u32 %v18300_v45, 16  ;;  %v15494_v18 = vld [vmem:[%s16276_s20 + $0xf40] ss:$8 sps:$4 sm:$0xff]   ;;  %5398 = vmatprep.mubr.bf16.mxu1 %v12779_v48 }
 0x1fe   : > { %v18308_v59 = vld [vmem:[%s16327_s24 + $0x3b8] sm:$0xff]  ;;  %v18314_v14 = vsel %vm16353_vm2, %v1806_v10, %v1810_v26  ;;  %v2028_v3 = vrot.slane %v2026_v4, 5  ;;  %v2137_v6 = vrot.slane %v2135_v2, 4  ;;  %v15511_v4 = vld [vmem:[%s16276_s20 + $0x1364] ss:$8 sps:$4 sm:$0xff]   ;;  %v18335_v50 = vsel %vm17284_vm5, %v13552_v43, %v9039_v40  ;;  %5458 = vmatpush1.bf16.msra.mxu1 %v15494_v18 }
 0x1ff   : > { %v1701_v51 = vshrl.u32 %v18308_v59, 16  ;;  %v15503_v16 = vld [vmem:[%s16276_s20 + $0x1350] ss:$8 sps:$4 sm:$0xff]   ;;  %v18318_v37 = vsel %vm16353_vm2, %v1918_v7, %v1922_v57  ;;  %v1704_v41 = vshll.u32 %v18308_v59, 16  ;;  %v15502_v49 = vld [vmem:[%s16276_s20 + $0xf54] ss:$8 sps:$4 sm:$0xff]   ;;  %v18339_v25 = vsel %vm17284_vm5, %v13560_v29, %v9071_v60 }
 0x200   : > { %v12795_v36 = vcombine.high %v18314_v14, %v18318_v37  ;;  %v12794_v10 = vcombine.low %v18314_v14, %v18318_v37  ;;  %v15500_v47 = vld [vmem:[%s16276_s20 + $0xf50] ss:$8 sps:$4 sm:$0xff]   ;;  %v2029_v17 = vor.u32 %v2028_v3, %v2025_v15  ;;  %v15508_v2 = vld [vmem:[%s16276_s20 + $0xf64] ss:$8 sps:$4 sm:$0xff]   ;;  %v2140_v43 = vrot.slane %v2138_v21, 5  ;;  %11683 = vmatpush1.bf16.msra.mxu0 %v15503_v16  ;;  %5459 = vmatprep.subr.bf16.mxu1 %v15502_v49 }
 0x201   : > { %v773_v7 = vld [vmem:[%s16327_s24 + $0x670] sm:$0x11]  ;;  %v8468_v40 = vld [vmem:[%s16327_s24 + $0x610] sm:$0xee]  ;;  %v13683_v11 = vcombine.high %v18335_v50, %v18339_v25  ;;  %11684 = vmatprep.subr.bf16.mxu0 %v15511_v4  ;;  %v18362_v49 = vld [vmem:[%s16327_s24 + $0x538] sm:$0xff]  ;;  %v1703_v45 = vrot.slane %v1701_v51, 4 }
 0x202   : > { %v781_v26 = vld [vmem:[%s16327_s24 + $0x6f0] sm:$0x11]  ;;  %v2032_v57 = vshll.u32 %v773_v7, 16  ;;  %v2030_v61 = vrot.slane %v2029_v17, 4  ;;  %v8476_v1 = vld [vmem:[%s16327_s24 + $0x690] sm:$0xee]  ;;  %v2141_v21 = vor.u32 %v2140_v43, %v2137_v6  ;;  %11622 = vmatmul.mubr.bf16.gmra.mrb[12].mxu0 %v13666_v53  ;;  %5460 = vmatpush1.bf16.msra.mxu1 %v15500_v47  ;;  %v13682_v53 = vcombine.low %v18335_v50, %v18339_v25 }
 0x203   : > { %v15517_v29 = vld [vmem:[%s16276_s20 + $0x1374] ss:$8 sps:$4 sm:$0xff]   ;;  %v2144_v60 = vshll.u32 %v781_v26, 16  ;;  %v13568_v52 = vrot.slane %v8468_v40, 9  ;;  %v13576_v15 = vrot.slane %v8476_v1, 9  ;;  %v1813_v48 = vshrl.u32 %v18362_v49, 16  ;;  %5461 = vmatprep.subr.bf16.mxu1 %v15508_v2  ;;  %11631 = vmatprep.mubr.bf16.mxu0 %v13683_v11 }
 0x204   : > { %v2034_v22 = vrot.slane %v2032_v57, 5  ;;  %v16048_v42 = vld [vmem:[%s16327_s24 + $0x650] sm:$0x11]  ;;  %v1816_v7 = vshll.u32 %v18362_v49, 16  ;;  %v2142_v4 = vrot.slane %v2141_v21, 4  ;;  %11685 = vmatpush1.bf16.msra.mxu0 %v15509_v9  ;;  %v2249_v57 = vrot.slane %v2247_v27, 4  ;;  %5399 = vmatmul.mubr.bf16.gmra.mrb[12].mxu1 %v12778_v30 }
 0x205   : > { %v2146_v33 = vrot.slane %v2144_v60, 5  ;;  %v9103_v18 = vrot.slane %v16048_v42, 5  ;;  %v16049_v16 = vld [vmem:[%s16327_s24 + $0x6d0] sm:$0x11]  ;;  %v15506_v17 = vld [vmem:[%s16276_s20 + $0xf60] ss:$8 sps:$4 sm:$0xff]   ;;  %11686 = vmatprep.subr.bf16.mxu0 %v15517_v29  ;;  %5408 = vmatprep.mubr.bf16.mxu1 %v12795_v36 }
 0x206   : > { %v9135_v3 = vrot.slane %v16049_v16, 5  ;;  %v18368_v6 = vsel %vm16353_vm2, %v2030_v61, %v2034_v22  ;;  %v15515_v26 = vld [vmem:[%s16276_s20 + $0x1370] ss:$8 sps:$4 sm:$0xff]   ;;  %v15514_v43 = vld [vmem:[%s16276_s20 + $0xf74] ss:$8 sps:$4 sm:$0xff]   ;;  %v2252_v47 = vrot.slane %v2250_v24, 5  ;;  %5462 = vmatpush1.bf16.msra.mxu1 %v15506_v17 }
 0x207   : > { %v18379_v40 = vsel %vm16353_vm2, %v2142_v4, %v2146_v33  ;;  %v2361_v9 = vrot.slane %v2359_v44, 4  ;;  %v15512_v27 = vld [vmem:[%s16276_s20 + $0xf70] ss:$8 sps:$4 sm:$0xff]   ;;  %v15521_v2 = vld [vmem:[%s16276_s20 + $0x1380] ss:$8 sps:$4 sm:$0xff]   ;;  %v18392_v50 = vsel %vm17284_vm5, %v13568_v52, %v9103_v18  ;;  %v2364_v22 = vrot.slane %v2362_v58, 5  ;;  %5463 = vmatprep.subr.bf16.mxu1 %v15514_v43 }
 0x208   : > { %v15523_v61 = vld [vmem:[%s16276_s20 + $0x1384] ss:$8 sps:$4 sm:$0xff]   ;;  %v12811_v29 = vcombine.high %v18368_v6, %v18379_v40  ;;  %v18396_v19 = vsel %vm17284_vm5, %v13576_v15, %v9135_v3  ;;  %v12810_v24 = vcombine.low %v18368_v6, %v18379_v40  ;;  %v789_v44 = vld [vmem:[%s16327_s24 + $0x770] sm:$0x11]  ;;  %v2253_v1 = vor.u32 %v2252_v47, %v2249_v57  ;;  %v8484_v52 = vld [vmem:[%s16327_s24 + $0x710] sm:$0xee]  ;;  %11687 = vmatpush1.bf16.msra.mxu0 %v15515_v26 }
 0x209   : > { %v797_v25 = vld [vmem:[%s16327_s24 + $0x7f0] sm:$0x11]  ;;  %v15520_v60 = vld [vmem:[%s16276_s20 + $0xf84] ss:$8 sps:$4 sm:$0xff]   ;;  %v2256_v11 = vshll.u32 %v789_v44, 16  ;;  %v13584_v42 = vrot.slane %v8484_v52, 9  ;;  %v2365_v30 = vor.u32 %v2364_v22, %v2361_v9  ;;  %11688 = vmatprep.subr.bf16.mxu0 %v15523_v61  ;;  %v13699_v57 = vcombine.high %v18392_v50, %v18396_v19 }
 0x20a   : > { %v2368_v21 = vshll.u32 %v797_v25, 16  ;;  %v8492_v33 = vld [vmem:[%s16327_s24 + $0x790] sm:$0xee]  ;;  %v16051_v18 = vld [vmem:[%s16327_s24 + $0x750] sm:$0x11]  ;;  %v2254_v55 = vrot.slane %v2253_v1, 4  ;;  %11632 = vmatmul.mubr.bf16.gmra.mrb[16].mxu0 %v13682_v53  ;;  %5464 = vmatpush1.bf16.msra.mxu1 %v15512_v27  ;;  %v13698_v23 = vcombine.low %v18392_v50, %v18396_v19 }
 0x20b   : > { %v9167_v15 = vrot.slane %v16051_v18, 5  ;;  %v16052_v16 = vld [vmem:[%s16327_s24 + $0x7d0] sm:$0x11]  ;;  %v2258_v58 = vrot.slane %v2256_v11, 5  ;;  %v18417_v4 = vld [vmem:[%s16327_s24 + $0x5b8] sm:$0xff]  ;;  %v13592_v36 = vrot.slane %v8492_v33, 9  ;;  %5465 = vmatprep.subr.bf16.mxu1 %v15520_v60  ;;  %11641 = vmatprep.mubr.bf16.mxu0 %v13699_v57 }
 0x20c   : > { %v9199_v28 = vrot.slane %v16052_v16, 5  ;;  %v15529_v39 = vld [vmem:[%s16276_s20 + $0x1394] ss:$8 sps:$4 sm:$0xff]   ;;  %v2370_v3 = vrot.slane %v2368_v21, 5  ;;  %v1925_v17 = vshrl.u32 %v18417_v4, 16  ;;  %v1928_v26 = vshll.u32 %v18417_v4, 16  ;;  %11689 = vmatpush1.bf16.msra.mxu0 %v15521_v2  ;;  %5409 = vmatmul.mubr.bf16.gmra.mrb[16].mxu1 %v12794_v10 }
 0x20d   : > { %v18424_v43 = vld [vmem:[%s16327_s24 + $0x638] sm:$0xff]  ;;  %v18429_v9 = vsel %vm16353_vm2, %v2254_v55, %v2258_v58  ;;  %v2366_v44 = vrot.slane %v2365_v30, 4  ;;  %v2473_v25 = vrot.slane %v2471_v20, 4  ;;  %v15518_v61 = vld [vmem:[%s16276_s20 + $0xf80] ss:$8 sps:$4 sm:$0xff]   ;;  %v2476_v11 = vrot.slane %v2474_v8, 5  ;;  %11690 = vmatprep.subr.bf16.mxu0 %v15529_v39  ;;  %5418 = vmatprep.mubr.bf16.mxu1 %v12811_v29 }
 0x20e   : > { %v2037_v47 = vshrl.u32 %v18424_v43, 16  ;;  %v15527_v1 = vld [vmem:[%s16276_s20 + $0x1390] ss:$8 sps:$4 sm:$0xff]   ;;  %v15526_v53 = vld [vmem:[%s16276_s20 + $0xf94] ss:$8 sps:$4 sm:$0xff]   ;;  %v18445_v20 = vsel %vm17284_vm5, %v13584_v42, %v9167_v15  ;;  %v18449_v27 = vsel %vm17284_vm5, %v13592_v36, %v9199_v28  ;;  %v19692_v18 = vshll.u32 %v17909_v46, 16  ;;  %5466 = vmatpush1.bf16.msra.mxu1 %v15518_v61 }
 0x20f   : > { %v15535_v22 = vld [vmem:[%s16276_s20 + $0x13a4] ss:$8 sps:$4 sm:$0xff]   ;;  %v18441_v21 = vsel %vm16353_vm2, %v2366_v44, %v2370_v3  ;;  %v15524_v8 = vld [vmem:[%s16276_s20 + $0xf90] ss:$8 sps:$4 sm:$0xff]   ;;  %v2477_v42 = vor.u32 %v2476_v11, %v2473_v25  ;;  %v15533_v30 = vld [vmem:[%s16276_s20 + $0x13a0] ss:$8 sps:$4 sm:$0xff]   ;;  %5467 = vmatprep.subr.bf16.mxu1 %v15526_v53  ;;  %v13715_v37 = vcombine.high %v18445_v20, %v18449_v27 }
 0x210   : > { %v12827_v2 = vcombine.high %v18429_v9, %v18441_v21  ;;  %v12826_v60 = vcombine.low %v18429_v9, %v18441_v21  ;;  %v805_v52 = vld [vmem:[%s16327_s24 + $0x870] sm:$0x11]  ;;  %v2588_v15 = vrot.slane %v19692_v18, 5  ;;  %v8500_v39 = vld [vmem:[%s16327_s24 + $0x810] sm:$0xee]  ;;  %11691 = vmatpush1.bf16.msra.mxu0 %v15527_v1  ;;  %v19693_v61 = vshrl.u32 %v18062_v38, 16 }
 0x211   : > { %v813_v33 = vld [vmem:[%s16327_s24 + $0x8f0] sm:$0x11]  ;;  %v2480_v16 = vshll.u32 %v805_v52, 16  ;;  %v8508_v55 = vld [vmem:[%s16327_s24 + $0x890] sm:$0xee]  ;;  %v2478_v3 = vrot.slane %v2477_v42, 4  ;;  %11692 = vmatprep.subr.bf16.mxu0 %v15535_v22 }
 0x212   : > { %v2592_v28 = vshll.u32 %v813_v33, 16  ;;  %v15532_v58 = vld [vmem:[%s16276_s20 + $0xfa4] ss:$8 sps:$4 sm:$0xff]   ;;  %v2589_v46 = vor.u32 %v2588_v15, %v2585_v32  ;;  %v15541_v14 = vld [vmem:[%s16276_s20 + $0x13b4] ss:$8 sps:$4 sm:$0xff]   ;;  %v13600_v19 = vrot.slane %v8500_v39, 9  ;;  %11642 = vmatmul.mubr.bf16.gmra.mrb[20].mxu0 %v13698_v23  ;;  %5468 = vmatpush1.bf16.msra.mxu1 %v15524_v8 }
 0x213   : > { %v2482_v10 = vrot.slane %v2480_v16, 5  ;;  %v16055_v36 = vld [vmem:[%s16327_s24 + $0x850] sm:$0x11]  ;;  %v13608_v25 = vrot.slane %v8508_v55, 9  ;;  %v919_v1 = vrot.slane %v19693_v61, 4  ;;  %v19694_v32 = vshll.u32 %v18062_v38, 16  ;;  %5469 = vmatprep.subr.bf16.mxu1 %v15532_v58  ;;  %11651 = vmatprep.mubr.bf16.mxu0 %v13715_v37 }
 0x214   : > { %v2594_v50 = vrot.slane %v2592_v28, 5  ;;  %v2590_v57 = vrot.slane %v2589_v46, 4  ;;  %v9231_v44 = vrot.slane %v16055_v36, 5  ;;  %v16056_v11 = vld [vmem:[%s16327_s24 + $0x8d0] sm:$0x11]  ;;  %v19695_v22 = vshrl.u32 %v18119_v56, 16  ;;  %11693 = vmatpush1.bf16.msra.mxu0 %v15533_v30  ;;  %5419 = vmatmul.mubr.bf16.gmra.mrb[20].mxu1 %v12810_v24 }
 0x215   : > { %v18482_v29 = vsel %vm16353_vm2, %v2478_v3, %v2482_v10  ;;  %v9263_v53 = vrot.slane %v16056_v11, 5  ;;  %v922_v52 = vrot.slane %v19694_v32, 5  ;;  %v15530_v42 = vld [vmem:[%s16276_s20 + $0xfa0] ss:$8 sps:$4 sm:$0xff]   ;;  %v15539_v18 = vld [vmem:[%s16276_s20 + $0x13b0] ss:$8 sps:$4 sm:$0xff]   ;;  %11694 = vmatprep.subr.bf16.mxu0 %v15541_v14  ;;  %5428 = vmatprep.mubr.bf16.mxu1 %v12827_v2 }
 0x216   : > { %v1031_v33 = vrot.slane %v19695_v22, 4  ;;  %v18493_v15 = vsel %vm16353_vm2, %v2590_v57, %v2594_v50  ;;  %v19696_v23 = vshll.u32 %v18119_v56, 16  ;;  %v2040_v38 = vshll.u32 %v18424_v43, 16  ;;  %v15538_v28 = vld [vmem:[%s16276_s20 + $0xfb4] ss:$8 sps:$4 sm:$0xff]   ;;  %5470 = vmatpush1.bf16.msra.mxu1 %v15530_v42 }
 0x217   : > { %v15547_v8 = vld [vmem:[%s16276_s20 + $0x13c4] ss:$8 sps:$4 sm:$0xff]   ;;  %v12843_v39 = vcombine.high %v18482_v29, %v18493_v15  ;;  %v12842_v55 = vcombine.low %v18482_v29, %v18493_v15  ;;  %v923_v30 = vor.u32 %v922_v52, %v919_v1  ;;  %v15536_v3 = vld [vmem:[%s16276_s20 + $0xfb0] ss:$8 sps:$4 sm:$0xff]   ;;  %v13714_v56 = vcombine.low %v18445_v20, %v18449_v27  ;;  %v15545_v46 = vld [vmem:[%s16276_s20 + $0x13c0] ss:$8 sps:$4 sm:$0xff]   ;;  %5471 = vmatprep.subr.bf16.mxu1 %v15538_v28 }
 0x218   : > { %v1034_v16 = vrot.slane %v19696_v23, 5  ;;  %v18510_v58 = vsel %vm17284_vm5, %v13600_v19, %v9231_v44  ;;  %v694_v14 = vld [vmem:[%s16327_s24 + $0x78] sm:$0x11]  ;;  %v8389_v57 = vld [vmem:[%s16327_s24 + $0x18] sm:$0xee]  ;;  %v18520_v37 = vsel %vm17284_vm5, %v13608_v25, %v9263_v53  ;;  %11695 = vmatpush1.bf16.msra.mxu0 %v15539_v18 }
 0x219   : > { %v702_v10 = vld [vmem:[%s16327_s24 + $0xf8] sm:$0x11]  ;;  %v924_v20 = vrot.slane %v923_v30, 4  ;;  %v926_v27 = vshll.u32 %v694_v14, 16  ;;  %v8397_v61 = vld [vmem:[%s16327_s24 + $0x98] sm:$0xee]  ;;  %11696 = vmatprep.subr.bf16.mxu0 %v15547_v8  ;;  %v13731_v53 = vcombine.high %v18510_v58, %v18520_v37 }
 0x21a   : > { %v1035_v50 = vor.u32 %v1034_v16, %v1031_v33  ;;  %v1038_v36 = vshll.u32 %v702_v10, 16  ;;  %v18524_v19 = vld [vmem:[%s16327_s24 + $0x6b8] sm:$0xff]  ;;  %v15544_v40 = vld [vmem:[%s16276_s20 + $0xfc4] ss:$8 sps:$4 sm:$0xff]   ;;  %v13489_v32 = vrot.slane %v8389_v57, 9  ;;  %v19697_v33 = vshrl.u32 %v18124_v62, 16  ;;  %11652 = vmatmul.mubr.bf16.gmra.mrb[24].mxu0 %v13714_v56  ;;  %5472 = vmatpush1.bf16.msra.mxu1 %v15536_v3 }
 0x21b   : > { %v2149_v44 = vshrl.u32 %v18524_v19, 16  ;;  %v2152_v1 = vshll.u32 %v18524_v19, 16  ;;  %v15553_v24 = vld [vmem:[%s16276_s20 + $0x13d4] ss:$8 sps:$4 sm:$0xff]   ;;  %v928_v25 = vrot.slane %v926_v27, 5  ;;  %v13497_v16 = vrot.slane %v8397_v61, 9  ;;  %5473 = vmatprep.subr.bf16.mxu1 %v15544_v40  ;;  %11661 = vmatprep.mubr.bf16.mxu0 %v13731_v53 }
 0x21c   : > { %v1036_v6 = vrot.slane %v1035_v50, 4  ;;  %v1040_v11 = vrot.slane %v1038_v36, 5  ;;  %v16058_v52 = vld [vmem:[%s16327_s24 + $0x58] sm:$0x11]  ;;  %v1143_v42 = vrot.slane %v19697_v33, 4  ;;  %11697 = vmatpush1.bf16.msra.mxu0 %v15545_v46  ;;  %v19698_v10 = vshll.u32 %v18124_v62, 16  ;;  %5429 = vmatmul.mubr.bf16.gmra.mrb[24].mxu1 %v12826_v60 }
 0x21d   : > { %v8787_v22 = vrot.slane %v16058_v52, 5  ;;  %v15542_v18 = vld [vmem:[%s16276_s20 + $0xfc0] ss:$8 sps:$4 sm:$0xff]   ;;  %v18541_v2 = vsel %vm16353_vm2, %v924_v20, %v928_v25  ;;  %v16059_v28 = vld [vmem:[%s16327_s24 + $0xd8] sm:$0x11]  ;;  %v19699_v57 = vshrl.u32 %v18135_v35, 16  ;;  %11698 = vmatprep.subr.bf16.mxu0 %v15553_v24  ;;  %v13730_v24 = vcombine.low %v18510_v58, %v18520_v37  ;;  %5438 = vmatprep.mubr.bf16.mxu1 %v12843_v39 }
 0x21e   : > { %v18545_v23 = vsel %vm16353_vm2, %v1036_v6, %v1040_v11  ;;  %v8819_v8 = vrot.slane %v16059_v28, 5  ;;  %v15551_v30 = vld [vmem:[%s16276_s20 + $0x13d0] ss:$8 sps:$4 sm:$0xff]   ;;  %v1146_v50 = vrot.slane %v19698_v10, 5  ;;  %v15550_v27 = vld [vmem:[%s16276_s20 + $0xfd4] ss:$8 sps:$4 sm:$0xff]   ;;  %5474 = vmatpush1.bf16.msra.mxu1 %v15542_v18 }
 0x21f   : > { %v12732_v56 = vcombine.low %v18541_v2, %v18545_v23  ;;  %v12733_v14 = vcombine.high %v18541_v2, %v18545_v23  ;;  %v1255_v20 = vrot.slane %v19699_v57, 4  ;;  %v15559_v3 = vld [vmem:[%s16276_s20 + $0x13e4] ss:$8 sps:$4 sm:$0xff]   ;;  %v710_v46 = vld [vmem:[%s16327_s24 + $0x178] sm:$0x11]  ;;  %v19700_v62 = vshll.u32 %v18135_v35, 16  ;;  %5475 = vmatprep.subr.bf16.mxu1 %v15550_v27 }
 0x220   : > { %v15548_v36 = vld [vmem:[%s16276_s20 + $0xfd0] ss:$8 sps:$4 sm:$0xff]   ;;  %v1147_v6 = vor.u32 %v1146_v50, %v1143_v42  ;;  %v1150_v25 = vshll.u32 %v710_v46, 16  ;;  %v15556_v40 = vld [vmem:[%s16276_s20 + $0xfe4] ss:$8 sps:$4 sm:$0xff]   ;;  %v18574_v53 = vsel %vm17284_vm5, %v13489_v32, %v8787_v22  ;;  %v18578_v35 = vsel %vm17284_vm5, %v13497_v16, %v8819_v8  ;;  %11699 = vmatpush1.bf16.msra.mxu0 %v15551_v30 }
 0x221   : > { %v718_v61 = vld [vmem:[%s16327_s24 + $0x1f8] sm:$0x11]  ;;  %v1258_v11 = vrot.slane %v19700_v62, 5  ;;  %v8405_v52 = vld [vmem:[%s16327_s24 + $0x118] sm:$0xee]  ;;  %11700 = vmatprep.subr.bf16.mxu0 %v15559_v3  ;;  %v13621_v30 = vcombine.high %v18574_v53, %v18578_v35  ;;  %v13620_v62 = vcombine.low %v18574_v53, %v18578_v35  ;;  %v2154_v43 = vrot.slane %v2152_v1, 5 }
 0x222   : > { %v15557_v33 = vld [vmem:[%s16276_s20 + $0x13e0] ss:$8 sps:$4 sm:$0xff]   ;;  %v1262_v42 = vshll.u32 %v718_v61, 16  ;;  %v8413_v28 = vld [vmem:[%s16327_s24 + $0x198] sm:$0xee]  ;;  %v1148_v60 = vrot.slane %v1147_v6, 4  ;;  %11662 = vmatmul.mubr.bf16.gmra.mrb[28].mxu0 %v13730_v24  ;;  %5476 = vmatpush1.bf16.msra.mxu1 %v15548_v36 }
 0x223   : > { %v18582_v9 = vld [vmem:[%s16327_s24 + $0x738] sm:$0xff]  ;;  %v1152_v58 = vrot.slane %v1150_v25, 5  ;;  %v1259_v37 = vor.u32 %v1258_v11, %v1255_v20  ;;  %v13505_v16 = vrot.slane %v8405_v52, 9  ;;  %v15554_v18 = vld [vmem:[%s16276_s20 + $0xfe0] ss:$8 sps:$4 sm:$0xff]   ;;  %v13513_v27 = vrot.slane %v8413_v28, 9  ;;  %5477 = vmatprep.subr.bf16.mxu1 %v15556_v40  ;;  %11704 = vmatprep.mubr.bf16.mxu0 %v13621_v30 }
 0x224   : > { %v2261_v21 = vshrl.u32 %v18582_v9, 16  ;;  %v15565_v32 = vld [vmem:[%s16276_s20 + $0x13f4] ss:$8 sps:$4 sm:$0xff]   ;;  %v1264_v22 = vrot.slane %v1262_v42, 5  ;;  %v2264_v50 = vshll.u32 %v18582_v9, 16  ;;  %v19701_v6 = vshrl.u32 %v18186_v31, 16  ;;  %11701 = vmatpush1.bf16.msra.mxu0 %v15557_v33  ;;  %5439 = vmatmul.mubr.bf16.gmra.mrb[28].mxu1 %v12842_v55 }
 0x225   : > { %v16061_v8 = vld [vmem:[%s16327_s24 + $0x158] sm:$0x11]  ;;  %v18596_v57 = vsel %vm16353_vm2, %v1148_v60, %v1152_v58  ;;  %v1260_v20 = vrot.slane %v1259_v37, 4  ;;  %v19702_v52 = vshll.u32 %v18186_v31, 16  ;;  %v1479_v42 = vrot.slane %v1477_v5, 4  ;;  %11702 = vmatprep.subr.bf16.mxu0 %v15565_v32  ;;  %5481 = vmatprep.mubr.bf16.mxu1 %v12733_v14 }
 0x226   : > { %v8851_v10 = vrot.slane %v16061_v8, 5  ;;  %v15562_v39 = vld [vmem:[%s16276_s20 + $0xff4] ss:$8 sps:$4 sm:$0xff]   ;;  %v1367_v25 = vrot.slane %v19701_v6, 4  ;;  %v15563_v3 = vld [vmem:[%s16276_s20 + $0x13f0] ss:$8 sps:$4 sm:$0xff]   ;;  %5478 = vmatpush1.bf16.msra.mxu1 %v15554_v18 }
 0x227   : > { %v16062_v46 = vld [vmem:[%s16327_s24 + $0x1d8] sm:$0x11]  ;;  %v18607_v11 = vsel %vm16353_vm2, %v1260_v20, %v1264_v22  ;;  %v1370_v24 = vrot.slane %v19702_v52, 5  ;;  %v15571_v36 = vld [vmem:[%s16276_s20 + $0x1404] ss:$8 sps:$4 sm:$0xff]   ;;  %v1482_v58 = vrot.slane %v1480_v54, 5  ;;  %5479 = vmatprep.subr.bf16.mxu1 %v15562_v39 }
 0x228   : > { %v8883_v61 = vrot.slane %v16062_v46, 5  ;;  %v12749_v33 = vcombine.high %v18596_v57, %v18607_v11  ;;  %v18618_v53 = vsel %vm17284_vm5, %v13505_v16, %v8851_v10  ;;  %v12748_v31 = vcombine.low %v18596_v57, %v18607_v11  ;;  %v726_v35 = vld [vmem:[%s16327_s24 + $0x278] sm:$0x11]  ;;  %v8421_v32 = vld [vmem:[%s16327_s24 + $0x218] sm:$0xee]  ;;  %11703 = vmatpush1.bf16.msra.mxu0 %v15563_v3 }
 0x229   : > { %v734_v28 = vld [vmem:[%s16327_s24 + $0x2f8] sm:$0x11]  ;;  %v1371_v5 = vor.u32 %v1370_v24, %v1367_v25  ;;  %v1374_v40 = vshll.u32 %v726_v35, 16  ;;  %v8429_v16 = vld [vmem:[%s16327_s24 + $0x298] sm:$0xee]  ;;  %v13521_v8 = vrot.slane %v8421_v32, 9  ;;  %v1483_v15 = vor.u32 %v1482_v58, %v1479_v42  ;;  %11785 = vmatprep.subr.bf16.mxu0 %v15571_v36 }
 0x22a   : > { %v15560_v60 = vld [vmem:[%s16276_s20 + $0xff0] ss:$8 sps:$4 sm:$0xff]   ;;  %v1486_v37 = vshll.u32 %v734_v28, 16  ;;  %v18633_v22 = vsel %vm17284_vm5, %v13513_v27, %v8883_v61  ;;  %v15569_v13 = vld [vmem:[%s16276_s20 + $0x1400] ss:$8 sps:$4 sm:$0xff]   ;;  %v13529_v6 = vrot.slane %v8429_v16, 9 }
 0x22b   : > { %v16063_v10 = vld [vmem:[%s16327_s24 + $0x258] sm:$0x11]  ;;  %v1372_v54 = vrot.slane %v1371_v5, 4  ;;  %v1376_v29 = vrot.slane %v1374_v40, 5  ;;  %v15568_v27 = vld [vmem:[%s16276_s20 + $0x4] ss:$8 sps:$4 sm:$0xff]   ;;  %v13637_v18 = vcombine.high %v18618_v53, %v18633_v22  ;;  %11705 = vmatmul.mubr.bf16.vlgmr.msra.gmra.mrb[0].mxu0 %v13620_v62  ;;  %5480 = vmatpush1.bf16.msra.mxu1 %v15560_v60 }
 0x22c   : > { %v8915_v30 = vrot.slane %v16063_v10, 5  ;;  %v16064_v20 = vld [vmem:[%s16327_s24 + $0x2d8] sm:$0x11]  ;;  %v1488_v55 = vrot.slane %v1486_v37, 5  ;;  %v1484_v3 = vrot.slane %v1483_v15, 4  ;;  %v1591_v39 = vrot.slane %v1589_v63, 4  ;;  %11786 = vmatpush1.bf16.msra.mxu0 %v15569_v13  ;;  %7482 = vmatprep.subr.bf16.mxu1 %v15568_v27 }
 0x22d   : > { %v8947_v46 = vrot.slane %v16064_v20, 5  ;;  %v15577_v61 = vld [vmem:[%s16276_s20 + $0x1414] ss:$8 sps:$4 sm:$0xff]   ;;  %v18648_v25 = vsel %vm16353_vm2, %v1372_v54, %v1376_v29  ;;  %v15566_v52 = vld [vmem:[%s16276_s20] ss:$8 sps:$4 sm:$0xff]   ;;  %v1594_v24 = vrot.slane %v1592_v34, 5  ;;  %11714 = vmatprep.mubr.bf16.mxu0 %v13637_v18 }
 0x22e   : > { %v15574_v14 = vld [vmem:[%s16276_s20 + $0x14] ss:$8 sps:$4 sm:$0xff]   ;;  %v15575_v42 = vld [vmem:[%s16276_s20 + $0x1410] ss:$8 sps:$4 sm:$0xff]   ;;  %v15583_v36 = vld [vmem:[%s16276_s20 + $0x1424] ss:$8 sps:$4 sm:$0xff]   ;;  %v18660_v35 = vsel %vm16353_vm2, %v1484_v3, %v1488_v55  ;;  %v18664_v63 = vsel %vm17284_vm5, %v13521_v8, %v8915_v30  ;;  %11787 = vmatprep.subr.bf16.mxu0 %v15577_v61  ;;  %5482 = vmatmul.mubr.bf16.vlgmr.msra.gmra.mrb[0].mxu1 %v12732_v56  ;;  %v13636_v30 = vcombine.low %v18618_v53, %v18633_v22 }
 0x22f   : > { %v18668_v62 = vsel %vm17284_vm5, %v13529_v6, %v8947_v46  ;;  %v12765_v34 = vcombine.high %v18648_v25, %v18660_v35  ;;  %v12764_v28 = vcombine.low %v18648_v25, %v18660_v35  ;;  %v742_v60 = vld [vmem:[%s16327_s24 + $0x378] sm:$0x11]  ;;  %v1595_v40 = vor.u32 %v1594_v24, %v1591_v39  ;;  %v8437_v16 = vld [vmem:[%s16327_s24 + $0x318] sm:$0xee]  ;;  %v15580_v10 = vld [vmem:[%s16276_s20 + $0x24] ss:$8 sps:$4 sm:$0xff]   ;;  %7483 = vmatpush1.bf16.msra.mxu1 %v15566_v52 }
 0x230   : > { %v750_v5 = vld [vmem:[%s16327_s24 + $0x3f8] sm:$0x11]  ;;  %v1706_v58 = vrot.slane %v1704_v41, 5  ;;  %v1598_v51 = vshll.u32 %v742_v60, 16  ;;  %v8445_v8 = vld [vmem:[%s16327_s24 + $0x398] sm:$0xee]  ;;  %11788 = vmatpush1.bf16.msra.mxu0 %v15575_v42  ;;  %v13653_v13 = vcombine.high %v18664_v63, %v18668_v62  ;;  %7484 = vmatprep.subr.bf16.mxu1 %v15574_v14 }
 0x231   : > { %v15572_v37 = vld [vmem:[%s16276_s20 + $0x10] ss:$8 sps:$4 sm:$0xff]   ;;  %v1710_v32 = vshll.u32 %v750_v5, 16  ;;  %v15581_v20 = vld [vmem:[%s16276_s20 + $0x1420] ss:$8 sps:$4 sm:$0xff]   ;;  %v1596_v46 = vrot.slane %v1595_v40, 4  ;;  %5491 = vmatprep.mubr.bf16.mxu1 %v12749_v33  ;;  %11789 = vmatprep.subr.bf16.mxu0 %v15583_v36 }
 0x232   : > { %v1707_v59 = vor.u32 %v1706_v58, %v1703_v45  ;;  %v15589_v41 = vld [vmem:[%s16276_s20 + $0x1434] ss:$8 sps:$4 sm:$0xff]   ;;  %v1600_v54 = vrot.slane %v1598_v51, 5  ;;  %v13537_v2 = vrot.slane %v8437_v16, 9  ;;  %v13545_v22 = vrot.slane %v8445_v8, 9 }
 0x233   : > { %v1712_v29 = vrot.slane %v1710_v32, 5  ;;  %v16065_v56 = vld [vmem:[%s16327_s24 + $0x358] sm:$0x11]  ;;  %v1815_v15 = vrot.slane %v1813_v48, 4  ;;  %v1818_v33 = vrot.slane %v1816_v7, 5  ;;  %v1927_v6 = vrot.slane %v1925_v17, 4  ;;  %11715 = vmatmul.mubr.bf16.gmra.mrb[4].mxu0 %v13636_v30  ;;  %7485 = vmatpush1.bf16.msra.mxu1 %v15572_v37 }
 0x234   : > { %v1708_v23 = vrot.slane %v1707_v59, 4  ;;  %v8979_v53 = vrot.slane %v16065_v56, 5  ;;  %v18701_v55 = vsel %vm16353_vm2, %v1596_v46, %v1600_v54  ;;  %v16066_v27 = vld [vmem:[%s16327_s24 + $0x3d8] sm:$0x11]  ;;  %v15578_v18 = vld [vmem:[%s16276_s20 + $0x20] ss:$8 sps:$4 sm:$0xff]   ;;  %11790 = vmatpush1.bf16.msra.mxu0 %v15581_v20  ;;  %7486 = vmatprep.subr.bf16.mxu1 %v15580_v10  ;;  %v13652_v30 = vcombine.low %v18664_v63, %v18668_v62 }
 0x235   : > { %v9011_v61 = vrot.slane %v16066_v27, 5  ;;  %v15586_v3 = vld [vmem:[%s16276_s20 + $0x34] ss:$8 sps:$4 sm:$0xff]   ;;  %v1930_v39 = vrot.slane %v1928_v26, 5  ;;  %v15587_v7 = vld [vmem:[%s16276_s20 + $0x1430] ss:$8 sps:$4 sm:$0xff]   ;;  %v1819_v42 = vor.u32 %v1818_v33, %v1815_v15  ;;  %11791 = vmatprep.subr.bf16.mxu0 %v15589_v41  ;;  %11724 = vmatprep.mubr.bf16.mxu0 %v13653_v13 }
 0x236   : > { %v18712_v48 = vsel %vm16353_vm2, %v1708_v23, %v1712_v29  ;;  %v18717_v52 = vld [vmem:[%s16327_s24 + $0x7b8] sm:$0xff]  ;;  %v15595_v17 = vld [vmem:[%s16276_s20 + $0x1444] ss:$8 sps:$4 sm:$0xff]   ;;  %v18728_v4 = vsel %vm17284_vm5, %v13537_v2, %v8979_v53  ;;  %5492 = vmatmul.mubr.bf16.gmra.mrb[4].mxu1 %v12748_v31  ;;  %v15593_v59 = vld [vmem:[%s16276_s20 + $0x1440] ss:$8 sps:$4 sm:$0xff]   ;;  %v2039_v62 = vrot.slane %v2037_v47, 4 }
 0x237   : > { %v2373_v49 = vshrl.u32 %v18717_v52, 16  ;;  %v12781_v14 = vcombine.high %v18701_v55, %v18712_v48  ;;  %v12780_v24 = vcombine.low %v18701_v55, %v18712_v48  ;;  %v758_v26 = vld [vmem:[%s16327_s24 + $0x578] sm:$0x11]  ;;  %v1931_v45 = vor.u32 %v1930_v39, %v1927_v6  ;;  %v8453_v60 = vld [vmem:[%s16327_s24 + $0x518] sm:$0xee]  ;;  %7487 = vmatpush1.bf16.msra.mxu1 %v15578_v18  ;;  %5501 = vmatprep.mubr.bf16.mxu1 %v12765_v34 }
 0x238   : > { %v766_v36 = vld [vmem:[%s16327_s24 + $0x5f8] sm:$0x11]  ;;  %v18736_v40 = vsel %vm17284_vm5, %v13545_v22, %v9011_v61  ;;  %v1820_v58 = vrot.slane %v1819_v42, 4  ;;  %v1822_v37 = vshll.u32 %v758_v26, 16  ;;  %v8461_v32 = vld [vmem:[%s16327_s24 + $0x598] sm:$0xee]  ;;  %11792 = vmatpush1.bf16.msra.mxu0 %v15587_v7  ;;  %7488 = vmatprep.subr.bf16.mxu1 %v15586_v3 }
 0x239   : > { %v15584_v5 = vld [vmem:[%s16276_s20 + $0x30] ss:$8 sps:$4 sm:$0xff]   ;;  %v1934_v51 = vshll.u32 %v766_v36, 16  ;;  %v2376_v16 = vshll.u32 %v18717_v52, 16  ;;  %v1932_v20 = vrot.slane %v1931_v45, 4  ;;  %v13669_v57 = vcombine.high %v18728_v4, %v18736_v40  ;;  %11793 = vmatprep.subr.bf16.mxu0 %v15595_v17 }
 0x23a   : > { %v18741_v8 = vld [vmem:[%s16327_s24 + $0x838] sm:$0xff]  ;;  %v15592_v46 = vld [vmem:[%s16276_s20 + $0x44] ss:$8 sps:$4 sm:$0xff]   ;;  %v1824_v41 = vrot.slane %v1822_v37, 5  ;;  %v13553_v11 = vrot.slane %v8453_v60, 9  ;;  %v13561_v2 = vrot.slane %v8461_v32, 9  ;;  %v13668_v19 = vcombine.low %v18728_v4, %v18736_v40 }
 0x23b   : > { %v2485_v10 = vshrl.u32 %v18741_v8, 16  ;;  %v1936_v13 = vrot.slane %v1934_v51, 5  ;;  %v15601_v54 = vld [vmem:[%s16276_s20 + $0x1454] ss:$8 sps:$4 sm:$0xff]   ;;  %v15590_v53 = vld [vmem:[%s16276_s20 + $0x40] ss:$8 sps:$4 sm:$0xff]   ;;  %11725 = vmatmul.mubr.bf16.gmra.mrb[8].mxu0 %v13652_v30  ;;  %7489 = vmatpush1.bf16.msra.mxu1 %v15584_v5 }
 0x23c   : > { %v16069_v31 = vld [vmem:[%s16327_s24 + $0x558] sm:$0x11]  ;;  %v18762_v29 = vsel %vm16353_vm2, %v1820_v58, %v1824_v41  ;;  %v2042_v15 = vrot.slane %v2040_v38, 5  ;;  %v2151_v27 = vrot.slane %v2149_v44, 4  ;;  %11794 = vmatpush1.bf16.msra.mxu0 %v15593_v59  ;;  %7490 = vmatprep.subr.bf16.mxu1 %v15592_v46  ;;  %v15607_v18 = vld [vmem:[%s16276_s20 + $0x1464] ss:$8 sps:$4 sm:$0xff]  }
 0x23d   : > { %v9043_v63 = vrot.slane %v16069_v31, 5  ;;  %v18766_v34 = vsel %vm16353_vm2, %v1932_v20, %v1936_v13  ;;  %v16070_v23 = vld [vmem:[%s16327_s24 + $0x5d8] sm:$0x11]  ;;  %11795 = vmatprep.subr.bf16.mxu0 %v15601_v54  ;;  %v2488_v38 = vshll.u32 %v18741_v8, 16  ;;  %11734 = vmatprep.mubr.bf16.mxu0 %v13669_v57  ;;  %v8469_v36 = vld [vmem:[%s16327_s24 + $0x618] sm:$0xee] }
 0x23e   : > { %v9075_v56 = vrot.slane %v16070_v23, 5  ;;  %v12797_v47 = vcombine.high %v18762_v29, %v18766_v34  ;;  %v12796_v22 = vcombine.low %v18762_v29, %v18766_v34  ;;  %v15598_v61 = vld [vmem:[%s16276_s20 + $0x54] ss:$8 sps:$4 sm:$0xff]   ;;  %v15599_v33 = vld [vmem:[%s16276_s20 + $0x1450] ss:$8 sps:$4 sm:$0xff]   ;;  %v2043_v39 = vor.u32 %v2042_v15, %v2039_v62  ;;  %5502 = vmatmul.mubr.bf16.gmra.mrb[8].mxu1 %v12764_v28 }
 0x23f   : > { %v774_v6 = vld [vmem:[%s16327_s24 + $0x678] sm:$0x11]  ;;  %v18789_v17 = vsel %vm17284_vm5, %v13553_v11, %v9043_v63  ;;  %v8477_v45 = vld [vmem:[%s16327_s24 + $0x698] sm:$0xee]  ;;  %v2155_v5 = vor.u32 %v2154_v43, %v2151_v27  ;;  %7491 = vmatpush1.bf16.msra.mxu1 %v15590_v53  ;;  %v15604_v58 = vld [vmem:[%s16276_s20 + $0x64] ss:$8 sps:$4 sm:$0xff]   ;;  %5511 = vmatprep.mubr.bf16.mxu1 %v12781_v14 }
 0x240   : > { %v782_v3 = vld [vmem:[%s16327_s24 + $0x6f8] sm:$0x11]  ;;  %v2046_v7 = vshll.u32 %v774_v6, 16  ;;  %v18793_v42 = vsel %vm17284_vm5, %v13561_v2, %v9075_v56  ;;  %v2044_v1 = vrot.slane %v2043_v39, 4  ;;  %11796 = vmatpush1.bf16.msra.mxu0 %v15599_v33  ;;  %v15605_v37 = vld [vmem:[%s16276_s20 + $0x1460] ss:$8 sps:$4 sm:$0xff]   ;;  %7492 = vmatprep.subr.bf16.mxu1 %v15598_v61 }
 0x241   : > { %v15596_v44 = vld [vmem:[%s16276_s20 + $0x50] ss:$8 sps:$4 sm:$0xff]   ;;  %v2158_v26 = vshll.u32 %v782_v3, 16  ;;  %v15613_v25 = vld [vmem:[%s16276_s20 + $0x1474] ss:$8 sps:$4 sm:$0xff]   ;;  %v13685_v35 = vcombine.high %v18789_v17, %v18793_v42  ;;  %v2156_v4 = vrot.slane %v2155_v5, 4  ;;  %11797 = vmatprep.subr.bf16.mxu0 %v15607_v18  ;;  %v13684_v27 = vcombine.low %v18789_v17, %v18793_v42 }
 0x242   : > { %v2048_v60 = vrot.slane %v2046_v7, 5  ;;  %v13569_v40 = vrot.slane %v8469_v36, 9  ;;  %v16071_v32 = vld [vmem:[%s16327_s24 + $0x658] sm:$0x11]  ;;  %v13577_v20 = vrot.slane %v8477_v45, 9  ;;  %v2263_v59 = vrot.slane %v2261_v21, 4 }
 0x243   : > { %v2160_v51 = vrot.slane %v2158_v26, 5  ;;  %v9107_v30 = vrot.slane %v16071_v32, 5  ;;  %v16072_v46 = vld [vmem:[%s16327_s24 + $0x6d8] sm:$0x11]  ;;  %v15602_v41 = vld [vmem:[%s16276_s20 + $0x60] ss:$8 sps:$4 sm:$0xff]   ;;  %11735 = vmatmul.mubr.bf16.gmra.mrb[12].mxu0 %v13668_v19  ;;  %7493 = vmatpush1.bf16.msra.mxu1 %v15596_v44 }
 0x244   : > { %v18812_v28 = vsel %vm16353_vm2, %v2044_v1, %v2048_v60  ;;  %v9139_v14 = vrot.slane %v16072_v46, 5  ;;  %v2266_v54 = vrot.slane %v2264_v50, 5  ;;  %v2375_v57 = vrot.slane %v2373_v49, 4  ;;  %11798 = vmatpush1.bf16.msra.mxu0 %v15605_v37  ;;  %v15611_v11 = vld [vmem:[%s16276_s20 + $0x1470] ss:$8 sps:$4 sm:$0xff]   ;;  %7494 = vmatprep.subr.bf16.mxu1 %v15604_v58 }
 0x245   : > { %v18821_v13 = vsel %vm16353_vm2, %v2156_v4, %v2160_v51  ;;  %v790_v63 = vld [vmem:[%s16327_s24 + $0x778] sm:$0x11]  ;;  %11799 = vmatprep.subr.bf16.mxu0 %v15613_v25  ;;  %v2378_v49 = vrot.slane %v2376_v16, 5  ;;  %11744 = vmatprep.mubr.bf16.mxu0 %v13685_v35  ;;  %v15619_v61 = vld [vmem:[%s16276_s20 + $0x1484] ss:$8 sps:$4 sm:$0xff]   ;;  %v18844_v33 = vsel %vm17284_vm5, %v13569_v40, %v9107_v30  ;;  %v2487_v42 = vrot.slane %v2485_v10, 4 }
 0x246   : > { %v12813_v21 = vcombine.high %v18812_v28, %v18821_v13  ;;  %v12812_v31 = vcombine.low %v18812_v28, %v18821_v13  ;;  %v798_v62 = vld [vmem:[%s16327_s24 + $0x7f8] sm:$0x11]  ;;  %v2267_v50 = vor.u32 %v2266_v54, %v2263_v59  ;;  %v2270_v2 = vshll.u32 %v790_v63, 16  ;;  %5512 = vmatmul.mubr.bf16.gmra.mrb[12].mxu1 %v12780_v24  ;;  %v15616_v16 = vld [vmem:[%s16276_s20 + $0x84] ss:$8 sps:$4 sm:$0xff]  }
 0x247   : > { %v15610_v9 = vld [vmem:[%s16276_s20 + $0x74] ss:$8 sps:$4 sm:$0xff]   ;;  %v2382_v23 = vshll.u32 %v798_v62, 16  ;;  %v15608_v15 = vld [vmem:[%s16276_s20 + $0x70] ss:$8 sps:$4 sm:$0xff]   ;;  %v18848_v52 = vsel %vm17284_vm5, %v13577_v20, %v9139_v14  ;;  %v2379_v3 = vor.u32 %v2378_v49, %v2375_v57  ;;  %7495 = vmatpush1.bf16.msra.mxu1 %v15602_v41  ;;  %5521 = vmatprep.mubr.bf16.mxu1 %v12797_v47  ;;  %v2490_v1 = vrot.slane %v2488_v38, 5 }
 0x248   : > { %v16073_v56 = vld [vmem:[%s16327_s24 + $0x8b8] sm:$0xff]  ;;  %v2268_v6 = vrot.slane %v2267_v50, 4  ;;  %v2272_v18 = vrot.slane %v2270_v2, 5  ;;  %11800 = vmatpush1.bf16.msra.mxu0 %v15611_v11  ;;  %v15617_v44 = vld [vmem:[%s16276_s20 + $0x1480] ss:$8 sps:$4 sm:$0xff]   ;;  %7496 = vmatprep.subr.bf16.mxu1 %v15610_v9  ;;  %v13701_v36 = vcombine.high %v18844_v33, %v18848_v52  ;;  %v13700_v14 = vcombine.low %v18844_v33, %v18848_v52 }
 0x249   : > { %v2597_v53 = vshrl.u32 %v16073_v56, 16  ;;  %v2384_v39 = vrot.slane %v2382_v23, 5  ;;  %v8485_v7 = vld [vmem:[%s16327_s24 + $0x718] sm:$0xee]  ;;  %v2600_v43 = vshll.u32 %v16073_v56, 16  ;;  %v2380_v24 = vrot.slane %v2379_v3, 4  ;;  %11801 = vmatprep.subr.bf16.mxu0 %v15619_v61 }
 0x24a   : > { %v8493_v17 = vld [vmem:[%s16327_s24 + $0x798] sm:$0xee]  ;;  %v18863_v48 = vsel %vm16353_vm2, %v2268_v6, %v2272_v18  ;;  %v15614_v26 = vld [vmem:[%s16276_s20 + $0x80] ss:$8 sps:$4 sm:$0xff]   ;;  %v13585_v45 = vrot.slane %v8485_v7, 9  ;;  %v2491_v4 = vor.u32 %v2490_v1, %v2487_v42 }
 0x24b   : > { %v15625_v55 = vld [vmem:[%s16276_s20 + $0x1494] ss:$8 sps:$4 sm:$0xff]   ;;  %11745 = vmatmul.mubr.bf16.gmra.mrb[16].mxu0 %v13684_v27  ;;  %v15623_v60 = vld [vmem:[%s16276_s20 + $0x1490] ss:$8 sps:$4 sm:$0xff]   ;;  %v18876_v5 = vsel %vm16353_vm2, %v2380_v24, %v2384_v39  ;;  %v13593_v10 = vrot.slane %v8493_v17, 9  ;;  %v2599_v51 = vrot.slane %v2597_v53, 4  ;;  %7497 = vmatpush1.bf16.msra.mxu1 %v15608_v15 }
 0x24c   : > { %v16074_v19 = vld [vmem:[%s16327_s24 + $0x758] sm:$0x11]  ;;  %11802 = vmatpush1.bf16.msra.mxu0 %v15617_v44  ;;  %v12829_v25 = vcombine.high %v18863_v48, %v18876_v5  ;;  %v12828_v8 = vcombine.low %v18863_v48, %v18876_v5  ;;  %v2602_v40 = vrot.slane %v2600_v43, 5  ;;  %7498 = vmatprep.subr.bf16.mxu1 %v15616_v16  ;;  %v15631_v59 = vld [vmem:[%s16276_s20 + $0x14a4] ss:$8 sps:$4 sm:$0xff]   ;;  %v2492_v41 = vrot.slane %v2491_v4, 4 }
 0x24d   : > { %v9171_v47 = vrot.slane %v16074_v19, 5  ;;  %v16075_v58 = vld [vmem:[%s16327_s24 + $0x7d8] sm:$0x11]  ;;  %11803 = vmatprep.subr.bf16.mxu0 %v15625_v55  ;;  %11754 = vmatprep.mubr.bf16.mxu0 %v13701_v36  ;;  %v15628_v57 = vld [vmem:[%s16276_s20 + $0xa4] ss:$8 sps:$4 sm:$0xff]  }
 0x24e   : > { %v9203_v37 = vrot.slane %v16075_v58, 5  ;;  %v806_v38 = vld [vmem:[%s16327_s24 + $0x878] sm:$0x11]  ;;  %v2603_v54 = vor.u32 %v2602_v40, %v2599_v51  ;;  %5522 = vmatmul.mubr.bf16.gmra.mrb[16].mxu1 %v12796_v22  ;;  %v15629_v11 = vld [vmem:[%s16276_s20 + $0x14a0] ss:$8 sps:$4 sm:$0xff]  }
 0x24f   : > { %v814_v35 = vld [vmem:[%s16327_s24 + $0x8f8] sm:$0x11]  ;;  %v2494_v30 = vshll.u32 %v806_v38, 16  ;;  %v9172_v63 = vsel %vm17284_vm5, %v13585_v45, %v9171_v47  ;;  %v8501_v2 = vld [vmem:[%s16327_s24 + $0x818] sm:$0xee]  ;;  %7499 = vmatpush1.bf16.msra.mxu1 %v15614_v26  ;;  %5531 = vmatprep.mubr.bf16.mxu1 %v12813_v21 }
 0x250   : > { %v15622_v32 = vld [vmem:[%s16276_s20 + $0x94] ss:$8 sps:$4 sm:$0xff]   ;;  %v2606_v20 = vshll.u32 %v814_v35, 16  ;;  %v15620_v46 = vld [vmem:[%s16276_s20 + $0x90] ss:$8 sps:$4 sm:$0xff]   ;;  %v9204_v62 = vsel %vm17284_vm5, %v13593_v10, %v9203_v37  ;;  %11804 = vmatpush1.bf16.msra.mxu0 %v15623_v60  ;;  %v2604_v49 = vrot.slane %v2603_v54, 4 }
 0x251   : > { %v2496_v9 = vrot.slane %v2494_v30, 5  ;;  %v8509_v23 = vld [vmem:[%s16327_s24 + $0x898] sm:$0xee]  ;;  %7500 = vmatprep.subr.bf16.mxu1 %v15622_v32  ;;  %11805 = vmatprep.subr.bf16.mxu0 %v15631_v59  ;;  %v13717_v22 = vcombine.high %v9172_v63, %v9204_v62  ;;  %v13601_v53 = vrot.slane %v8501_v2, 9  ;;  %v16076_v15 = vld [vmem:[%s16327_s24 + $0x858] sm:$0x11]  ;;  %v13716_v7 = vcombine.low %v9172_v63, %v9204_v62 }
 0x252   : > { %v2608_v50 = vrot.slane %v2606_v20, 5  ;;  %v15637_v29 = vld [vmem:[%s16276_s20 + $0x14b4] ss:$8 sps:$4 sm:$0xff]   ;;  %v9235_v27 = vrot.slane %v16076_v15, 5  ;;  %v13609_v61 = vrot.slane %v8509_v23, 9  ;;  %v16083_v63 = vld [vmem:[%s16327_s24 + $0x80] sm:$0xff] }
 0x253   : > { %v18907_v34 = vsel %vm16353_vm2, %v2492_v41, %v2496_v9  ;;  %11755 = vmatmul.mubr.bf16.gmra.mrb[20].mxu0 %v13700_v14  ;;  %v16077_v33 = vld [vmem:[%s16327_s24 + $0x8d8] sm:$0x11]  ;;  %7501 = vmatpush1.bf16.msra.mxu1 %v15620_v46  ;;  %v15643_v39 = vld [vmem:[%s16276_s20 + $0x14c4] ss:$8 sps:$4 sm:$0xff]   ;;  %v15641_v43 = vld [vmem:[%s16276_s20 + $0x14c0] ss:$8 sps:$4 sm:$0xff]  }
 0x254   : > { %v18911_v56 = vsel %vm16353_vm2, %v2604_v49, %v2608_v50  ;;  %v9267_v52 = vrot.slane %v16077_v33, 5  ;;  %11806 = vmatpush1.bf16.msra.mxu0 %v15629_v11  ;;  %v15635_v6 = vld [vmem:[%s16276_s20 + $0x14b0] ss:$8 sps:$4 sm:$0xff]   ;;  %7502 = vmatprep.subr.bf16.mxu1 %v15628_v57  ;;  %v15634_v18 = vld [vmem:[%s16276_s20 + $0xb4] ss:$8 sps:$4 sm:$0xff]   ;;  %v9236_v44 = vsel %vm17284_vm5, %v13601_v53, %v9235_v27  ;;  %v16082_v11 = vld [vmem:[%s16327_s24] sm:$0xff] }
 0x255   : > { %v12845_v21 = vcombine.high %v18907_v34, %v18911_v56  ;;  %v12844_v16 = vcombine.low %v18907_v34, %v18911_v56  ;;  %11807 = vmatprep.subr.bf16.mxu0 %v15637_v29  ;;  %v15632_v3 = vld [vmem:[%s16276_s20 + $0xb0] ss:$8 sps:$4 sm:$0xff]   ;;  %11764 = vmatprep.mubr.bf16.mxu0 %v13717_v22  ;;  %v8390_v55 = vld [vmem:[%s16327_s24 + $0x20] sm:$0xee]  ;;  %v15649_v13 = vld [vmem:[%s16276_s20 + $0x14d4] ss:$8 sps:$4 sm:$0xff]   ;;  %v13103_v62 = vcombine.high %v16082_v11, %v16083_v63 }
 0x256   : > { %5532 = vmatmul.mubr.bf16.gmra.mrb[20].mxu1 %v12812_v31  ;;  %v9268_v17 = vsel %vm17284_vm5, %v13609_v61, %v9267_v52  ;;  %v8398_v24 = vld [vmem:[%s16327_s24 + $0xa0] sm:$0xee]  ;;  %v13490_v42 = vrot.slane %v8390_v55, 9  ;;  %v16078_v26 = vld [vmem:[%s16327_s24 + $0x60] sm:$0x11]  ;;  %v13102_v56 = vcombine.low %v16082_v11, %v16083_v63 }
 0x257   : > { %7503 = vmatpush1.bf16.msra.mxu1 %v15626_v12  ;;  %5541 = vmatprep.mubr.bf16.mxu1 %v12829_v25  ;;  %v15640_v28 = vld [vmem:[%s16276_s20 + $0xc4] ss:$8 sps:$4 sm:$0xff]   ;;  %v13733_v31 = vcombine.high %v9236_v44, %v9268_v17  ;;  %v8791_v36 = vrot.slane %v16078_v26, 5  ;;  %v13498_v45 = vrot.slane %v8398_v24, 9  ;;  %v15638_v1 = vld [vmem:[%s16276_s20 + $0xc0] ss:$8 sps:$4 sm:$0xff]   ;;  %v13732_v25 = vcombine.low %v9236_v44, %v9268_v17 }
 0x258   : > { %11808 = vmatpush1.bf16.msra.mxu0 %v15635_v6  ;;  %7504 = vmatprep.subr.bf16.mxu1 %v15634_v18  ;;  %v16079_v19 = vld [vmem:[%s16327_s24 + $0xe0] sm:$0x11]  ;;  %v15647_v60 = vld [vmem:[%s16276_s20 + $0x14d0] ss:$8 sps:$4 sm:$0xff]   ;;  %v15646_v10 = vld [vmem:[%s16276_s20 + $0xd4] ss:$8 sps:$4 sm:$0xff]  }
 0x259   : > { %11809 = vmatprep.subr.bf16.mxu0 %v15643_v39  ;;  %v8823_v47 = vrot.slane %v16079_v19, 5  ;;  %v15644_v58 = vld [vmem:[%s16276_s20 + $0xd0] ss:$8 sps:$4 sm:$0xff]   ;;  %v15655_v37 = vld [vmem:[%s16276_s20 + $0x14e4] ss:$8 sps:$4 sm:$0xff]   ;;  %v8792_v35 = vsel %vm17284_vm5, %v13490_v42, %v8791_v36 }
 0x25a   : > { %v15652_v51 = vld [vmem:[%s16276_s20 + $0xe4] ss:$8 sps:$4 sm:$0xff]   ;;  %v15653_v38 = vld [vmem:[%s16276_s20 + $0x14e0] ss:$8 sps:$4 sm:$0xff]   ;;  %v15661_v48 = vld [vmem:[%s16276_s20 + $0x14f4] ss:$8 sps:$4 sm:$0xff]  }
 0x25b   : > { %11765 = vmatmul.mubr.bf16.gmra.mrb[24].mxu0 %v13716_v7  ;;  %7505 = vmatpush1.bf16.msra.mxu1 %v15632_v3  ;;  %v8824_v4 = vsel %vm17284_vm5, %v13498_v45, %v8823_v47  ;;  %v8406_v40 = vld [vmem:[%s16327_s24 + $0x120] sm:$0xee]  ;;  %v16080_v30 = vld [vmem:[%s16327_s24 + $0x160] sm:$0x11]  ;;  %v15659_v54 = vld [vmem:[%s16276_s20 + $0x14f0] ss:$8 sps:$4 sm:$0xff]  }
 0x25c   : > { %11810 = vmatpush1.bf16.msra.mxu0 %v15641_v43  ;;  %7506 = vmatprep.subr.bf16.mxu1 %v15640_v28  ;;  %v8414_v32 = vld [vmem:[%s16327_s24 + $0x1a0] sm:$0xee]  ;;  %v13623_v5 = vcombine.high %v8792_v35, %v8824_v4  ;;  %v8855_v20 = vrot.slane %v16080_v30, 5  ;;  %v16081_v14 = vld [vmem:[%s16327_s24 + $0x1e0] sm:$0x11]  ;;  %v13622_v2 = vcombine.low %v8792_v35, %v8824_v4 }
 0x25d   : > { %11811 = vmatprep.subr.bf16.mxu0 %v15649_v13  ;;  %11774 = vmatprep.mubr.bf16.mxu0 %v13733_v31  ;;  %v13514_v46 = vrot.slane %v8414_v32, 9  ;;  %v8887_v59 = vrot.slane %v16081_v14, 5  ;;  %v15650_v41 = vld [vmem:[%s16276_s20 + $0xe0] ss:$8 sps:$4 sm:$0xff]   ;;  %v15658_v57 = vld [vmem:[%s16276_s20 + $0xf4] ss:$8 sps:$4 sm:$0xff]  }
 0x25e   : > { %5542 = vmatmul.mubr.bf16.gmra.mrb[24].mxu1 %v12828_v8  ;;  %v13506_v8 = vrot.slane %v8406_v40, 9  ;;  %v15656_v9 = vld [vmem:[%s16276_s20 + $0xf0] ss:$8 sps:$4 sm:$0xff]   ;;  %v15667_v50 = vld [vmem:[%s16276_s20 + $0x1504] ss:$8 sps:$4 sm:$0xff]  }
 0x25f   : > { %7507 = vmatpush1.bf16.msra.mxu1 %v15638_v1  ;;  %5551 = vmatprep.mubr.bf16.mxu1 %v12845_v21  ;;  %v15664_v49 = vld [vmem:[%s16276_s20 + $0x104] ss:$8 sps:$4 sm:$0xff]   ;;  %v15665_v23 = vld [vmem:[%s16276_s20 + $0x1500] ss:$8 sps:$4 sm:$0xff]   ;;  %v8888_v22 = vsel %vm17284_vm5, %v13514_v46, %v8887_v59  ;;  %v15673_v34 = vld [vmem:[%s16276_s20 + $0x1514] ss:$8 sps:$4 sm:$0xff]  }
 0x260   : > { %11812 = vmatpush1.bf16.msra.mxu0 %v15647_v60  ;;  %7508 = vmatprep.subr.bf16.mxu1 %v15646_v10  ;;  %v8856_v29 = vsel %vm17284_vm5, %v13506_v8, %v8855_v20  ;;  %v8422_v53 = vld [vmem:[%s16327_s24 + $0x220] sm:$0xee]  ;;  %v16084_v61 = vld [vmem:[%s16327_s24 + $0x260] sm:$0x11]  ;;  %v15671_v18 = vld [vmem:[%s16276_s20 + $0x1510] ss:$8 sps:$4 sm:$0xff]  }
 0x261   : > { %11813 = vmatprep.subr.bf16.mxu0 %v15655_v37  ;;  %v8430_v15 = vld [vmem:[%s16327_s24 + $0x2a0] sm:$0xee]  ;;  %v13639_v27 = vcombine.high %v8856_v29, %v8888_v22  ;;  %v13522_v21 = vrot.slane %v8422_v53, 9  ;;  %v8919_v33 = vrot.slane %v16084_v61, 5  ;;  %v15670_v3 = vld [vmem:[%s16276_s20 + $0x114] ss:$8 sps:$4 sm:$0xff]   ;;  %v13638_v55 = vcombine.low %v8856_v29, %v8888_v22 }
 0x262   : > { %v13530_v52 = vrot.slane %v8430_v15, 9  ;;  %v15662_v6 = vld [vmem:[%s16276_s20 + $0x100] ss:$8 sps:$4 sm:$0xff]   ;;  %v15668_v44 = vld [vmem:[%s16276_s20 + $0x110] ss:$8 sps:$4 sm:$0xff]  }
 0x263   : > { %11775 = vmatmul.mubr.bf16.gmra.mrb[28].mxu0 %v13732_v25  ;;  %7509 = vmatpush1.bf16.msra.mxu1 %v15644_v58  ;;  %v16086_v39 = vld [vmem:[%s16327_s24 + $0x100] sm:$0xff]  ;;  %v8920_v28 = vsel %vm17284_vm5, %v13522_v21, %v8919_v33  ;;  %v15685_v36 = vld [vmem:[%s16276_s20 + $0x1534] ss:$8 sps:$4 sm:$0xff]   ;;  %v15683_v25 = vld [vmem:[%s16276_s20 + $0x1530] ss:$8 sps:$4 sm:$0xff]  }
 0x264   : > { %11814 = vmatpush1.bf16.msra.mxu0 %v15653_v38  ;;  %7510 = vmatprep.subr.bf16.mxu1 %v15652_v51  ;;  %v16087_v7 = vld [vmem:[%s16327_s24 + $0x180] sm:$0xff]  ;;  %v15682_v38 = vld [vmem:[%s16276_s20 + $0x134] ss:$8 sps:$4 sm:$0xff]   ;;  %v15680_v32 = vld [vmem:[%s16276_s20 + $0x130] ss:$8 sps:$4 sm:$0xff]  }
 0x265   : > { %11815 = vmatprep.subr.bf16.mxu0 %v15661_v48  ;;  %11817 = vmatprep.mubr.bf16.mxu0 %v13623_v5  ;;  %v13119_v43 = vcombine.high %v16086_v39, %v16087_v7  ;;  %v15679_v17 = vld [vmem:[%s16276_s20 + $0x1524] ss:$8 sps:$4 sm:$0xff]   ;;  %v15677_v24 = vld [vmem:[%s16276_s20 + $0x1520] ss:$8 sps:$4 sm:$0xff]   ;;  %v13118_v45 = vcombine.low %v16086_v39, %v16087_v7  ;;  %v15694_v29 = vld [vmem:[%s16276_s20 + $0x154] ss:$8 sps:$4 sm:$0xff]  }
 0x266   : > { %5552 = vmatmul.mubr.bf16.gmra.mrb[28].mxu1 %v12844_v16  ;;  %v16085_v16 = vld [vmem:[%s16327_s24 + $0x2e0] sm:$0x11]  ;;  %v8438_v31 = vld [vmem:[%s16327_s24 + $0x320] sm:$0xee] }
 0x267   : > { %7511 = vmatpush1.bf16.msra.mxu1 %v15650_v41  ;;  %7514 = vmatprep.mubr.bf16.mxu1 %v13103_v62  ;;  %v8951_v12 = vrot.slane %v16085_v16, 5  ;;  %v8446_v42 = vld [vmem:[%s16327_s24 + $0x3a0] sm:$0xee]  ;;  %v13538_v47 = vrot.slane %v8438_v31, 9  ;;  %v16088_v1 = vld [vmem:[%s16327_s24 + $0x360] sm:$0x11] }
 0x268   : > { %11816 = vmatpush1.bf16.msra.mxu0 %v15659_v54  ;;  %7512 = vmatprep.subr.bf16.mxu1 %v15658_v57  ;;  %v15676_v26 = vld [vmem:[%s16276_s20 + $0x124] ss:$8 sps:$4 sm:$0xff]   ;;  %v8983_v60 = vrot.slane %v16088_v1, 5  ;;  %v13546_v10 = vrot.slane %v8446_v42, 9  ;;  %v15674_v51 = vld [vmem:[%s16276_s20 + $0x120] ss:$8 sps:$4 sm:$0xff]  }
 0x269   : > { %11898 = vmatprep.subr.bf16.mxu0 %v15667_v50  ;;  %v8952_v13 = vsel %vm17284_vm5, %v13530_v52, %v8951_v12  ;;  %v16089_v58 = vld [vmem:[%s16327_s24 + $0x3e0] sm:$0x11]  ;;  %v8454_v14 = vld [vmem:[%s16327_s24 + $0x520] sm:$0xee]  ;;  %v15697_v41 = vld [vmem:[%s16276_s20 + $0x1554] ss:$8 sps:$4 sm:$0xff]  }
 0x26a   : > { %v13655_v19 = vcombine.high %v8920_v28, %v8952_v13  ;;  %v9015_v37 = vrot.slane %v16089_v58, 5  ;;  %v16090_v35 = vld [vmem:[%s16327_s24 + $0x200] sm:$0xff]  ;;  %v13654_v8 = vcombine.low %v8920_v28, %v8952_v13  ;;  %v8984_v20 = vsel %vm17284_vm5, %v13538_v47, %v8983_v60  ;;  %v15707_v28 = vld [vmem:[%s16276_s20 + $0x1570] ss:$8 sps:$4 sm:$0xff]   ;;  %v15706_v13 = vld [vmem:[%s16276_s20 + $0x174] ss:$8 sps:$4 sm:$0xff]  }
 0x26b   : > { %11818 = vmatmul.mubr.bf16.vlgmr.msra.gmra.mrb[0].mxu0 %v13622_v2  ;;  %7513 = vmatpush1.bf16.msra.mxu1 %v15656_v9  ;;  %v16091_v4 = vld [vmem:[%s16327_s24 + $0x280] sm:$0xff]  ;;  %v13554_v11 = vrot.slane %v8454_v14, 9 }
 0x26c   : > { %11899 = vmatpush1.bf16.msra.mxu0 %v15665_v23  ;;  %7595 = vmatprep.subr.bf16.mxu1 %v15664_v49  ;;  %v13135_v40 = vcombine.high %v16090_v35, %v16091_v4  ;;  %v15691_v48 = vld [vmem:[%s16276_s20 + $0x1544] ss:$8 sps:$4 sm:$0xff]   ;;  %v15689_v30 = vld [vmem:[%s16276_s20 + $0x1540] ss:$8 sps:$4 sm:$0xff]   ;;  %v9016_v46 = vsel %vm17284_vm5, %v13546_v10, %v9015_v37  ;;  %v13134_v54 = vcombine.low %v16090_v35, %v16091_v4  ;;  %v15695_v23 = vld [vmem:[%s16276_s20 + $0x1550] ss:$8 sps:$4 sm:$0xff]  }
 0x26d   : > { %11900 = vmatprep.subr.bf16.mxu0 %v15673_v34  ;;  %11827 = vmatprep.mubr.bf16.mxu0 %v13639_v27  ;;  %v15688_v5 = vld [vmem:[%s16276_s20 + $0x144] ss:$8 sps:$4 sm:$0xff]   ;;  %v13671_v57 = vcombine.high %v8984_v20, %v9016_v46  ;;  %v15686_v49 = vld [vmem:[%s16276_s20 + $0x140] ss:$8 sps:$4 sm:$0xff]   ;;  %v15692_v34 = vld [vmem:[%s16276_s20 + $0x150] ss:$8 sps:$4 sm:$0xff]   ;;  %v13670_v21 = vcombine.low %v8984_v20, %v9016_v46 }
 0x26e   : > { %7515 = vmatmul.mubr.bf16.vlgmr.msra.gmra.mrb[0].mxu1 %v13102_v56  ;;  %v8462_v59 = vld [vmem:[%s16327_s24 + $0x5a0] sm:$0xee]  ;;  %v16092_v63 = vld [vmem:[%s16327_s24 + $0x560] sm:$0x11]  ;;  %v15718_v20 = vld [vmem:[%s16276_s20 + $0x194] ss:$8 sps:$4 sm:$0xff]  }
 0x26f   : > { %7596 = vmatpush1.bf16.msra.mxu1 %v15662_v6  ;;  %7524 = vmatprep.mubr.bf16.mxu1 %v13119_v43  ;;  %v9047_v62 = vrot.slane %v16092_v63, 5  ;;  %v13562_v9 = vrot.slane %v8462_v59, 9  ;;  %v16093_v50 = vld [vmem:[%s16327_s24 + $0x5e0] sm:$0x11]  ;;  %v8470_v16 = vld [vmem:[%s16327_s24 + $0x620] sm:$0xee] }
 0x270   : > { %11901 = vmatpush1.bf16.msra.mxu0 %v15671_v18  ;;  %7597 = vmatprep.subr.bf16.mxu1 %v15670_v3  ;;  %v9079_v2 = vrot.slane %v16093_v50, 5  ;;  %v16094_v22 = vld [vmem:[%s16327_s24 + $0x300] sm:$0xff]  ;;  %v15709_v6 = vld [vmem:[%s16276_s20 + $0x1574] ss:$8 sps:$4 sm:$0xff]   ;;  %v13570_v39 = vrot.slane %v8470_v16, 9 }
 0x271   : > { %11902 = vmatprep.subr.bf16.mxu0 %v15679_v17  ;;  %v16095_v53 = vld [vmem:[%s16327_s24 + $0x380] sm:$0xff]  ;;  %v9048_v33 = vsel %vm17284_vm5, %v13554_v11, %v9047_v62 }
 0x272   : > { %v13151_v15 = vcombine.high %v16094_v22, %v16095_v53  ;;  %v15703_v56 = vld [vmem:[%s16276_s20 + $0x1564] ss:$8 sps:$4 sm:$0xff]   ;;  %v15701_v61 = vld [vmem:[%s16276_s20 + $0x1560] ss:$8 sps:$4 sm:$0xff]   ;;  %v9080_v52 = vsel %vm17284_vm5, %v13562_v9, %v9079_v2  ;;  %v13150_v18 = vcombine.low %v16094_v22, %v16095_v53 }
 0x273   : > { %11828 = vmatmul.mubr.bf16.gmra.mrb[4].mxu0 %v13638_v55  ;;  %7598 = vmatpush1.bf16.msra.mxu1 %v15668_v44  ;;  %v15700_v27 = vld [vmem:[%s16276_s20 + $0x164] ss:$8 sps:$4 sm:$0xff]   ;;  %v13687_v3 = vcombine.high %v9048_v33, %v9080_v52  ;;  %v15713_v47 = vld [vmem:[%s16276_s20 + $0x1580] ss:$8 sps:$4 sm:$0xff]  }
 0x274   : > { %11903 = vmatpush1.bf16.msra.mxu0 %v15677_v24  ;;  %7599 = vmatprep.subr.bf16.mxu1 %v15676_v26  ;;  %v8478_v12 = vld [vmem:[%s16327_s24 + $0x6a0] sm:$0xee]  ;;  %v16096_v7 = vld [vmem:[%s16327_s24 + $0x660] sm:$0x11] }
 0x275   : > { %11904 = vmatprep.subr.bf16.mxu0 %v15685_v36  ;;  %11837 = vmatprep.mubr.bf16.mxu0 %v13655_v19  ;;  %v9111_v43 = vrot.slane %v16096_v7, 5  ;;  %v13578_v44 = vrot.slane %v8478_v12, 9  ;;  %v16097_v17 = vld [vmem:[%s16327_s24 + $0x6e0] sm:$0x11]  ;;  %v15704_v36 = vld [vmem:[%s16276_s20 + $0x170] ss:$8 sps:$4 sm:$0xff]   ;;  %v13686_v19 = vcombine.low %v9048_v33, %v9080_v52 }
 0x276   : > { %7525 = vmatmul.mubr.bf16.gmra.mrb[4].mxu1 %v13118_v45  ;;  %v9143_v55 = vrot.slane %v16097_v17, 5  ;;  %v15698_v24 = vld [vmem:[%s16276_s20 + $0x160] ss:$8 sps:$4 sm:$0xff]   ;;  %v15715_v45 = vld [vmem:[%s16276_s20 + $0x1584] ss:$8 sps:$4 sm:$0xff]  }
 0x277   : > { %7600 = vmatpush1.bf16.msra.mxu1 %v15674_v51  ;;  %7534 = vmatprep.mubr.bf16.mxu1 %v13135_v40  ;;  %v16098_v31 = vld [vmem:[%s16327_s24 + $0x500] sm:$0xff]  ;;  %v9112_v1 = vsel %vm17284_vm5, %v13570_v39, %v9111_v43  ;;  %v15721_v51 = vld [vmem:[%s16276_s20 + $0x1594] ss:$8 sps:$4 sm:$0xff]   ;;  %v8391_v17 = vld [vmem:[%s16327_s24 + $0x28] sm:$0xee] }
 0x278   : > { %11905 = vmatpush1.bf16.msra.mxu0 %v15683_v25  ;;  %7601 = vmatprep.subr.bf16.mxu1 %v15682_v38  ;;  %v16099_v42 = vld [vmem:[%s16327_s24 + $0x580] sm:$0xff]  ;;  %v9144_v60 = vsel %vm17284_vm5, %v13578_v44, %v9143_v55  ;;  %v15730_v33 = vld [vmem:[%s16276_s20 + $0x1b4] ss:$8 sps:$4 sm:$0xff]   ;;  %v8399_v55 = vld [vmem:[%s16327_s24 + $0xa8] sm:$0xee] }
 0x279   : > { %11906 = vmatprep.subr.bf16.mxu0 %v15691_v48  ;;  %v13167_v26 = vcombine.high %v16098_v31, %v16099_v42  ;;  %v8486_v10 = vld [vmem:[%s16327_s24 + $0x720] sm:$0xee]  ;;  %v13166_v25 = vcombine.low %v16098_v31, %v16099_v42  ;;  %v13703_v38 = vcombine.high %v9112_v1, %v9144_v60  ;;  %v16100_v4 = vld [vmem:[%s16327_s24 + $0x760] sm:$0x11]  ;;  %v13702_v11 = vcombine.low %v9112_v1, %v9144_v60  ;;  %v16108_v42 = vld [vmem:[%s16327_s24 + $0x68] sm:$0x11] }
 0x27a   : > { %v8494_v58 = vld [vmem:[%s16327_s24 + $0x7a0] sm:$0xee]  ;;  %v13586_v35 = vrot.slane %v8486_v10, 9  ;;  %v9175_v40 = vrot.slane %v16100_v4, 5  ;;  %v16101_v48 = vld [vmem:[%s16327_s24 + $0x7e0] sm:$0x11] }
 0x27b   : > { %11838 = vmatmul.mubr.bf16.gmra.mrb[8].mxu0 %v13654_v8  ;;  %7602 = vmatpush1.bf16.msra.mxu1 %v15680_v32  ;;  %v15712_v37 = vld [vmem:[%s16276_s20 + $0x184] ss:$8 sps:$4 sm:$0xff]   ;;  %v13594_v32 = vrot.slane %v8494_v58, 9  ;;  %v15710_v8 = vld [vmem:[%s16276_s20 + $0x180] ss:$8 sps:$4 sm:$0xff]   ;;  %v13491_v31 = vrot.slane %v8391_v17, 9 }
 0x27c   : > { %11907 = vmatpush1.bf16.msra.mxu0 %v15689_v30  ;;  %7603 = vmatprep.subr.bf16.mxu1 %v15688_v5  ;;  %v9207_v5 = vrot.slane %v16101_v48, 5  ;;  %v15719_v30 = vld [vmem:[%s16276_s20 + $0x1590] ss:$8 sps:$4 sm:$0xff]   ;;  %v16102_v46 = vld [vmem:[%s16327_s24 + $0x600] sm:$0xff]  ;;  %v9176_v62 = vsel %vm17284_vm5, %v13586_v35, %v9175_v40  ;;  %v15742_v60 = vld [vmem:[%s16276_s20 + $0x1d4] ss:$8 sps:$4 sm:$0xff]  }
 0x27d   : > { %11908 = vmatprep.subr.bf16.mxu0 %v15697_v41  ;;  %11847 = vmatprep.mubr.bf16.mxu0 %v13671_v57  ;;  %v16103_v14 = vld [vmem:[%s16327_s24 + $0x680] sm:$0xff]  ;;  %v15716_v41 = vld [vmem:[%s16276_s20 + $0x190] ss:$8 sps:$4 sm:$0xff]   ;;  %v8415_v48 = vld [vmem:[%s16327_s24 + $0x1a8] sm:$0xee] }
 0x27e   : > { %7535 = vmatmul.mubr.bf16.gmra.mrb[8].mxu1 %v13134_v54  ;;  %v13183_v59 = vcombine.high %v16102_v46, %v16103_v14  ;;  %v15727_v54 = vld [vmem:[%s16276_s20 + $0x15a4] ss:$8 sps:$4 sm:$0xff]   ;;  %v15725_v63 = vld [vmem:[%s16276_s20 + $0x15a0] ss:$8 sps:$4 sm:$0xff]   ;;  %v9208_v9 = vsel %vm17284_vm5, %v13594_v32, %v9207_v5  ;;  %v15743_v1 = vld [vmem:[%s16276_s20 + $0x15d0] ss:$8 sps:$4 sm:$0xff]  }
 0x27f   : > { %7604 = vmatpush1.bf16.msra.mxu1 %v15686_v49  ;;  %7544 = vmatprep.mubr.bf16.mxu1 %v13151_v15  ;;  %v15724_v57 = vld [vmem:[%s16276_s20 + $0x1a4] ss:$8 sps:$4 sm:$0xff]   ;;  %v15733_v49 = vld [vmem:[%s16276_s20 + $0x15b4] ss:$8 sps:$4 sm:$0xff]   ;;  %v13718_v39 = vcombine.low %v9176_v62, %v9208_v9  ;;  %v15737_v7 = vld [vmem:[%s16276_s20 + $0x15c0] ss:$8 sps:$4 sm:$0xff]  }
 0x280   : > { %11909 = vmatpush1.bf16.msra.mxu0 %v15695_v23  ;;  %7605 = vmatprep.subr.bf16.mxu1 %v15694_v29  ;;  %v8502_v50 = vld [vmem:[%s16327_s24 + $0x820] sm:$0xee]  ;;  %v13182_v23 = vcombine.low %v16102_v46, %v16103_v14  ;;  %v13719_v29 = vcombine.high %v9176_v62, %v9208_v9  ;;  %v16104_v53 = vld [vmem:[%s16327_s24 + $0x860] sm:$0x11]  ;;  %v8407_v32 = vld [vmem:[%s16327_s24 + $0x128] sm:$0xee] }
 0x281   : > { %11910 = vmatprep.subr.bf16.mxu0 %v15703_v56  ;;  %v8510_v2 = vld [vmem:[%s16327_s24 + $0x8a0] sm:$0xee]  ;;  %v13602_v22 = vrot.slane %v8502_v50, 9  ;;  %v9239_v15 = vrot.slane %v16104_v53, 5  ;;  %v16105_v56 = vld [vmem:[%s16327_s24 + $0x8e0] sm:$0x11] }
 0x282   : > { %v16106_v52 = vld [vmem:[%s16327_s24 + $0x700] sm:$0xff]  ;;  %v13507_v46 = vrot.slane %v8407_v32, 9  ;;  %v16112_v14 = vld [vmem:[%s16327_s24 + $0x168] sm:$0x11]  ;;  %v15754_v62 = vld [vmem:[%s16276_s20 + $0x1f4] ss:$8 sps:$4 sm:$0xff]  }
 0x283   : > { %11848 = vmatmul.mubr.bf16.gmra.mrb[12].mxu0 %v13670_v21  ;;  %7606 = vmatpush1.bf16.msra.mxu1 %v15692_v34  ;;  %v13610_v34 = vrot.slane %v8510_v2, 9  ;;  %v15722_v21 = vld [vmem:[%s16276_s20 + $0x1a0] ss:$8 sps:$4 sm:$0xff]   ;;  %v9240_v43 = vsel %vm17284_vm5, %v13602_v22, %v9239_v15  ;;  %v15748_v5 = vld [vmem:[%s16276_s20 + $0x1e4] ss:$8 sps:$4 sm:$0xff]  }
 0x284   : > { %11911 = vmatpush1.bf16.msra.mxu0 %v15701_v61  ;;  %7607 = vmatprep.subr.bf16.mxu1 %v15700_v27  ;;  %v9271_v27 = vrot.slane %v16105_v56, 5  ;;  %v15731_v61 = vld [vmem:[%s16276_s20 + $0x15b0] ss:$8 sps:$4 sm:$0xff]   ;;  %v16107_v16 = vld [vmem:[%s16327_s24 + $0x780] sm:$0xff]  ;;  %v16114_v9 = vld [vmem:[%s16327_s24 + $0x8] sm:$0xff] }
 0x285   : > { %11912 = vmatprep.subr.bf16.mxu0 %v15709_v6  ;;  %11857 = vmatprep.mubr.bf16.mxu0 %v13687_v3  ;;  %v13199_v12 = vcombine.high %v16106_v52, %v16107_v16  ;;  %v15728_v6 = vld [vmem:[%s16276_s20 + $0x1b0] ss:$8 sps:$4 sm:$0xff]   ;;  %v15736_v3 = vld [vmem:[%s16276_s20 + $0x1c4] ss:$8 sps:$4 sm:$0xff]   ;;  %v15749_v35 = vld [vmem:[%s16276_s20 + $0x15e0] ss:$8 sps:$4 sm:$0xff]  }
 0x286   : > { %7545 = vmatmul.mubr.bf16.gmra.mrb[12].mxu1 %v13150_v18  ;;  %v15739_v18 = vld [vmem:[%s16276_s20 + $0x15c4] ss:$8 sps:$4 sm:$0xff]   ;;  %v9272_v44 = vsel %vm17284_vm5, %v13610_v34, %v9271_v27  ;;  %v15761_v53 = vld [vmem:[%s16276_s20 + $0x1600] ss:$8 sps:$4 sm:$0xff]  }
 0x287   : > { %7608 = vmatpush1.bf16.msra.mxu1 %v15698_v24  ;;  %7554 = vmatprep.mubr.bf16.mxu1 %v13167_v26  ;;  %v15745_v24 = vld [vmem:[%s16276_s20 + $0x15d4] ss:$8 sps:$4 sm:$0xff]   ;;  %v8795_v26 = vrot.slane %v16108_v42, 5  ;;  %v16110_v10 = vld [vmem:[%s16327_s24 + $0x800] sm:$0xff]  ;;  %v16115_v50 = vld [vmem:[%s16327_s24 + $0x88] sm:$0xff] }
 0x288   : > { %11913 = vmatpush1.bf16.msra.mxu0 %v15707_v28  ;;  %7609 = vmatprep.subr.bf16.mxu1 %v15706_v13  ;;  %v13198_v28 = vcombine.low %v16106_v52, %v16107_v16  ;;  %v13735_v13 = vcombine.high %v9240_v43, %v9272_v44  ;;  %v16111_v58 = vld [vmem:[%s16327_s24 + $0x880] sm:$0xff]  ;;  %v13105_v2 = vcombine.high %v16114_v9, %v16115_v50  ;;  %v8423_v56 = vld [vmem:[%s16327_s24 + $0x228] sm:$0xee]  ;;  %v16116_v16 = vld [vmem:[%s16327_s24 + $0x268] sm:$0x11] }
 0x289   : > { %11914 = vmatprep.subr.bf16.mxu0 %v15715_v45  ;;  %v16109_v45 = vld [vmem:[%s16327_s24 + $0xe8] sm:$0x11]  ;;  %v8796_v4 = vsel %vm17284_vm5, %v13491_v31, %v8795_v26  ;;  %v8431_v27 = vld [vmem:[%s16327_s24 + $0x2a8] sm:$0xee]  ;;  %v13523_v52 = vrot.slane %v8423_v56, 9 }
 0x28a   : > { %v15760_v22 = vld [vmem:[%s16276_s20 + $0x204] ss:$8 sps:$4 sm:$0xff]   ;;  %v15773_v42 = vld [vmem:[%s16276_s20 + $0x1620] ss:$8 sps:$4 sm:$0xff]  }
 0x28b   : > { %11858 = vmatmul.mubr.bf16.gmra.mrb[16].mxu0 %v13686_v19  ;;  %7610 = vmatpush1.bf16.msra.mxu1 %v15704_v36  ;;  %v13499_v36 = vrot.slane %v8399_v55, 9  ;;  %v8827_v19 = vrot.slane %v16109_v45, 5  ;;  %v16119_v17 = vld [vmem:[%s16327_s24 + $0x188] sm:$0xff] }
 0x28c   : > { %11915 = vmatpush1.bf16.msra.mxu0 %v15713_v47  ;;  %7611 = vmatprep.subr.bf16.mxu1 %v15712_v37  ;;  %v15734_v47 = vld [vmem:[%s16276_s20 + $0x1c0] ss:$8 sps:$4 sm:$0xff]   ;;  %v13215_v37 = vcombine.high %v16110_v10, %v16111_v58 }
 0x28d   : > { %11916 = vmatprep.subr.bf16.mxu0 %v15721_v51  ;;  %11867 = vmatprep.mubr.bf16.mxu0 %v13703_v38  ;;  %v15740_v51 = vld [vmem:[%s16276_s20 + $0x1d0] ss:$8 sps:$4 sm:$0xff]   ;;  %v13734_v38 = vcombine.low %v9240_v43, %v9272_v44  ;;  %v8828_v40 = vsel %vm17284_vm5, %v13499_v36, %v8827_v19  ;;  %v15766_v43 = vld [vmem:[%s16276_s20 + $0x214] ss:$8 sps:$4 sm:$0xff]   ;;  %v16118_v44 = vld [vmem:[%s16327_s24 + $0x108] sm:$0xff] }
 0x28e   : > { %7555 = vmatmul.mubr.bf16.gmra.mrb[16].mxu1 %v13166_v25  ;;  %v15751_v25 = vld [vmem:[%s16276_s20 + $0x15e4] ss:$8 sps:$4 sm:$0xff]   ;;  %v13121_v55 = vcombine.high %v16118_v44, %v16119_v17 }
 0x28f   : > { %7612 = vmatpush1.bf16.msra.mxu1 %v15710_v8  ;;  %7564 = vmatprep.mubr.bf16.mxu1 %v13183_v59  ;;  %v15757_v8 = vld [vmem:[%s16276_s20 + $0x15f4] ss:$8 sps:$4 sm:$0xff]   ;;  %v8859_v59 = vrot.slane %v16112_v14, 5  ;;  %v8439_v45 = vld [vmem:[%s16327_s24 + $0x328] sm:$0xee] }
 0x290   : > { %11917 = vmatpush1.bf16.msra.mxu0 %v15719_v30  ;;  %7613 = vmatprep.subr.bf16.mxu1 %v15718_v20  ;;  %v13214_v30 = vcombine.low %v16110_v10, %v16111_v58  ;;  %v13625_v20 = vcombine.high %v8796_v4, %v8828_v40  ;;  %v8447_v19 = vld [vmem:[%s16327_s24 + $0x3a8] sm:$0xee]  ;;  %v13539_v10 = vrot.slane %v8439_v45, 9  ;;  %v16120_v58 = vld [vmem:[%s16327_s24 + $0x368] sm:$0x11] }
 0x291   : > { %11918 = vmatprep.subr.bf16.mxu0 %v15727_v54  ;;  %v16113_v54 = vld [vmem:[%s16327_s24 + $0x1e8] sm:$0x11]  ;;  %v8860_v15 = vsel %vm17284_vm5, %v13507_v46, %v8859_v59 }
 0x292   : > { %v16122_v32 = vld [vmem:[%s16327_s24 + $0x208] sm:$0xff] }
 0x293   : > { %11868 = vmatmul.mubr.bf16.gmra.mrb[20].mxu0 %v13702_v11  ;;  %7614 = vmatpush1.bf16.msra.mxu1 %v15716_v41  ;;  %v13515_v41 = vrot.slane %v8415_v48, 9  ;;  %v15746_v11 = vld [vmem:[%s16276_s20 + $0x1e0] ss:$8 sps:$4 sm:$0xff]  }
 0x294   : > { %11919 = vmatpush1.bf16.msra.mxu0 %v15725_v63  ;;  %7615 = vmatprep.subr.bf16.mxu1 %v15724_v57  ;;  %v8891_v57 = vrot.slane %v16113_v54, 5  ;;  %v15755_v63 = vld [vmem:[%s16276_s20 + $0x15f0] ss:$8 sps:$4 sm:$0xff]   ;;  %v16123_v48 = vld [vmem:[%s16327_s24 + $0x288] sm:$0xff] }
 0x295   : > { %11920 = vmatprep.subr.bf16.mxu0 %v15733_v49  ;;  %11877 = vmatprep.mubr.bf16.mxu0 %v13719_v29  ;;  %v15752_v49 = vld [vmem:[%s16276_s20 + $0x1f0] ss:$8 sps:$4 sm:$0xff]   ;;  %v13624_v29 = vcombine.low %v8796_v4, %v8828_v40  ;;  %v15778_v40 = vld [vmem:[%s16276_s20 + $0x234] ss:$8 sps:$4 sm:$0xff]   ;;  %v15785_v46 = vld [vmem:[%s16276_s20 + $0x1640] ss:$8 sps:$4 sm:$0xff]  }
 0x296   : > { %7565 = vmatmul.mubr.bf16.gmra.mrb[20].mxu1 %v13182_v23  ;;  %v15763_v23 = vld [vmem:[%s16276_s20 + $0x1604] ss:$8 sps:$4 sm:$0xff]   ;;  %v8892_v34 = vsel %vm17284_vm5, %v13515_v41, %v8891_v57  ;;  %v15779_v4 = vld [vmem:[%s16276_s20 + $0x1630] ss:$8 sps:$4 sm:$0xff]  }
 0x297   : > { %7616 = vmatpush1.bf16.msra.mxu1 %v15722_v21  ;;  %7574 = vmatprep.mubr.bf16.mxu1 %v13199_v12  ;;  %v15769_v21 = vld [vmem:[%s16276_s20 + $0x1614] ss:$8 sps:$4 sm:$0xff]   ;;  %v8923_v12 = vrot.slane %v16116_v16, 5  ;;  %v13640_v31 = vcombine.low %v8860_v15, %v8892_v34  ;;  %v8455_v41 = vld [vmem:[%s16327_s24 + $0x528] sm:$0xee] }
 0x298   : > { %11921 = vmatpush1.bf16.msra.mxu0 %v15731_v61  ;;  %7617 = vmatprep.subr.bf16.mxu1 %v15730_v33  ;;  %v13104_v61 = vcombine.low %v16114_v9, %v16115_v50  ;;  %v13641_v33 = vcombine.high %v8860_v15, %v8892_v34  ;;  %v8463_v54 = vld [vmem:[%s16327_s24 + $0x5a8] sm:$0xee]  ;;  %v13555_v9 = vrot.slane %v8455_v41, 9  ;;  %v16124_v50 = vld [vmem:[%s16327_s24 + $0x568] sm:$0x11] }
 0x299   : > { %11922 = vmatprep.subr.bf16.mxu0 %v15739_v18  ;;  %v16117_v18 = vld [vmem:[%s16327_s24 + $0x2e8] sm:$0x11]  ;;  %v8924_v26 = vsel %vm17284_vm5, %v13523_v52, %v8923_v12  ;;  %v15790_v15 = vld [vmem:[%s16276_s20 + $0x254] ss:$8 sps:$4 sm:$0xff]  }
 0x29a   : > { %v15784_v57 = vld [vmem:[%s16276_s20 + $0x244] ss:$8 sps:$4 sm:$0xff]   ;;  %v15797_v16 = vld [vmem:[%s16276_s20 + $0x1660] ss:$8 sps:$4 sm:$0xff]  }
 0x29b   : > { %11878 = vmatmul.mubr.bf16.gmra.mrb[24].mxu0 %v13718_v39  ;;  %7618 = vmatpush1.bf16.msra.mxu1 %v15728_v6  ;;  %v13531_v6 = vrot.slane %v8431_v27, 9  ;;  %v15758_v39 = vld [vmem:[%s16276_s20 + $0x200] ss:$8 sps:$4 sm:$0xff]  }
 0x29c   : > { %11923 = vmatpush1.bf16.msra.mxu0 %v15737_v7  ;;  %7619 = vmatprep.subr.bf16.mxu1 %v15736_v3  ;;  %v8955_v3 = vrot.slane %v16117_v18, 5  ;;  %v15767_v7 = vld [vmem:[%s16276_s20 + $0x1610] ss:$8 sps:$4 sm:$0xff]   ;;  %v16126_v34 = vld [vmem:[%s16327_s24 + $0x308] sm:$0xff] }
 0x29d   : > { %11924 = vmatprep.subr.bf16.mxu0 %v15745_v24  ;;  %11887 = vmatprep.mubr.bf16.mxu0 %v13735_v13  ;;  %v15764_v24 = vld [vmem:[%s16276_s20 + $0x210] ss:$8 sps:$4 sm:$0xff]   ;;  %v15772_v13 = vld [vmem:[%s16276_s20 + $0x224] ss:$8 sps:$4 sm:$0xff]  }
 0x29e   : > { %7575 = vmatmul.mubr.bf16.gmra.mrb[24].mxu1 %v13198_v28  ;;  %v15775_v28 = vld [vmem:[%s16276_s20 + $0x1624] ss:$8 sps:$4 sm:$0xff]   ;;  %v8956_v36 = vsel %vm17284_vm5, %v13531_v6, %v8955_v3 }
 0x29f   : > { %7620 = vmatpush1.bf16.msra.mxu1 %v15734_v47  ;;  %7584 = vmatprep.mubr.bf16.mxu1 %v13215_v37  ;;  %v15781_v47 = vld [vmem:[%s16276_s20 + $0x1634] ss:$8 sps:$4 sm:$0xff]   ;;  %v8987_v37 = vrot.slane %v16120_v58, 5  ;;  %v16127_v56 = vld [vmem:[%s16327_s24 + $0x388] sm:$0xff] }
 0x2a0   : > { %11925 = vmatpush1.bf16.msra.mxu0 %v15743_v1  ;;  %7621 = vmatprep.subr.bf16.mxu1 %v15742_v60  ;;  %v13120_v1 = vcombine.low %v16118_v44, %v16119_v17  ;;  %v13657_v60 = vcombine.high %v8924_v26, %v8956_v36  ;;  %v13153_v27 = vcombine.high %v16126_v34, %v16127_v56  ;;  %v8471_v18 = vld [vmem:[%s16327_s24 + $0x628] sm:$0xee]  ;;  %v16128_v17 = vld [vmem:[%s16327_s24 + $0x668] sm:$0x11] }
 0x2a1   : > { %11926 = vmatprep.subr.bf16.mxu0 %v15751_v25  ;;  %v16121_v25 = vld [vmem:[%s16327_s24 + $0x3e8] sm:$0x11]  ;;  %v8988_v14 = vsel %vm17284_vm5, %v13539_v10, %v8987_v37  ;;  %v8479_v3 = vld [vmem:[%s16327_s24 + $0x6a8] sm:$0xee]  ;;  %v13571_v44 = vrot.slane %v8471_v18, 9 }
 0x2a2   : > { %v16131_v45 = vld [vmem:[%s16327_s24 + $0x588] sm:$0xff] }
 0x2a3   : > { %11888 = vmatmul.mubr.bf16.gmra.mrb[28].mxu0 %v13734_v38  ;;  %7622 = vmatpush1.bf16.msra.mxu1 %v15740_v51  ;;  %v13547_v51 = vrot.slane %v8447_v19, 9  ;;  %v9019_v38 = vrot.slane %v16121_v25, 5  ;;  %v15809_v58 = vld [vmem:[%s16276_s20 + $0x1680] ss:$8 sps:$4 sm:$0xff]  }
 0x2a4   : > { %11927 = vmatpush1.bf16.msra.mxu0 %v15749_v35  ;;  %7623 = vmatprep.subr.bf16.mxu1 %v15748_v5  ;;  %v15770_v35 = vld [vmem:[%s16276_s20 + $0x220] ss:$8 sps:$4 sm:$0xff]   ;;  %v13137_v5 = vcombine.high %v16122_v32, %v16123_v48 }
 0x2a5   : > { %11928 = vmatprep.subr.bf16.mxu0 %v15757_v8  ;;  %11930 = vmatprep.mubr.bf16.mxu0 %v13625_v20  ;;  %v15776_v8 = vld [vmem:[%s16276_s20 + $0x230] ss:$8 sps:$4 sm:$0xff]   ;;  %v13656_v20 = vcombine.low %v8924_v26, %v8956_v36  ;;  %v9020_v59 = vsel %vm17284_vm5, %v13547_v51, %v9019_v38  ;;  %v15802_v26 = vld [vmem:[%s16276_s20 + $0x274] ss:$8 sps:$4 sm:$0xff]   ;;  %v16130_v36 = vld [vmem:[%s16327_s24 + $0x508] sm:$0xff] }
 0x2a6   : > { %7585 = vmatmul.mubr.bf16.gmra.mrb[28].mxu1 %v13214_v30  ;;  %v15787_v30 = vld [vmem:[%s16276_s20 + $0x1644] ss:$8 sps:$4 sm:$0xff]   ;;  %v13672_v52 = vcombine.low %v8988_v14, %v9020_v59  ;;  %v13169_v19 = vcombine.high %v16130_v36, %v16131_v45 }
 0x2a7   : > { %7624 = vmatpush1.bf16.msra.mxu1 %v15746_v11  ;;  %7627 = vmatprep.mubr.bf16.mxu1 %v13105_v2  ;;  %v15793_v11 = vld [vmem:[%s16276_s20 + $0x1654] ss:$8 sps:$4 sm:$0xff]   ;;  %v9051_v2 = vrot.slane %v16124_v50, 5  ;;  %v8487_v25 = vld [vmem:[%s16327_s24 + $0x728] sm:$0xee] }
 0x2a8   : > { %11929 = vmatpush1.bf16.msra.mxu0 %v15755_v63  ;;  %7625 = vmatprep.subr.bf16.mxu1 %v15754_v62  ;;  %v13136_v63 = vcombine.low %v16122_v32, %v16123_v48  ;;  %v13673_v62 = vcombine.high %v8988_v14, %v9020_v59  ;;  %v8495_v38 = vld [vmem:[%s16327_s24 + $0x7a8] sm:$0xee]  ;;  %v13587_v32 = vrot.slane %v8487_v25, 9  ;;  %v16132_v48 = vld [vmem:[%s16327_s24 + $0x768] sm:$0x11] }
 0x2a9   : > { %12011 = vmatprep.subr.bf16.mxu0 %v15763_v23  ;;  %v16125_v23 = vld [vmem:[%s16327_s24 + $0x5e8] sm:$0x11]  ;;  %v9052_v12 = vsel %vm17284_vm5, %v13555_v9, %v9051_v2  ;;  %v15815_v14 = vld [vmem:[%s16276_s20 + $0x1690] ss:$8 sps:$4 sm:$0xff]   ;;  %v15814_v59 = vld [vmem:[%s16276_s20 + $0x294] ss:$8 sps:$4 sm:$0xff]  }
 0x2aa   : > { %v16134_v41 = vld [vmem:[%s16327_s24 + $0x608] sm:$0xff] }
 0x2ab   : > { %11931 = vmatmul.mubr.bf16.vlgmr.msra.gmra.mrb[0].mxu0 %v13624_v29  ;;  %7626 = vmatpush1.bf16.msra.mxu1 %v15752_v49  ;;  %v13563_v49 = vrot.slane %v8463_v54, 9  ;;  %v9083_v29 = vrot.slane %v16125_v23, 5  ;;  %v16135_v54 = vld [vmem:[%s16327_s24 + $0x688] sm:$0xff] }
 0x2ac   : > { %12012 = vmatpush1.bf16.msra.mxu0 %v15761_v53  ;;  %7708 = vmatprep.subr.bf16.mxu1 %v15760_v22  ;;  %v15782_v22 = vld [vmem:[%s16276_s20 + $0x240] ss:$8 sps:$4 sm:$0xff]   ;;  %v15791_v53 = vld [vmem:[%s16276_s20 + $0x1650] ss:$8 sps:$4 sm:$0xff]  }
 0x2ad   : > { %12013 = vmatprep.subr.bf16.mxu0 %v15769_v21  ;;  %11940 = vmatprep.mubr.bf16.mxu0 %v13641_v33  ;;  %v15788_v21 = vld [vmem:[%s16276_s20 + $0x250] ss:$8 sps:$4 sm:$0xff]   ;;  %v15796_v33 = vld [vmem:[%s16276_s20 + $0x264] ss:$8 sps:$4 sm:$0xff]   ;;  %v9084_v6 = vsel %vm17284_vm5, %v13563_v49, %v9083_v29  ;;  %v15821_v9 = vld [vmem:[%s16276_s20 + $0x16a0] ss:$8 sps:$4 sm:$0xff]  }
 0x2ae   : > { %7628 = vmatmul.mubr.bf16.vlgmr.msra.gmra.mrb[0].mxu1 %v13104_v61  ;;  %v15799_v61 = vld [vmem:[%s16276_s20 + $0x1664] ss:$8 sps:$4 sm:$0xff]   ;;  %v13688_v10 = vcombine.low %v9052_v12, %v9084_v6 }
 0x2af   : > { %7709 = vmatpush1.bf16.msra.mxu1 %v15758_v39  ;;  %7637 = vmatprep.mubr.bf16.mxu1 %v13121_v55  ;;  %v15805_v39 = vld [vmem:[%s16276_s20 + $0x1674] ss:$8 sps:$4 sm:$0xff]   ;;  %v9115_v55 = vrot.slane %v16128_v17, 5  ;;  %v8503_v49 = vld [vmem:[%s16327_s24 + $0x828] sm:$0xee] }
 0x2b0   : > { %12014 = vmatpush1.bf16.msra.mxu0 %v15767_v7  ;;  %7710 = vmatprep.subr.bf16.mxu1 %v15766_v43  ;;  %v13152_v7 = vcombine.low %v16126_v34, %v16127_v56  ;;  %v13689_v43 = vcombine.high %v9052_v12, %v9084_v6  ;;  %v8511_v23 = vld [vmem:[%s16327_s24 + $0x8a8] sm:$0xee]  ;;  %v13603_v34 = vrot.slane %v8503_v49, 9  ;;  %v16136_v56 = vld [vmem:[%s16327_s24 + $0x868] sm:$0x11]  ;;  %v16146_v49 = vld [vmem:[%s16327_s24 + $0x10] sm:$0xff] }
 0x2b1   : > { %12015 = vmatprep.subr.bf16.mxu0 %v15775_v28  ;;  %v16129_v28 = vld [vmem:[%s16327_s24 + $0x6e8] sm:$0x11]  ;;  %v9116_v37 = vsel %vm17284_vm5, %v13571_v44, %v9115_v55  ;;  %v15826_v12 = vld [vmem:[%s16276_s20 + $0x2b4] ss:$8 sps:$4 sm:$0xff]  }
 0x2b2   : > { %v15820_v29 = vld [vmem:[%s16276_s20 + $0x2a4] ss:$8 sps:$4 sm:$0xff]   ;;  %v15833_v17 = vld [vmem:[%s16276_s20 + $0x16c0] ss:$8 sps:$4 sm:$0xff]  }
 0x2b3   : > { %11941 = vmatmul.mubr.bf16.gmra.mrb[4].mxu0 %v13640_v31  ;;  %7711 = vmatpush1.bf16.msra.mxu1 %v15764_v24  ;;  %v13579_v24 = vrot.slane %v8479_v3, 9  ;;  %v15794_v31 = vld [vmem:[%s16276_s20 + $0x260] ss:$8 sps:$4 sm:$0xff]  }
 0x2b4   : > { %12016 = vmatpush1.bf16.msra.mxu0 %v15773_v42  ;;  %7712 = vmatprep.subr.bf16.mxu1 %v15772_v13  ;;  %v9147_v13 = vrot.slane %v16129_v28, 5  ;;  %v15803_v42 = vld [vmem:[%s16276_s20 + $0x1670] ss:$8 sps:$4 sm:$0xff]   ;;  %v16138_v6 = vld [vmem:[%s16327_s24 + $0x708] sm:$0xff] }
 0x2b5   : > { %12017 = vmatprep.subr.bf16.mxu0 %v15781_v47  ;;  %11950 = vmatprep.mubr.bf16.mxu0 %v13657_v60  ;;  %v15800_v47 = vld [vmem:[%s16276_s20 + $0x270] ss:$8 sps:$4 sm:$0xff]   ;;  %v15808_v60 = vld [vmem:[%s16276_s20 + $0x284] ss:$8 sps:$4 sm:$0xff]  }
 0x2b6   : > { %7638 = vmatmul.mubr.bf16.gmra.mrb[4].mxu1 %v13120_v1  ;;  %v15811_v1 = vld [vmem:[%s16276_s20 + $0x1684] ss:$8 sps:$4 sm:$0xff]   ;;  %v9148_v51 = vsel %vm17284_vm5, %v13579_v24, %v9147_v13  ;;  %v8392_v28 = vld [vmem:[%s16327_s24 + $0x30] sm:$0xee] }
 0x2b7   : > { %7713 = vmatpush1.bf16.msra.mxu1 %v15770_v35  ;;  %7647 = vmatprep.mubr.bf16.mxu1 %v13137_v5  ;;  %v15817_v35 = vld [vmem:[%s16276_s20 + $0x1694] ss:$8 sps:$4 sm:$0xff]   ;;  %v9179_v5 = vrot.slane %v16132_v48, 5  ;;  %v16139_v18 = vld [vmem:[%s16327_s24 + $0x788] sm:$0xff] }
 0x2b8   : > { %12018 = vmatpush1.bf16.msra.mxu0 %v15779_v4  ;;  %7714 = vmatprep.subr.bf16.mxu1 %v15778_v40  ;;  %v13168_v4 = vcombine.low %v16130_v36, %v16131_v45  ;;  %v13705_v40 = vcombine.high %v9116_v37, %v9148_v51  ;;  %v13201_v3 = vcombine.high %v16138_v6, %v16139_v18  ;;  %v8400_v13 = vld [vmem:[%s16327_s24 + $0xb0] sm:$0xee]  ;;  %v13492_v36 = vrot.slane %v8392_v28, 9  ;;  %v16140_v45 = vld [vmem:[%s16327_s24 + $0x70] sm:$0x11]  ;;  %v16143_v25 = vld [vmem:[%s16327_s24 + $0x888] sm:$0xff] }
 0x2b9   : > { %12019 = vmatprep.subr.bf16.mxu0 %v15787_v30  ;;  %v16133_v30 = vld [vmem:[%s16327_s24 + $0x7e8] sm:$0x11]  ;;  %v9180_v50 = vsel %vm17284_vm5, %v13587_v32, %v9179_v5  ;;  %v16151_v28 = vld [vmem:[%s16327_s24 + $0x190] sm:$0xff] }
 0x2ba   : > { %v15845_v48 = vld [vmem:[%s16276_s20 + $0x16e0] ss:$8 sps:$4 sm:$0xff]  }
 0x2bb   : > { %11951 = vmatmul.mubr.bf16.gmra.mrb[8].mxu0 %v13656_v20  ;;  %7715 = vmatpush1.bf16.msra.mxu1 %v15776_v8  ;;  %v13595_v8 = vrot.slane %v8495_v38, 9  ;;  %v9211_v20 = vrot.slane %v16133_v30, 5  ;;  %v8408_v30 = vld [vmem:[%s16327_s24 + $0x130] sm:$0xee] }
 0x2bc   : > { %12020 = vmatpush1.bf16.msra.mxu0 %v15785_v46  ;;  %7716 = vmatprep.subr.bf16.mxu1 %v15784_v57  ;;  %v15806_v46 = vld [vmem:[%s16276_s20 + $0x280] ss:$8 sps:$4 sm:$0xff]   ;;  %v13185_v57 = vcombine.high %v16134_v41, %v16135_v54 }
 0x2bd   : > { %12021 = vmatprep.subr.bf16.mxu0 %v15793_v11  ;;  %11960 = vmatprep.mubr.bf16.mxu0 %v13673_v62  ;;  %v15812_v11 = vld [vmem:[%s16276_s20 + $0x290] ss:$8 sps:$4 sm:$0xff]   ;;  %v13704_v62 = vcombine.low %v9116_v37, %v9148_v51  ;;  %v9212_v2 = vsel %vm17284_vm5, %v13595_v8, %v9211_v20  ;;  %v15838_v37 = vld [vmem:[%s16276_s20 + $0x2d4] ss:$8 sps:$4 sm:$0xff]   ;;  %v16142_v51 = vld [vmem:[%s16327_s24 + $0x808] sm:$0xff] }
 0x2be   : > { %7648 = vmatmul.mubr.bf16.gmra.mrb[8].mxu1 %v13136_v63  ;;  %v15823_v63 = vld [vmem:[%s16276_s20 + $0x16a4] ss:$8 sps:$4 sm:$0xff]   ;;  %v13720_v44 = vcombine.low %v9180_v50, %v9212_v2  ;;  %v13217_v38 = vcombine.high %v16142_v51, %v16143_v25  ;;  %v8416_v20 = vld [vmem:[%s16327_s24 + $0x1b0] sm:$0xee] }
 0x2bf   : > { %7717 = vmatpush1.bf16.msra.mxu1 %v15782_v22  ;;  %7657 = vmatprep.mubr.bf16.mxu1 %v13153_v27  ;;  %v15829_v22 = vld [vmem:[%s16276_s20 + $0x16b4] ss:$8 sps:$4 sm:$0xff]   ;;  %v9243_v27 = vrot.slane %v16136_v56, 5 }
 0x2c0   : > { %12022 = vmatpush1.bf16.msra.mxu0 %v15791_v53  ;;  %7718 = vmatprep.subr.bf16.mxu1 %v15790_v15  ;;  %v13184_v53 = vcombine.low %v16134_v41, %v16135_v54  ;;  %v13721_v15 = vcombine.high %v9180_v50, %v9212_v2  ;;  %v13508_v41 = vrot.slane %v8408_v30, 9  ;;  %v16144_v54 = vld [vmem:[%s16327_s24 + $0x170] sm:$0x11] }
 0x2c1   : > { %12023 = vmatprep.subr.bf16.mxu0 %v15799_v61  ;;  %v16137_v61 = vld [vmem:[%s16327_s24 + $0x8e8] sm:$0x11]  ;;  %v9244_v55 = vsel %vm17284_vm5, %v13603_v34, %v9243_v27  ;;  %v15851_v50 = vld [vmem:[%s16276_s20 + $0x16f0] ss:$8 sps:$4 sm:$0xff]   ;;  %v15850_v2 = vld [vmem:[%s16276_s20 + $0x2f4] ss:$8 sps:$4 sm:$0xff]  }
 0x2c2   : > { %v15857_v27 = vld [vmem:[%s16276_s20 + $0x1700] ss:$8 sps:$4 sm:$0xff]   ;;  %v16155_v30 = vld [vmem:[%s16327_s24 + $0x290] sm:$0xff] }
 0x2c3   : > { %11961 = vmatmul.mubr.bf16.gmra.mrb[12].mxu0 %v13672_v52  ;;  %7719 = vmatpush1.bf16.msra.mxu1 %v15788_v21  ;;  %v13611_v21 = vrot.slane %v8511_v23, 9  ;;  %v15818_v52 = vld [vmem:[%s16276_s20 + $0x2a0] ss:$8 sps:$4 sm:$0xff]   ;;  %v16147_v23 = vld [vmem:[%s16327_s24 + $0x90] sm:$0xff] }
 0x2c4   : > { %12024 = vmatpush1.bf16.msra.mxu0 %v15797_v16  ;;  %7720 = vmatprep.subr.bf16.mxu1 %v15796_v33  ;;  %v9275_v33 = vrot.slane %v16137_v61, 5  ;;  %v15827_v16 = vld [vmem:[%s16276_s20 + $0x16b0] ss:$8 sps:$4 sm:$0xff]  }
 0x2c5   : > { %12025 = vmatprep.subr.bf16.mxu0 %v15805_v39  ;;  %11970 = vmatprep.mubr.bf16.mxu0 %v13689_v43  ;;  %v15824_v39 = vld [vmem:[%s16276_s20 + $0x2b0] ss:$8 sps:$4 sm:$0xff]   ;;  %v15832_v43 = vld [vmem:[%s16276_s20 + $0x2c4] ss:$8 sps:$4 sm:$0xff]  }
 0x2c6   : > { %7658 = vmatmul.mubr.bf16.gmra.mrb[12].mxu1 %v13152_v7  ;;  %v15835_v7 = vld [vmem:[%s16276_s20 + $0x16c4] ss:$8 sps:$4 sm:$0xff]   ;;  %v9276_v24 = vsel %vm17284_vm5, %v13611_v21, %v9275_v33  ;;  %v8424_v21 = vld [vmem:[%s16327_s24 + $0x230] sm:$0xee] }
 0x2c7   : > { %7721 = vmatpush1.bf16.msra.mxu1 %v15794_v31  ;;  %7667 = vmatprep.mubr.bf16.mxu1 %v13169_v19  ;;  %v15841_v31 = vld [vmem:[%s16276_s20 + $0x16d4] ss:$8 sps:$4 sm:$0xff]   ;;  %v8799_v19 = vrot.slane %v16140_v45, 5  ;;  %v13736_v32 = vcombine.low %v9244_v55, %v9276_v24  ;;  %v15856_v33 = vld [vmem:[%s16276_s20 + $0x304] ss:$8 sps:$4 sm:$0xff]  }
 0x2c8   : > { %12026 = vmatpush1.bf16.msra.mxu0 %v15803_v42  ;;  %7722 = vmatprep.subr.bf16.mxu1 %v15802_v26  ;;  %v13200_v42 = vcombine.low %v16138_v6, %v16139_v18  ;;  %v13737_v26 = vcombine.high %v9244_v55, %v9276_v24  ;;  %v8432_v61 = vld [vmem:[%s16327_s24 + $0x2b0] sm:$0xee]  ;;  %v13524_v6 = vrot.slane %v8424_v21, 9  ;;  %v16148_v18 = vld [vmem:[%s16327_s24 + $0x270] sm:$0x11] }
 0x2c9   : > { %12027 = vmatprep.subr.bf16.mxu0 %v15811_v1  ;;  %v16141_v1 = vld [vmem:[%s16327_s24 + $0xf0] sm:$0x11]  ;;  %v8800_v5 = vsel %vm17284_vm5, %v13492_v36, %v8799_v19  ;;  %v15869_v19 = vld [vmem:[%s16276_s20 + $0x1720] ss:$8 sps:$4 sm:$0xff]  }
 0x2ca   : > { %v15862_v55 = vld [vmem:[%s16276_s20 + $0x314] ss:$8 sps:$4 sm:$0xff]  }
 0x2cb   : > { %11971 = vmatmul.mubr.bf16.gmra.mrb[16].mxu0 %v13688_v10  ;;  %7723 = vmatpush1.bf16.msra.mxu1 %v15800_v47  ;;  %v13500_v47 = vrot.slane %v8400_v13, 9  ;;  %v15830_v10 = vld [vmem:[%s16276_s20 + $0x2c0] ss:$8 sps:$4 sm:$0xff]   ;;  %v16150_v24 = vld [vmem:[%s16327_s24 + $0x110] sm:$0xff] }
 0x2cc   : > { %12028 = vmatpush1.bf16.msra.mxu0 %v15809_v58  ;;  %7724 = vmatprep.subr.bf16.mxu1 %v15808_v60  ;;  %v8831_v60 = vrot.slane %v16141_v1, 5  ;;  %v15839_v58 = vld [vmem:[%s16276_s20 + $0x16d0] ss:$8 sps:$4 sm:$0xff]   ;;  %v13123_v13 = vcombine.high %v16150_v24, %v16151_v28 }
 0x2cd   : > { %12029 = vmatprep.subr.bf16.mxu0 %v15817_v35  ;;  %11980 = vmatprep.mubr.bf16.mxu0 %v13705_v40  ;;  %v15836_v35 = vld [vmem:[%s16276_s20 + $0x2d0] ss:$8 sps:$4 sm:$0xff]   ;;  %v15844_v40 = vld [vmem:[%s16276_s20 + $0x2e4] ss:$8 sps:$4 sm:$0xff]  }
 0x2ce   : > { %7668 = vmatmul.mubr.bf16.gmra.mrb[16].mxu1 %v13168_v4  ;;  %v15847_v4 = vld [vmem:[%s16276_s20 + $0x16e4] ss:$8 sps:$4 sm:$0xff]   ;;  %v8832_v8 = vsel %vm17284_vm5, %v13500_v47, %v8831_v60  ;;  %v8440_v47 = vld [vmem:[%s16327_s24 + $0x330] sm:$0xee] }
 0x2cf   : > { %7725 = vmatpush1.bf16.msra.mxu1 %v15806_v46  ;;  %7677 = vmatprep.mubr.bf16.mxu1 %v13185_v57  ;;  %v15853_v46 = vld [vmem:[%s16276_s20 + $0x16f4] ss:$8 sps:$4 sm:$0xff]   ;;  %v8863_v57 = vrot.slane %v16144_v54, 5  ;;  %v15868_v60 = vld [vmem:[%s16276_s20 + $0x324] ss:$8 sps:$4 sm:$0xff]  }
 0x2d0   : > { %12030 = vmatpush1.bf16.msra.mxu0 %v15815_v14  ;;  %7726 = vmatprep.subr.bf16.mxu1 %v15814_v59  ;;  %v13216_v14 = vcombine.low %v16142_v51, %v16143_v25  ;;  %v13627_v59 = vcombine.high %v8800_v5, %v8832_v8  ;;  %v8448_v1 = vld [vmem:[%s16327_s24 + $0x3b0] sm:$0xee]  ;;  %v13540_v51 = vrot.slane %v8440_v47, 9  ;;  %v16152_v25 = vld [vmem:[%s16327_s24 + $0x370] sm:$0x11] }
 0x2d1   : > { %12031 = vmatprep.subr.bf16.mxu0 %v15823_v63  ;;  %v16145_v63 = vld [vmem:[%s16327_s24 + $0x1f0] sm:$0x11]  ;;  %v8864_v34 = vsel %vm17284_vm5, %v13508_v41, %v8863_v57  ;;  %v15881_v57 = vld [vmem:[%s16276_s20 + $0x1740] ss:$8 sps:$4 sm:$0xff]  }
 0x2d2   : > { %v16158_v21 = vld [vmem:[%s16327_s24 + $0x310] sm:$0xff] }
 0x2d3   : > { %11981 = vmatmul.mubr.bf16.gmra.mrb[20].mxu0 %v13704_v62  ;;  %7727 = vmatpush1.bf16.msra.mxu1 %v15812_v11  ;;  %v13516_v11 = vrot.slane %v8416_v20, 9  ;;  %v8895_v62 = vrot.slane %v16145_v63, 5  ;;  %v8464_v63 = vld [vmem:[%s16327_s24 + $0x5b0] sm:$0xee] }
 0x2d4   : > { %12032 = vmatpush1.bf16.msra.mxu0 %v15821_v9  ;;  %7728 = vmatprep.subr.bf16.mxu1 %v15820_v29  ;;  %v15842_v9 = vld [vmem:[%s16276_s20 + $0x2e0] ss:$8 sps:$4 sm:$0xff]   ;;  %v13107_v29 = vcombine.high %v16146_v49, %v16147_v23  ;;  %v16162_v47 = vld [vmem:[%s16327_s24 + $0x510] sm:$0xff] }
 0x2d5   : > { %12033 = vmatprep.subr.bf16.mxu0 %v15829_v22  ;;  %11990 = vmatprep.mubr.bf16.mxu0 %v13721_v15  ;;  %v15859_v22 = vld [vmem:[%s16276_s20 + $0x1704] ss:$8 sps:$4 sm:$0xff]   ;;  %v13626_v15 = vcombine.low %v8800_v5, %v8832_v8  ;;  %v8896_v56 = vsel %vm17284_vm5, %v13516_v11, %v8895_v62  ;;  %v15874_v5 = vld [vmem:[%s16276_s20 + $0x334] ss:$8 sps:$4 sm:$0xff]  }
 0x2d6   : > { %7678 = vmatmul.mubr.bf16.gmra.mrb[20].mxu1 %v13184_v53  ;;  %v15848_v53 = vld [vmem:[%s16276_s20 + $0x2f0] ss:$8 sps:$4 sm:$0xff]   ;;  %v15880_v62 = vld [vmem:[%s16276_s20 + $0x344] ss:$8 sps:$4 sm:$0xff]  }
 0x2d7   : > { %7729 = vmatpush1.bf16.msra.mxu1 %v15818_v52  ;;  %7687 = vmatprep.mubr.bf16.mxu1 %v13201_v3  ;;  %v15865_v52 = vld [vmem:[%s16276_s20 + $0x1714] ss:$8 sps:$4 sm:$0xff]   ;;  %v8927_v3 = vrot.slane %v16148_v18, 5 }
 0x2d8   : > { %12034 = vmatpush1.bf16.msra.mxu0 %v15827_v16  ;;  %7730 = vmatprep.subr.bf16.mxu1 %v15826_v12  ;;  %v13106_v16 = vcombine.low %v16146_v49, %v16147_v23  ;;  %v13643_v12 = vcombine.high %v8864_v34, %v8896_v56  ;;  %v16154_v8 = vld [vmem:[%s16327_s24 + $0x210] sm:$0xff] }
 0x2d9   : > { %12035 = vmatprep.subr.bf16.mxu0 %v15835_v7  ;;  %v16149_v7 = vld [vmem:[%s16327_s24 + $0x2f0] sm:$0x11]  ;;  %v8928_v36 = vsel %vm17284_vm5, %v13524_v6, %v8927_v3  ;;  %v13139_v20 = vcombine.high %v16154_v8, %v16155_v30  ;;  %v8456_v11 = vld [vmem:[%s16327_s24 + $0x530] sm:$0xee]  ;;  %v15893_v3 = vld [vmem:[%s16276_s20 + $0x1760] ss:$8 sps:$4 sm:$0xff]  }
 0x2da   : > { %v13556_v49 = vrot.slane %v8456_v11, 9  ;;  %v16156_v23 = vld [vmem:[%s16327_s24 + $0x570] sm:$0x11] }
 0x2db   : > { %11991 = vmatmul.mubr.bf16.gmra.mrb[24].mxu0 %v13720_v44  ;;  %7731 = vmatpush1.bf16.msra.mxu1 %v15824_v39  ;;  %v13532_v39 = vrot.slane %v8432_v61, 9  ;;  %v15854_v44 = vld [vmem:[%s16276_s20 + $0x300] ss:$8 sps:$4 sm:$0xff]   ;;  %v16159_v61 = vld [vmem:[%s16327_s24 + $0x390] sm:$0xff] }
 0x2dc   : > { %12036 = vmatpush1.bf16.msra.mxu0 %v15833_v17  ;;  %7732 = vmatprep.subr.bf16.mxu1 %v15832_v43  ;;  %v8959_v43 = vrot.slane %v16149_v7, 5  ;;  %v15863_v17 = vld [vmem:[%s16276_s20 + $0x1710] ss:$8 sps:$4 sm:$0xff]  }
 0x2dd   : > { %12037 = vmatprep.subr.bf16.mxu0 %v15841_v31  ;;  %12000 = vmatprep.mubr.bf16.mxu0 %v13737_v26  ;;  %v15871_v31 = vld [vmem:[%s16276_s20 + $0x1724] ss:$8 sps:$4 sm:$0xff]   ;;  %v13642_v26 = vcombine.low %v8864_v34, %v8896_v56  ;;  %v15878_v34 = vld [vmem:[%s16276_s20 + $0x340] ss:$8 sps:$4 sm:$0xff]   ;;  %v15887_v56 = vld [vmem:[%s16276_s20 + $0x1750] ss:$8 sps:$4 sm:$0xff]  }
 0x2de   : > { %7688 = vmatmul.mubr.bf16.gmra.mrb[24].mxu1 %v13200_v42  ;;  %v15860_v42 = vld [vmem:[%s16276_s20 + $0x310] ss:$8 sps:$4 sm:$0xff]   ;;  %v8960_v45 = vsel %vm17284_vm5, %v13532_v39, %v8959_v43  ;;  %v15892_v43 = vld [vmem:[%s16276_s20 + $0x364] ss:$8 sps:$4 sm:$0xff]  }
 0x2df   : > { %7733 = vmatpush1.bf16.msra.mxu1 %v15830_v10  ;;  %7697 = vmatprep.mubr.bf16.mxu1 %v13217_v38  ;;  %v15877_v10 = vld [vmem:[%s16276_s20 + $0x1734] ss:$8 sps:$4 sm:$0xff]   ;;  %v8991_v38 = vrot.slane %v16152_v25, 5 }
 0x2e0   : > { %12038 = vmatpush1.bf16.msra.mxu0 %v15839_v58  ;;  %7734 = vmatprep.subr.bf16.mxu1 %v15838_v37  ;;  %v13122_v58 = vcombine.low %v16150_v24, %v16151_v28  ;;  %v13659_v37 = vcombine.high %v8928_v36, %v8960_v45  ;;  %v8472_v39 = vld [vmem:[%s16327_s24 + $0x630] sm:$0xee]  ;;  %v16160_v28 = vld [vmem:[%s16327_s24 + $0x670] sm:$0x11] }
 0x2e1   : > { %12039 = vmatprep.subr.bf16.mxu0 %v15847_v4  ;;  %v16153_v4 = vld [vmem:[%s16327_s24 + $0x3f0] sm:$0x11]  ;;  %v8992_v41 = vsel %vm17284_vm5, %v13540_v51, %v8991_v38  ;;  %v8480_v7 = vld [vmem:[%s16327_s24 + $0x6b0] sm:$0xee]  ;;  %v13572_v24 = vrot.slane %v8472_v39, 9 }
 0x2e2   : > { %v15905_v38 = vld [vmem:[%s16276_s20 + $0x1780] ss:$8 sps:$4 sm:$0xff]   ;;  %v16166_v11 = vld [vmem:[%s16327_s24 + $0x610] sm:$0xff] }
 0x2e3   : > { %12001 = vmatmul.mubr.bf16.gmra.mrb[28].mxu0 %v13736_v32  ;;  %7735 = vmatpush1.bf16.msra.mxu1 %v15836_v35  ;;  %v13548_v35 = vrot.slane %v8448_v1, 9  ;;  %v15866_v32 = vld [vmem:[%s16276_s20 + $0x320] ss:$8 sps:$4 sm:$0xff]   ;;  %v16163_v1 = vld [vmem:[%s16327_s24 + $0x590] sm:$0xff] }
 0x2e4   : > { %12040 = vmatpush1.bf16.msra.mxu0 %v15845_v48  ;;  %7736 = vmatprep.subr.bf16.mxu1 %v15844_v40  ;;  %v9023_v40 = vrot.slane %v16153_v4, 5  ;;  %v15875_v48 = vld [vmem:[%s16276_s20 + $0x1730] ss:$8 sps:$4 sm:$0xff]  }
 0x2e5   : > { %12041 = vmatprep.subr.bf16.mxu0 %v15853_v46  ;;  %12043 = vmatprep.mubr.bf16.mxu0 %v13627_v59  ;;  %v15883_v46 = vld [vmem:[%s16276_s20 + $0x1744] ss:$8 sps:$4 sm:$0xff]   ;;  %v13658_v59 = vcombine.low %v8928_v36, %v8960_v45  ;;  %v15890_v36 = vld [vmem:[%s16276_s20 + $0x360] ss:$8 sps:$4 sm:$0xff]   ;;  %v15899_v45 = vld [vmem:[%s16276_s20 + $0x1770] ss:$8 sps:$4 sm:$0xff]  }
 0x2e6   : > { %7698 = vmatmul.mubr.bf16.gmra.mrb[28].mxu1 %v13216_v14  ;;  %v15872_v14 = vld [vmem:[%s16276_s20 + $0x330] ss:$8 sps:$4 sm:$0xff]   ;;  %v9024_v54 = vsel %vm17284_vm5, %v13548_v35, %v9023_v40  ;;  %v15904_v40 = vld [vmem:[%s16276_s20 + $0x384] ss:$8 sps:$4 sm:$0xff]  }
 0x2e7   : > { %7737 = vmatpush1.bf16.msra.mxu1 %v15842_v9  ;;  %7740 = vmatprep.mubr.bf16.mxu1 %v13107_v29  ;;  %v15889_v9 = vld [vmem:[%s16276_s20 + $0x1754] ss:$8 sps:$4 sm:$0xff]   ;;  %v9055_v29 = vrot.slane %v16156_v23, 5 }
 0x2e8   : > { %12042 = vmatpush1.bf16.msra.mxu0 %v15851_v50  ;;  %7738 = vmatprep.subr.bf16.mxu1 %v15850_v2  ;;  %v13138_v50 = vcombine.low %v16154_v8, %v16155_v30  ;;  %v13675_v2 = vcombine.high %v8992_v41, %v9024_v54  ;;  %v8488_v35 = vld [vmem:[%s16327_s24 + $0x730] sm:$0xee]  ;;  %v16164_v30 = vld [vmem:[%s16327_s24 + $0x770] sm:$0x11] }
 0x2e9   : > { %12124 = vmatprep.subr.bf16.mxu0 %v15859_v22  ;;  %v13564_v22 = vrot.slane %v8464_v63, 9  ;;  %v9056_v6 = vsel %vm17284_vm5, %v13556_v49, %v9055_v29  ;;  %v8496_v4 = vld [vmem:[%s16327_s24 + $0x7b0] sm:$0xee]  ;;  %v13588_v8 = vrot.slane %v8488_v35, 9  ;;  %v15917_v29 = vld [vmem:[%s16276_s20 + $0x17a0] ss:$8 sps:$4 sm:$0xff]  }
 0x2ea   : > { %v16167_v63 = vld [vmem:[%s16327_s24 + $0x690] sm:$0xff] }
 0x2eb   : > { %12044 = vmatmul.mubr.bf16.vlgmr.msra.gmra.mrb[0].mxu0 %v13626_v15  ;;  %7739 = vmatpush1.bf16.msra.mxu1 %v15848_v53  ;;  %v16157_v53 = vld [vmem:[%s16327_s24 + $0x5f0] sm:$0x11] }
 0x2ec   : > { %12125 = vmatpush1.bf16.msra.mxu0 %v15857_v27  ;;  %7821 = vmatprep.subr.bf16.mxu1 %v15856_v33  ;;  %v9087_v15 = vrot.slane %v16157_v53, 5  ;;  %v15886_v27 = vld [vmem:[%s16276_s20 + $0x354] ss:$8 sps:$4 sm:$0xff]   ;;  %v13155_v33 = vcombine.high %v16158_v21, %v16159_v61 }
 0x2ed   : > { %12126 = vmatprep.subr.bf16.mxu0 %v15865_v52  ;;  %12053 = vmatprep.mubr.bf16.mxu0 %v13643_v12  ;;  %v15895_v52 = vld [vmem:[%s16276_s20 + $0x1764] ss:$8 sps:$4 sm:$0xff]   ;;  %v13674_v12 = vcombine.low %v8992_v41, %v9024_v54  ;;  %v15902_v41 = vld [vmem:[%s16276_s20 + $0x380] ss:$8 sps:$4 sm:$0xff]   ;;  %v15911_v54 = vld [vmem:[%s16276_s20 + $0x1790] ss:$8 sps:$4 sm:$0xff]  }
 0x2ee   : > { %7741 = vmatmul.mubr.bf16.vlgmr.msra.gmra.mrb[0].mxu1 %v13106_v16  ;;  %v15884_v16 = vld [vmem:[%s16276_s20 + $0x350] ss:$8 sps:$4 sm:$0xff]   ;;  %v9088_v18 = vsel %vm17284_vm5, %v13564_v22, %v9087_v15  ;;  %v15916_v15 = vld [vmem:[%s16276_s20 + $0x3a4] ss:$8 sps:$4 sm:$0xff]  }
 0x2ef   : > { %7822 = vmatpush1.bf16.msra.mxu1 %v15854_v44  ;;  %7750 = vmatprep.mubr.bf16.mxu1 %v13123_v13  ;;  %v15901_v44 = vld [vmem:[%s16276_s20 + $0x1774] ss:$8 sps:$4 sm:$0xff]   ;;  %v9119_v13 = vrot.slane %v16160_v28, 5 }
 0x2f0   : > { %12127 = vmatpush1.bf16.msra.mxu0 %v15863_v17  ;;  %7823 = vmatprep.subr.bf16.mxu1 %v15862_v55  ;;  %v13154_v17 = vcombine.low %v16158_v21, %v16159_v61  ;;  %v13691_v55 = vcombine.high %v9056_v6, %v9088_v18  ;;  %v8504_v22 = vld [vmem:[%s16327_s24 + $0x830] sm:$0xee]  ;;  %v16168_v61 = vld [vmem:[%s16327_s24 + $0x870] sm:$0x11] }
 0x2f1   : > { %12128 = vmatprep.subr.bf16.mxu0 %v15871_v31  ;;  %v13580_v31 = vrot.slane %v8480_v7, 9  ;;  %v9120_v51 = vsel %vm17284_vm5, %v13572_v24, %v9119_v13  ;;  %v8512_v53 = vld [vmem:[%s16327_s24 + $0x8b0] sm:$0xee]  ;;  %v13604_v21 = vrot.slane %v8504_v22, 9  ;;  %v15929_v13 = vld [vmem:[%s16276_s20 + $0x17c0] ss:$8 sps:$4 sm:$0xff]  }
 0x2f2   : > { %v16170_v39 = vld [vmem:[%s16327_s24 + $0x710] sm:$0xff]  ;;  %v16178_v22 = vld [vmem:[%s16327_s24 + $0x18] sm:$0xff] }
 0x2f3   : > { %12054 = vmatmul.mubr.bf16.gmra.mrb[4].mxu0 %v13642_v26  ;;  %7824 = vmatpush1.bf16.msra.mxu1 %v15860_v42  ;;  %v16161_v42 = vld [vmem:[%s16327_s24 + $0x6f0] sm:$0x11] }
 0x2f4   : > { %12129 = vmatpush1.bf16.msra.mxu0 %v15869_v19  ;;  %7825 = vmatprep.subr.bf16.mxu1 %v15868_v60  ;;  %v9151_v26 = vrot.slane %v16161_v42, 5  ;;  %v15898_v19 = vld [vmem:[%s16276_s20 + $0x374] ss:$8 sps:$4 sm:$0xff]   ;;  %v13171_v60 = vcombine.high %v16162_v47, %v16163_v1 }
 0x2f5   : > { %12130 = vmatprep.subr.bf16.mxu0 %v15877_v10  ;;  %12063 = vmatprep.mubr.bf16.mxu0 %v13659_v37  ;;  %v15907_v10 = vld [vmem:[%s16276_s20 + $0x1784] ss:$8 sps:$4 sm:$0xff]   ;;  %v13690_v37 = vcombine.low %v9056_v6, %v9088_v18  ;;  %v15914_v6 = vld [vmem:[%s16276_s20 + $0x3a0] ss:$8 sps:$4 sm:$0xff]   ;;  %v15923_v18 = vld [vmem:[%s16276_s20 + $0x17b0] ss:$8 sps:$4 sm:$0xff]  }
 0x2f6   : > { %7751 = vmatmul.mubr.bf16.gmra.mrb[4].mxu1 %v13122_v58  ;;  %v15896_v58 = vld [vmem:[%s16276_s20 + $0x370] ss:$8 sps:$4 sm:$0xff]   ;;  %v9152_v25 = vsel %vm17284_vm5, %v13580_v31, %v9151_v26  ;;  %v15928_v26 = vld [vmem:[%s16276_s20 + $0x3c4] ss:$8 sps:$4 sm:$0xff]  }
 0x2f7   : > { %7826 = vmatpush1.bf16.msra.mxu1 %v15866_v32  ;;  %7760 = vmatprep.mubr.bf16.mxu1 %v13139_v20  ;;  %v15913_v32 = vld [vmem:[%s16276_s20 + $0x1794] ss:$8 sps:$4 sm:$0xff]   ;;  %v9183_v20 = vrot.slane %v16164_v30, 5 }
 0x2f8   : > { %12131 = vmatpush1.bf16.msra.mxu0 %v15875_v48  ;;  %7827 = vmatprep.subr.bf16.mxu1 %v15874_v5  ;;  %v13170_v48 = vcombine.low %v16162_v47, %v16163_v1  ;;  %v13707_v5 = vcombine.high %v9120_v51, %v9152_v25  ;;  %v16171_v7 = vld [vmem:[%s16327_s24 + $0x790] sm:$0xff]  ;;  %v8393_v31 = vld [vmem:[%s16327_s24 + $0x38] sm:$0xee]  ;;  %v16172_v1 = vld [vmem:[%s16327_s24 + $0x78] sm:$0x11] }
 0x2f9   : > { %12132 = vmatprep.subr.bf16.mxu0 %v15883_v46  ;;  %v13596_v46 = vrot.slane %v8496_v4, 9  ;;  %v9184_v49 = vsel %vm17284_vm5, %v13588_v8, %v9183_v20  ;;  %v8401_v42 = vld [vmem:[%s16327_s24 + $0xb8] sm:$0xee]  ;;  %v13493_v47 = vrot.slane %v8393_v31, 9  ;;  %v16174_v35 = vld [vmem:[%s16327_s24 + $0x810] sm:$0xff] }
 0x2fa   : > { %v16175_v4 = vld [vmem:[%s16327_s24 + $0x890] sm:$0xff] }
 0x2fb   : > { %12064 = vmatmul.mubr.bf16.gmra.mrb[8].mxu0 %v13658_v59  ;;  %7828 = vmatpush1.bf16.msra.mxu1 %v15872_v14  ;;  %v16165_v14 = vld [vmem:[%s16327_s24 + $0x7f0] sm:$0x11] }
 0x2fc   : > { %12133 = vmatpush1.bf16.msra.mxu0 %v15881_v57  ;;  %7829 = vmatprep.subr.bf16.mxu1 %v15880_v62  ;;  %v9215_v59 = vrot.slane %v16165_v14, 5  ;;  %v15910_v57 = vld [vmem:[%s16276_s20 + $0x394] ss:$8 sps:$4 sm:$0xff]   ;;  %v13187_v62 = vcombine.high %v16166_v11, %v16167_v63  ;;  %v15941_v14 = vld [vmem:[%s16276_s20 + $0x17e0] ss:$8 sps:$4 sm:$0xff]  }
 0x2fd   : > { %12134 = vmatprep.subr.bf16.mxu0 %v15889_v9  ;;  %12073 = vmatprep.mubr.bf16.mxu0 %v13675_v2  ;;  %v15919_v9 = vld [vmem:[%s16276_s20 + $0x17a4] ss:$8 sps:$4 sm:$0xff]   ;;  %v13706_v2 = vcombine.low %v9120_v51, %v9152_v25  ;;  %v15926_v51 = vld [vmem:[%s16276_s20 + $0x3c0] ss:$8 sps:$4 sm:$0xff]   ;;  %v15935_v25 = vld [vmem:[%s16276_s20 + $0x17d0] ss:$8 sps:$4 sm:$0xff]  }
 0x2fe   : > { %7761 = vmatmul.mubr.bf16.gmra.mrb[8].mxu1 %v13138_v50  ;;  %v15908_v50 = vld [vmem:[%s16276_s20 + $0x390] ss:$8 sps:$4 sm:$0xff]   ;;  %v9216_v23 = vsel %vm17284_vm5, %v13596_v46, %v9215_v59 }
 0x2ff   : > { %7830 = vmatpush1.bf16.msra.mxu1 %v15878_v34  ;;  %7770 = vmatprep.mubr.bf16.mxu1 %v13155_v33  ;;  %v15925_v34 = vld [vmem:[%s16276_s20 + $0x17b4] ss:$8 sps:$4 sm:$0xff]   ;;  %v9247_v33 = vrot.slane %v16168_v61, 5  ;;  %v15932_v46 = vld [vmem:[%s16276_s20 + $0x3d0] ss:$8 sps:$4 sm:$0xff]  }
 0x300   : > { %12135 = vmatpush1.bf16.msra.mxu0 %v15887_v56  ;;  %7831 = vmatprep.subr.bf16.mxu1 %v15886_v27  ;;  %v13186_v56 = vcombine.low %v16166_v11, %v16167_v63  ;;  %v13723_v27 = vcombine.high %v9184_v49, %v9216_v23  ;;  %v16176_v59 = vld [vmem:[%s16327_s24 + $0x178] sm:$0x11]  ;;  %v15940_v11 = vld [vmem:[%s16276_s20 + $0x3e4] ss:$8 sps:$4 sm:$0xff]  }
 0x301   : > { %12136 = vmatprep.subr.bf16.mxu0 %v15895_v52  ;;  %v13612_v52 = vrot.slane %v8512_v53, 9  ;;  %v9248_v24 = vsel %vm17284_vm5, %v13604_v21, %v9247_v33  ;;  %v15949_v63 = vld [vmem:[%s16276_s20 + $0x17f4] ss:$8 sps:$4 sm:$0xff]   ;;  %v15944_v33 = vld [vmem:[%s16276_s20 + $0x3f0] ss:$8 sps:$4 sm:$0xff]  }
 0x302   : > { %v16179_v53 = vld [vmem:[%s16327_s24 + $0x98] sm:$0xff] }
 0x303   : > { %12074 = vmatmul.mubr.bf16.gmra.mrb[12].mxu0 %v13674_v12  ;;  %7832 = vmatpush1.bf16.msra.mxu1 %v15884_v16  ;;  %v16169_v16 = vld [vmem:[%s16327_s24 + $0x8f0] sm:$0x11]  ;;  %v8433_v21 = vld [vmem:[%s16327_s24 + $0x2b8] sm:$0xee] }
 0x304   : > { %12137 = vmatpush1.bf16.msra.mxu0 %v15893_v3  ;;  %7833 = vmatprep.subr.bf16.mxu1 %v15892_v43  ;;  %v9279_v12 = vrot.slane %v16169_v16, 5  ;;  %v15922_v3 = vld [vmem:[%s16276_s20 + $0x3b4] ss:$8 sps:$4 sm:$0xff]   ;;  %v13203_v43 = vcombine.high %v16170_v39, %v16171_v7 }
 0x305   : > { %12138 = vmatprep.subr.bf16.mxu0 %v15901_v44  ;;  %12083 = vmatprep.mubr.bf16.mxu0 %v13691_v55  ;;  %v15931_v44 = vld [vmem:[%s16276_s20 + $0x17c4] ss:$8 sps:$4 sm:$0xff]   ;;  %v13722_v55 = vcombine.low %v9184_v49, %v9216_v23  ;;  %v15938_v49 = vld [vmem:[%s16276_s20 + $0x3e0] ss:$8 sps:$4 sm:$0xff]   ;;  %v15947_v23 = vld [vmem:[%s16276_s20 + $0x17f0] ss:$8 sps:$4 sm:$0xff]  }
 0x306   : > { %7771 = vmatmul.mubr.bf16.gmra.mrb[12].mxu1 %v13154_v17  ;;  %v15920_v17 = vld [vmem:[%s16276_s20 + $0x3b0] ss:$8 sps:$4 sm:$0xff]   ;;  %v9280_v28 = vsel %vm17284_vm5, %v13612_v52, %v9279_v12 }
 0x307   : > { %7834 = vmatpush1.bf16.msra.mxu1 %v15890_v36  ;;  %7780 = vmatprep.mubr.bf16.mxu1 %v13171_v60  ;;  %v15937_v36 = vld [vmem:[%s16276_s20 + $0x17d4] ss:$8 sps:$4 sm:$0xff]   ;;  %v8803_v60 = vrot.slane %v16172_v1, 5  ;;  %v13738_v8 = vcombine.low %v9248_v24, %v9280_v28 }
 0x308   : > { %12139 = vmatpush1.bf16.msra.mxu0 %v15899_v45  ;;  %7835 = vmatprep.subr.bf16.mxu1 %v15898_v19  ;;  %v13202_v45 = vcombine.low %v16170_v39, %v16171_v7  ;;  %v13739_v19 = vcombine.high %v9248_v24, %v9280_v28  ;;  %v16180_v12 = vld [vmem:[%s16327_s24 + $0x278] sm:$0x11]  ;;  %v13108_v7 = vcombine.low %v16178_v22, %v16179_v53  ;;  %v8441_v28 = vld [vmem:[%s16327_s24 + $0x338] sm:$0xee] }
 0x309   : > { %12140 = vmatprep.subr.bf16.mxu0 %v15907_v10  ;;  %v13501_v10 = vrot.slane %v8401_v42, 9  ;;  %v8804_v30 = vsel %vm17284_vm5, %v13493_v47, %v8803_v60  ;;  %v16185_v47 = vld [vmem:[%s16327_s24 + $0x3f8] sm:$0x11] }
 0x30a   : > { %v9027_v1 = vrot.slane %v16185_v47, 5 }
 0x30b   : > { %12084 = vmatmul.mubr.bf16.gmra.mrb[16].mxu0 %v13690_v37  ;;  %7836 = vmatpush1.bf16.msra.mxu1 %v15896_v58  ;;  %v16173_v58 = vld [vmem:[%s16327_s24 + $0xf8] sm:$0x11] }
 0x30c   : > { %12141 = vmatpush1.bf16.msra.mxu0 %v15905_v38  ;;  %7837 = vmatprep.subr.bf16.mxu1 %v15904_v40  ;;  %v8835_v37 = vrot.slane %v16173_v58, 5  ;;  %v15934_v38 = vld [vmem:[%s16276_s20 + $0x3d4] ss:$8 sps:$4 sm:$0xff]   ;;  %v13219_v40 = vcombine.high %v16174_v35, %v16175_v4 }
 0x30d   : > { %12142 = vmatprep.subr.bf16.mxu0 %v15913_v32  ;;  %12093 = vmatprep.mubr.bf16.mxu0 %v13707_v5  ;;  %v15943_v32 = vld [vmem:[%s16276_s20 + $0x17e4] ss:$8 sps:$4 sm:$0xff]   ;;  %v8417_v5 = vld [vmem:[%s16327_s24 + $0x1b8] sm:$0xee] }
 0x30e   : > { %7781 = vmatmul.mubr.bf16.gmra.mrb[16].mxu1 %v13170_v48  ;;  %v8409_v48 = vld [vmem:[%s16327_s24 + $0x138] sm:$0xee]  ;;  %v8836_v20 = vsel %vm17284_vm5, %v13501_v10, %v8835_v37 }
 0x30f   : > { %7838 = vmatpush1.bf16.msra.mxu1 %v15902_v41  ;;  %7790 = vmatprep.mubr.bf16.mxu1 %v13187_v62  ;;  %v8867_v41 = vrot.slane %v16176_v59, 5  ;;  %v13509_v62 = vrot.slane %v8409_v48, 9  ;;  %v13628_v61 = vcombine.low %v8804_v30, %v8836_v20  ;;  %v16186_v10 = vld [vmem:[%s16327_s24 + $0x218] sm:$0xff] }
 0x310   : > { %12143 = vmatpush1.bf16.msra.mxu0 %v15911_v54  ;;  %7839 = vmatprep.subr.bf16.mxu1 %v15910_v57  ;;  %v16177_v54 = vld [vmem:[%s16327_s24 + $0x1f8] sm:$0x11] }
 0x311   : > { %12144 = vmatprep.subr.bf16.mxu0 %v15919_v9  ;;  %v8899_v57 = vrot.slane %v16177_v54, 5  ;;  %v13517_v9 = vrot.slane %v8417_v5, 9  ;;  %v16187_v58 = vld [vmem:[%s16327_s24 + $0x298] sm:$0xff] }
 0x312   : > { %v13141_v37 = vcombine.high %v16186_v10, %v16187_v58  ;;  %v16188_v48 = vld [vmem:[%s16327_s24 + $0x578] sm:$0x11] }
 0x313   : > { %12094 = vmatmul.mubr.bf16.gmra.mrb[20].mxu0 %v13706_v2  ;;  %7840 = vmatpush1.bf16.msra.mxu1 %v15908_v50  ;;  %v13629_v50 = vcombine.high %v8804_v30, %v8836_v20  ;;  %v13218_v2 = vcombine.low %v16174_v35, %v16175_v4  ;;  %v8465_v35 = vld [vmem:[%s16327_s24 + $0x5b8] sm:$0xee]  ;;  %v9059_v5 = vrot.slane %v16188_v48, 5  ;;  %v16189_v30 = vld [vmem:[%s16327_s24 + $0x5f8] sm:$0x11] }
 0x314   : > { %12145 = vmatpush1.bf16.msra.mxu0 %v15917_v29  ;;  %7841 = vmatprep.subr.bf16.mxu1 %v15916_v15  ;;  %v15946_v29 = vld [vmem:[%s16276_s20 + $0x3f4] ss:$8 sps:$4 sm:$0xff]   ;;  %v13109_v15 = vcombine.high %v16178_v22, %v16179_v53  ;;  %v9091_v20 = vrot.slane %v16189_v30, 5 }
 0x315   : > { %12146 = vmatprep.subr.bf16.mxu0 %v15925_v34  ;;  %12103 = vmatprep.mubr.bf16.mxu0 %v13723_v27  ;;  %v8868_v34 = vsel %vm17284_vm5, %v13509_v62, %v8867_v41  ;;  %v8425_v27 = vld [vmem:[%s16327_s24 + $0x238] sm:$0xee] }
 0x316   : > { %7791 = vmatmul.mubr.bf16.gmra.mrb[20].mxu1 %v13186_v56  ;;  %v8900_v56 = vsel %vm17284_vm5, %v13517_v9, %v8899_v57  ;;  %v13525_v16 = vrot.slane %v8425_v27, 9  ;;  %v16191_v59 = vld [vmem:[%s16327_s24 + $0x398] sm:$0xff] }
 0x317   : > { %7842 = vmatpush1.bf16.msra.mxu1 %v15914_v6  ;;  %7800 = vmatprep.mubr.bf16.mxu1 %v13203_v43  ;;  %v13645_v52 = vcombine.high %v8868_v34, %v8900_v56  ;;  %v8931_v6 = vrot.slane %v16180_v12, 5  ;;  %v16182_v43 = vld [vmem:[%s16327_s24 + $0x118] sm:$0xff]  ;;  %v13644_v31 = vcombine.low %v8868_v34, %v8900_v56 }
 0x318   : > { %12147 = vmatpush1.bf16.msra.mxu0 %v15923_v18  ;;  %7843 = vmatprep.subr.bf16.mxu1 %v15922_v3  ;;  %v13533_v18 = vrot.slane %v8433_v21, 9  ;;  %v16181_v3 = vld [vmem:[%s16327_s24 + $0x2f8] sm:$0x11] }
 0x319   : > { %12148 = vmatprep.subr.bf16.mxu0 %v15931_v44  ;;  %v8963_v39 = vrot.slane %v16181_v3, 5  ;;  %v16183_v44 = vld [vmem:[%s16327_s24 + $0x198] sm:$0xff] }
 0x31a   : > { %v13124_v60 = vcombine.low %v16182_v43, %v16183_v44  ;;  %v16195_v34 = vld [vmem:[%s16327_s24 + $0x598] sm:$0xff] }
 0x31b   : > { %12104 = vmatmul.mubr.bf16.gmra.mrb[24].mxu0 %v13722_v55  ;;  %7844 = vmatpush1.bf16.msra.mxu1 %v15920_v17  ;;  %v13125_v17 = vcombine.high %v16182_v43, %v16183_v44  ;;  %v8932_v55 = vsel %vm17284_vm5, %v13525_v16, %v8931_v6  ;;  %v8964_v24 = vsel %vm17284_vm5, %v13533_v18, %v8963_v39  ;;  %v16196_v6 = vld [vmem:[%s16327_s24 + $0x778] sm:$0x11] }
 0x31c   : > { %12149 = vmatpush1.bf16.msra.mxu0 %v15929_v13  ;;  %7845 = vmatprep.subr.bf16.mxu1 %v15928_v26  ;;  %v8449_v13 = vld [vmem:[%s16327_s24 + $0x3b8] sm:$0xee]  ;;  %v13661_v42 = vcombine.high %v8932_v55, %v8964_v24  ;;  %v13541_v26 = vrot.slane %v8441_v28, 9  ;;  %v13660_v4 = vcombine.low %v8932_v55, %v8964_v24  ;;  %v9187_v18 = vrot.slane %v16196_v6, 5  ;;  %v16197_v39 = vld [vmem:[%s16327_s24 + $0x7f8] sm:$0x11] }
 0x31d   : > { %12150 = vmatprep.subr.bf16.mxu0 %v15937_v36  ;;  %12113 = vmatprep.mubr.bf16.mxu0 %v13739_v19  ;;  %v16184_v36 = vld [vmem:[%s16327_s24 + $0x378] sm:$0x11]  ;;  %v13549_v19 = vrot.slane %v8449_v13, 9  ;;  %v8505_v13 = vld [vmem:[%s16327_s24 + $0x838] sm:$0xee] }
 0x31e   : > { %7801 = vmatmul.mubr.bf16.gmra.mrb[24].mxu1 %v13202_v45  ;;  %v8995_v45 = vrot.slane %v16184_v36, 5  ;;  %v16198_v44 = vld [vmem:[%s16327_s24 + $0x618] sm:$0xff]  ;;  %v13605_v36 = vrot.slane %v8505_v13, 9 }
 0x31f   : > { %7846 = vmatpush1.bf16.msra.mxu1 %v15926_v51  ;;  %7810 = vmatprep.mubr.bf16.mxu1 %v13219_v40  ;;  %v16205_v48 = vld [vmem:[%s16327_s24 + $0x898] sm:$0xff] }
 0x320   : > { %12151 = vmatpush1.bf16.msra.mxu0 %v15935_v25  ;;  %7847 = vmatprep.subr.bf16.mxu1 %v15934_v38  ;;  %v8996_v51 = vsel %vm17284_vm5, %v13541_v26, %v8995_v45  ;;  %v9028_v25 = vsel %vm17284_vm5, %v13549_v19, %v9027_v1  ;;  %v8457_v38 = vld [vmem:[%s16327_s24 + $0x538] sm:$0xee]  ;;  %v16200_v45 = vld [vmem:[%s16327_s24 + $0x878] sm:$0x11] }
 0x321   : > { %12152 = vmatprep.subr.bf16.mxu0 %v15943_v32  ;;  %v13677_v40 = vcombine.high %v8996_v51, %v9028_v25  ;;  %v13557_v32 = vrot.slane %v8457_v38, 9  ;;  %v13676_v62 = vcombine.low %v8996_v51, %v9028_v25  ;;  %v9251_v19 = vrot.slane %v16200_v45, 5  ;;  %v16201_v1 = vld [vmem:[%s16327_s24 + $0x8f8] sm:$0x11]  ;;  %v12277_v45 = vld [vmem:[#allocation2 + $0x40] sm:$0xff] }
 0x323   : > { %12114 = vmatmul.mubr.bf16.gmra.mrb[28].mxu0 %v13738_v8  ;;  %7848 = vmatpush1.bf16.msra.mxu1 %v15932_v46  ;;  %v13565_v8 = vrot.slane %v8465_v35, 9  ;;  %v13140_v46 = vcombine.low %v16186_v10, %v16187_v58  ;;  %v9060_v54 = vsel %vm17284_vm5, %v13557_v32, %v9059_v5  ;;  %v16202_v58 = vld [vmem:[%s16327_s24 + $0x718] sm:$0xff]  ;;  %v9252_v25 = vsel %vm17284_vm5, %v13605_v36, %v9251_v19 }
 0x324   : > { %12153 = vmatpush1.bf16.msra.mxu0 %v15941_v14  ;;  %7849 = vmatprep.subr.bf16.mxu1 %v15940_v11  ;;  %v16190_v14 = vld [vmem:[%s16327_s24 + $0x318] sm:$0xff] }
 0x325   : > { %12154 = vmatprep.subr.bf16.mxu0 %v15949_v63  ;;  %12156 = vmatprep.mubr.bf16.mxu0 %v13629_v50  ;;  %v13157_v41 = vcombine.high %v16190_v14, %v16191_v59  ;;  %v9092_v57 = vsel %vm17284_vm5, %v13565_v8, %v9091_v20  ;;  %v8473_v11 = vld [vmem:[%s16327_s24 + $0x638] sm:$0xee]  ;;  %v13156_v53 = vcombine.low %v16190_v14, %v16191_v59 }
 0x326   : > { %7811 = vmatmul.mubr.bf16.gmra.mrb[28].mxu1 %v13218_v2  ;;  %v8481_v63 = vld [vmem:[%s16327_s24 + $0x6b8] sm:$0xee]  ;;  %v13693_v9 = vcombine.high %v9060_v54, %v9092_v57  ;;  %v13573_v50 = vrot.slane %v8473_v11, 9  ;;  %v16192_v2 = vld [vmem:[%s16327_s24 + $0x678] sm:$0x11]  ;;  %v12270_v11 = vld [vmem:[#allocation2 + $0x8] sm:$0xff] }
 0x327   : > { %7850 = vmatpush1.bf16.msra.mxu1 %v15938_v49  ;;  %7853 = vmatprep.mubr.bf16.mxu1 %v13109_v15  ;;  %v9123_v49 = vrot.slane %v16192_v2, 5  ;;  %v16194_v15 = vld [vmem:[%s16327_s24 + $0x518] sm:$0xff] }
 0x328   : > { %12155 = vmatpush1.bf16.msra.mxu0 %v15947_v23  ;;  %7851 = vmatprep.subr.bf16.mxu1 %v15946_v29  ;;  %v13581_v23 = vrot.slane %v8481_v63, 9  ;;  %v16193_v29 = vld [vmem:[%s16327_s24 + $0x6f8] sm:$0x11]  ;;  %v13173_v56 = vcombine.high %v16194_v15, %v16195_v34  ;;  %v13172_v43 = vcombine.low %v16194_v15, %v16195_v34 }
 0x329   : > { %v9155_v22 = vrot.slane %v16193_v29, 5  ;;  %v9124_v27 = vsel %vm17284_vm5, %v13573_v50, %v9123_v49  ;;  %v16204_v32 = vld [vmem:[%s16327_s24 + $0x818] sm:$0xff] }
 0x32a   : > { %v13221_v5 = vcombine.high %v16204_v32, %v16205_v48  ;;  %v13220_v30 = vcombine.low %v16204_v32, %v16205_v48 }
 0x32b   : > { %12157 = vmatmul.mubr.bf16.vlgmr.msra.gmra.mrb[0].mxu0 %v13628_v61  ;;  %7852 = vmatpush1.bf16.msra.mxu1 %v15944_v33  ;;  %v9156_v21 = vsel %vm17284_vm5, %v13581_v23, %v9155_v22  ;;  %v8489_v61 = vld [vmem:[%s16327_s24 + $0x738] sm:$0xee] }
 0x32c   : > { %12166 = vmatprep.mubr.bf16.mxu0 %v13645_v52  ;;  %v8497_v33 = vld [vmem:[%s16327_s24 + $0x7b8] sm:$0xee]  ;;  %v13692_v52 = vcombine.low %v9060_v54, %v9092_v57  ;;  %v13709_v16 = vcombine.high %v9124_v27, %v9156_v21  ;;  %v13589_v12 = vrot.slane %v8489_v61, 9 }
 0x32d   : > { %v13597_v3 = vrot.slane %v8497_v33, 9  ;;  %v12272_v23 = vld [vmem:[#allocation2 + $0x18] sm:$0xff]  ;;  %v12273_v33 = vld [vmem:[#allocation2 + $0x20] sm:$0xff] }
 0x32e   : > { %7854 = vmatmul.mubr.bf16.vlgmr.msra.gmra.mrb[0].mxu1 %v13108_v7  ;;  %v9219_v7 = vrot.slane %v16197_v39, 5  ;;  %v9188_v24 = vsel %vm17284_vm5, %v13589_v12, %v9187_v18  ;;  %v12274_v12 = vld [vmem:[#allocation2 + $0x28] sm:$0xff] }
 0x32f   : > { %7863 = vmatprep.mubr.bf16.mxu1 %v13125_v17  ;;  %v16199_v17 = vld [vmem:[%s16327_s24 + $0x698] sm:$0xff] }
 0x330   : > { %v13189_v55 = vcombine.high %v16198_v44, %v16199_v17  ;;  %v9220_v28 = vsel %vm17284_vm5, %v13597_v3, %v9219_v7  ;;  %v13188_v10 = vcombine.low %v16198_v44, %v16199_v17  ;;  %v12275_v3 = vld [vmem:[#allocation2 + $0x30] sm:$0xff]  ;;  %v12276_v44 = vld [vmem:[#allocation2 + $0x38] sm:$0xff] }
 0x331   : > { %v13725_v26 = vcombine.high %v9188_v24, %v9220_v28  ;;  %v13724_v35 = vcombine.low %v9188_v24, %v9220_v28 }
 0x333   : > { %12167 = vmatmul.mubr.bf16.gmra.mrb[4].mxu0 %v13644_v31  ;;  %v8513_v31 = vld [vmem:[%s16327_s24 + $0x8b8] sm:$0xee] }
 0x334   : > { %12176 = vmatprep.mubr.bf16.mxu0 %v13661_v42  ;;  %v13708_v42 = vcombine.low %v9124_v27, %v9156_v21  ;;  %v13613_v47 = vrot.slane %v8513_v31, 9 }
 0x336   : > { %7864 = vmatmul.mubr.bf16.gmra.mrb[4].mxu1 %v13124_v60  ;;  %v9283_v60 = vrot.slane %v16201_v1, 5  ;;  %v12278_v1 = vld [vmem:[#allocation2 + $0x48] sm:$0xff] }
 0x337   : > { %7873 = vmatprep.mubr.bf16.mxu1 %v13141_v37  ;;  %v16203_v37 = vld [vmem:[%s16327_s24 + $0x798] sm:$0xff] }
 0x338   : > { %v13205_v51 = vcombine.high %v16202_v58, %v16203_v37  ;;  %v9284_v38 = vsel %vm17284_vm5, %v13613_v47, %v9283_v60 }
 0x339   : > { %v13740_v8 = vcombine.low %v9252_v25, %v9284_v38 }
 0x33b   : > { %12177 = vmatmul.mubr.bf16.gmra.mrb[8].mxu0 %v13660_v4  ;;  %v13741_v4 = vcombine.high %v9252_v25, %v9284_v38  ;;  %v12280_v38 = vld [vmem:[#allocation2 + $0x58] sm:$0xff] }
 0x33c   : > { %12186 = vmatprep.mubr.bf16.mxu0 %v13677_v40  ;;  %v13204_v40 = vcombine.low %v16202_v58, %v16203_v37  ;;  %v12279_v58 = vld [vmem:[#allocation2 + $0x50] sm:$0xff] }
 0x33e   : > { %7874 = vmatmul.mubr.bf16.gmra.mrb[8].mxu1 %v13140_v46 }
 0x33f   : > { %7883 = vmatprep.mubr.bf16.mxu1 %v13157_v41  ;;  %v12269_v41 = vld [vmem:[#allocation2] sm:$0xff] }
 0x343   : > { %12187 = vmatmul.mubr.bf16.gmra.mrb[12].mxu0 %v13676_v62 }
 0x344   : > { %12196 = vmatprep.mubr.bf16.mxu0 %v13693_v9  ;;  %v12271_v9 = vld [vmem:[#allocation2 + $0x10] sm:$0xff] }
 0x346   : > { %7884 = vmatmul.mubr.bf16.gmra.mrb[12].mxu1 %v13156_v53 }
 0x347   : > { %7893 = vmatprep.mubr.bf16.mxu1 %v13173_v56 }
 0x34b   : > { %12197 = vmatmul.mubr.bf16.gmra.mrb[16].mxu0 %v13692_v52 }
 0x34c   : > { %12206 = vmatprep.mubr.bf16.mxu0 %v13709_v16 }
 0x34e   : > { %7894 = vmatmul.mubr.bf16.gmra.mrb[16].mxu1 %v13172_v43 }
 0x34f   : > { %7903 = vmatprep.mubr.bf16.mxu1 %v13189_v55 }
 0x353   : > { %12207 = vmatmul.mubr.bf16.gmra.mrb[20].mxu0 %v13708_v42 }
 0x354   : > { %12216 = vmatprep.mubr.bf16.mxu0 %v13725_v26 }
 0x356   : > { %7904 = vmatmul.mubr.bf16.gmra.mrb[20].mxu1 %v13188_v10 }
 0x357   : > { %7913 = vmatprep.mubr.bf16.mxu1 %v13205_v51 }
 0x35b   : > { %12217 = vmatmul.mubr.bf16.gmra.mrb[24].mxu0 %v13724_v35 }
 0x35c   : > { %12226 = vmatprep.mubr.bf16.mxu0 %v13741_v4 }
 0x35e   : > { %7914 = vmatmul.mubr.bf16.gmra.mrb[24].mxu1 %v13204_v40 }
 0x35f   : > { %7923 = vmatprep.mubr.bf16.mxu1 %v13221_v5 }
 0x363   : > { %12227 = vmatmul.mubr.bf16.gmra.mrb[28].mxu0 %v13740_v8 }
 0x366   : > { %7924 = vmatmul.mubr.bf16.gmra.mrb[28].mxu1 %v13220_v30 }
 0x3fe   : > { %v12158_v20 = vpop.f32.mrb[0].mxu0 }
 0x3ff   : > { %v12160_v46 = vpop.f32.mrb[1].mxu0 }
 0x400   : > { %v12162_v0 = vpop.f32.mrb[2].mxu0 }
 0x401   : > { %v12164_v14 = vpop.f32.mrb[3].mxu0  ;;  %v7855_v59 = vpop.f32.mrb[0].mxu1 }
 0x402   : > { %v14036_v54 = vadd.f32 %v12158_v20, %v7855_v59  ;;  %v7857_v57 = vpop.f32.mrb[1].mxu1  ;;  %v12282_v59 = vld [vmem:[#allocation2 + $0x68] sm:$0xff] }
 0x403   : > { %v14037_v63 = vadd.f32 %v12160_v46, %v7857_v57  ;;  %v7859_v62 = vpop.f32.mrb[2].mxu1  ;;  %v12281_v46 = vld [vmem:[#allocation2 + $0x60] sm:$0xff]  ;;  %v12283_v57 = vld [vmem:[#allocation2 + $0x70] sm:$0xff] }
 0x404   : > { %v12301_v50 = vadd.f32 %v14036_v54, %v12269_v41  ;;  %v14038_v2 = vadd.f32 %v12162_v0, %v7859_v62  ;;  %v7861_v49 = vpop.f32.mrb[3].mxu1 }
 0x405   : > { %v12302_v29 = vadd.f32 %v14037_v63, %v12270_v11  ;;  %v14039_v22 = vadd.f32 %v12164_v14, %v7861_v49 }
 0x406   : > { %v12168_v53 = vpop.f32.mrb[4].mxu0  ;;  %12333 = vst [vmem:[#allocation2] sm:$0xff] %v12301_v50  ;;  %v12303_v15 = vadd.f32 %v14038_v2, %v12271_v9  ;;  %v12284_v9 = vld [vmem:[#allocation2 + $0x78] sm:$0xff] }
 0x407   : > { %v12170_v34 = vpop.f32.mrb[5].mxu0  ;;  %12334 = vst [vmem:[#allocation2 + $0x8] sm:$0xff] %v12302_v29  ;;  %v12304_v56 = vadd.f32 %v14039_v22, %v12272_v23 }
 0x408   : > { %v12172_v27 = vpop.f32.mrb[6].mxu0  ;;  %12335 = vst [vmem:[#allocation2 + $0x10] sm:$0xff] %v12303_v15 }
 0x409   : > { %v12174_v21 = vpop.f32.mrb[7].mxu0  ;;  %12336 = vst [vmem:[#allocation2 + $0x18] sm:$0xff] %v12304_v56  ;;  %v7865_v61 = vpop.f32.mrb[4].mxu1  ;;  %v12285_v56 = vld [vmem:[#allocation2 + $0x80] sm:$0xff] }
 0x40a   : > { %v14040_v52 = vadd.f32 %v12168_v53, %v7865_v61  ;;  %v7867_v16 = vpop.f32.mrb[5].mxu1  ;;  %v12286_v61 = vld [vmem:[#allocation2 + $0x88] sm:$0xff] }
 0x40b   : > { %v14041_v6 = vadd.f32 %v12170_v34, %v7867_v16  ;;  %v7869_v18 = vpop.f32.mrb[6].mxu1  ;;  %v12287_v16 = vld [vmem:[#allocation2 + $0x90] sm:$0xff] }
 0x40c   : > { %v12305_v39 = vadd.f32 %v14040_v52, %v12273_v33  ;;  %v14042_v7 = vadd.f32 %v12172_v27, %v7869_v18  ;;  %v7871_v43 = vpop.f32.mrb[7].mxu1 }
 0x40d   : > { %v12306_v17 = vadd.f32 %v14041_v6, %v12274_v12  ;;  %v14043_v55 = vadd.f32 %v12174_v21, %v7871_v43 }
 0x40e   : > { %v12178_v24 = vpop.f32.mrb[8].mxu0  ;;  %12337 = vst [vmem:[#allocation2 + $0x20] sm:$0xff] %v12305_v39  ;;  %v12307_v28 = vadd.f32 %v14042_v7, %v12275_v3  ;;  %v12288_v3 = vld [vmem:[#allocation2 + $0x98] sm:$0xff] }
 0x40f   : > { %v12180_v13 = vpop.f32.mrb[9].mxu0  ;;  %12338 = vst [vmem:[#allocation2 + $0x28] sm:$0xff] %v12306_v17  ;;  %v12308_v31 = vadd.f32 %v14043_v55, %v12276_v44 }
 0x410   : > { %v12182_v42 = vpop.f32.mrb[10].mxu0  ;;  %12339 = vst [vmem:[#allocation2 + $0x30] sm:$0xff] %v12307_v28 }
 0x411   : > { %v12184_v26 = vpop.f32.mrb[11].mxu0  ;;  %12340 = vst [vmem:[#allocation2 + $0x38] sm:$0xff] %v12308_v31  ;;  %v7875_v36 = vpop.f32.mrb[8].mxu1  ;;  %v12289_v31 = vld [vmem:[#allocation2 + $0xa0] sm:$0xff] }
 0x412   : > { %v14044_v19 = vadd.f32 %v12178_v24, %v7875_v36  ;;  %v7877_v47 = vpop.f32.mrb[9].mxu1  ;;  %v12290_v36 = vld [vmem:[#allocation2 + $0xa8] sm:$0xff] }
 0x413   : > { %v14045_v60 = vadd.f32 %v12180_v13, %v7877_v47  ;;  %v7879_v10 = vpop.f32.mrb[10].mxu1  ;;  %v12291_v47 = vld [vmem:[#allocation2 + $0xb0] sm:$0xff] }
 0x414   : > { %v12309_v37 = vadd.f32 %v14044_v19, %v12277_v45  ;;  %v14046_v51 = vadd.f32 %v12182_v42, %v7879_v10  ;;  %v7881_v25 = vpop.f32.mrb[11].mxu1 }
 0x415   : > { %v12310_v35 = vadd.f32 %v14045_v60, %v12278_v1  ;;  %v14047_v4 = vadd.f32 %v12184_v26, %v7881_v25 }
 0x416   : > { %v12188_v40 = vpop.f32.mrb[12].mxu0  ;;  %12341 = vst [vmem:[#allocation2 + $0x40] sm:$0xff] %v12309_v37  ;;  %v12311_v32 = vadd.f32 %v14046_v51, %v12279_v58  ;;  %v12292_v58 = vld [vmem:[#allocation2 + $0xb8] sm:$0xff] }
 0x417   : > { %v12190_v48 = vpop.f32.mrb[13].mxu0  ;;  %12342 = vst [vmem:[#allocation2 + $0x48] sm:$0xff] %v12310_v35  ;;  %v12312_v5 = vadd.f32 %v14047_v4, %v12280_v38 }
 0x418   : > { %v12192_v8 = vpop.f32.mrb[14].mxu0  ;;  %12343 = vst [vmem:[#allocation2 + $0x50] sm:$0xff] %v12311_v32 }
 0x419   : > { %v12194_v30 = vpop.f32.mrb[15].mxu0  ;;  %12344 = vst [vmem:[#allocation2 + $0x58] sm:$0xff] %v12312_v5  ;;  %v7885_v20 = vpop.f32.mrb[12].mxu1  ;;  %v12293_v5 = vld [vmem:[#allocation2 + $0xc0] sm:$0xff] }
 0x41a   : > { %v14048_v0 = vadd.f32 %v12188_v40, %v7885_v20  ;;  %v7887_v14 = vpop.f32.mrb[13].mxu1  ;;  %v12294_v20 = vld [vmem:[#allocation2 + $0xc8] sm:$0xff] }
 0x41b   : > { %v14049_v41 = vadd.f32 %v12190_v48, %v7887_v14  ;;  %v7889_v54 = vpop.f32.mrb[14].mxu1  ;;  %v12295_v14 = vld [vmem:[#allocation2 + $0xd0] sm:$0xff] }
 0x41c   : > { %v12313_v11 = vadd.f32 %v14048_v0, %v12281_v46  ;;  %v14050_v63 = vadd.f32 %v12192_v8, %v7889_v54  ;;  %v7891_v62 = vpop.f32.mrb[15].mxu1 }
 0x41d   : > { %v12314_v50 = vadd.f32 %v14049_v41, %v12282_v59  ;;  %v14051_v2 = vadd.f32 %v12194_v30, %v7891_v62 }
 0x41e   : > { %v12198_v49 = vpop.f32.mrb[16].mxu0  ;;  %12345 = vst [vmem:[#allocation2 + $0x60] sm:$0xff] %v12313_v11  ;;  %v12315_v23 = vadd.f32 %v14050_v63, %v12283_v57  ;;  %v12296_v57 = vld [vmem:[#allocation2 + $0xd8] sm:$0xff] }
 0x41f   : > { %v12200_v29 = vpop.f32.mrb[17].mxu0  ;;  %12346 = vst [vmem:[#allocation2 + $0x68] sm:$0xff] %v12314_v50  ;;  %v12316_v22 = vadd.f32 %v14051_v2, %v12284_v9 }
 0x420   : > { %v12202_v53 = vpop.f32.mrb[18].mxu0  ;;  %12347 = vst [vmem:[#allocation2 + $0x70] sm:$0xff] %v12315_v23 }
 0x421   : > { %v12204_v15 = vpop.f32.mrb[19].mxu0  ;;  %12348 = vst [vmem:[#allocation2 + $0x78] sm:$0xff] %v12316_v22  ;;  %v7895_v34 = vpop.f32.mrb[16].mxu1  ;;  %v12297_v22 = vld [vmem:[#allocation2 + $0xe0] sm:$0xff] }
 0x422   : > { %v14052_v27 = vadd.f32 %v12198_v49, %v7895_v34  ;;  %v7897_v21 = vpop.f32.mrb[17].mxu1  ;;  %v12298_v34 = vld [vmem:[#allocation2 + $0xe8] sm:$0xff] }
 0x423   : > { %v14053_v33 = vadd.f32 %v12200_v29, %v7897_v21  ;;  %v7899_v52 = vpop.f32.mrb[18].mxu1  ;;  %v12299_v21 = vld [vmem:[#allocation2 + $0xf0] sm:$0xff] }
 0x424   : > { %v12317_v12 = vadd.f32 %v14052_v27, %v12285_v56  ;;  %v14054_v6 = vadd.f32 %v12202_v53, %v7899_v52  ;;  %v7901_v18 = vpop.f32.mrb[19].mxu1 }
 0x425   : > { %v12318_v39 = vadd.f32 %v14053_v33, %v12286_v61  ;;  %v14055_v7 = vadd.f32 %v12204_v15, %v7901_v18 }
 0x426   : > { %v12208_v43 = vpop.f32.mrb[20].mxu0  ;;  %12349 = vst [vmem:[#allocation2 + $0x80] sm:$0xff] %v12317_v12  ;;  %v12319_v44 = vadd.f32 %v14054_v6, %v12287_v16  ;;  %v12300_v16 = vld [vmem:[#allocation2 + $0xf8] sm:$0xff] }
 0x427   : > { %v12210_v17 = vpop.f32.mrb[21].mxu0  ;;  %12350 = vst [vmem:[#allocation2 + $0x88] sm:$0xff] %v12318_v39  ;;  %v12320_v55 = vadd.f32 %v14055_v7, %v12288_v3  ;;  %v12403_v39 = vlaneseq (!%p13998_p6) }
 0x428   : > { %v12212_v24 = vpop.f32.mrb[22].mxu0  ;;  %12351 = vst [vmem:[#allocation2 + $0x90] sm:$0xff] %v12319_v44  ;;  %v12369_v44 = vld [vmem:[#allocation2] sm:$0xff] (!%p13998_p6) }
 0x429   : > { %v12214_v28 = vpop.f32.mrb[23].mxu0  ;;  %12352 = vst [vmem:[#allocation2 + $0x98] sm:$0xff] %v12320_v55  ;;  %v7905_v13 = vpop.f32.mrb[20].mxu1  ;;  %v12404_v7 = vshrl.u32 (!%p13998_p6), %v12403_v39, 7 }
 0x42a   : > { %v14056_v42 = vadd.f32 %v12208_v43, %v7905_v13  ;;  %v7907_v26 = vpop.f32.mrb[21].mxu1  ;;  %v12401_v43 = vld [vmem:[%s19566_s2] sm:$0x3] (!%p13998_p6)  ;;  %v12372_v13 = vld [vmem:[#allocation2 + $0x18] sm:$0xff] (!%p13998_p6) }
 0x42b   : > { %v14057_v45 = vadd.f32 %v12210_v17, %v7907_v26  ;;  %v7909_v19 = vpop.f32.mrb[22].mxu1  ;;  %v12370_v17 = vld [vmem:[#allocation2 + $0x8] sm:$0xff] (!%p13998_p6)  ;;  %v12405_v55 = vsub.s32 (!%p13998_p6), 0, %v12404_v7 }
 0x42c   : > { %v12321_v1 = vadd.f32 %v14056_v42, %v12289_v31  ;;  %v14058_v60 = vadd.f32 %v12212_v24, %v7909_v19  ;;  %v7911_v10 = vpop.f32.mrb[23].mxu1  ;;  %v12409_v24 = vsub.s32 (!%p13998_p6), 1, %v12404_v7  ;;  %v12373_v31 = vld [vmem:[#allocation2 + $0x20] sm:$0xff] (!%p13998_p6)  ;;  %v12376_v19 = vld [vmem:[#allocation2 + $0x38] sm:$0xff] (!%p13998_p6) }
 0x42d   : > { %v12322_v37 = vadd.f32 %v14057_v45, %v12290_v36  ;;  %v14059_v51 = vadd.f32 %v12214_v28, %v7911_v10  ;;  %v12371_v28 = vld [vmem:[#allocation2 + $0x10] sm:$0xff] (!%p13998_p6)  ;;  %v19471_v42 = vrot.slane (!%p13998_p6), %v12401_v43, %v12405_v55  ;;  %v12374_v36 = vld [vmem:[#allocation2 + $0x28] sm:$0xff] (!%p13998_p6) }
 0x42e   : > { %v12218_v25 = vpop.f32.mrb[24].mxu0  ;;  %12353 = vst [vmem:[#allocation2 + $0xa0] sm:$0xff] %v12321_v1  ;;  %v12323_v38 = vadd.f32 %v14058_v60, %v12291_v47  ;;  %v19473_v26 = vrot.slane (!%p13998_p6), %v12401_v43, %v12409_v24  ;;  %v12375_v45 = vld [vmem:[#allocation2 + $0x30] sm:$0xff] (!%p13998_p6) }
 0x42f   : > { %v12220_v35 = vpop.f32.mrb[25].mxu0  ;;  %12354 = vst [vmem:[#allocation2 + $0xa8] sm:$0xff] %v12322_v37  ;;  %v12324_v4 = vadd.f32 %v14059_v51, %v12292_v58  ;;  %v12413_v47 = vadd.f32 (!%p13998_p6), %v19471_v42, %v12369_v44  ;;  %v12415_v60 = vadd.f32 (!%p13998_p6), %v19471_v42, %v12371_v28  ;;  %v12417_v58 = vadd.f32 (!%p13998_p6), %v19471_v42, %v12373_v31 }
 0x430   : > { %v12222_v40 = vpop.f32.mrb[26].mxu0  ;;  %12355 = vst [vmem:[#allocation2 + $0xb0] sm:$0xff] %v12323_v38  ;;  %v12414_v1 = vadd.f32 (!%p13998_p6), %v19473_v26, %v12370_v17  ;;  %v12416_v10 = vadd.f32 (!%p13998_p6), %v19473_v26, %v12372_v13  ;;  %v12418_v37 = vadd.f32 (!%p13998_p6), %v19473_v26, %v12374_v36  ;;  %v12419_v51 = vadd.f32 (!%p13998_p6), %v19471_v42, %v12375_v45  ;;  %v12377_v38 = vld [vmem:[#allocation2 + $0x40] sm:$0xff] (!%p13998_p6) }
 0x431   : > { %v12224_v32 = vpop.f32.mrb[27].mxu0  ;;  %12356 = vst [vmem:[#allocation2 + $0xb8] sm:$0xff] %v12324_v4  ;;  %v7915_v48 = vpop.f32.mrb[24].mxu1  ;;  %v12445_v4 = vmax.f32 (!%p13998_p6), %v12413_v47, 0.0 }
 0x432   : > { %v14060_v8 = vadd.f32 %v12218_v25, %v7915_v48  ;;  %v7917_v30 = vpop.f32.mrb[25].mxu1  ;;  %v12420_v25 = vadd.f32 (!%p13998_p6), %v19473_v26, %v12376_v19  ;;  %v12448_v48 = vmax.f32 (!%p13998_p6), %v12416_v10, 0.0 }
 0x433   : > { %v14061_v46 = vadd.f32 %v12220_v35, %v7917_v30  ;;  %v7919_v0 = vpop.f32.mrb[26].mxu1  ;;  %v12378_v35 = vld [vmem:[#allocation2 + $0x48] sm:$0xff] (!%p13998_p6)  ;;  %v12449_v30 = vmax.f32 (!%p13998_p6), %v12417_v58, 0.0 }
 0x434   : > { %v12325_v59 = vadd.f32 %v14060_v8, %v12293_v5  ;;  %v14062_v41 = vadd.f32 %v12222_v40, %v7919_v0  ;;  %v7921_v54 = vpop.f32.mrb[27].mxu1  ;;  %v12446_v40 = vmax.f32 (!%p13998_p6), %v12414_v1, 0.0  ;;  %v12379_v5 = vld [vmem:[#allocation2 + $0x50] sm:$0xff] (!%p13998_p6)  ;;  %v12380_v8 = vld [vmem:[#allocation2 + $0x58] sm:$0xff] (!%p13998_p6)  ;;  %v12452_v0 = vmax.f32 (!%p13998_p6), %v12420_v25, 0.0 }
 0x435   : > { %v12326_v11 = vadd.f32 %v14061_v46, %v12294_v20  ;;  %v14063_v63 = vadd.f32 %v12224_v32, %v7921_v54  ;;  %v12447_v32 = vmax.f32 (!%p13998_p6), %v12415_v60, 0.0  ;;  %v12450_v20 = vmax.f32 (!%p13998_p6), %v12418_v37, 0.0 }
 0x436   : > { %v12228_v62 = vpop.f32.mrb[28].mxu0  ;;  %12357 = vst [vmem:[#allocation2 + $0xc0] sm:$0xff] %v12325_v59  ;;  %v12327_v9 = vadd.f32 %v14062_v41, %v12295_v14  ;;  %v12451_v46 = vmax.f32 (!%p13998_p6), %v12419_v51, 0.0  ;;  %v12381_v14 = vld [vmem:[#allocation2 + $0x60] sm:$0xff] (!%p13998_p6)  ;;  %v12382_v59 = vld [vmem:[#allocation2 + $0x68] sm:$0xff] (!%p13998_p6)  ;;  %v14020_v41 = vpack.c.bf16 (!%p13998_p6), %v12446_v40, %v12445_v4 }
 0x437   : > { %v12230_v50 = vpop.f32.mrb[29].mxu0  ;;  %12358 = vst [vmem:[#allocation2 + $0xc8] sm:$0xff] %v12326_v11  ;;  %v12328_v2 = vadd.f32 %v14063_v63, %v12296_v57  ;;  %v14021_v54 = vpack.c.bf16 (!%p13998_p6), %v12448_v48, %v12447_v32  ;;  %v12421_v57 = vadd.f32 (!%p13998_p6), %v19471_v42, %v12377_v38  ;;  %v12422_v11 = vadd.f32 (!%p13998_p6), %v19473_v26, %v12378_v35  ;;  %v12383_v63 = vld [vmem:[#allocation2 + $0x70] sm:$0xff] (!%p13998_p6)  ;;  %v12390_v39 = vld [vmem:[#allocation2 + $0xa8] sm:$0xff] (!%p13998_p6) }
 0x438   : > { %v12232_v49 = vpop.f32.mrb[30].mxu0  ;;  %12359 = vst [vmem:[#allocation2 + $0xd0] sm:$0xff] %v12327_v9  ;;  %v14022_v9 = vpack.c.bf16 (!%p13998_p6), %v12450_v20, %v12449_v30  ;;  %12573 = vst [vmem:[%s19567_s3] sm:$0xff] (!%p13998_p6), %v14020_v41  ;;  %v12391_v55 = vld [vmem:[#allocation2 + $0xb0] sm:$0xff] (!%p13998_p6)  ;;  %v12392_v24 = vld [vmem:[#allocation2 + $0xb8] sm:$0xff] (!%p13998_p6)  ;;  %v12434_v60 = vadd.f32 (!%p13998_p6), %v19473_v26, %v12390_v39 }
 0x439   : > { %v12234_v23 = vpop.f32.mrb[31].mxu0  ;;  %12360 = vst [vmem:[#allocation2 + $0xd8] sm:$0xff] %v12328_v2  ;;  %v7925_v29 = vpop.f32.mrb[28].mxu1  ;;  %v12423_v2 = vadd.f32 (!%p13998_p6), %v19471_v42, %v12379_v5  ;;  %12574 = vst [vmem:[%s19567_s3 + $0x8] sm:$0xff] (!%p13998_p6), %v14021_v54  ;;  %v12435_v51 = vadd.f32 (!%p13998_p6), %v19471_v42, %v12391_v55  ;;  %v12436_v25 = vadd.f32 (!%p13998_p6), %v19473_v26, %v12392_v24 }
 0x43a   : > { %v14064_v53 = vadd.f32 %v12228_v62, %v7925_v29  ;;  %v7927_v15 = vpop.f32.mrb[29].mxu1  ;;  %v12384_v62 = vld [vmem:[#allocation2 + $0x78] sm:$0xff] (!%p13998_p6)  ;;  %v12453_v29 = vmax.f32 (!%p13998_p6), %v12421_v57, 0.0  ;;  %12575 = vst [vmem:[%s19567_s3 + $0x10] sm:$0xff] (!%p13998_p6), %v14022_v9  ;;  %v12466_v32 = vmax.f32 (!%p13998_p6), %v12434_v60, 0.0 }
 0x43b   : > { %v14065_v56 = vadd.f32 %v12230_v50, %v7927_v15  ;;  %v7929_v27 = vpop.f32.mrb[30].mxu1  ;;  %12368 = sbr.rel (%p13998_p6) target bundleno = 1104 (0x450), region = 40  ;;  %v14023_v50 = vpack.c.bf16 (!%p13998_p6), %v12452_v0, %v12451_v46  ;;  %v12426_v15 = vadd.f32 (!%p13998_p6), %v19473_v26, %v12382_v59  ;;  %v12467_v20 = vmax.f32 (!%p13998_p6), %v12435_v51, 0.0 }
 0x43c   : > { %v12329_v61 = vadd.f32 %v14064_v53, %v12297_v22  ;;  %v14066_v33 = vadd.f32 %v12232_v49, %v7929_v27  ;;  %v7931_v52 = vpop.f32.mrb[31].mxu1  ;;  %v12424_v49 = vadd.f32 (!%p13998_p6), %v19473_v26, %v12380_v8  ;;  %v12454_v22 = vmax.f32 (!%p13998_p6), %v12422_v11, 0.0 }
 0x43d   : > { %v12330_v12 = vadd.f32 %v14065_v56, %v12298_v34  ;;  %v14067_v6 = vadd.f32 %v12234_v23, %v7931_v52  ;;  %v12385_v23 = vld [vmem:[#allocation2 + $0x80] sm:$0xff] (!%p13998_p6)  ;;  %v12425_v53 = vadd.f32 (!%p13998_p6), %v19471_v42, %v12381_v14  ;;  %v12386_v34 = vld [vmem:[#allocation2 + $0x88] sm:$0xff] (!%p13998_p6)  ;;  %12576 = vst [vmem:[%s19567_s3 + $0x18] sm:$0xff] (!%p13998_p6), %v14023_v50  ;;  %v12455_v56 = vmax.f32 (!%p13998_p6), %v12423_v2, 0.0  ;;  %v12388_v52 = vld [vmem:[#allocation2 + $0x98] sm:$0xff] (!%p13998_p6) }
 0x43e   : > { %12361 = vst [vmem:[#allocation2 + $0xe0] sm:$0xff] %v12329_v61  ;;  %v12331_v18 = vadd.f32 %v14066_v33, %v12299_v21  ;;  %v12456_v27 = vmax.f32 (!%p13998_p6), %v12424_v49, 0.0  ;;  %v12427_v21 = vadd.f32 (!%p13998_p6), %v19471_v42, %v12383_v63  ;;  %v12428_v61 = vadd.f32 (!%p13998_p6), %v19473_v26, %v12384_v62  ;;  %v12387_v33 = vld [vmem:[#allocation2 + $0x90] sm:$0xff] (!%p13998_p6)  ;;  %v12393_v45 = vld [vmem:[#allocation2 + $0xc0] sm:$0xff] (!%p13998_p6)  ;;  %v12394_v10 = vld [vmem:[#allocation2 + $0xc8] sm:$0xff] (!%p13998_p6) }
 0x43f   : > { %12362 = vst [vmem:[#allocation2 + $0xe8] sm:$0xff] %v12330_v12  ;;  %v12332_v3 = vadd.f32 %v14067_v6, %v12300_v16  ;;  %v14024_v16 = vpack.c.bf16 (!%p13998_p6), %v12454_v22, %v12453_v29  ;;  %v12457_v12 = vmax.f32 (!%p13998_p6), %v12425_v53, 0.0  ;;  %v12458_v6 = vmax.f32 (!%p13998_p6), %v12426_v15, 0.0  ;;  %v12395_v38 = vld [vmem:[#allocation2 + $0xd0] sm:$0xff] (!%p13998_p6) }
 0x440   : > { %12363 = vst [vmem:[#allocation2 + $0xf0] sm:$0xff] %v12331_v18  ;;  %v12429_v18 = vadd.f32 (!%p13998_p6), %v19471_v42, %v12385_v23  ;;  %v14025_v7 = vpack.c.bf16 (!%p13998_p6), %v12456_v27, %v12455_v56  ;;  %v12459_v43 = vmax.f32 (!%p13998_p6), %v12427_v21, 0.0  ;;  %v12460_v44 = vmax.f32 (!%p13998_p6), %v12428_v61, 0.0  ;;  %v12396_v35 = vld [vmem:[#allocation2 + $0xd8] sm:$0xff] (!%p13998_p6) }
 0x441   : > { %12364 = vst [vmem:[#allocation2 + $0xf8] sm:$0xff] %v12332_v3  ;;  %v12389_v3 = vld [vmem:[#allocation2 + $0xa0] sm:$0xff] (!%p13998_p6)  ;;  %v12430_v17 = vadd.f32 (!%p13998_p6), %v19473_v26, %v12386_v34  ;;  %12577 = vst [vmem:[%s19567_s3 + $0x20] sm:$0xff] (!%p13998_p6), %v14024_v16  ;;  %v14026_v28 = vpack.c.bf16 (!%p13998_p6), %v12458_v6, %v12457_v12  ;;  %v12431_v31 = vadd.f32 (!%p13998_p6), %v19471_v42, %v12387_v33  ;;  %v12468_v46 = vmax.f32 (!%p13998_p6), %v12436_v25, 0.0 }
 0x442   : > { %v12461_v13 = vmax.f32 %v12429_v18, 0.0  ;;  %v12432_v36 = vadd.f32 %v19473_v26, %v12388_v52  ;;  %12578 = vst [vmem:[%s19567_s3 + $0x28] sm:$0xff] %v14025_v7  ;;  %v14027_v19 = vpack.c.bf16 %v12460_v44, %v12459_v43  ;;  %v12433_v1 = vadd.f32 %v19471_v42, %v12389_v3 }
 0x443   : > { %v12462_v47 = vmax.f32 %v12430_v17, 0.0  ;;  %12579 = vst [vmem:[%s19567_s3 + $0x30] sm:$0xff] %v14026_v28  ;;  %v12463_v58 = vmax.f32 %v12431_v31, 0.0  ;;  %v12437_v48 = vadd.f32 %v19471_v42, %v12393_v45  ;;  %v12438_v0 = vadd.f32 %v19473_v26, %v12394_v10 }
 0x444   : > { %v12464_v37 = vmax.f32 %v12432_v36, 0.0  ;;  %12580 = vst [vmem:[%s19567_s3 + $0x38] sm:$0xff] %v14027_v19  ;;  %v12465_v40 = vmax.f32 %v12433_v1, 0.0  ;;  %v12439_v57 = vadd.f32 %v19471_v42, %v12395_v38  ;;  %v12440_v11 = vadd.f32 %v19473_v26, %v12396_v35 }
 0x445   : > { %v14028_v4 = vpack.c.bf16 %v12462_v47, %v12461_v13  ;;  %v12397_v5 = vld [vmem:[#allocation2 + $0xe0] sm:$0xff]  ;;  %v12469_v54 = vmax.f32 %v12437_v48, 0.0  ;;  %v14031_v63 = vpack.c.bf16 %v12468_v46, %v12467_v20  ;;  %v12470_v62 = vmax.f32 %v12438_v0, 0.0 }
 0x446   : > { %v12398_v8 = vld [vmem:[#allocation2 + $0xe8] sm:$0xff]  ;;  %v14029_v30 = vpack.c.bf16 %v12464_v37, %v12463_v58  ;;  %v14030_v41 = vpack.c.bf16 %v12466_v32, %v12465_v40  ;;  %v12441_v9 = vadd.f32 %v19471_v42, %v12397_v5  ;;  %v12471_v2 = vmax.f32 %v12439_v57, 0.0 }
 0x447   : > { %v12399_v14 = vld [vmem:[#allocation2 + $0xf0] sm:$0xff]  ;;  %12581 = vst [vmem:[%s19567_s3 + $0x40] sm:$0xff] %v14028_v4  ;;  %v12442_v50 = vadd.f32 %v19473_v26, %v12398_v8  ;;  %v12472_v49 = vmax.f32 %v12440_v11, 0.0  ;;  %12584 = vst [vmem:[%s19567_s3 + $0x58] sm:$0xff] %v14031_v63  ;;  %v14032_v22 = vpack.c.bf16 %v12470_v62, %v12469_v54 }
 0x448   : > { %v12400_v59 = vld [vmem:[#allocation2 + $0xf8] sm:$0xff]  ;;  %12582 = vst [vmem:[%s19567_s3 + $0x48] sm:$0xff] %v14029_v30  ;;  %12583 = vst [vmem:[%s19567_s3 + $0x50] sm:$0xff] %v14030_v41  ;;  %v12443_v23 = vadd.f32 %v19471_v42, %v12399_v14  ;;  %v12473_v53 = vmax.f32 %v12441_v9, 0.0 }
 0x449   : > { %v12444_v29 = vadd.f32 %v19473_v26, %v12400_v59  ;;  %v12474_v15 = vmax.f32 %v12442_v50, 0.0  ;;  %v14033_v34 = vpack.c.bf16 %v12472_v49, %v12471_v2  ;;  %12585 = vst [vmem:[%s19567_s3 + $0x60] sm:$0xff] %v14032_v22 }
 0x44a   : > { %v12475_v56 = vmax.f32 %v12443_v23, 0.0 }
 0x44b   : > { %v12476_v27 = vmax.f32 %v12444_v29, 0.0  ;;  %v14034_v21 = vpack.c.bf16 %v12474_v15, %v12473_v53  ;;  %12586 = vst [vmem:[%s19567_s3 + $0x68] sm:$0xff] %v14033_v34 }
 0x44d   : > { %v14035_v42 = vpack.c.bf16 %v12476_v27, %v12475_v56  ;;  %12587 = vst [vmem:[%s19567_s3 + $0x70] sm:$0xff] %v14034_v21 }
 0x44f   : > { %12588 = vst [vmem:[%s19567_s3 + $0x78] sm:$0xff] %v14035_v42 }
 0x450 PF: > { %s13_s14 = sadd.s32 1, %s16228_s14   ;;  %s19703_s12 = smov %s16224_s13 }
 0x451   : > { %p10_p7 = scmp.ge.s32.totalorder %s13_s14, 5   ;;  %s19704_s13 = smov %s19706_s15 }
 0x453   :  { %12 = sbr.rel (!%p10_p7) target bundleno = 2 (0x2), region = 77 }

// kernel: visualnet_forward.4
= control target key start
LH: loop header
LB: loop body
LE: loop exit
PB: predicated region body
PF: predicated region fallthrough
CT: control target
= control target key end

     0   :  { %s2394_s12 = smov 0   ;;  %s2396_s13 = smov 0   ;;  %s2866_s0 = inlined_call_operand.vmem [shape: bf16[2,10,10,256], index: 0, kind: input, shape index: {}]   ;;  %s2867_s1 = inlined_call_operand.vmem [shape: bf16[3,768,128], index: 1, kind: input, shape index: {}]   ;;  %s2868_s2 = inlined_call_operand.vmem [shape: f32[1,128], index: 2, kind: input, shape index: {}]   ;;  %s2869_s3 = inlined_call_operand.vmem [shape: bf16[128,128], index: 3, kind: output, shape index: {}]  }
   0x1   :  { %s2398_s14 = smov 0  }
   0x2 LB: > { %s25_s15 = sadd.s32 1, %s2367_s13  ;;  %p1848_p0 = scmp.ge.s32.totalorder %s2371_s14, 1  ;;  %s2371_s14 = sphi %s2398_s14, %s13_s14   ;;  %s2367_s13 = sphi %s2396_s13, %s2875_s13   ;;  %s2363_s12 = sphi %s2394_s12, %s2874_s12  }
   0x3   : > { %p26_p1 = scmp.ge.s32.totalorder %s25_s15, 3  ;;  %p183_p2 = scmp.lt.s32.totalorder %s2371_s14, 4 }
   0x5   : > { %s2877_s15 = smov (%p26_p1, %s25_s15), 0  ;;  %p184_p3 = pnand %p1848_p0, %p183_p2 }
   0x6   : > { %p229_p4 = scmp.lt.s32.totalorder (!%p184_p3), %s2363_s12, 2  ;;  %p1850_p5 = scmp.ne.s32.totalorder (!%p184_p3), %s2363_s12, 0 }
   0x7   : > { %187 = sbr.rel (%p184_p3) target bundleno = 391 (0x187), region = 32 }
   0xe   : > { %s230_s16 = scalar_select %p229_p4, %s2363_s12, 2 }
   0xf   : > { %253 = sbr.rel (%p1850_p5) target bundleno = 24 (0x18), region = 36  ;;  %v2373_v0 = vmov (!%p1850_p5), 0.0  }
  0x10   : > { %s2259_s17 = smul.u32 384, %s230_s16  ;;  %254 = vst [vmem:[#allocation2] sm:$0xff] (!%p1850_p5), %v2373_v0  ;;  %255 = vst [vmem:[#allocation2 + $0x8] sm:$0xff] (!%p1850_p5), %v2373_v0 }
  0x11   : > { %256 = vst [vmem:[#allocation2 + $0x10] sm:$0xff] (!%p1850_p5), %v2373_v0  ;;  %257 = vst [vmem:[#allocation2 + $0x18] sm:$0xff] (!%p1850_p5), %v2373_v0 }
  0x12   : > { %s2419_s20 = scalar_lea.vmem %s2867_s1, %s2259_s17  ;;  %258 = vst [vmem:[#allocation2 + $0x20] sm:$0xff] (!%p1850_p5), %v2373_v0  ;;  %259 = vst [vmem:[#allocation2 + $0x28] sm:$0xff] (!%p1850_p5), %v2373_v0 }
  0x13   : > { %260 = vst [vmem:[#allocation2 + $0x30] sm:$0xff] (!%p1850_p5), %v2373_v0  ;;  %261 = vst [vmem:[#allocation2 + $0x38] sm:$0xff] (!%p1850_p5), %v2373_v0 }
  0x14   : > { %262 = vst [vmem:[#allocation2 + $0x40] sm:$0xff] (!%p1850_p5), %v2373_v0  ;;  %263 = vst [vmem:[#allocation2 + $0x48] sm:$0xff] (!%p1850_p5), %v2373_v0 }
  0x15   : > { %264 = vst [vmem:[#allocation2 + $0x50] sm:$0xff] (!%p1850_p5), %v2373_v0  ;;  %265 = vst [vmem:[#allocation2 + $0x58] sm:$0xff] (!%p1850_p5), %v2373_v0 }
  0x16   : > { %266 = vst [vmem:[#allocation2 + $0x60] sm:$0xff] %v2373_v0  ;;  %267 = vst [vmem:[#allocation2 + $0x68] sm:$0xff] %v2373_v0 }
  0x17   : > { %268 = vst [vmem:[#allocation2 + $0x70] sm:$0xff] %v2373_v0  ;;  %269 = vst [vmem:[#allocation2 + $0x78] sm:$0xff] %v2373_v0 }
  0x18 PF: > { %v2285_v1 = vld [vmem:[%s2419_s20 + $0xc0] sm:$0xff]   ;;  %v2287_v3 = vld [vmem:[%s2419_s20 + $0xc8] sm:$0xff]   ;;  %v2289_v5 = vld [vmem:[%s2419_s20 + $0xd0] sm:$0xff]   ;;  %s1987_s21 = sshll.u32 %s2363_s12, 4  ;;  %vm337_vm0 = vsmask.f32 3328 }
  0x19   : > { %v2286_v2 = vld [vmem:[%s2419_s20 + $0x80] sm:$0xff]   ;;  %2051 = vmatprep.subr.bf16.mxu0 %v2285_v1  ;;  %2243 = vmatprep.subr.bf16.mxu1 %v2285_v1  ;;  %v2288_v4 = vld [vmem:[%s2419_s20 + $0x88] sm:$0xff]   ;;  %v2290_v6 = vld [vmem:[%s2419_s20 + $0x90] sm:$0xff]   ;;  %s2435_s24 = scalar_lea.vmem %s2866_s0, %s1987_s21  ;;  %vm338_vm1 = vsmask.f32 7440  ;;  %vm1174_vm3 = vcmask 1042432  }
  0x1a   : > { %2052 = vmatpush3.bf16.msra.mxu0 %v2286_v2  ;;  %2251 = vmatpush3.bf16.msra.mxu1 %v2286_v2  ;;  %v2291_v7 = vld [vmem:[%s2419_s20 + $0xd8] sm:$0xff]   ;;  %v2293_v9 = vld [vmem:[%s2419_s20 + $0xe0] sm:$0xff]   ;;  %v2295_v11 = vld [vmem:[%s2419_s20 + $0xe8] sm:$0xff]   ;;  %vm1175_vm4 = vcmask 1046532   ;;  %p1965_p6 = scmp.ne.s32.totalorder %s2363_s12, 2 }
  0x1b   : > { %2053 = vmatprep.subr.bf16.mxu0 %v2287_v3  ;;  %2244 = vmatprep.subr.bf16.mxu1 %v2287_v3  ;;  %v2292_v8 = vld [vmem:[%s2419_s20 + $0x98] sm:$0xff]   ;;  %v2294_v10 = vld [vmem:[%s2419_s20 + $0xa0] sm:$0xff]   ;;  %v2443_v13 = vld [vmem:[%s2435_s24 + $0x10] sm:$0xff] }
  0x1c   : > { %v2440_v12 = vld [vmem:[%s2435_s24] sm:$0xff]  ;;  %v2446_v14 = vld [vmem:[%s2435_s24 + $0x8] sm:$0x11]  ;;  %v2449_v15 = vld [vmem:[%s2435_s24 + $0x18] sm:$0x11]  ;;  %v355_v20 = vshrl.u32 %v2443_v13, 16 }
  0x1d   : > { %v341_v16 = vshrl.u32 %v2440_v12, 16  ;;  %v344_v17 = vshll.u32 %v2440_v12, 16  ;;  %v2296_v18 = vld [vmem:[%s2419_s20 + $0xa8] sm:$0xff]   ;;  %v350_v19 = vshll.u32 %v2446_v14, 16  ;;  %v358_v21 = vshll.u32 %v2443_v13, 16  ;;  %v2459_v23 = vld [vmem:[%s2435_s24 + $0xa0] sm:$0xff]  ;;  %vm2476_vm2 = vmor %vm337_vm0, %vm338_vm1 }
  0x1e   : > { %2054 = vmatpush3.bf16.msra.mxu0 %v2288_v4  ;;  %2252 = vmatpush3.bf16.msra.mxu1 %v2288_v4  ;;  %v364_v22 = vshll.u32 %v2449_v15, 16  ;;  %v2297_v24 = vld [vmem:[%s2419_s20 + $0xf0] sm:$0xff]   ;;  %v2466_v28 = vld [vmem:[%s2435_s24 + $0xa8] sm:$0x11]  ;;  %v357_v30 = vrot.slane %v355_v20, 4  ;;  %v453_v35 = vshrl.u32 %v2459_v23, 16  ;;  %v1885_v58 = vcombine.low %v2440_v12, %v2443_v13  ;;  %vm2661_vm5 = vmor %vm1174_vm3, %vm1175_vm4 }
  0x1f   : > { %2055 = vmatprep.subr.bf16.mxu0 %v2289_v5  ;;  %2245 = vmatprep.subr.bf16.mxu1 %v2289_v5  ;;  %v343_v25 = vrot.slane %v341_v16, 4  ;;  %v346_v26 = vrot.slane %v344_v17, 5  ;;  %v2463_v27 = vld [vmem:[%s2435_s24 + $0xb0] sm:$0xff]  ;;  %v352_v29 = vrot.slane %v350_v19, 5  ;;  %v360_v31 = vrot.slane %v358_v21, 5  ;;  %v2299_v47 = vld [vmem:[%s2419_s20 + $0xf8] sm:$0xff]  }
  0x20   : > { %v366_v32 = vrot.slane %v364_v22, 5  ;;  %v2469_v33 = vld [vmem:[%s2435_s24 + $0xb8] sm:$0x11]  ;;  %v456_v36 = vshll.u32 %v2459_v23, 16  ;;  %v462_v37 = vshll.u32 %v2466_v28, 16  ;;  %v467_v40 = vshrl.u32 %v2463_v27, 16 }
  0x21   : > { %v347_v34 = vor.u32 %v346_v26, %v343_v25  ;;  %v361_v39 = vor.u32 %v360_v31, %v357_v30  ;;  %v470_v41 = vshll.u32 %v2463_v27, 16  ;;  %v476_v42 = vshll.u32 %v2469_v33, 16  ;;  %v2298_v43 = vld [vmem:[%s2419_s20 + $0xb0] sm:$0xff]   ;;  %v2300_v55 = vld [vmem:[%s2419_s20 + $0xb8] sm:$0xff]   ;;  %v2301_v62 = vld [vmem:[%s2419_s20 + $0x40] sm:$0xff]  }
  0x22   : > { %2056 = vmatpush3.bf16.msra.mxu0 %v2290_v6  ;;  %2253 = vmatpush3.bf16.msra.mxu1 %v2290_v6  ;;  %v455_v45 = vrot.slane %v453_v35, 4  ;;  %v458_v46 = vrot.slane %v456_v36, 5  ;;  %v469_v49 = vrot.slane %v467_v40, 4  ;;  %v464_v53 = vrot.slane %v462_v37, 5  ;;  %v2302_v1 = vld [vmem:[%s2419_s20 + $0x140] sm:$0xff]   ;;  %v2510_v16 = vld [vmem:[%s2435_s24 + $0x30] sm:$0xff] }
  0x23   : > { %2057 = vmatprep.subr.bf16.mxu0 %v2291_v7  ;;  %2246 = vmatprep.subr.bf16.mxu1 %v2291_v7  ;;  %v348_v44 = vrot.slane %v347_v34, 4  ;;  %v362_v48 = vrot.slane %v361_v39, 4  ;;  %v472_v50 = vrot.slane %v470_v41, 5  ;;  %v478_v54 = vrot.slane %v476_v42, 5  ;;  %v2303_v3 = vld [vmem:[%s2419_s20] sm:$0xff]   ;;  %v2305_v7 = vld [vmem:[%s2419_s20 + $0x48] sm:$0xff]  }
  0x24   : > { %v459_v52 = vor.u32 %v458_v46, %v455_v45  ;;  %v1894_v59 = vcombine.high %v2459_v23, %v2463_v27  ;;  %v1893_v63 = vcombine.low %v2459_v23, %v2463_v27  ;;  %v2304_v4 = vld [vmem:[%s2419_s20 + $0x100] sm:$0xff]   ;;  %v2513_v17 = vld [vmem:[%s2435_s24 + $0x28] sm:$0x11]  ;;  %v383_v25 = vshrl.u32 %v2510_v16, 16  ;;  %v2530_v31 = vld [vmem:[%s2435_s24 + $0xd0] sm:$0xff] }
  0x25   : > { %v353_v51 = vsel %vm2476_vm2, %v348_v44, %v352_v29  ;;  %v367_v56 = vsel %vm2476_vm2, %v362_v48, %v366_v32  ;;  %v473_v57 = vor.u32 %v472_v50, %v469_v49  ;;  %v2307_v21 = vld [vmem:[%s2419_s20 + $0x8] sm:$0xff]   ;;  %v386_v26 = vshll.u32 %v2510_v16, 16  ;;  %v2527_v30 = vld [vmem:[%s2435_s24 + $0xc0] sm:$0xff]  ;;  %v2536_v36 = vld [vmem:[%s2435_s24 + $0xd8] sm:$0x11] }
  0x26   : > { %2058 = vmatpush3.bf16.msra.mxu0 %v2292_v8  ;;  %2254 = vmatpush3.bf16.msra.mxu1 %v2292_v8  ;;  %v1854_v60 = vcombine.high %v353_v51, %v367_v56  ;;  %v460_v61 = vrot.slane %v459_v52, 4  ;;  %v1853_v5 = vcombine.low %v353_v51, %v367_v56  ;;  %v2308_v22 = vld [vmem:[%s2419_s20 + $0x108] sm:$0xff]   ;;  %v1896_v37 = vcombine.high %v2527_v30, %v2530_v31  ;;  %v2309_v48 = vld [vmem:[%s2419_s20 + $0x50] sm:$0xff]  }
  0x27   : > { %2059 = vmatprep.subr.bf16.mxu0 %v2293_v9  ;;  %2247 = vmatprep.subr.bf16.mxu1 %v2293_v9  ;;  %v474_v0 = vrot.slane %v473_v57, 4  ;;  %v2533_v35 = vld [vmem:[%s2435_s24 + $0xc8] sm:$0x11]  ;;  %v1895_v39 = vcombine.low %v2527_v30, %v2530_v31  ;;  %v385_v41 = vrot.slane %v383_v25, 4  ;;  %v388_v42 = vrot.slane %v386_v26, 5  ;;  %v2316_v25 = vld [vmem:[%s2419_s20 + $0x118] sm:$0xff]  }
  0x28   : > { %788 = vmatprep.mubr.bf16.mxu0 %v1854_v60  ;;  %v465_v2 = vsel %vm2476_vm2, %v460_v61, %v464_v53  ;;  %v481_v45 = vshrl.u32 %v2527_v30, 16  ;;  %v484_v46 = vshll.u32 %v2527_v30, 16  ;;  %v495_v50 = vshrl.u32 %v2530_v31, 16  ;;  %v2310_v53 = vld [vmem:[%s2419_s20 + $0x150] sm:$0xff]   ;;  %v2565_v26 = vld [vmem:[%s2435_s24 + $0x40] sm:$0xff] }
  0x29   : > { %v479_v6 = vsel %vm2476_vm2, %v474_v0, %v478_v54  ;;  %v389_v49 = vor.u32 %v388_v42, %v385_v41  ;;  %v498_v51 = vshll.u32 %v2530_v31, 16  ;;  %v504_v52 = vshll.u32 %v2536_v36, 16  ;;  %v2574_v41 = vld [vmem:[%s2435_s24 + $0x58] sm:$0x11] }
  0x2a   : > { %2060 = vmatpush3.bf16.msra.mxu0 %v2294_v10  ;;  %2255 = vmatpush3.bf16.msra.mxu1 %v2294_v10  ;;  %v1861_v8 = vcombine.low %v465_v2, %v479_v6  ;;  %v1862_v9 = vcombine.high %v465_v2, %v479_v6  ;;  %v2306_v10 = vld [vmem:[%s2419_s20 + $0x148] sm:$0xff]   ;;  %v486_v56 = vrot.slane %v484_v46, 5  ;;  %v497_v60 = vrot.slane %v495_v50, 4  ;;  %v2311_v2 = vld [vmem:[%s2419_s20 + $0x10] sm:$0xff]  }
  0x2b   : > { %2061 = vmatprep.subr.bf16.mxu0 %v2295_v11  ;;  %2248 = vmatprep.subr.bf16.mxu1 %v2295_v11  ;;  %v2507_v11 = vld [vmem:[%s2435_s24 + $0x20] sm:$0xff]  ;;  %v390_v57 = vrot.slane %v389_v49, 4  ;;  %v500_v61 = vrot.slane %v498_v51, 5  ;;  %v2312_v6 = vld [vmem:[%s2419_s20 + $0x110] sm:$0xff]   ;;  %v397_v42 = vshrl.u32 %v2565_v26, 16  ;;  %v420_v50 = vshll.u32 %v2574_v41, 16 }
  0x2c   : > { %v369_v19 = vshrl.u32 %v2507_v11, 16  ;;  %v372_v20 = vshll.u32 %v2507_v11, 16  ;;  %820 = vmatprep.mubr.bf16.mxu1 %v1862_v9  ;;  %v2589_v51 = vld [vmem:[%s2435_s24 + $0xe8] sm:$0x11] }
  0x2d   : > { %v399_v49 = vrot.slane %v397_v42, 4 }
  0x2e   : > { %2062 = vmatpush3.bf16.msra.mxu0 %v2296_v18  ;;  %2256 = vmatpush3.bf16.msra.mxu1 %v2296_v18  ;;  %v2516_v18 = vld [vmem:[%s2435_s24 + $0x38] sm:$0x11]  ;;  %v371_v32 = vrot.slane %v369_v19, 4  ;;  %v374_v34 = vrot.slane %v372_v20, 5 }
  0x2f   : > { %2063 = vmatprep.subr.bf16.mxu0 %v2297_v24  ;;  %2249 = vmatprep.subr.bf16.mxu1 %v2297_v24  ;;  %v378_v24 = vshll.u32 %v2513_v17, 16  ;;  %v392_v29 = vshll.u32 %v2516_v18, 16  ;;  %v2314_v20 = vld [vmem:[%s2419_s20 + $0x158] sm:$0xff]   ;;  %v1191_v38 = vrot.slane %v2516_v18, 5 }
  0x30   : > { %v375_v44 = vor.u32 %v374_v34, %v371_v32  ;;  %v2568_v34 = vld [vmem:[%s2435_s24 + $0x50] sm:$0xff] }
  0x31   : > { %v380_v40 = vrot.slane %v378_v24, 5  ;;  %v414_v46 = vshll.u32 %v2568_v34, 16 }
  0x32   : > { %2064 = vmatpush3.bf16.msra.mxu0 %v2298_v43  ;;  %2257 = vmatpush3.bf16.msra.mxu1 %v2298_v43  ;;  %v394_v43 = vrot.slane %v392_v29, 5  ;;  %v376_v54 = vrot.slane %v375_v44, 4 }
  0x33   : > { %2065 = vmatprep.subr.bf16.mxu0 %v2299_v47  ;;  %2250 = vmatprep.subr.bf16.mxu1 %v2299_v47  ;;  %v490_v47 = vshll.u32 %v2533_v35, 16 }
  0x36   : > { %2066 = vmatpush3.bf16.msra.mxu0 %v2300_v55  ;;  %2258 = vmatpush3.bf16.msra.mxu1 %v2300_v55  ;;  %v483_v55 = vrot.slane %v481_v45, 4  ;;  %v411_v45 = vshrl.u32 %v2568_v34, 16 }
  0x37   : > { %2115 = vmatprep.subr.bf16.mxu1 %v2301_v62  ;;  %2179 = vmatprep.subr.bf16.mxu0 %v2302_v1  ;;  %v381_v62 = vsel %vm2476_vm2, %v376_v54, %v380_v40  ;;  %v492_v1 = vrot.slane %v490_v47, 5  ;;  %v2571_v40 = vld [vmem:[%s2435_s24 + $0x48] sm:$0x11]  ;;  %v2582_v47 = vld [vmem:[%s2435_s24 + $0xe0] sm:$0xff] }
  0x38   : > { %v487_v0 = vor.u32 %v486_v56, %v483_v55  ;;  %v406_v44 = vshll.u32 %v2571_v40, 16  ;;  %v413_v55 = vrot.slane %v411_v45, 4  ;;  %v416_v56 = vrot.slane %v414_v46, 5  ;;  %v2320_v45 = vld [vmem:[%s2419_s20 + $0x120] sm:$0xff]  }
  0x39   : > { %789 = vmatmul.mubr.bf16.vlgmr.msra.gmra.mrb[0].mxu0 %v1853_v5  ;;  %821 = vmatmul.mubr.bf16.vlgmr.msra.gmra.mrb[0].mxu1 %v1861_v8  ;;  %v506_v5 = vrot.slane %v504_v52, 5  ;;  %v2592_v52 = vld [vmem:[%s2435_s24 + $0xf8] sm:$0x11] }
  0x3a   : > { %2116 = vmatpush3.bf16.msra.mxu1 %v2303_v3  ;;  %2180 = vmatpush3.bf16.msra.mxu0 %v2304_v4  ;;  %v395_v3 = vsel %vm2476_vm2, %v390_v57, %v394_v43  ;;  %v501_v4 = vor.u32 %v500_v61, %v497_v60  ;;  %v488_v8 = vrot.slane %v487_v0, 4  ;;  %v400_v43 = vshll.u32 %v2565_v26, 16 }
  0x3b   : > { %2117 = vmatprep.subr.bf16.mxu1 %v2305_v7  ;;  %2181 = vmatprep.subr.bf16.mxu0 %v2306_v10  ;;  %v1856_v7 = vcombine.high %v381_v62, %v395_v3  ;;  %v1855_v9 = vcombine.low %v381_v62, %v395_v3  ;;  %v2313_v10 = vld [vmem:[%s2419_s20 + $0x58] sm:$0xff]   ;;  %v408_v54 = vrot.slane %v406_v44, 5  ;;  %v422_v57 = vrot.slane %v420_v50, 5 }
  0x3c   : > { %v502_v19 = vrot.slane %v501_v4, 4  ;;  %v509_v60 = vshrl.u32 %v2582_v47, 16  ;;  %v512_v61 = vshll.u32 %v2582_v47, 16  ;;  %v518_v62 = vshll.u32 %v2589_v51, 16  ;;  %v2317_v4 = vld [vmem:[%s2419_s20 + $0x60] sm:$0xff]  }
  0x3d   : > { %796 = vmatprep.mubr.bf16.mxu0 %v1856_v7 }
  0x3e   : > { %2118 = vmatpush3.bf16.msra.mxu1 %v2307_v21  ;;  %2182 = vmatpush3.bf16.msra.mxu0 %v2308_v22  ;;  %v493_v21 = vsel %vm2476_vm2, %v488_v8, %v492_v1  ;;  %v2315_v22 = vld [vmem:[%s2419_s20 + $0x18] sm:$0xff]   ;;  %v507_v24 = vsel %vm2476_vm2, %v502_v19, %v506_v5  ;;  %v417_v1 = vor.u32 %v416_v56, %v413_v55  ;;  %v2318_v5 = vld [vmem:[%s2419_s20 + $0x160] sm:$0xff]   ;;  %v514_v7 = vrot.slane %v512_v61, 5  ;;  %v2322_v56 = vld [vmem:[%s2419_s20 + $0x168] sm:$0xff]  }
  0x3f   : > { %2119 = vmatprep.subr.bf16.mxu1 %v2309_v48  ;;  %2183 = vmatprep.subr.bf16.mxu0 %v2310_v53  ;;  %v1864_v29 = vcombine.high %v493_v21, %v507_v24  ;;  %v1863_v32 = vcombine.low %v493_v21, %v507_v24  ;;  %v2585_v48 = vld [vmem:[%s2435_s24 + $0xf0] sm:$0xff]  ;;  %v402_v53 = vrot.slane %v400_v43, 5  ;;  %v532_v8 = vshll.u32 %v2592_v52, 16  ;;  %v2319_v24 = vld [vmem:[%s2419_s20 + $0x20] sm:$0xff]   ;;  %v2324_v61 = vld [vmem:[%s2419_s20 + $0x128] sm:$0xff]  }
  0x40   : > { %v526_v3 = vshll.u32 %v2585_v48, 16 }
  0x41   : > { %797 = vmatmul.mubr.bf16.gmra.mrb[4].mxu0 %v1855_v9  ;;  %828 = vmatprep.mubr.bf16.mxu1 %v1864_v29  ;;  %v403_v0 = vor.u32 %v402_v53, %v399_v49  ;;  %v1897_v29 = vcombine.low %v2582_v47, %v2585_v48  ;;  %v534_v44 = vrot.slane %v532_v8, 5  ;;  %v2321_v53 = vld [vmem:[%s2419_s20 + $0x68] sm:$0xff]  }
  0x42   : > { %2120 = vmatpush3.bf16.msra.mxu1 %v2311_v2  ;;  %2184 = vmatpush3.bf16.msra.mxu0 %v2312_v6  ;;  %v523_v2 = vshrl.u32 %v2585_v48, 16  ;;  %v511_v6 = vrot.slane %v509_v60, 4 }
  0x43   : > { %2121 = vmatprep.subr.bf16.mxu1 %v2313_v10  ;;  %2185 = vmatprep.subr.bf16.mxu0 %v2314_v20  ;;  %v404_v9 = vrot.slane %v403_v0, 4  ;;  %v418_v10 = vrot.slane %v417_v1, 4  ;;  %v528_v20 = vrot.slane %v526_v3, 5  ;;  %v2627_v3 = vld [vmem:[%s2435_s24 + $0x68] sm:$0x11] }
  0x44   : > { %829 = vmatmul.mubr.bf16.gmra.mrb[4].mxu1 %v1863_v32  ;;  %v525_v19 = vrot.slane %v523_v2, 4  ;;  %v515_v21 = vor.u32 %v514_v7, %v511_v6  ;;  %v2624_v2 = vld [vmem:[%s2435_s24 + $0x70] sm:$0xff]  ;;  %v434_v7 = vshll.u32 %v2627_v3, 16 }
  0x45   : > { %v409_v32 = vsel %vm2476_vm2, %v404_v9, %v408_v54  ;;  %v423_v42 = vsel %vm2476_vm2, %v418_v10, %v422_v57  ;;  %v2323_v57 = vld [vmem:[%s2419_s20 + $0x28] sm:$0xff]   ;;  %v439_v8 = vshrl.u32 %v2624_v2, 16  ;;  %v442_v9 = vshll.u32 %v2624_v2, 16  ;;  %v2638_v10 = vld [vmem:[%s2435_s24 + $0x100] sm:$0xff] }
  0x46   : > { %2122 = vmatpush3.bf16.msra.mxu1 %v2315_v22  ;;  %2186 = vmatpush3.bf16.msra.mxu0 %v2316_v25  ;;  %v520_v22 = vrot.slane %v518_v62, 5  ;;  %v1898_v25 = vcombine.high %v2582_v47, %v2585_v48  ;;  %v529_v43 = vor.u32 %v528_v20, %v525_v19  ;;  %v1858_v46 = vcombine.high %v409_v32, %v423_v42  ;;  %v2621_v62 = vld [vmem:[%s2435_s24 + $0x60] sm:$0xff]  ;;  %v2641_v19 = vld [vmem:[%s2435_s24 + $0x110] sm:$0xff] }
  0x47   : > { %2123 = vmatprep.subr.bf16.mxu1 %v2317_v4  ;;  %2187 = vmatprep.subr.bf16.mxu0 %v2318_v5  ;;  %v516_v49 = vrot.slane %v515_v21, 4  ;;  %v1857_v50 = vcombine.low %v409_v32, %v423_v42  ;;  %v2630_v4 = vld [vmem:[%s2435_s24 + $0x78] sm:$0x11]  ;;  %v425_v5 = vshrl.u32 %v2621_v62, 16  ;;  %v428_v6 = vshll.u32 %v2621_v62, 16 }
  0x48   : > { %v530_v55 = vrot.slane %v529_v43, 4  ;;  %804 = vmatprep.mubr.bf16.mxu0 %v1858_v46  ;;  %v448_v21 = vshll.u32 %v2630_v4, 16  ;;  %v436_v42 = vrot.slane %v434_v7, 5  ;;  %v441_v43 = vrot.slane %v439_v8, 4 }
  0x49   : > { %v521_v54 = vsel %vm2476_vm2, %v516_v49, %v520_v22  ;;  %805 = vmatmul.mubr.bf16.gmra.mrb[8].mxu0 %v1857_v50  ;;  %v427_v20 = vrot.slane %v425_v5, 4  ;;  %v2645_v22 = vld [vmem:[%s2435_s24 + $0x108] sm:$0x11]  ;;  %v430_v32 = vrot.slane %v428_v6, 5  ;;  %v537_v46 = vshrl.u32 %v2638_v10, 16 }
  0x4a   : > { %2124 = vmatpush3.bf16.msra.mxu1 %v2319_v24  ;;  %2188 = vmatpush3.bf16.msra.mxu0 %v2320_v45  ;;  %v535_v60 = vsel %vm2476_vm2, %v530_v55, %v534_v44  ;;  %v2648_v24 = vld [vmem:[%s2435_s24 + $0x118] sm:$0x11]  ;;  %v444_v44 = vrot.slane %v442_v9, 5  ;;  %v450_v45 = vrot.slane %v448_v21, 5  ;;  %v540_v49 = vshll.u32 %v2638_v10, 16 }
  0x4b   : > { %2125 = vmatprep.subr.bf16.mxu1 %v2321_v53  ;;  %2189 = vmatprep.subr.bf16.mxu0 %v2322_v56  ;;  %v1866_v0 = vcombine.high %v521_v54, %v535_v60  ;;  %v1865_v1 = vcombine.low %v521_v54, %v535_v60  ;;  %v546_v50 = vshll.u32 %v2645_v22, 16  ;;  %v431_v53 = vor.u32 %v430_v32, %v427_v20  ;;  %v2326_v60 = vld [vmem:[%s2419_s20 + $0x170] sm:$0xff]  }
  0x4c   : > { %v445_v55 = vor.u32 %v444_v44, %v441_v43  ;;  %v551_v56 = vshrl.u32 %v2641_v19, 16  ;;  %v554_v54 = vshll.u32 %v2641_v19, 16  ;;  %v560_v5 = vshll.u32 %v2648_v24, 16  ;;  %v2327_v32 = vld [vmem:[%s2419_s20 + $0x30] sm:$0xff]  }
  0x4d   : > { %836 = vmatprep.mubr.bf16.mxu1 %v1866_v0  ;;  %v539_v0 = vrot.slane %v537_v46, 4  ;;  %v432_v6 = vrot.slane %v431_v53, 4  ;;  %v1900_v43 = vcombine.high %v2638_v10, %v2641_v19  ;;  %v1899_v44 = vcombine.low %v2638_v10, %v2641_v19 }
  0x4e   : > { %2126 = vmatpush3.bf16.msra.mxu1 %v2323_v57  ;;  %2190 = vmatpush3.bf16.msra.mxu0 %v2324_v61  ;;  %v2325_v57 = vld [vmem:[%s2419_s20 + $0x70] sm:$0xff]   ;;  %v1179_v61 = vrot.slane %v2446_v14, 5  ;;  %v446_v7 = vrot.slane %v445_v55, 4  ;;  %v553_v8 = vrot.slane %v551_v56, 4  ;;  %v556_v9 = vrot.slane %v554_v54, 5 }
  0x4f   : > { %837 = vmatmul.mubr.bf16.gmra.mrb[8].mxu1 %v1865_v1  ;;  %v542_v1 = vrot.slane %v540_v49, 5  ;;  %2127 = vmatprep.subr.bf16.mxu1 %v2325_v57  ;;  %v548_v14 = vrot.slane %v546_v50, 5  ;;  %v437_v46 = vsel %vm2476_vm2, %v432_v6, %v436_v42  ;;  %v562_v55 = vrot.slane %v560_v5, 5  ;;  %v2328_v56 = vld [vmem:[%s2419_s20 + $0x130] sm:$0xff]   ;;  %v2331_v5 = vld [vmem:[%s2419_s20 + $0x38] sm:$0xff]  }
  0x50   : > { %2191 = vmatprep.subr.bf16.mxu0 %v2326_v60  ;;  %v451_v49 = vsel %vm2476_vm2, %v446_v7, %v450_v45  ;;  %v557_v53 = vor.u32 %v556_v9, %v553_v8  ;;  %v2329_v60 = vld [vmem:[%s2419_s20 + $0x78] sm:$0xff]   ;;  %v1183_v42 = vrot.slane %v2449_v15, 5  ;;  %v1886_v8 = vcombine.high %v2440_v12, %v2443_v13  ;;  %v1126_v9 = vld [vmem:[%s2435_s24] sm:$0xee] }
  0x51   : > { %v543_v21 = vor.u32 %v542_v1, %v539_v0  ;;  %v1860_v54 = vcombine.high %v437_v46, %v451_v49  ;;  %v1859_v57 = vcombine.low %v437_v46, %v451_v49  ;;  %v2330_v1 = vld [vmem:[%s2419_s20 + $0x178] sm:$0xff]   ;;  %v1187_v15 = vrot.slane %v2513_v17, 5  ;;  %v1128_v49 = vld [vmem:[%s2435_s24 + $0x20] sm:$0xee] }
  0x52   : > { %2128 = vmatpush3.bf16.msra.mxu1 %v2327_v32  ;;  %v558_v0 = vrot.slane %v557_v53, 4  ;;  %2192 = vmatpush3.bf16.msra.mxu0 %v2328_v56  ;;  %v2332_v7 = vld [vmem:[%s2419_s20 + $0x138] sm:$0xff]   ;;  %v1917_v46 = vrot.slane %v1126_v9, 9  ;;  %v1211_v53 = vrot.slane %v2466_v28, 5  ;;  %v1129_v56 = vld [vmem:[%s2435_s24 + $0x30] sm:$0xee] }
  0x53   : > { %v544_v50 = vrot.slane %v543_v21, 4  ;;  %812 = vmatprep.mubr.bf16.mxu0 %v1860_v54  ;;  %2129 = vmatprep.subr.bf16.mxu1 %v2329_v60  ;;  %v1919_v54 = vrot.slane %v1128_v49, 9  ;;  %v1130_v60 = vld [vmem:[%s2435_s24 + $0x40] sm:$0xee] }
  0x54   : > { %v563_v6 = vsel %vm2476_vm2, %v558_v0, %v562_v55  ;;  %813 = vmatmul.mubr.bf16.gmra.mrb[12].mxu0 %v1859_v57  ;;  %2193 = vmatprep.subr.bf16.mxu0 %v2330_v1  ;;  %v1180_v17 = vsel %vm2661_vm5, %v1917_v46, %v1179_v61  ;;  %v1920_v57 = vrot.slane %v1129_v56, 9  ;;  %v1131_v0 = vld [vmem:[%s2435_s24 + $0x50] sm:$0xee]  ;;  %v1195_v1 = vrot.slane %v2571_v40, 5  ;;  %v1136_v9 = vld [vmem:[%s2435_s24 + $0xc0] sm:$0xee] }
  0x55   : > { %v549_v45 = vsel %vm2476_vm2, %v544_v50, %v548_v14  ;;  %v1127_v14 = vld [vmem:[%s2435_s24 + $0x10] sm:$0xee]  ;;  %v1215_v50 = vrot.slane %v2469_v33, 5  ;;  %v1188_v18 = vsel %vm2661_vm5, %v1919_v54, %v1187_v15  ;;  %v1134_v33 = vld [vmem:[%s2435_s24 + $0xa0] sm:$0xee]  ;;  %v1199_v15 = vrot.slane %v2574_v41, 5 }
  0x56   : > { %v1868_v21 = vcombine.high %v549_v45, %v563_v6  ;;  %v1867_v32 = vcombine.low %v549_v45, %v563_v6  ;;  %2130 = vmatpush3.bf16.msra.mxu1 %v2331_v5  ;;  %2194 = vmatpush3.bf16.msra.mxu0 %v2332_v7  ;;  %v1918_v55 = vrot.slane %v1127_v14, 9  ;;  %v1219_v45 = vrot.slane %v2533_v35, 5  ;;  %v1135_v7 = vld [vmem:[%s2435_s24 + $0xb0] sm:$0xee] }
  0x57   : > { %v1192_v61 = vsel %vm2661_vm5, %v1920_v57, %v1191_v38  ;;  %v1921_v14 = vrot.slane %v1130_v60, 9  ;;  %v1925_v40 = vrot.slane %v1134_v33, 9  ;;  %v1223_v35 = vrot.slane %v2536_v36, 5  ;;  %v1133_v57 = vld [vmem:[%s2435_s24 + $0x70] sm:$0xee] }
  0x58   : > { %844 = vmatprep.mubr.bf16.mxu1 %v1868_v21  ;;  %v1184_v28 = vsel %vm2661_vm5, %v1918_v55, %v1183_v42  ;;  %v1137_v21 = vld [vmem:[%s2435_s24 + $0xd0] sm:$0xee]  ;;  %v1922_v42 = vrot.slane %v1131_v0, 9  ;;  %v1927_v46 = vrot.slane %v1136_v9, 9  ;;  %v1888_v38 = vcombine.high %v2507_v11, %v2510_v16 }
  0x59   : > { %845 = vmatmul.mubr.bf16.gmra.mrb[12].mxu1 %v1867_v32  ;;  %v1933_v5 = vcombine.low %v1180_v17, %v1184_v28  ;;  %v1934_v6 = vcombine.high %v1180_v17, %v1184_v28  ;;  %v1936_v32 = vcombine.high %v1188_v18, %v1192_v61  ;;  %v1928_v49 = vrot.slane %v1137_v21, 9  ;;  %v1132_v17 = vld [vmem:[%s2435_s24 + $0x60] sm:$0xee] }
  0x5a   : > { %1061 = vmatprep.mubr.bf16.mxu1 %v1886_v8  ;;  %v1926_v8 = vrot.slane %v1135_v7, 9  ;;  %v1212_v55 = vsel %vm2661_vm5, %v1925_v40, %v1211_v53  ;;  %v1196_v56 = vsel %vm2661_vm5, %v1921_v14, %v1195_v1  ;;  %v1200_v41 = vsel %vm2661_vm5, %v1922_v42, %v1199_v15  ;;  %v1140_v15 = vld [vmem:[%s2435_s24 + $0x100] sm:$0xee]  ;;  %v1141_v40 = vld [vmem:[%s2435_s24 + $0x110] sm:$0xee] }
  0x5b   : > { %1465 = vmatprep.mubr.bf16.mxu0 %v1934_v6  ;;  %v1220_v54 = vsel %vm2661_vm5, %v1927_v46, %v1219_v45  ;;  %v1224_v28 = vsel %vm2661_vm5, %v1928_v49, %v1223_v35  ;;  %v1935_v53 = vcombine.low %v1188_v18, %v1192_v61  ;;  %v1203_v6 = vrot.slane %v2627_v3, 5  ;;  %v1138_v61 = vld [vmem:[%s2435_s24 + $0xe0] sm:$0xee] }
  0x5c   : > { %1466 = vmatmul.mubr.bf16.vlgmr.msra.gmra.mrb[16].mxu0 %v1933_v5  ;;  %v1216_v36 = vsel %vm2661_vm5, %v1926_v8, %v1215_v50  ;;  %v1944_v1 = vcombine.high %v1220_v54, %v1224_v28  ;;  %v1943_v33 = vcombine.low %v1220_v54, %v1224_v28  ;;  %v1938_v5 = vcombine.high %v1196_v56, %v1200_v41 }
  0x5d   : > { %1473 = vmatprep.mubr.bf16.mxu0 %v1936_v32  ;;  %v1942_v60 = vcombine.high %v1212_v55, %v1216_v36  ;;  %v1941_v0 = vcombine.low %v1212_v55, %v1216_v36  ;;  %v1923_v50 = vrot.slane %v1132_v17, 9  ;;  %v1924_v45 = vrot.slane %v1133_v57, 9  ;;  %v1139_v32 = vld [vmem:[%s2435_s24 + $0xf0] sm:$0xee] }
  0x5e   : > { %v1207_v7 = vrot.slane %v2630_v4, 5  ;;  %v1887_v9 = vcombine.low %v2507_v11, %v2510_v16  ;;  %v1890_v21 = vcombine.high %v2565_v26, %v2568_v34  ;;  %v1889_v11 = vcombine.low %v2565_v26, %v2568_v34 }
  0x5f   : > { %v1204_v12 = vsel %vm2661_vm5, %v1923_v50, %v1203_v6  ;;  %v1892_v16 = vcombine.high %v2621_v62, %v2624_v2  ;;  %v1891_v18 = vcombine.low %v2621_v62, %v2624_v2  ;;  %v1929_v26 = vrot.slane %v1138_v61, 9 }
  0x60   : > { %v1208_v13 = vsel %vm2661_vm5, %v1924_v45, %v1207_v7  ;;  %v1227_v34 = vrot.slane %v2589_v51, 5  ;;  %v1930_v14 = vrot.slane %v1139_v32, 9  ;;  %v1231_v42 = vrot.slane %v2592_v52, 5 }
  0x61   : > { %1062 = vmatmul.mubr.bf16.vlgmr.msra.gmra.mrb[16].mxu1 %v1885_v58  ;;  %v1937_v58 = vcombine.low %v1196_v56, %v1200_v41  ;;  %v1940_v3 = vcombine.high %v1204_v12, %v1208_v13  ;;  %v1939_v4 = vcombine.low %v1204_v12, %v1208_v13  ;;  %v1931_v51 = vrot.slane %v1140_v15, 9 }
  0x62   : > { %1069 = vmatprep.mubr.bf16.mxu1 %v1888_v38  ;;  %v1228_v62 = vsel %vm2661_vm5, %v1929_v26, %v1227_v34  ;;  %v1232_v2 = vsel %vm2661_vm5, %v1930_v14, %v1231_v42  ;;  %v1235_v52 = vrot.slane %v2645_v22, 5  ;;  %v1932_v35 = vrot.slane %v1141_v40, 9 }
  0x63   : > { %v1239_v8 = vrot.slane %v2648_v24, 5  ;;  %v1945_v27 = vcombine.low %v1228_v62, %v1232_v2 }
  0x64   : > { %1474 = vmatmul.mubr.bf16.gmra.mrb[20].mxu0 %v1935_v53  ;;  %v1236_v46 = vsel %vm2661_vm5, %v1931_v51, %v1235_v52 }
  0x65   : > { %1481 = vmatprep.mubr.bf16.mxu0 %v1938_v5  ;;  %v1240_v23 = vsel %vm2661_vm5, %v1932_v35, %v1239_v8 }
  0x69   : > { %1070 = vmatmul.mubr.bf16.gmra.mrb[20].mxu1 %v1887_v9 }
  0x6a   : > { %1077 = vmatprep.mubr.bf16.mxu1 %v1890_v21 }
  0x6c   : > { %1482 = vmatmul.mubr.bf16.gmra.mrb[24].mxu0 %v1937_v58 }
  0x6d   : > { %1489 = vmatprep.mubr.bf16.mxu0 %v1940_v3 }
  0x71   : > { %1078 = vmatmul.mubr.bf16.gmra.mrb[24].mxu1 %v1889_v11 }
  0x72   : > { %1085 = vmatprep.mubr.bf16.mxu1 %v1892_v16 }
  0x74   : > { %1490 = vmatmul.mubr.bf16.gmra.mrb[28].mxu0 %v1939_v4 }
  0x75   : > { %1497 = vmatprep.mubr.bf16.mxu0 %v1942_v60 }
  0x79   : > { %1086 = vmatmul.mubr.bf16.gmra.mrb[28].mxu1 %v1891_v18 }
  0x7a   : > { %1093 = vmatprep.mubr.bf16.mxu1 %v1894_v59  ;;  %v1946_v59 = vcombine.high %v1228_v62, %v1232_v2 }
  0x7c   : > { %1498 = vmatmul.mubr.bf16.gmra.mrb[32].mxu0 %v1941_v0 }
  0x7d   : > { %1505 = vmatprep.mubr.bf16.mxu0 %v1944_v1 }
  0x81   : > { %1094 = vmatmul.mubr.bf16.gmra.mrb[32].mxu1 %v1893_v63  ;;  %v1948_v63 = vcombine.high %v1236_v46, %v1240_v23 }
  0x82   : > { %1101 = vmatprep.mubr.bf16.mxu1 %v1896_v37  ;;  %v1947_v37 = vcombine.low %v1236_v46, %v1240_v23 }
  0x84   : > { %1506 = vmatmul.mubr.bf16.gmra.mrb[36].mxu0 %v1943_v33 }
  0x85   : > { %1513 = vmatprep.mubr.bf16.mxu0 %v1946_v59 }
  0x89   : > { %1102 = vmatmul.mubr.bf16.gmra.mrb[36].mxu1 %v1895_v39 }
  0x8a   : > { %1109 = vmatprep.mubr.bf16.mxu1 %v1898_v25 }
  0x8c   : > { %1514 = vmatmul.mubr.bf16.gmra.mrb[40].mxu0 %v1945_v27 }
  0x8d   : > { %1521 = vmatprep.mubr.bf16.mxu0 %v1948_v63  ;;  %v1546_v63 = vld [vmem:[#allocation2] sm:$0xff] }
  0x91   : > { %1110 = vmatmul.mubr.bf16.gmra.mrb[40].mxu1 %v1897_v29 }
  0x92   : > { %1117 = vmatprep.mubr.bf16.mxu1 %v1900_v43 }
  0x94   : > { %1522 = vmatmul.mubr.bf16.gmra.mrb[44].mxu0 %v1947_v37 }
  0x99   : > { %1118 = vmatmul.mubr.bf16.gmra.mrb[44].mxu1 %v1899_v44 }
 0x10c   : > { %v2067_v30 = vpop.f32.mrb[0].mxu0  ;;  %v2091_v31 = vpop.f32.mrb[0].mxu1 }
 0x10d   : > { %v2068_v39 = vpop.f32.mrb[1].mxu0  ;;  %v2092_v25 = vpop.f32.mrb[1].mxu1 }
 0x10e   : > { %v2069_v22 = vadd.f32 %v2068_v39, %v2067_v30  ;;  %v2787_v24 = vadd.f32 %v2092_v25, %v2091_v31  ;;  %v2070_v20 = vpop.f32.mrb[2].mxu0  ;;  %v2094_v47 = vpop.f32.mrb[2].mxu1 }
 0x10f   : > { %v2071_v48 = vpop.f32.mrb[3].mxu0  ;;  %v2095_v29 = vpop.f32.mrb[3].mxu1 }
 0x110   : > { %v2072_v49 = vadd.f32 %v2071_v48, %v2070_v20  ;;  %v2789_v38 = vadd.f32 %v2095_v29, %v2094_v47  ;;  %v1547_v20 = vld [vmem:[#allocation2 + $0x8] sm:$0xff] }
 0x114   : > { %v2073_v43 = vpop.f32.mrb[4].mxu0 }
 0x115   : > { %v2074_v55 = vpop.f32.mrb[5].mxu0 }
 0x116   : > { %v2791_v56 = vadd.f32 %v2074_v55, %v2073_v43  ;;  %v2076_v10 = vpop.f32.mrb[6].mxu0 }
 0x117   : > { %v2077_v19 = vpop.f32.mrb[7].mxu0  ;;  %v2097_v44 = vpop.f32.mrb[4].mxu1 }
 0x118   : > { %v2793_v41 = vadd.f32 %v2077_v19, %v2076_v10  ;;  %v2098_v36 = vpop.f32.mrb[5].mxu1 }
 0x119   : > { %v2795_v54 = vadd.f32 %v2098_v36, %v2097_v44  ;;  %v2100_v17 = vpop.f32.mrb[6].mxu1 }
 0x11a   : > { %v2101_v57 = vpop.f32.mrb[7].mxu1 }
 0x11b   : > { %v2797_v60 = vadd.f32 %v2101_v57, %v2100_v17 }
 0x11c   : > { %v2079_v0 = vpop.f32.mrb[8].mxu0 }
 0x11d   : > { %v2080_v28 = vpop.f32.mrb[9].mxu0 }
 0x11e   : > { %v2799_v53 = vadd.f32 %v2080_v28, %v2079_v0  ;;  %v2082_v1 = vpop.f32.mrb[10].mxu0 }
 0x11f   : > { %v2083_v33 = vpop.f32.mrb[11].mxu0 }
 0x120   : > { %v2801_v50 = vadd.f32 %v2083_v33, %v2082_v1 }
 0x122   : > { %v2103_v5 = vpop.f32.mrb[8].mxu1 }
 0x123   : > { %v2104_v6 = vpop.f32.mrb[9].mxu1 }
 0x124   : > { %v2803_v45 = vadd.f32 %v2104_v6, %v2103_v5  ;;  %v2106_v7 = vpop.f32.mrb[10].mxu1 }
 0x125   : > { %v2107_v9 = vpop.f32.mrb[11].mxu1 }
 0x126   : > { %v2805_v21 = vadd.f32 %v2107_v9, %v2106_v7  ;;  %v1549_v7 = vld [vmem:[#allocation2 + $0x18] sm:$0xff] }
 0x127   : > { %v2085_v12 = vpop.f32.mrb[12].mxu0 }
 0x128   : > { %v2086_v13 = vpop.f32.mrb[13].mxu0 }
 0x129   : > { %v2807_v58 = vadd.f32 %v2086_v13, %v2085_v12  ;;  %v2088_v3 = vpop.f32.mrb[14].mxu0 }
 0x12a   : > { %v2089_v11 = vpop.f32.mrb[15].mxu0 }
 0x12b   : > { %v2809_v4 = vadd.f32 %v2089_v11, %v2088_v3 }
 0x12c   : > { %v2109_v16 = vpop.f32.mrb[12].mxu1 }
 0x12d   : > { %v2110_v18 = vpop.f32.mrb[13].mxu1 }
 0x12e   : > { %v2811_v61 = vadd.f32 %v2110_v18, %v2109_v16  ;;  %v2112_v32 = vpop.f32.mrb[14].mxu1 }
 0x12f   : > { %v2113_v26 = vpop.f32.mrb[15].mxu1  ;;  %v2195_v14 = vpop.f32.mrb[16].mxu0 }
 0x130   : > { %v2813_v34 = vadd.f32 %v2113_v26, %v2112_v32  ;;  %v2196_v42 = vpop.f32.mrb[17].mxu0 }
 0x131   : > { %v2197_v62 = vadd.f32 %v2196_v42, %v2195_v14  ;;  %v2198_v2 = vpop.f32.mrb[18].mxu0 }
 0x132   : > { %v2199_v15 = vpop.f32.mrb[19].mxu0 }
 0x133   : > { %v2200_v59 = vadd.f32 %v2199_v15, %v2198_v2 }
 0x134   : > { %v2131_v40 = vpop.f32.mrb[16].mxu1 }
 0x135   : > { %v2132_v51 = vpop.f32.mrb[17].mxu1 }
 0x136   : > { %v2133_v52 = vadd.f32 %v2132_v51, %v2131_v40  ;;  %v2134_v35 = vpop.f32.mrb[18].mxu1 }
 0x137   : > { %v2135_v8 = vpop.f32.mrb[19].mxu1  ;;  %v2201_v27 = vpop.f32.mrb[20].mxu0 }
 0x138   : > { %v1064_v46 = vadd.f32 %v2133_v52, %v2069_v22  ;;  %v2136_v23 = vadd.f32 %v2135_v8, %v2134_v35  ;;  %v2202_v37 = vpop.f32.mrb[21].mxu0  ;;  %v1551_v52 = vld [vmem:[#allocation2 + $0x28] sm:$0xff] }
 0x139   : > { %v2203_v39 = vadd.f32 %v2202_v37, %v2201_v27  ;;  %v2204_v25 = vpop.f32.mrb[22].mxu0 }
 0x13a   : > { %v1530_v30 = vadd.f32 %v2197_v62, %v1064_v46  ;;  %v1067_v31 = vadd.f32 %v2136_v23, %v2072_v49  ;;  %v2205_v47 = vpop.f32.mrb[23].mxu0  ;;  %v1548_v49 = vld [vmem:[#allocation2 + $0x10] sm:$0xff] }
 0x13b   : > { %v2206_v55 = vadd.f32 %v2205_v47, %v2204_v25 }
 0x13c   : > { %v1562_v48 = vadd.f32 %v1546_v63, %v1530_v30  ;;  %v1531_v29 = vadd.f32 %v2200_v59, %v1067_v31  ;;  %v2137_v43 = vpop.f32.mrb[20].mxu1 }
 0x13d   : > { %v2138_v10 = vpop.f32.mrb[21].mxu1 }
 0x13e   : > { %1578 = vst [vmem:[#allocation2] sm:$0xff] %v1562_v48  ;;  %v1563_v19 = vadd.f32 %v1547_v20, %v1531_v29  ;;  %v2139_v44 = vadd.f32 %v2138_v10, %v2137_v43  ;;  %v2140_v36 = vpop.f32.mrb[22].mxu1  ;;  %v1553_v10 = vld [vmem:[#allocation2 + $0x38] sm:$0xff] }
 0x13f   : > { %v2141_v22 = vpop.f32.mrb[23].mxu1  ;;  %v2207_v0 = vpop.f32.mrb[24].mxu0 }
 0x140   : > { %1579 = vst [vmem:[#allocation2 + $0x8] sm:$0xff] %v1563_v19  ;;  %v1072_v17 = vadd.f32 %v2139_v44, %v2791_v56  ;;  %v2142_v57 = vadd.f32 %v2141_v22, %v2140_v36  ;;  %v2208_v28 = vpop.f32.mrb[25].mxu0 }
 0x141   : > { %v2209_v5 = vadd.f32 %v2208_v28, %v2207_v0  ;;  %v2210_v6 = vpop.f32.mrb[26].mxu0 }
 0x142   : > { %v1532_v1 = vadd.f32 %v2203_v39, %v1072_v17  ;;  %v1075_v33 = vadd.f32 %v2142_v57, %v2793_v41  ;;  %v2211_v9 = vpop.f32.mrb[27].mxu0  ;;  %v1550_v41 = vld [vmem:[#allocation2 + $0x20] sm:$0xff] }
 0x143   : > { %v2212_v11 = vadd.f32 %v2211_v9, %v2210_v6 }
 0x144   : > { %v1564_v12 = vadd.f32 %v1548_v49, %v1532_v1  ;;  %v1533_v13 = vadd.f32 %v2206_v55, %v1075_v33  ;;  %v2143_v3 = vpop.f32.mrb[24].mxu1 }
 0x145   : > { %v2144_v16 = vpop.f32.mrb[25].mxu1 }
 0x146   : > { %1580 = vst [vmem:[#allocation2 + $0x10] sm:$0xff] %v1564_v12  ;;  %v1565_v18 = vadd.f32 %v1549_v7, %v1533_v13  ;;  %v2145_v32 = vadd.f32 %v2144_v16, %v2143_v3  ;;  %v2146_v56 = vpop.f32.mrb[26].mxu1  ;;  %v1555_v3 = vld [vmem:[#allocation2 + $0x48] sm:$0xff] }
 0x147   : > { %v2147_v26 = vpop.f32.mrb[27].mxu1  ;;  %v2213_v62 = vpop.f32.mrb[28].mxu0 }
 0x148   : > { %1581 = vst [vmem:[#allocation2 + $0x18] sm:$0xff] %v1565_v18  ;;  %v1080_v14 = vadd.f32 %v2145_v32, %v2799_v53  ;;  %v2148_v42 = vadd.f32 %v2147_v26, %v2146_v56  ;;  %v2214_v2 = vpop.f32.mrb[29].mxu0 }
 0x149   : > { %v2215_v59 = vadd.f32 %v2214_v2, %v2213_v62  ;;  %v2216_v51 = vpop.f32.mrb[30].mxu0 }
 0x14a   : > { %v1534_v15 = vadd.f32 %v2209_v5, %v1080_v14  ;;  %v1083_v40 = vadd.f32 %v2148_v42, %v2801_v50  ;;  %v2217_v35 = vpop.f32.mrb[31].mxu0  ;;  %v1552_v50 = vld [vmem:[#allocation2 + $0x30] sm:$0xff] }
 0x14b   : > { %v2218_v27 = vadd.f32 %v2217_v35, %v2216_v51 }
 0x14c   : > { %v1566_v8 = vadd.f32 %v1550_v41, %v1534_v15  ;;  %v1535_v46 = vadd.f32 %v2212_v11, %v1083_v40  ;;  %v2149_v23 = vpop.f32.mrb[28].mxu1 }
 0x14d   : > { %v2150_v63 = vpop.f32.mrb[29].mxu1 }
 0x14e   : > { %1582 = vst [vmem:[#allocation2 + $0x20] sm:$0xff] %v1566_v8  ;;  %v1567_v37 = vadd.f32 %v1551_v52, %v1535_v46  ;;  %v2151_v30 = vadd.f32 %v2150_v63, %v2149_v23  ;;  %v2152_v53 = vpop.f32.mrb[30].mxu1  ;;  %v1557_v8 = vld [vmem:[#allocation2 + $0x58] sm:$0xff] }
 0x14f   : > { %v2153_v31 = vpop.f32.mrb[31].mxu1  ;;  %v2219_v20 = vpop.f32.mrb[32].mxu0 }
 0x150   : > { %1583 = vst [vmem:[#allocation2 + $0x28] sm:$0xff] %v1567_v37  ;;  %v1088_v39 = vadd.f32 %v2151_v30, %v2807_v58  ;;  %v2154_v25 = vadd.f32 %v2153_v31, %v2152_v53  ;;  %v2220_v47 = vpop.f32.mrb[33].mxu0 }
 0x151   : > { %v2221_v43 = vadd.f32 %v2220_v47, %v2219_v20  ;;  %v2222_v55 = vpop.f32.mrb[34].mxu0 }
 0x152   : > { %v1536_v48 = vadd.f32 %v2215_v59, %v1088_v39  ;;  %v1091_v29 = vadd.f32 %v2154_v25, %v2809_v4  ;;  %v2223_v19 = vpop.f32.mrb[35].mxu0  ;;  %v1554_v4 = vld [vmem:[#allocation2 + $0x40] sm:$0xff] }
 0x153   : > { %v2224_v17 = vadd.f32 %v2223_v19, %v2222_v55 }
 0x154   : > { %v1568_v44 = vadd.f32 %v1552_v50, %v1536_v48  ;;  %v1537_v36 = vadd.f32 %v2218_v27, %v1091_v29  ;;  %v2155_v22 = vpop.f32.mrb[32].mxu1 }
 0x155   : > { %v2156_v57 = vpop.f32.mrb[33].mxu1 }
 0x156   : > { %1584 = vst [vmem:[#allocation2 + $0x30] sm:$0xff] %v1568_v44  ;;  %v1569_v0 = vadd.f32 %v1553_v10, %v1537_v36  ;;  %v2157_v49 = vadd.f32 %v2156_v57, %v2155_v22  ;;  %v2158_v58 = vpop.f32.mrb[34].mxu1  ;;  %v1559_v10 = vld [vmem:[#allocation2 + $0x68] sm:$0xff] }
 0x157   : > { %v2159_v28 = vpop.f32.mrb[35].mxu1  ;;  %v2225_v5 = vpop.f32.mrb[36].mxu0 }
 0x158   : > { %1585 = vst [vmem:[#allocation2 + $0x38] sm:$0xff] %v1569_v0  ;;  %v1096_v1 = vadd.f32 %v2157_v49, %v2787_v24  ;;  %v2160_v33 = vadd.f32 %v2159_v28, %v2158_v58  ;;  %v2226_v6 = vpop.f32.mrb[37].mxu0 }
 0x159   : > { %v2227_v12 = vadd.f32 %v2226_v6, %v2225_v5  ;;  %v2228_v13 = vpop.f32.mrb[38].mxu0 }
 0x15a   : > { %v1538_v7 = vadd.f32 %v2221_v43, %v1096_v1  ;;  %v1099_v9 = vadd.f32 %v2160_v33, %v2789_v38  ;;  %v2229_v11 = vpop.f32.mrb[39].mxu0  ;;  %v1556_v38 = vld [vmem:[#allocation2 + $0x50] sm:$0xff] }
 0x15b   : > { %v2230_v56 = vadd.f32 %v2229_v11, %v2228_v13  ;;  %v1560_v33 = vld [vmem:[#allocation2 + $0x70] sm:$0xff]  ;;  %v1599_v13 = vld [vmem:[#allocation2 + $0x8] sm:$0xff] (!%p1965_p6) }
 0x15c   : > { %v1570_v16 = vadd.f32 %v1554_v4, %v1538_v7  ;;  %v1539_v18 = vadd.f32 %v2224_v17, %v1099_v9  ;;  %v2161_v32 = vpop.f32.mrb[36].mxu1  ;;  %v1561_v4 = vld [vmem:[#allocation2 + $0x78] sm:$0xff] }
 0x15d   : > { %v2162_v26 = vpop.f32.mrb[37].mxu1 }
 0x15e   : > { %1586 = vst [vmem:[#allocation2 + $0x40] sm:$0xff] %v1570_v16  ;;  %v1571_v14 = vadd.f32 %v1555_v3, %v1539_v18  ;;  %v2163_v42 = vadd.f32 %v2162_v26, %v2161_v32  ;;  %v2164_v24 = vpop.f32.mrb[38].mxu1  ;;  %v1600_v16 = vld [vmem:[#allocation2 + $0x10] sm:$0xff] (!%p1965_p6)  ;;  %v1601_v18 = vld [vmem:[#allocation2 + $0x18] sm:$0xff] (!%p1965_p6)  ;;  %v1603_v26 = vld [vmem:[#allocation2 + $0x28] sm:$0xff] (!%p1965_p6) }
 0x15f   : > { %v2165_v62 = vpop.f32.mrb[39].mxu1  ;;  %v2231_v15 = vpop.f32.mrb[40].mxu0 }
 0x160   : > { %1587 = vst [vmem:[#allocation2 + $0x48] sm:$0xff] %v1571_v14  ;;  %v1104_v41 = vadd.f32 %v2163_v42, %v2795_v54  ;;  %v2166_v2 = vadd.f32 %v2165_v62, %v2164_v24  ;;  %v2232_v40 = vpop.f32.mrb[41].mxu0  ;;  %v1604_v42 = vld [vmem:[#allocation2 + $0x30] sm:$0xff] (!%p1965_p6)  ;;  %v1605_v24 = vld [vmem:[#allocation2 + $0x38] sm:$0xff] (!%p1965_p6) }
 0x161   : > { %v2233_v52 = vadd.f32 %v2232_v40, %v2231_v15  ;;  %v2234_v35 = vpop.f32.mrb[42].mxu0 }
 0x162   : > { %v1540_v59 = vadd.f32 %v2227_v12, %v1104_v41  ;;  %v1107_v51 = vadd.f32 %v2166_v2, %v2797_v60  ;;  %v2235_v46 = vpop.f32.mrb[43].mxu0  ;;  %v1558_v60 = vld [vmem:[#allocation2 + $0x60] sm:$0xff] }
 0x163   : > { %v2236_v37 = vadd.f32 %v2235_v46, %v2234_v35  ;;  %v1598_v12 = vld [vmem:[#allocation2] sm:$0xff] (!%p1965_p6) }
 0x164   : > { %v1572_v23 = vadd.f32 %v1556_v38, %v1540_v59  ;;  %v1541_v27 = vadd.f32 %v2230_v56, %v1107_v51  ;;  %v2167_v63 = vpop.f32.mrb[40].mxu1 }
 0x165   : > { %v2168_v30 = vpop.f32.mrb[41].mxu1  ;;  %v1606_v38 = vld [vmem:[#allocation2 + $0x40] sm:$0xff] (!%p1965_p6) }
 0x166   : > { %1588 = vst [vmem:[#allocation2 + $0x50] sm:$0xff] %v1572_v23  ;;  %v1573_v53 = vadd.f32 %v1557_v8, %v1541_v27  ;;  %v2169_v31 = vadd.f32 %v2168_v30, %v2167_v63  ;;  %v2170_v54 = vpop.f32.mrb[42].mxu1 }
 0x167   : > { %v2171_v39 = vpop.f32.mrb[43].mxu1  ;;  %v2237_v50 = vpop.f32.mrb[44].mxu0  ;;  %v1607_v40 = vld [vmem:[#allocation2 + $0x48] sm:$0xff] (!%p1965_p6) }
 0x168   : > { %1589 = vst [vmem:[#allocation2 + $0x58] sm:$0xff] %v1573_v53  ;;  %v1112_v25 = vadd.f32 %v2169_v31, %v2803_v45  ;;  %v2172_v20 = vadd.f32 %v2171_v39, %v2170_v54  ;;  %v2238_v47 = vpop.f32.mrb[45].mxu0 }
 0x169   : > { %v2239_v43 = vadd.f32 %v2238_v47, %v2237_v50  ;;  %v2240_v55 = vpop.f32.mrb[46].mxu0 }
 0x16a   : > { %v1542_v48 = vadd.f32 %v2233_v52, %v1112_v25  ;;  %v1115_v29 = vadd.f32 %v2172_v20, %v2805_v21  ;;  %v2241_v19 = vpop.f32.mrb[47].mxu0 }
 0x16b   : > { %v2242_v17 = vadd.f32 %v2241_v19, %v2240_v55 }
 0x16c   : > { %v1574_v44 = vadd.f32 %v1558_v60, %v1542_v48  ;;  %v1543_v36 = vadd.f32 %v2236_v37, %v1115_v29  ;;  %v2173_v22 = vpop.f32.mrb[44].mxu1 }
 0x16d   : > { %v2174_v57 = vpop.f32.mrb[45].mxu1  ;;  %v1608_v59 = vld [vmem:[#allocation2 + $0x50] sm:$0xff] (!%p1965_p6) }
 0x16e   : > { %1590 = vst [vmem:[#allocation2 + $0x60] sm:$0xff] %v1574_v44  ;;  %v1575_v0 = vadd.f32 %v1559_v10, %v1543_v36  ;;  %v2175_v49 = vadd.f32 %v2174_v57, %v2173_v22  ;;  %v2176_v45 = vpop.f32.mrb[46].mxu1 }
 0x16f   : > { %v2177_v58 = vpop.f32.mrb[47].mxu1  ;;  %v1609_v46 = vld [vmem:[#allocation2 + $0x58] sm:$0xff] (!%p1965_p6) }
 0x170   : > { %1591 = vst [vmem:[#allocation2 + $0x68] sm:$0xff] %v1575_v0  ;;  %v1120_v28 = vadd.f32 %v2175_v49, %v2811_v61  ;;  %v2178_v1 = vadd.f32 %v2177_v58, %v2176_v45  ;;  %v1966_v61 = vld [vmem:[%s2868_s2] ss:$0 sm:$0xff] (!%p1965_p6) }
 0x171   : > { %v1621_v3 = vadd.f32 (!%p1965_p6), %v1966_v61, %v1598_v12  ;;  %v1622_v11 = vadd.f32 (!%p1965_p6), %v1966_v61, %v1599_v13  ;;  %v1623_v32 = vadd.f32 (!%p1965_p6), %v1966_v61, %v1600_v16  ;;  %v1624_v56 = vadd.f32 (!%p1965_p6), %v1966_v61, %v1601_v18 }
 0x172   : > { %v1544_v21 = vadd.f32 %v2239_v43, %v1120_v28  ;;  %v1123_v5 = vadd.f32 %v2178_v1, %v2813_v34  ;;  %1597 = sbr.rel (%p1965_p6) target bundleno = 391 (0x187), region = 40  ;;  %v1602_v34 = vld [vmem:[#allocation2 + $0x20] sm:$0xff] (!%p1965_p6)  ;;  %v1626_v2 = vadd.f32 (!%p1965_p6), %v1966_v61, %v1603_v26  ;;  %v1627_v15 = vadd.f32 (!%p1965_p6), %v1966_v61, %v1604_v42 }
 0x173   : > { %v1625_v14 = vadd.f32 (!%p1965_p6), %v1966_v61, %v1602_v34  ;;  %v1637_v62 = vmax.f32 (!%p1965_p6), %v1621_v3, 0.0  ;;  %v1638_v41 = vmax.f32 (!%p1965_p6), %v1622_v11, 0.0  ;;  %v1639_v51 = vmax.f32 (!%p1965_p6), %v1623_v32, 0.0 }
 0x174   : > { %v1576_v6 = vadd.f32 %v1560_v33, %v1544_v21  ;;  %v1545_v7 = vadd.f32 %v2242_v17, %v1123_v5  ;;  %v1640_v52 = vmax.f32 (!%p1965_p6), %v1624_v56, 0.0  ;;  %v1628_v8 = vadd.f32 (!%p1965_p6), %v1966_v61, %v1605_v24 }
 0x175   : > { %v1641_v35 = vmax.f32 (!%p1965_p6), %v1625_v14, 0.0  ;;  %v1610_v23 = vld [vmem:[#allocation2 + $0x60] sm:$0xff] (!%p1965_p6)  ;;  %v2007_v27 = vpack.c.bf16 (!%p1965_p6), %v1638_v41, %v1637_v62  ;;  %v1642_v63 = vmax.f32 (!%p1965_p6), %v1626_v2, 0.0  ;;  %v1643_v37 = vmax.f32 (!%p1965_p6), %v1627_v15, 0.0 }
 0x176   : > { %1592 = vst [vmem:[#allocation2 + $0x70] sm:$0xff] %v1576_v6  ;;  %v1577_v9 = vadd.f32 %v1561_v4, %v1545_v7  ;;  %v1629_v30 = vadd.f32 (!%p1965_p6), %v1966_v61, %v1606_v38  ;;  %v2012_v31 = vpack.c.bf16 (!%p1965_p6), %v1640_v52, %v1639_v51  ;;  %v1644_v54 = vmax.f32 (!%p1965_p6), %v1628_v8, 0.0 }
 0x177   : > { %v1611_v53 = vld [vmem:[#allocation2 + $0x68] sm:$0xff] (!%p1965_p6)  ;;  %v1630_v39 = vadd.f32 (!%p1965_p6), %v1966_v61, %v1607_v40  ;;  %v1631_v25 = vadd.f32 (!%p1965_p6), %v1966_v61, %v1608_v59  ;;  %2008 = vst [vmem:[%s2869_s3] sm:$0xff] (!%p1965_p6), %v2007_v27   ;;  %v2017_v60 = vpack.c.bf16 (!%p1965_p6), %v1642_v63, %v1641_v35  ;;  %v1632_v48 = vadd.f32 (!%p1965_p6), %v1966_v61, %v1609_v46 }
 0x178   : > { %1593 = vst [vmem:[#allocation2 + $0x78] sm:$0xff] %v1577_v9  ;;  %v1645_v47 = vmax.f32 (!%p1965_p6), %v1629_v30, 0.0  ;;  %v1633_v29 = vadd.f32 (!%p1965_p6), %v1966_v61, %v1610_v23  ;;  %2044 = vst [vmem:[%s2869_s3 + $0x8] sm:$0xff] (!%p1965_p6), %v2012_v31   ;;  %v2022_v43 = vpack.c.bf16 (!%p1965_p6), %v1644_v54, %v1643_v37  ;;  %v1634_v19 = vadd.f32 (!%p1965_p6), %v1966_v61, %v1611_v53 }
 0x179   : > { %v1646_v55 = vmax.f32 %v1630_v39, 0.0  ;;  %v1647_v10 = vmax.f32 %v1631_v25, 0.0  ;;  %2045 = vst [vmem:[%s2869_s3 + $0x10] sm:$0xff] %v2017_v60   ;;  %v1648_v44 = vmax.f32 %v1632_v48, 0.0 }
 0x17a   : > { %v1649_v36 = vmax.f32 %v1633_v29, 0.0  ;;  %2046 = vst [vmem:[%s2869_s3 + $0x18] sm:$0xff] %v2022_v43   ;;  %v1650_v0 = vmax.f32 %v1634_v19, 0.0 }
 0x17b   : > { %v2027_v57 = vpack.c.bf16 %v1646_v55, %v1645_v47  ;;  %v2032_v49 = vpack.c.bf16 %v1648_v44, %v1647_v10 }
 0x17c   : > { %v2037_v28 = vpack.c.bf16 %v1650_v0, %v1649_v36 }
 0x17d   : > { %v1612_v20 = vld [vmem:[#allocation2 + $0x70] sm:$0xff]  ;;  %2047 = vst [vmem:[%s2869_s3 + $0x20] sm:$0xff] %v2027_v57   ;;  %2048 = vst [vmem:[%s2869_s3 + $0x28] sm:$0xff] %v2032_v49  }
 0x17e   : > { %v1635_v22 = vadd.f32 %v1966_v61, %v1612_v20  ;;  %2049 = vst [vmem:[%s2869_s3 + $0x30] sm:$0xff] %v2037_v28  }
 0x17f   : > { %v1613_v50 = vld [vmem:[#allocation2 + $0x78] sm:$0xff] }
 0x180   : > { %v1636_v17 = vadd.f32 %v1966_v61, %v1613_v50  ;;  %v1651_v45 = vmax.f32 %v1635_v22, 0.0 }
 0x182   : > { %v1652_v58 = vmax.f32 %v1636_v17, 0.0 }
 0x184   : > { %v2042_v1 = vpack.c.bf16 %v1652_v58, %v1651_v45 }
 0x186   : > { %2050 = vst [vmem:[%s2869_s3 + $0x38] sm:$0xff] %v2042_v1  }
 0x187 PF: > { %s13_s14 = sadd.s32 1, %s2371_s14   ;;  %s2874_s12 = smov %s2367_s13 }
 0x188   : > { %p10_p7 = scmp.ge.s32.totalorder %s13_s14, 5   ;;  %s2875_s13 = smov %s2877_s15 }
 0x18a   :  { %12 = sbr.rel (!%p10_p7) target bundleno = 2 (0x2), region = 77 }

// kernel: visualnet_forward.5
= control target key start
LH: loop header
LB: loop body
LE: loop exit
PB: predicated region body
PF: predicated region fallthrough
CT: control target
= control target key end

     0   :  { %s3095_s12 = smov 0   ;;  %s3097_s13 = smov 0   ;;  %s3457_s0 = inlined_call_operand.vmem [shape: bf16[8,2048], index: 0, kind: input, shape index: {}]   ;;  %s3458_s1 = inlined_call_operand.vmem [shape: bf16[2048,512], index: 1, kind: input, shape index: {}]   ;;  %s3459_s2 = inlined_call_operand.vmem [shape: f32[1,512], index: 2, kind: input, shape index: {}]   ;;  %s3460_s3 = inlined_call_operand.vmem [shape: f32[8,512], index: 3, kind: output, shape index: {}]  }
   0x1   :  { %s3099_s14 = smov 0  }
   0x2 LB: > { %s25_s15 = sadd.s32 1, %s3068_s13  ;;  %p2356_p0 = scmp.ge.s32.totalorder %s3072_s14, 1  ;;  %s3072_s14 = sphi %s3099_s14, %s13_s14   ;;  %s3068_s13 = sphi %s3097_s13, %s3462_s13   ;;  %s3064_s12 = sphi %s3095_s12, %s3461_s12  }
   0x3   : > { %p26_p1 = scmp.ge.s32.totalorder %s25_s15, 2  ;;  %p194_p2 = scmp.lt.s32.totalorder %s3072_s14, 3 }
   0x5   : > { %s3464_s15 = smov (%p26_p1, %s25_s15), 0  ;;  %p195_p3 = pnand %p2356_p0, %p194_p2 }
   0x6   : > { %s2357_s16 = sshll.u32 (!%p195_p3), %s3064_s12, 3  ;;  %s2359_s17 = sshll.u32 (!%p195_p3), %s3064_s12, 7 }
   0x7   : > { %198 = sbr.rel (%p195_p3) target bundleno = 513 (0x201), region = 32  ;;  %p243_p4 = scmp.lt.s32.totalorder (!%p195_p3), %s2357_s16, 15 }
   0x8   : > { %p252_p5 = scmp.lt.s32.totalorder (!%p195_p3), %s2359_s17, 255  ;;  %p2362_p6 = scmp.ne.s32.totalorder (!%p195_p3), %s3064_s12, 0 }
   0xe   : > { %s3466_s16 = smov (!%p243_p4, %s2357_s16), 15  ;;  %s3468_s17 = smov (!%p252_p5, %s2359_s17), 255 }
   0xf   : > { %s2358_s18 = sshll.u32 %s3466_s16, 2  ;;  %s2632_s22 = sshll.u32 %s3468_s17, 4  ;;  %v3074_v0 = vmov (!%p2362_p6), 0.0  }
  0x10   : > { %s3120_s21 = scalar_lea.vmem %s3457_s0, %s2358_s18  ;;  %s3125_s25 = scalar_lea.vmem %s3458_s1, %s2632_s22  ;;  %281 = vst [vmem:[#allocation2] sm:$0xff] (!%p2362_p6), %v3074_v0  ;;  %282 = vst [vmem:[#allocation2 + $0x8] sm:$0xff] (!%p2362_p6), %v3074_v0 }
  0x11   : > { %280 = sbr.rel (%p2362_p6) target bundleno = 24 (0x18), region = 36  ;;  %283 = vst [vmem:[#allocation2 + $0x10] sm:$0xff] (!%p2362_p6), %v3074_v0  ;;  %284 = vst [vmem:[#allocation2 + $0x18] sm:$0xff] (!%p2362_p6), %v3074_v0 }
  0x18 PF: > { %v2658_v1 = vld [vmem:[%s3125_s25 + $0x4] ss:$16 sps:$4 sm:$0xff]   ;;  %v2662_v3 = vld [vmem:[%s3125_s25] ss:$16 sps:$4 sm:$0xff]   ;;  %v290_v49 = vld [vmem:[%s3120_s21 + $0x8] sm:$0xff]  ;;  %p2627_p7 = scmp.ne.s32.totalorder %s3064_s12, 1 }
  0x19   : > { %v2660_v2 = vld [vmem:[%s3125_s25 + $0x204] ss:$16 sps:$4 sm:$0xff]   ;;  %1857 = vmatprep.subr.bf16.mxu0 %v2658_v1  ;;  %v2663_v4 = vld [vmem:[%s3125_s25 + $0x200] ss:$16 sps:$4 sm:$0xff]   ;;  %v3180_v52 = vcombine.high %v290_v49, %v290_v49 }
  0x1a   : > { %1898 = vmatprep.subr.bf16.mxu1 %v2660_v2  ;;  %v2664_v5 = vld [vmem:[%s3125_s25 + $0x24] ss:$16 sps:$4 sm:$0xff]   ;;  %1858 = vmatpush1.bf16.msra.mxu0 %v2662_v3  ;;  %v2668_v7 = vld [vmem:[%s3125_s25 + $0x20] ss:$16 sps:$4 sm:$0xff]  }
  0x1b   : > { %1899 = vmatpush1.bf16.msra.mxu1 %v2663_v4  ;;  %v2666_v6 = vld [vmem:[%s3125_s25 + $0x224] ss:$16 sps:$4 sm:$0xff]   ;;  %1859 = vmatprep.subr.bf16.mxu0 %v2664_v5  ;;  %v2669_v8 = vld [vmem:[%s3125_s25 + $0x220] ss:$16 sps:$4 sm:$0xff]  }
  0x1c   : > { %1900 = vmatprep.subr.bf16.mxu1 %v2666_v6  ;;  %v2670_v9 = vld [vmem:[%s3125_s25 + $0x44] ss:$16 sps:$4 sm:$0xff]   ;;  %v2674_v11 = vld [vmem:[%s3125_s25 + $0x40] ss:$16 sps:$4 sm:$0xff]   ;;  %1930 = vmatprep.mubr.bf16.mxu1 %v3180_v52 }
  0x1d   : > { %v2672_v10 = vld [vmem:[%s3125_s25 + $0x244] ss:$16 sps:$4 sm:$0xff]   ;;  %v2675_v12 = vld [vmem:[%s3125_s25 + $0x240] ss:$16 sps:$4 sm:$0xff]  }
  0x1e   : > { %1860 = vmatpush1.bf16.msra.mxu0 %v2668_v7  ;;  %v2676_v13 = vld [vmem:[%s3125_s25 + $0x64] ss:$16 sps:$4 sm:$0xff]   ;;  %v2680_v15 = vld [vmem:[%s3125_s25 + $0x60] ss:$16 sps:$4 sm:$0xff]  }
  0x1f   : > { %1901 = vmatpush1.bf16.msra.mxu1 %v2669_v8  ;;  %1861 = vmatprep.subr.bf16.mxu0 %v2670_v9  ;;  %v2678_v14 = vld [vmem:[%s3125_s25 + $0x264] ss:$16 sps:$4 sm:$0xff]   ;;  %v2681_v16 = vld [vmem:[%s3125_s25 + $0x260] ss:$16 sps:$4 sm:$0xff]   ;;  %v3204_v8 = vcombine.low %v290_v49, %v290_v49 }
  0x20   : > { %1902 = vmatprep.subr.bf16.mxu1 %v2672_v10  ;;  %v2682_v17 = vld [vmem:[%s3125_s25 + $0x84] ss:$16 sps:$4 sm:$0xff]   ;;  %v2686_v19 = vld [vmem:[%s3125_s25 + $0x80] ss:$16 sps:$4 sm:$0xff]  }
  0x21   : > { %v2684_v18 = vld [vmem:[%s3125_s25 + $0x284] ss:$16 sps:$4 sm:$0xff]   ;;  %v2687_v20 = vld [vmem:[%s3125_s25 + $0x280] ss:$16 sps:$4 sm:$0xff]  }
  0x22   : > { %1862 = vmatpush1.bf16.msra.mxu0 %v2674_v11  ;;  %v2688_v21 = vld [vmem:[%s3125_s25 + $0xa4] ss:$16 sps:$4 sm:$0xff]   ;;  %v2692_v23 = vld [vmem:[%s3125_s25 + $0xa0] ss:$16 sps:$4 sm:$0xff]  }
  0x23   : > { %1903 = vmatpush1.bf16.msra.mxu1 %v2675_v12  ;;  %1863 = vmatprep.subr.bf16.mxu0 %v2676_v13  ;;  %v2690_v22 = vld [vmem:[%s3125_s25 + $0x2a4] ss:$16 sps:$4 sm:$0xff]   ;;  %v2693_v24 = vld [vmem:[%s3125_s25 + $0x2a0] ss:$16 sps:$4 sm:$0xff]  }
  0x24   : > { %1904 = vmatprep.subr.bf16.mxu1 %v2678_v14  ;;  %v2694_v25 = vld [vmem:[%s3125_s25 + $0xc4] ss:$16 sps:$4 sm:$0xff]   ;;  %v2698_v27 = vld [vmem:[%s3125_s25 + $0xc0] ss:$16 sps:$4 sm:$0xff]  }
  0x25   : > { %v2696_v26 = vld [vmem:[%s3125_s25 + $0x2c4] ss:$16 sps:$4 sm:$0xff]   ;;  %v2699_v28 = vld [vmem:[%s3125_s25 + $0x2c0] ss:$16 sps:$4 sm:$0xff]  }
  0x26   : > { %1864 = vmatpush1.bf16.msra.mxu0 %v2680_v15  ;;  %v2700_v29 = vld [vmem:[%s3125_s25 + $0xe4] ss:$16 sps:$4 sm:$0xff]   ;;  %v2704_v31 = vld [vmem:[%s3125_s25 + $0xe0] ss:$16 sps:$4 sm:$0xff]  }
  0x27   : > { %1905 = vmatpush1.bf16.msra.mxu1 %v2681_v16  ;;  %1865 = vmatprep.subr.bf16.mxu0 %v2682_v17  ;;  %v2702_v30 = vld [vmem:[%s3125_s25 + $0x2e4] ss:$16 sps:$4 sm:$0xff]   ;;  %v2705_v32 = vld [vmem:[%s3125_s25 + $0x2e0] ss:$16 sps:$4 sm:$0xff]  }
  0x28   : > { %1906 = vmatprep.subr.bf16.mxu1 %v2684_v18  ;;  %v2706_v33 = vld [vmem:[%s3125_s25 + $0x104] ss:$16 sps:$4 sm:$0xff]   ;;  %v2710_v35 = vld [vmem:[%s3125_s25 + $0x100] ss:$16 sps:$4 sm:$0xff]  }
  0x29   : > { %v2708_v34 = vld [vmem:[%s3125_s25 + $0x304] ss:$16 sps:$4 sm:$0xff]   ;;  %v2711_v36 = vld [vmem:[%s3125_s25 + $0x300] ss:$16 sps:$4 sm:$0xff]  }
  0x2a   : > { %1866 = vmatpush1.bf16.msra.mxu0 %v2686_v19  ;;  %v2712_v37 = vld [vmem:[%s3125_s25 + $0x124] ss:$16 sps:$4 sm:$0xff]   ;;  %v2716_v39 = vld [vmem:[%s3125_s25 + $0x120] ss:$16 sps:$4 sm:$0xff]  }
  0x2b   : > { %1907 = vmatpush1.bf16.msra.mxu1 %v2687_v20  ;;  %1867 = vmatprep.subr.bf16.mxu0 %v2688_v21  ;;  %v2714_v38 = vld [vmem:[%s3125_s25 + $0x324] ss:$16 sps:$4 sm:$0xff]   ;;  %v2717_v40 = vld [vmem:[%s3125_s25 + $0x320] ss:$16 sps:$4 sm:$0xff]  }
  0x2c   : > { %1908 = vmatprep.subr.bf16.mxu1 %v2690_v22  ;;  %v2718_v41 = vld [vmem:[%s3125_s25 + $0x144] ss:$16 sps:$4 sm:$0xff]   ;;  %v2722_v43 = vld [vmem:[%s3125_s25 + $0x140] ss:$16 sps:$4 sm:$0xff]  }
  0x2d   : > { %v2720_v42 = vld [vmem:[%s3125_s25 + $0x344] ss:$16 sps:$4 sm:$0xff]   ;;  %v2723_v44 = vld [vmem:[%s3125_s25 + $0x340] ss:$16 sps:$4 sm:$0xff]  }
  0x2e   : > { %1868 = vmatpush1.bf16.msra.mxu0 %v2692_v23  ;;  %v2724_v45 = vld [vmem:[%s3125_s25 + $0x164] ss:$16 sps:$4 sm:$0xff]   ;;  %v2728_v50 = vld [vmem:[%s3125_s25 + $0x160] ss:$16 sps:$4 sm:$0xff]  }
  0x2f   : > { %1909 = vmatpush1.bf16.msra.mxu1 %v2693_v24  ;;  %1869 = vmatprep.subr.bf16.mxu0 %v2694_v25  ;;  %v2726_v46 = vld [vmem:[%s3125_s25 + $0x364] ss:$16 sps:$4 sm:$0xff]   ;;  %v2729_v51 = vld [vmem:[%s3125_s25 + $0x360] ss:$16 sps:$4 sm:$0xff]  }
  0x30   : > { %1910 = vmatprep.subr.bf16.mxu1 %v2696_v26  ;;  %v289_v47 = vld [vmem:[%s3120_s21] sm:$0xff] }
  0x31   : > { %v3175_v48 = vcombine.high %v289_v47, %v289_v47  ;;  %v2730_v53 = vld [vmem:[%s3125_s25 + $0x184] ss:$16 sps:$4 sm:$0xff]   ;;  %v2734_v55 = vld [vmem:[%s3125_s25 + $0x180] ss:$16 sps:$4 sm:$0xff]   ;;  %v3202_v7 = vcombine.low %v289_v47, %v289_v47 }
  0x32   : > { %1870 = vmatpush1.bf16.msra.mxu0 %v2698_v27  ;;  %v2732_v54 = vld [vmem:[%s3125_s25 + $0x384] ss:$16 sps:$4 sm:$0xff]   ;;  %v2735_v56 = vld [vmem:[%s3125_s25 + $0x380] ss:$16 sps:$4 sm:$0xff]  }
  0x33   : > { %1911 = vmatpush1.bf16.msra.mxu1 %v2699_v28  ;;  %1871 = vmatprep.subr.bf16.mxu0 %v2700_v29  ;;  %v2736_v57 = vld [vmem:[%s3125_s25 + $0x1a4] ss:$16 sps:$4 sm:$0xff]   ;;  %v2740_v59 = vld [vmem:[%s3125_s25 + $0x1a0] ss:$16 sps:$4 sm:$0xff]  }
  0x34   : > { %1912 = vmatprep.subr.bf16.mxu1 %v2702_v30  ;;  %1889 = vmatprep.mubr.bf16.mxu0 %v3175_v48  ;;  %v2738_v58 = vld [vmem:[%s3125_s25 + $0x3a4] ss:$16 sps:$4 sm:$0xff]   ;;  %v2741_v60 = vld [vmem:[%s3125_s25 + $0x3a0] ss:$16 sps:$4 sm:$0xff]  }
  0x35   : > { %v2742_v61 = vld [vmem:[%s3125_s25 + $0x1c4] ss:$16 sps:$4 sm:$0xff]   ;;  %v2746_v63 = vld [vmem:[%s3125_s25 + $0x1c0] ss:$16 sps:$4 sm:$0xff]  }
  0x36   : > { %1872 = vmatpush1.bf16.msra.mxu0 %v2704_v31  ;;  %v2744_v62 = vld [vmem:[%s3125_s25 + $0x3c4] ss:$16 sps:$4 sm:$0xff]   ;;  %v2747_v0 = vld [vmem:[%s3125_s25 + $0x3c0] ss:$16 sps:$4 sm:$0xff]  }
  0x37   : > { %1913 = vmatpush1.bf16.msra.mxu1 %v2705_v32  ;;  %1873 = vmatprep.subr.bf16.mxu0 %v2706_v33  ;;  %v2748_v1 = vld [vmem:[%s3125_s25 + $0x1e4] ss:$16 sps:$4 sm:$0xff]   ;;  %v2752_v3 = vld [vmem:[%s3125_s25 + $0x1e0] ss:$16 sps:$4 sm:$0xff]  }
  0x38   : > { %1914 = vmatprep.subr.bf16.mxu1 %v2708_v34  ;;  %v2750_v2 = vld [vmem:[%s3125_s25 + $0x3e4] ss:$16 sps:$4 sm:$0xff]   ;;  %v2753_v4 = vld [vmem:[%s3125_s25 + $0x3e0] ss:$16 sps:$4 sm:$0xff]   ;;  %v3236_v34 = vld [vmem:[%s3120_s21 + $0x18] sm:$0xff] }
  0x39   : > { %v2760_v5 = vld [vmem:[%s3125_s25 + $0x404] ss:$16 sps:$4 sm:$0xff]   ;;  %v2758_v9 = vld [vmem:[%s3125_s25 + $0x400] ss:$16 sps:$4 sm:$0xff]  }
  0x3a   : > { %1874 = vmatpush1.bf16.msra.mxu0 %v2710_v35  ;;  %v2763_v6 = vld [vmem:[%s3125_s25 + $0x604] ss:$16 sps:$4 sm:$0xff]   ;;  %v2761_v10 = vld [vmem:[%s3125_s25 + $0x600] ss:$16 sps:$4 sm:$0xff]  }
  0x3b   : > { %1915 = vmatpush1.bf16.msra.mxu1 %v2711_v36  ;;  %1875 = vmatprep.subr.bf16.mxu0 %v2712_v37  ;;  %v2766_v11 = vld [vmem:[%s3125_s25 + $0x424] ss:$16 sps:$4 sm:$0xff]   ;;  %v2764_v13 = vld [vmem:[%s3125_s25 + $0x420] ss:$16 sps:$4 sm:$0xff]  }
  0x3c   : > { %1916 = vmatprep.subr.bf16.mxu1 %v2714_v38  ;;  %v2769_v12 = vld [vmem:[%s3125_s25 + $0x624] ss:$16 sps:$4 sm:$0xff]   ;;  %v2767_v14 = vld [vmem:[%s3125_s25 + $0x620] ss:$16 sps:$4 sm:$0xff]   ;;  %v3246_v38 = vcombine.high %v3236_v34, %v3236_v34 }
  0x3d   : > { %v2772_v15 = vld [vmem:[%s3125_s25 + $0x444] ss:$16 sps:$4 sm:$0xff]   ;;  %v2770_v17 = vld [vmem:[%s3125_s25 + $0x440] ss:$16 sps:$4 sm:$0xff]  }
  0x3e   : > { %1876 = vmatpush1.bf16.msra.mxu0 %v2716_v39  ;;  %v2775_v16 = vld [vmem:[%s3125_s25 + $0x644] ss:$16 sps:$4 sm:$0xff]   ;;  %v2773_v18 = vld [vmem:[%s3125_s25 + $0x640] ss:$16 sps:$4 sm:$0xff]  }
  0x3f   : > { %1917 = vmatpush1.bf16.msra.mxu1 %v2717_v40  ;;  %1877 = vmatprep.subr.bf16.mxu0 %v2718_v41  ;;  %v2778_v19 = vld [vmem:[%s3125_s25 + $0x464] ss:$16 sps:$4 sm:$0xff]   ;;  %v2776_v21 = vld [vmem:[%s3125_s25 + $0x460] ss:$16 sps:$4 sm:$0xff]  }
  0x40   : > { %1918 = vmatprep.subr.bf16.mxu1 %v2720_v42  ;;  %v2781_v20 = vld [vmem:[%s3125_s25 + $0x664] ss:$16 sps:$4 sm:$0xff]   ;;  %v2779_v22 = vld [vmem:[%s3125_s25 + $0x660] ss:$16 sps:$4 sm:$0xff]  }
  0x41   : > { %v2784_v23 = vld [vmem:[%s3125_s25 + $0x484] ss:$16 sps:$4 sm:$0xff]   ;;  %v2782_v25 = vld [vmem:[%s3125_s25 + $0x480] ss:$16 sps:$4 sm:$0xff]  }
  0x42   : > { %1878 = vmatpush1.bf16.msra.mxu0 %v2722_v43  ;;  %v2787_v24 = vld [vmem:[%s3125_s25 + $0x684] ss:$16 sps:$4 sm:$0xff]   ;;  %v2785_v26 = vld [vmem:[%s3125_s25 + $0x680] ss:$16 sps:$4 sm:$0xff]  }
  0x43   : > { %1919 = vmatpush1.bf16.msra.mxu1 %v2723_v44  ;;  %1879 = vmatprep.subr.bf16.mxu0 %v2724_v45  ;;  %v2790_v27 = vld [vmem:[%s3125_s25 + $0x4a4] ss:$16 sps:$4 sm:$0xff]   ;;  %v2788_v29 = vld [vmem:[%s3125_s25 + $0x4a0] ss:$16 sps:$4 sm:$0xff]  }
  0x44   : > { %1920 = vmatprep.subr.bf16.mxu1 %v2726_v46  ;;  %v2793_v28 = vld [vmem:[%s3125_s25 + $0x6a4] ss:$16 sps:$4 sm:$0xff]   ;;  %v2791_v30 = vld [vmem:[%s3125_s25 + $0x6a0] ss:$16 sps:$4 sm:$0xff]  }
  0x45   : > { %v2796_v31 = vld [vmem:[%s3125_s25 + $0x4c4] ss:$16 sps:$4 sm:$0xff]   ;;  %v2794_v35 = vld [vmem:[%s3125_s25 + $0x4c0] ss:$16 sps:$4 sm:$0xff]  }
  0x46   : > { %1880 = vmatpush1.bf16.msra.mxu0 %v2728_v50  ;;  %v2799_v32 = vld [vmem:[%s3125_s25 + $0x6c4] ss:$16 sps:$4 sm:$0xff]   ;;  %v2797_v36 = vld [vmem:[%s3125_s25 + $0x6c0] ss:$16 sps:$4 sm:$0xff]  }
  0x47   : > { %1921 = vmatpush1.bf16.msra.mxu1 %v2729_v51  ;;  %1881 = vmatprep.subr.bf16.mxu0 %v2730_v53  ;;  %v3233_v33 = vld [vmem:[%s3120_s21 + $0x10] sm:$0xff] }
  0x48   : > { %1922 = vmatprep.subr.bf16.mxu1 %v2732_v54  ;;  %v3242_v37 = vcombine.high %v3233_v33, %v3233_v33  ;;  %v2802_v39 = vld [vmem:[%s3125_s25 + $0x4e4] ss:$16 sps:$4 sm:$0xff]   ;;  %v2800_v41 = vld [vmem:[%s3125_s25 + $0x4e0] ss:$16 sps:$4 sm:$0xff]  }
  0x49   : > { %v2805_v40 = vld [vmem:[%s3125_s25 + $0x6e4] ss:$16 sps:$4 sm:$0xff]   ;;  %v2803_v42 = vld [vmem:[%s3125_s25 + $0x6e0] ss:$16 sps:$4 sm:$0xff]  }
  0x4a   : > { %1882 = vmatpush1.bf16.msra.mxu0 %v2734_v55  ;;  %v2808_v43 = vld [vmem:[%s3125_s25 + $0x504] ss:$16 sps:$4 sm:$0xff]   ;;  %v2806_v45 = vld [vmem:[%s3125_s25 + $0x500] ss:$16 sps:$4 sm:$0xff]  }
  0x4b   : > { %1923 = vmatpush1.bf16.msra.mxu1 %v2735_v56  ;;  %1883 = vmatprep.subr.bf16.mxu0 %v2736_v57  ;;  %v2811_v44 = vld [vmem:[%s3125_s25 + $0x704] ss:$16 sps:$4 sm:$0xff]   ;;  %v2809_v46 = vld [vmem:[%s3125_s25 + $0x700] ss:$16 sps:$4 sm:$0xff]  }
  0x4c   : > { %1924 = vmatprep.subr.bf16.mxu1 %v2738_v58  ;;  %v2814_v47 = vld [vmem:[%s3125_s25 + $0x524] ss:$16 sps:$4 sm:$0xff]   ;;  %v2812_v50 = vld [vmem:[%s3125_s25 + $0x520] ss:$16 sps:$4 sm:$0xff]  }
  0x4d   : > { %v2817_v49 = vld [vmem:[%s3125_s25 + $0x724] ss:$16 sps:$4 sm:$0xff]   ;;  %v2815_v51 = vld [vmem:[%s3125_s25 + $0x720] ss:$16 sps:$4 sm:$0xff]  }
  0x4e   : > { %1884 = vmatpush1.bf16.msra.mxu0 %v2740_v59  ;;  %v2820_v53 = vld [vmem:[%s3125_s25 + $0x544] ss:$16 sps:$4 sm:$0xff]   ;;  %v2818_v55 = vld [vmem:[%s3125_s25 + $0x540] ss:$16 sps:$4 sm:$0xff]  }
  0x4f   : > { %1925 = vmatpush1.bf16.msra.mxu1 %v2741_v60  ;;  %1885 = vmatprep.subr.bf16.mxu0 %v2742_v61  ;;  %v2823_v54 = vld [vmem:[%s3125_s25 + $0x744] ss:$16 sps:$4 sm:$0xff]   ;;  %v2821_v56 = vld [vmem:[%s3125_s25 + $0x740] ss:$16 sps:$4 sm:$0xff]  }
  0x50   : > { %1926 = vmatprep.subr.bf16.mxu1 %v2744_v62  ;;  %v2826_v57 = vld [vmem:[%s3125_s25 + $0x564] ss:$16 sps:$4 sm:$0xff]   ;;  %v2824_v59 = vld [vmem:[%s3125_s25 + $0x560] ss:$16 sps:$4 sm:$0xff]  }
  0x51   : > { %v2829_v58 = vld [vmem:[%s3125_s25 + $0x764] ss:$16 sps:$4 sm:$0xff]   ;;  %v2827_v60 = vld [vmem:[%s3125_s25 + $0x760] ss:$16 sps:$4 sm:$0xff]  }
  0x52   : > { %1886 = vmatpush1.bf16.msra.mxu0 %v2746_v63  ;;  %v2832_v61 = vld [vmem:[%s3125_s25 + $0x584] ss:$16 sps:$4 sm:$0xff]   ;;  %v2830_v63 = vld [vmem:[%s3125_s25 + $0x580] ss:$16 sps:$4 sm:$0xff]  }
  0x53   : > { %1927 = vmatpush1.bf16.msra.mxu1 %v2747_v0  ;;  %1887 = vmatprep.subr.bf16.mxu0 %v2748_v1  ;;  %v2835_v62 = vld [vmem:[%s3125_s25 + $0x784] ss:$16 sps:$4 sm:$0xff]   ;;  %v2833_v0 = vld [vmem:[%s3125_s25 + $0x780] ss:$16 sps:$4 sm:$0xff]  }
  0x54   : > { %1928 = vmatprep.subr.bf16.mxu1 %v2750_v2  ;;  %v2838_v1 = vld [vmem:[%s3125_s25 + $0x5a4] ss:$16 sps:$4 sm:$0xff]  }
  0x55   : > { %v2841_v2 = vld [vmem:[%s3125_s25 + $0x7a4] ss:$16 sps:$4 sm:$0xff]  }
  0x56   : > { %1888 = vmatpush1.bf16.msra.mxu0 %v2752_v3  ;;  %v2836_v3 = vld [vmem:[%s3125_s25 + $0x5a0] ss:$16 sps:$4 sm:$0xff]  }
  0x57   : > { %1929 = vmatpush1.bf16.msra.mxu1 %v2753_v4  ;;  %1939 = vmatprep.subr.bf16.mxu0 %v2760_v5  ;;  %v2839_v4 = vld [vmem:[%s3125_s25 + $0x7a0] ss:$16 sps:$4 sm:$0xff]   ;;  %v2844_v5 = vld [vmem:[%s3125_s25 + $0x5c4] ss:$16 sps:$4 sm:$0xff]  }
  0x58   : > { %1980 = vmatprep.subr.bf16.mxu1 %v2763_v6  ;;  %v2847_v6 = vld [vmem:[%s3125_s25 + $0x7c4] ss:$16 sps:$4 sm:$0xff]  }
  0x59   : > { %1890 = vmatmul.mubr.bf16.vlgmr.msra.gmra.mrb[0].mxu0 %v3202_v7 }
  0x5a   : > { %1931 = vmatmul.mubr.bf16.vlgmr.msra.gmra.mrb[0].mxu1 %v3204_v8  ;;  %1940 = vmatpush1.bf16.msra.mxu0 %v2758_v9  ;;  %v2842_v9 = vld [vmem:[%s3125_s25 + $0x5c0] ss:$16 sps:$4 sm:$0xff]  }
  0x5b   : > { %1981 = vmatpush1.bf16.msra.mxu1 %v2761_v10  ;;  %1941 = vmatprep.subr.bf16.mxu0 %v2766_v11  ;;  %v2845_v10 = vld [vmem:[%s3125_s25 + $0x7c0] ss:$16 sps:$4 sm:$0xff]   ;;  %v2850_v11 = vld [vmem:[%s3125_s25 + $0x5e4] ss:$16 sps:$4 sm:$0xff]  }
  0x5c   : > { %1982 = vmatprep.subr.bf16.mxu1 %v2769_v12  ;;  %1971 = vmatprep.mubr.bf16.mxu0 %v3242_v37  ;;  %v2853_v12 = vld [vmem:[%s3125_s25 + $0x7e4] ss:$16 sps:$4 sm:$0xff]  }
  0x5d   : > { %2012 = vmatprep.mubr.bf16.mxu1 %v3246_v38 }
  0x5e   : > { %1942 = vmatpush1.bf16.msra.mxu0 %v2764_v13  ;;  %v2848_v13 = vld [vmem:[%s3125_s25 + $0x5e0] ss:$16 sps:$4 sm:$0xff]  }
  0x5f   : > { %1983 = vmatpush1.bf16.msra.mxu1 %v2767_v14  ;;  %1943 = vmatprep.subr.bf16.mxu0 %v2772_v15  ;;  %v2851_v14 = vld [vmem:[%s3125_s25 + $0x7e0] ss:$16 sps:$4 sm:$0xff]   ;;  %v2860_v15 = vld [vmem:[%s3125_s25 + $0xc] ss:$16 sps:$4 sm:$0xff]  }
  0x60   : > { %1984 = vmatprep.subr.bf16.mxu1 %v2775_v16  ;;  %v2863_v16 = vld [vmem:[%s3125_s25 + $0x20c] ss:$16 sps:$4 sm:$0xff]  }
  0x62   : > { %1944 = vmatpush1.bf16.msra.mxu0 %v2770_v17  ;;  %v3290_v17 = vcombine.low %v3233_v33, %v3233_v33  ;;  %v2882_v33 = vld [vmem:[%s3125_s25 + $0x88] ss:$16 sps:$4 sm:$0xff]  }
  0x63   : > { %1985 = vmatpush1.bf16.msra.mxu1 %v2773_v18  ;;  %1945 = vmatprep.subr.bf16.mxu0 %v2778_v19  ;;  %v3294_v18 = vcombine.low %v3236_v34, %v3236_v34  ;;  %v2858_v19 = vld [vmem:[%s3125_s25 + $0x8] ss:$16 sps:$4 sm:$0xff]  }
  0x64   : > { %1986 = vmatprep.subr.bf16.mxu1 %v2781_v20  ;;  %v2861_v20 = vld [vmem:[%s3125_s25 + $0x208] ss:$16 sps:$4 sm:$0xff]  }
  0x65   : > { %v2885_v34 = vld [vmem:[%s3125_s25 + $0x288] ss:$16 sps:$4 sm:$0xff]  }
  0x66   : > { %1946 = vmatpush1.bf16.msra.mxu0 %v2776_v21  ;;  %v2866_v21 = vld [vmem:[%s3125_s25 + $0x2c] ss:$16 sps:$4 sm:$0xff]  }
  0x67   : > { %1987 = vmatpush1.bf16.msra.mxu1 %v2779_v22  ;;  %1947 = vmatprep.subr.bf16.mxu0 %v2784_v23  ;;  %v2869_v22 = vld [vmem:[%s3125_s25 + $0x22c] ss:$16 sps:$4 sm:$0xff]   ;;  %v2864_v23 = vld [vmem:[%s3125_s25 + $0x28] ss:$16 sps:$4 sm:$0xff]  }
  0x68   : > { %1988 = vmatprep.subr.bf16.mxu1 %v2787_v24  ;;  %v2867_v24 = vld [vmem:[%s3125_s25 + $0x228] ss:$16 sps:$4 sm:$0xff]  }
  0x6a   : > { %1948 = vmatpush1.bf16.msra.mxu0 %v2782_v25  ;;  %v2872_v25 = vld [vmem:[%s3125_s25 + $0x4c] ss:$16 sps:$4 sm:$0xff]  }
  0x6b   : > { %1989 = vmatpush1.bf16.msra.mxu1 %v2785_v26  ;;  %1949 = vmatprep.subr.bf16.mxu0 %v2790_v27  ;;  %v2875_v26 = vld [vmem:[%s3125_s25 + $0x24c] ss:$16 sps:$4 sm:$0xff]   ;;  %v2870_v27 = vld [vmem:[%s3125_s25 + $0x48] ss:$16 sps:$4 sm:$0xff]  }
  0x6c   : > { %1990 = vmatprep.subr.bf16.mxu1 %v2793_v28  ;;  %v2873_v28 = vld [vmem:[%s3125_s25 + $0x248] ss:$16 sps:$4 sm:$0xff]  }
  0x6e   : > { %1950 = vmatpush1.bf16.msra.mxu0 %v2788_v29  ;;  %v2878_v29 = vld [vmem:[%s3125_s25 + $0x6c] ss:$16 sps:$4 sm:$0xff]  }
  0x6f   : > { %1991 = vmatpush1.bf16.msra.mxu1 %v2791_v30  ;;  %1951 = vmatprep.subr.bf16.mxu0 %v2796_v31  ;;  %v2881_v30 = vld [vmem:[%s3125_s25 + $0x26c] ss:$16 sps:$4 sm:$0xff]   ;;  %v2876_v31 = vld [vmem:[%s3125_s25 + $0x68] ss:$16 sps:$4 sm:$0xff]  }
  0x70   : > { %1992 = vmatprep.subr.bf16.mxu1 %v2799_v32  ;;  %v2879_v32 = vld [vmem:[%s3125_s25 + $0x268] ss:$16 sps:$4 sm:$0xff]  }
  0x72   : > { %1952 = vmatpush1.bf16.msra.mxu0 %v2794_v35  ;;  %v2890_v35 = vld [vmem:[%s3125_s25 + $0xac] ss:$16 sps:$4 sm:$0xff]  }
  0x73   : > { %1993 = vmatpush1.bf16.msra.mxu1 %v2797_v36  ;;  %1953 = vmatprep.subr.bf16.mxu0 %v2802_v39  ;;  %v2893_v36 = vld [vmem:[%s3125_s25 + $0x2ac] ss:$16 sps:$4 sm:$0xff]   ;;  %v2888_v39 = vld [vmem:[%s3125_s25 + $0xa8] ss:$16 sps:$4 sm:$0xff]  }
  0x74   : > { %1994 = vmatprep.subr.bf16.mxu1 %v2805_v40  ;;  %v2891_v40 = vld [vmem:[%s3125_s25 + $0x2a8] ss:$16 sps:$4 sm:$0xff]  }
  0x76   : > { %1954 = vmatpush1.bf16.msra.mxu0 %v2800_v41  ;;  %v2896_v41 = vld [vmem:[%s3125_s25 + $0xcc] ss:$16 sps:$4 sm:$0xff]  }
  0x77   : > { %1995 = vmatpush1.bf16.msra.mxu1 %v2803_v42  ;;  %1955 = vmatprep.subr.bf16.mxu0 %v2808_v43  ;;  %v2899_v42 = vld [vmem:[%s3125_s25 + $0x2cc] ss:$16 sps:$4 sm:$0xff]   ;;  %v2894_v43 = vld [vmem:[%s3125_s25 + $0xc8] ss:$16 sps:$4 sm:$0xff]  }
  0x78   : > { %1996 = vmatprep.subr.bf16.mxu1 %v2811_v44  ;;  %v2897_v44 = vld [vmem:[%s3125_s25 + $0x2c8] ss:$16 sps:$4 sm:$0xff]  }
  0x7a   : > { %1956 = vmatpush1.bf16.msra.mxu0 %v2806_v45  ;;  %v2902_v45 = vld [vmem:[%s3125_s25 + $0xec] ss:$16 sps:$4 sm:$0xff]  }
  0x7b   : > { %1997 = vmatpush1.bf16.msra.mxu1 %v2809_v46  ;;  %1957 = vmatprep.subr.bf16.mxu0 %v2814_v47  ;;  %v2905_v46 = vld [vmem:[%s3125_s25 + $0x2ec] ss:$16 sps:$4 sm:$0xff]   ;;  %v2900_v47 = vld [vmem:[%s3125_s25 + $0xe8] ss:$16 sps:$4 sm:$0xff]  }
  0x7c   : > { %1998 = vmatprep.subr.bf16.mxu1 %v2817_v49  ;;  %v2903_v49 = vld [vmem:[%s3125_s25 + $0x2e8] ss:$16 sps:$4 sm:$0xff]  }
  0x7e   : > { %1958 = vmatpush1.bf16.msra.mxu0 %v2812_v50  ;;  %v2908_v50 = vld [vmem:[%s3125_s25 + $0x10c] ss:$16 sps:$4 sm:$0xff]  }
  0x7f   : > { %1999 = vmatpush1.bf16.msra.mxu1 %v2815_v51  ;;  %1959 = vmatprep.subr.bf16.mxu0 %v2820_v53  ;;  %v2911_v51 = vld [vmem:[%s3125_s25 + $0x30c] ss:$16 sps:$4 sm:$0xff]   ;;  %v2906_v53 = vld [vmem:[%s3125_s25 + $0x108] ss:$16 sps:$4 sm:$0xff]  }
  0x80   : > { %2000 = vmatprep.subr.bf16.mxu1 %v2823_v54  ;;  %v2909_v54 = vld [vmem:[%s3125_s25 + $0x308] ss:$16 sps:$4 sm:$0xff]  }
  0x82   : > { %1960 = vmatpush1.bf16.msra.mxu0 %v2818_v55  ;;  %v2914_v55 = vld [vmem:[%s3125_s25 + $0x12c] ss:$16 sps:$4 sm:$0xff]  }
  0x83   : > { %2001 = vmatpush1.bf16.msra.mxu1 %v2821_v56  ;;  %1961 = vmatprep.subr.bf16.mxu0 %v2826_v57  ;;  %v2917_v56 = vld [vmem:[%s3125_s25 + $0x32c] ss:$16 sps:$4 sm:$0xff]   ;;  %v2912_v57 = vld [vmem:[%s3125_s25 + $0x128] ss:$16 sps:$4 sm:$0xff]  }
  0x84   : > { %2002 = vmatprep.subr.bf16.mxu1 %v2829_v58  ;;  %v2915_v58 = vld [vmem:[%s3125_s25 + $0x328] ss:$16 sps:$4 sm:$0xff]  }
  0x86   : > { %1962 = vmatpush1.bf16.msra.mxu0 %v2824_v59  ;;  %v2920_v59 = vld [vmem:[%s3125_s25 + $0x14c] ss:$16 sps:$4 sm:$0xff]  }
  0x87   : > { %2003 = vmatpush1.bf16.msra.mxu1 %v2827_v60  ;;  %1963 = vmatprep.subr.bf16.mxu0 %v2832_v61  ;;  %v2923_v60 = vld [vmem:[%s3125_s25 + $0x34c] ss:$16 sps:$4 sm:$0xff]   ;;  %v2918_v61 = vld [vmem:[%s3125_s25 + $0x148] ss:$16 sps:$4 sm:$0xff]  }
  0x88   : > { %2004 = vmatprep.subr.bf16.mxu1 %v2835_v62  ;;  %v2921_v62 = vld [vmem:[%s3125_s25 + $0x348] ss:$16 sps:$4 sm:$0xff]  }
  0x8a   : > { %1964 = vmatpush1.bf16.msra.mxu0 %v2830_v63  ;;  %v2926_v63 = vld [vmem:[%s3125_s25 + $0x16c] ss:$16 sps:$4 sm:$0xff]  }
  0x8b   : > { %2005 = vmatpush1.bf16.msra.mxu1 %v2833_v0  ;;  %1965 = vmatprep.subr.bf16.mxu0 %v2838_v1  ;;  %v2929_v0 = vld [vmem:[%s3125_s25 + $0x36c] ss:$16 sps:$4 sm:$0xff]   ;;  %v2924_v1 = vld [vmem:[%s3125_s25 + $0x168] ss:$16 sps:$4 sm:$0xff]  }
  0x8c   : > { %2006 = vmatprep.subr.bf16.mxu1 %v2841_v2  ;;  %v2927_v2 = vld [vmem:[%s3125_s25 + $0x368] ss:$16 sps:$4 sm:$0xff]  }
  0x8e   : > { %1966 = vmatpush1.bf16.msra.mxu0 %v2836_v3  ;;  %v2932_v3 = vld [vmem:[%s3125_s25 + $0x18c] ss:$16 sps:$4 sm:$0xff]  }
  0x8f   : > { %2007 = vmatpush1.bf16.msra.mxu1 %v2839_v4  ;;  %1967 = vmatprep.subr.bf16.mxu0 %v2844_v5  ;;  %v2935_v4 = vld [vmem:[%s3125_s25 + $0x38c] ss:$16 sps:$4 sm:$0xff]   ;;  %v2930_v5 = vld [vmem:[%s3125_s25 + $0x188] ss:$16 sps:$4 sm:$0xff]  }
  0x90   : > { %2008 = vmatprep.subr.bf16.mxu1 %v2847_v6  ;;  %v2933_v6 = vld [vmem:[%s3125_s25 + $0x388] ss:$16 sps:$4 sm:$0xff]  }
  0x92   : > { %1968 = vmatpush1.bf16.msra.mxu0 %v2842_v9  ;;  %v2938_v9 = vld [vmem:[%s3125_s25 + $0x1ac] ss:$16 sps:$4 sm:$0xff]  }
  0x93   : > { %2009 = vmatpush1.bf16.msra.mxu1 %v2845_v10  ;;  %1969 = vmatprep.subr.bf16.mxu0 %v2850_v11  ;;  %v2941_v10 = vld [vmem:[%s3125_s25 + $0x3ac] ss:$16 sps:$4 sm:$0xff]   ;;  %v2936_v11 = vld [vmem:[%s3125_s25 + $0x1a8] ss:$16 sps:$4 sm:$0xff]  }
  0x94   : > { %2010 = vmatprep.subr.bf16.mxu1 %v2853_v12  ;;  %v2939_v12 = vld [vmem:[%s3125_s25 + $0x3a8] ss:$16 sps:$4 sm:$0xff]  }
  0x96   : > { %1970 = vmatpush1.bf16.msra.mxu0 %v2848_v13  ;;  %v2944_v13 = vld [vmem:[%s3125_s25 + $0x1cc] ss:$16 sps:$4 sm:$0xff]  }
  0x97   : > { %2011 = vmatpush1.bf16.msra.mxu1 %v2851_v14  ;;  %2021 = vmatprep.subr.bf16.mxu0 %v2860_v15  ;;  %v2947_v14 = vld [vmem:[%s3125_s25 + $0x3cc] ss:$16 sps:$4 sm:$0xff]   ;;  %v2942_v15 = vld [vmem:[%s3125_s25 + $0x1c8] ss:$16 sps:$4 sm:$0xff]  }
  0x98   : > { %2062 = vmatprep.subr.bf16.mxu1 %v2863_v16  ;;  %v2945_v16 = vld [vmem:[%s3125_s25 + $0x3c8] ss:$16 sps:$4 sm:$0xff]  }
  0x99   : > { %1972 = vmatmul.mubr.bf16.vlgmr.msra.gmra.mrb[4].mxu0 %v3290_v17 }
  0x9a   : > { %2013 = vmatmul.mubr.bf16.vlgmr.msra.gmra.mrb[4].mxu1 %v3294_v18  ;;  %2022 = vmatpush1.bf16.msra.mxu0 %v2858_v19  ;;  %v2950_v19 = vld [vmem:[%s3125_s25 + $0x1ec] ss:$16 sps:$4 sm:$0xff]  }
  0x9b   : > { %2063 = vmatpush1.bf16.msra.mxu1 %v2861_v20  ;;  %2023 = vmatprep.subr.bf16.mxu0 %v2866_v21  ;;  %v2953_v20 = vld [vmem:[%s3125_s25 + $0x3ec] ss:$16 sps:$4 sm:$0xff]   ;;  %v2948_v21 = vld [vmem:[%s3125_s25 + $0x1e8] ss:$16 sps:$4 sm:$0xff]  }
  0x9c   : > { %2064 = vmatprep.subr.bf16.mxu1 %v2869_v22  ;;  %2053 = vmatprep.mubr.bf16.mxu0 %v3175_v48  ;;  %v2884_v48 = vld [vmem:[%s3125_s25 + $0x8c] ss:$16 sps:$4 sm:$0xff]   ;;  %v2951_v22 = vld [vmem:[%s3125_s25 + $0x3e8] ss:$16 sps:$4 sm:$0xff]  }
  0x9d   : > { %2094 = vmatprep.mubr.bf16.mxu1 %v3180_v52  ;;  %v2887_v52 = vld [vmem:[%s3125_s25 + $0x28c] ss:$16 sps:$4 sm:$0xff]  }
  0x9e   : > { %2024 = vmatpush1.bf16.msra.mxu0 %v2864_v23  ;;  %v2956_v23 = vld [vmem:[%s3125_s25 + $0x40c] ss:$16 sps:$4 sm:$0xff]  }
  0x9f   : > { %2065 = vmatpush1.bf16.msra.mxu1 %v2867_v24  ;;  %2025 = vmatprep.subr.bf16.mxu0 %v2872_v25  ;;  %v2959_v24 = vld [vmem:[%s3125_s25 + $0x60c] ss:$16 sps:$4 sm:$0xff]   ;;  %v2954_v25 = vld [vmem:[%s3125_s25 + $0x408] ss:$16 sps:$4 sm:$0xff]  }
  0xa0   : > { %2066 = vmatprep.subr.bf16.mxu1 %v2875_v26  ;;  %v2957_v26 = vld [vmem:[%s3125_s25 + $0x608] ss:$16 sps:$4 sm:$0xff]  }
  0xa2   : > { %2026 = vmatpush1.bf16.msra.mxu0 %v2870_v27  ;;  %v2962_v27 = vld [vmem:[%s3125_s25 + $0x42c] ss:$16 sps:$4 sm:$0xff]  }
  0xa3   : > { %2067 = vmatpush1.bf16.msra.mxu1 %v2873_v28  ;;  %2027 = vmatprep.subr.bf16.mxu0 %v2878_v29  ;;  %v2965_v28 = vld [vmem:[%s3125_s25 + $0x62c] ss:$16 sps:$4 sm:$0xff]   ;;  %v2960_v29 = vld [vmem:[%s3125_s25 + $0x428] ss:$16 sps:$4 sm:$0xff]  }
  0xa4   : > { %2068 = vmatprep.subr.bf16.mxu1 %v2881_v30  ;;  %v2963_v30 = vld [vmem:[%s3125_s25 + $0x628] ss:$16 sps:$4 sm:$0xff]  }
  0xa6   : > { %2028 = vmatpush1.bf16.msra.mxu0 %v2876_v31  ;;  %v2968_v31 = vld [vmem:[%s3125_s25 + $0x44c] ss:$16 sps:$4 sm:$0xff]  }
  0xa7   : > { %2069 = vmatpush1.bf16.msra.mxu1 %v2879_v32  ;;  %2029 = vmatprep.subr.bf16.mxu0 %v2884_v48  ;;  %v2971_v32 = vld [vmem:[%s3125_s25 + $0x64c] ss:$16 sps:$4 sm:$0xff]  }
  0xa8   : > { %2070 = vmatprep.subr.bf16.mxu1 %v2887_v52  ;;  %v2974_v48 = vld [vmem:[%s3125_s25 + $0x46c] ss:$16 sps:$4 sm:$0xff]  }
  0xa9   : > { %v2977_v52 = vld [vmem:[%s3125_s25 + $0x66c] ss:$16 sps:$4 sm:$0xff]  }
  0xaa   : > { %2030 = vmatpush1.bf16.msra.mxu0 %v2882_v33  ;;  %v2972_v33 = vld [vmem:[%s3125_s25 + $0x468] ss:$16 sps:$4 sm:$0xff]  }
  0xab   : > { %2071 = vmatpush1.bf16.msra.mxu1 %v2885_v34  ;;  %2031 = vmatprep.subr.bf16.mxu0 %v2890_v35  ;;  %v2983_v34 = vld [vmem:[%s3125_s25 + $0x68c] ss:$16 sps:$4 sm:$0xff]   ;;  %v2978_v35 = vld [vmem:[%s3125_s25 + $0x488] ss:$16 sps:$4 sm:$0xff]  }
  0xac   : > { %2072 = vmatprep.subr.bf16.mxu1 %v2893_v36  ;;  %v2981_v36 = vld [vmem:[%s3125_s25 + $0x688] ss:$16 sps:$4 sm:$0xff]  }
  0xae   : > { %2032 = vmatpush1.bf16.msra.mxu0 %v2888_v39  ;;  %v2986_v39 = vld [vmem:[%s3125_s25 + $0x4ac] ss:$16 sps:$4 sm:$0xff]  }
  0xaf   : > { %2073 = vmatpush1.bf16.msra.mxu1 %v2891_v40  ;;  %2033 = vmatprep.subr.bf16.mxu0 %v2896_v41  ;;  %v2989_v40 = vld [vmem:[%s3125_s25 + $0x6ac] ss:$16 sps:$4 sm:$0xff]   ;;  %v2984_v41 = vld [vmem:[%s3125_s25 + $0x4a8] ss:$16 sps:$4 sm:$0xff]  }
  0xb0   : > { %2074 = vmatprep.subr.bf16.mxu1 %v2899_v42  ;;  %v2987_v42 = vld [vmem:[%s3125_s25 + $0x6a8] ss:$16 sps:$4 sm:$0xff]  }
  0xb2   : > { %2034 = vmatpush1.bf16.msra.mxu0 %v2894_v43  ;;  %v2992_v43 = vld [vmem:[%s3125_s25 + $0x4cc] ss:$16 sps:$4 sm:$0xff]  }
  0xb3   : > { %2075 = vmatpush1.bf16.msra.mxu1 %v2897_v44  ;;  %2035 = vmatprep.subr.bf16.mxu0 %v2902_v45  ;;  %v2995_v44 = vld [vmem:[%s3125_s25 + $0x6cc] ss:$16 sps:$4 sm:$0xff]   ;;  %v2990_v45 = vld [vmem:[%s3125_s25 + $0x4c8] ss:$16 sps:$4 sm:$0xff]  }
  0xb4   : > { %2076 = vmatprep.subr.bf16.mxu1 %v2905_v46  ;;  %v2993_v46 = vld [vmem:[%s3125_s25 + $0x6c8] ss:$16 sps:$4 sm:$0xff]  }
  0xb6   : > { %2036 = vmatpush1.bf16.msra.mxu0 %v2900_v47  ;;  %v2998_v47 = vld [vmem:[%s3125_s25 + $0x4ec] ss:$16 sps:$4 sm:$0xff]  }
  0xb7   : > { %2077 = vmatpush1.bf16.msra.mxu1 %v2903_v49  ;;  %2037 = vmatprep.subr.bf16.mxu0 %v2908_v50  ;;  %v3001_v49 = vld [vmem:[%s3125_s25 + $0x6ec] ss:$16 sps:$4 sm:$0xff]   ;;  %v2996_v50 = vld [vmem:[%s3125_s25 + $0x4e8] ss:$16 sps:$4 sm:$0xff]  }
  0xb8   : > { %2078 = vmatprep.subr.bf16.mxu1 %v2911_v51  ;;  %v2999_v51 = vld [vmem:[%s3125_s25 + $0x6e8] ss:$16 sps:$4 sm:$0xff]  }
  0xba   : > { %2038 = vmatpush1.bf16.msra.mxu0 %v2906_v53  ;;  %v3004_v53 = vld [vmem:[%s3125_s25 + $0x50c] ss:$16 sps:$4 sm:$0xff]  }
  0xbb   : > { %2079 = vmatpush1.bf16.msra.mxu1 %v2909_v54  ;;  %2039 = vmatprep.subr.bf16.mxu0 %v2914_v55  ;;  %v3007_v54 = vld [vmem:[%s3125_s25 + $0x70c] ss:$16 sps:$4 sm:$0xff]   ;;  %v3002_v55 = vld [vmem:[%s3125_s25 + $0x508] ss:$16 sps:$4 sm:$0xff]  }
  0xbc   : > { %2080 = vmatprep.subr.bf16.mxu1 %v2917_v56  ;;  %v3005_v56 = vld [vmem:[%s3125_s25 + $0x708] ss:$16 sps:$4 sm:$0xff]  }
  0xbe   : > { %2040 = vmatpush1.bf16.msra.mxu0 %v2912_v57  ;;  %v3010_v57 = vld [vmem:[%s3125_s25 + $0x52c] ss:$16 sps:$4 sm:$0xff]  }
  0xbf   : > { %2081 = vmatpush1.bf16.msra.mxu1 %v2915_v58  ;;  %2041 = vmatprep.subr.bf16.mxu0 %v2920_v59  ;;  %v3013_v58 = vld [vmem:[%s3125_s25 + $0x72c] ss:$16 sps:$4 sm:$0xff]   ;;  %v3008_v59 = vld [vmem:[%s3125_s25 + $0x528] ss:$16 sps:$4 sm:$0xff]  }
  0xc0   : > { %2082 = vmatprep.subr.bf16.mxu1 %v2923_v60  ;;  %v3011_v60 = vld [vmem:[%s3125_s25 + $0x728] ss:$16 sps:$4 sm:$0xff]  }
  0xc2   : > { %2042 = vmatpush1.bf16.msra.mxu0 %v2918_v61  ;;  %v3016_v61 = vld [vmem:[%s3125_s25 + $0x54c] ss:$16 sps:$4 sm:$0xff]  }
  0xc3   : > { %2083 = vmatpush1.bf16.msra.mxu1 %v2921_v62  ;;  %2043 = vmatprep.subr.bf16.mxu0 %v2926_v63  ;;  %v3019_v62 = vld [vmem:[%s3125_s25 + $0x74c] ss:$16 sps:$4 sm:$0xff]   ;;  %v3014_v63 = vld [vmem:[%s3125_s25 + $0x548] ss:$16 sps:$4 sm:$0xff]  }
  0xc4   : > { %2084 = vmatprep.subr.bf16.mxu1 %v2929_v0  ;;  %v3017_v0 = vld [vmem:[%s3125_s25 + $0x748] ss:$16 sps:$4 sm:$0xff]  }
  0xc6   : > { %2044 = vmatpush1.bf16.msra.mxu0 %v2924_v1  ;;  %v3022_v1 = vld [vmem:[%s3125_s25 + $0x56c] ss:$16 sps:$4 sm:$0xff]  }
  0xc7   : > { %2085 = vmatpush1.bf16.msra.mxu1 %v2927_v2  ;;  %2045 = vmatprep.subr.bf16.mxu0 %v2932_v3  ;;  %v3025_v2 = vld [vmem:[%s3125_s25 + $0x76c] ss:$16 sps:$4 sm:$0xff]   ;;  %v3020_v3 = vld [vmem:[%s3125_s25 + $0x568] ss:$16 sps:$4 sm:$0xff]  }
  0xc8   : > { %2086 = vmatprep.subr.bf16.mxu1 %v2935_v4  ;;  %v3023_v4 = vld [vmem:[%s3125_s25 + $0x768] ss:$16 sps:$4 sm:$0xff]  }
  0xca   : > { %2046 = vmatpush1.bf16.msra.mxu0 %v2930_v5  ;;  %v3028_v5 = vld [vmem:[%s3125_s25 + $0x58c] ss:$16 sps:$4 sm:$0xff]  }
  0xcb   : > { %2087 = vmatpush1.bf16.msra.mxu1 %v2933_v6  ;;  %2047 = vmatprep.subr.bf16.mxu0 %v2938_v9  ;;  %v3031_v6 = vld [vmem:[%s3125_s25 + $0x78c] ss:$16 sps:$4 sm:$0xff]   ;;  %v3026_v9 = vld [vmem:[%s3125_s25 + $0x588] ss:$16 sps:$4 sm:$0xff]  }
  0xcc   : > { %2088 = vmatprep.subr.bf16.mxu1 %v2941_v10  ;;  %v3029_v10 = vld [vmem:[%s3125_s25 + $0x788] ss:$16 sps:$4 sm:$0xff]  }
  0xce   : > { %2048 = vmatpush1.bf16.msra.mxu0 %v2936_v11  ;;  %v3034_v11 = vld [vmem:[%s3125_s25 + $0x5ac] ss:$16 sps:$4 sm:$0xff]  }
  0xcf   : > { %2089 = vmatpush1.bf16.msra.mxu1 %v2939_v12  ;;  %2049 = vmatprep.subr.bf16.mxu0 %v2944_v13  ;;  %v3037_v12 = vld [vmem:[%s3125_s25 + $0x7ac] ss:$16 sps:$4 sm:$0xff]   ;;  %v3032_v13 = vld [vmem:[%s3125_s25 + $0x5a8] ss:$16 sps:$4 sm:$0xff]  }
  0xd0   : > { %2090 = vmatprep.subr.bf16.mxu1 %v2947_v14  ;;  %v3035_v14 = vld [vmem:[%s3125_s25 + $0x7a8] ss:$16 sps:$4 sm:$0xff]  }
  0xd2   : > { %2050 = vmatpush1.bf16.msra.mxu0 %v2942_v15  ;;  %v3040_v15 = vld [vmem:[%s3125_s25 + $0x5cc] ss:$16 sps:$4 sm:$0xff]  }
  0xd3   : > { %2091 = vmatpush1.bf16.msra.mxu1 %v2945_v16  ;;  %2051 = vmatprep.subr.bf16.mxu0 %v2950_v19  ;;  %v3043_v16 = vld [vmem:[%s3125_s25 + $0x7cc] ss:$16 sps:$4 sm:$0xff]   ;;  %v3038_v19 = vld [vmem:[%s3125_s25 + $0x5c8] ss:$16 sps:$4 sm:$0xff]  }
  0xd4   : > { %2092 = vmatprep.subr.bf16.mxu1 %v2953_v20  ;;  %v3041_v20 = vld [vmem:[%s3125_s25 + $0x7c8] ss:$16 sps:$4 sm:$0xff]  }
  0xd6   : > { %2052 = vmatpush1.bf16.msra.mxu0 %v2948_v21  ;;  %v3046_v21 = vld [vmem:[%s3125_s25 + $0x5ec] ss:$16 sps:$4 sm:$0xff]  }
  0xd7   : > { %2093 = vmatpush1.bf16.msra.mxu1 %v2951_v22  ;;  %2103 = vmatprep.subr.bf16.mxu0 %v2956_v23  ;;  %v3049_v22 = vld [vmem:[%s3125_s25 + $0x7ec] ss:$16 sps:$4 sm:$0xff]   ;;  %v3044_v23 = vld [vmem:[%s3125_s25 + $0x5e8] ss:$16 sps:$4 sm:$0xff]  }
  0xd8   : > { %2144 = vmatprep.subr.bf16.mxu1 %v2959_v24  ;;  %v3047_v24 = vld [vmem:[%s3125_s25 + $0x7e8] ss:$16 sps:$4 sm:$0xff]  }
  0xd9   : > { %2054 = vmatmul.mubr.bf16.vlgmr.msra.gmra.mrb[8].mxu0 %v3202_v7  ;;  %v2966_v7 = vld [vmem:[%s3125_s25 + $0x448] ss:$16 sps:$4 sm:$0xff]  }
  0xda   : > { %2095 = vmatmul.mubr.bf16.vlgmr.msra.gmra.mrb[8].mxu1 %v3204_v8  ;;  %2104 = vmatpush1.bf16.msra.mxu0 %v2954_v25  ;;  %v2969_v8 = vld [vmem:[%s3125_s25 + $0x648] ss:$16 sps:$4 sm:$0xff]  }
  0xdb   : > { %2145 = vmatpush1.bf16.msra.mxu1 %v2957_v26  ;;  %2105 = vmatprep.subr.bf16.mxu0 %v2962_v27 }
  0xdc   : > { %2146 = vmatprep.subr.bf16.mxu1 %v2965_v28  ;;  %2135 = vmatprep.mubr.bf16.mxu0 %v3242_v37  ;;  %v2975_v37 = vld [vmem:[%s3125_s25 + $0x668] ss:$16 sps:$4 sm:$0xff]  }
  0xdd   : > { %2176 = vmatprep.mubr.bf16.mxu1 %v3246_v38  ;;  %v2980_v38 = vld [vmem:[%s3125_s25 + $0x48c] ss:$16 sps:$4 sm:$0xff]  }
  0xde   : > { %2106 = vmatpush1.bf16.msra.mxu0 %v2960_v29 }
  0xdf   : > { %2147 = vmatpush1.bf16.msra.mxu1 %v2963_v30  ;;  %2107 = vmatprep.subr.bf16.mxu0 %v2968_v31 }
  0xe0   : > { %2148 = vmatprep.subr.bf16.mxu1 %v2971_v32 }
  0xe2   : > { %2108 = vmatpush1.bf16.msra.mxu0 %v2966_v7 }
  0xe3   : > { %2149 = vmatpush1.bf16.msra.mxu1 %v2969_v8  ;;  %2109 = vmatprep.subr.bf16.mxu0 %v2974_v48 }
  0xe4   : > { %2150 = vmatprep.subr.bf16.mxu1 %v2977_v52 }
  0xe6   : > { %2110 = vmatpush1.bf16.msra.mxu0 %v2972_v33 }
  0xe7   : > { %2151 = vmatpush1.bf16.msra.mxu1 %v2975_v37  ;;  %2111 = vmatprep.subr.bf16.mxu0 %v2980_v38 }
  0xe8   : > { %2152 = vmatprep.subr.bf16.mxu1 %v2983_v34  ;;  %v285_v34 = vld [vmem:[#allocation2] sm:$0xff] }
  0xea   : > { %2112 = vmatpush1.bf16.msra.mxu0 %v2978_v35 }
  0xeb   : > { %2153 = vmatpush1.bf16.msra.mxu1 %v2981_v36  ;;  %2113 = vmatprep.subr.bf16.mxu0 %v2986_v39  ;;  %v286_v39 = vld [vmem:[#allocation2 + $0x8] sm:$0xff] }
  0xec   : > { %2154 = vmatprep.subr.bf16.mxu1 %v2989_v40 }
  0xee   : > { %2114 = vmatpush1.bf16.msra.mxu0 %v2984_v41 }
  0xef   : > { %2155 = vmatpush1.bf16.msra.mxu1 %v2987_v42  ;;  %2115 = vmatprep.subr.bf16.mxu0 %v2992_v43 }
  0xf0   : > { %2156 = vmatprep.subr.bf16.mxu1 %v2995_v44 }
  0xf2   : > { %2116 = vmatpush1.bf16.msra.mxu0 %v2990_v45 }
  0xf3   : > { %2157 = vmatpush1.bf16.msra.mxu1 %v2993_v46  ;;  %2117 = vmatprep.subr.bf16.mxu0 %v2998_v47 }
  0xf4   : > { %2158 = vmatprep.subr.bf16.mxu1 %v3001_v49 }
  0xf6   : > { %2118 = vmatpush1.bf16.msra.mxu0 %v2996_v50 }
  0xf7   : > { %2159 = vmatpush1.bf16.msra.mxu1 %v2999_v51  ;;  %2119 = vmatprep.subr.bf16.mxu0 %v3004_v53 }
  0xf8   : > { %2160 = vmatprep.subr.bf16.mxu1 %v3007_v54 }
  0xfa   : > { %2120 = vmatpush1.bf16.msra.mxu0 %v3002_v55 }
  0xfb   : > { %2161 = vmatpush1.bf16.msra.mxu1 %v3005_v56  ;;  %2121 = vmatprep.subr.bf16.mxu0 %v3010_v57 }
  0xfc   : > { %2162 = vmatprep.subr.bf16.mxu1 %v3013_v58 }
  0xfe   : > { %2122 = vmatpush1.bf16.msra.mxu0 %v3008_v59 }
  0xff   : > { %2163 = vmatpush1.bf16.msra.mxu1 %v3011_v60  ;;  %2123 = vmatprep.subr.bf16.mxu0 %v3016_v61 }
 0x100   : > { %2164 = vmatprep.subr.bf16.mxu1 %v3019_v62  ;;  %v287_v62 = vld [vmem:[#allocation2 + $0x10] sm:$0xff] }
 0x102   : > { %2124 = vmatpush1.bf16.msra.mxu0 %v3014_v63 }
 0x103   : > { %2165 = vmatpush1.bf16.msra.mxu1 %v3017_v0  ;;  %2125 = vmatprep.subr.bf16.mxu0 %v3022_v1 }
 0x104   : > { %2166 = vmatprep.subr.bf16.mxu1 %v3025_v2 }
 0x106   : > { %2126 = vmatpush1.bf16.msra.mxu0 %v3020_v3  ;;  %v288_v3 = vld [vmem:[#allocation2 + $0x18] sm:$0xff] }
 0x107   : > { %2167 = vmatpush1.bf16.msra.mxu1 %v3023_v4  ;;  %2127 = vmatprep.subr.bf16.mxu0 %v3028_v5 }
 0x108   : > { %2168 = vmatprep.subr.bf16.mxu1 %v3031_v6 }
 0x10a   : > { %2128 = vmatpush1.bf16.msra.mxu0 %v3026_v9 }
 0x10b   : > { %2169 = vmatpush1.bf16.msra.mxu1 %v3029_v10  ;;  %2129 = vmatprep.subr.bf16.mxu0 %v3034_v11  ;;  %v2203_v11 = vlaneseq (!%p2627_p7) }
 0x10c   : > { %2170 = vmatprep.subr.bf16.mxu1 %v3037_v12 }
 0x10d   : > { %v2204_v12 = vshrl.u32 (!%p2627_p7), %v2203_v11, 7 }
 0x10e   : > { %2130 = vmatpush1.bf16.msra.mxu0 %v3032_v13  ;;  %v2201_v13 = vld [vmem:[%s3459_s2] sm:$0xf] (!%p2627_p7) }
 0x10f   : > { %2171 = vmatpush1.bf16.msra.mxu1 %v3035_v14  ;;  %2131 = vmatprep.subr.bf16.mxu0 %v3040_v15  ;;  %v2205_v15 = vsub.s32 (!%p2627_p7), 0, %v2204_v12 }
 0x110   : > { %2172 = vmatprep.subr.bf16.mxu1 %v3043_v16  ;;  %v2209_v16 = vsub.s32 (!%p2627_p7), 1, %v2204_v12 }
 0x112   : > { %2132 = vmatpush1.bf16.msra.mxu0 %v3038_v19  ;;  %v2213_v19 = vsub.s32 (!%p2627_p7), 2, %v2204_v12 }
 0x113   : > { %2173 = vmatpush1.bf16.msra.mxu1 %v3041_v20  ;;  %2133 = vmatprep.subr.bf16.mxu0 %v3046_v21  ;;  %v2217_v20 = vsub.s32 (!%p2627_p7), 3, %v2204_v12 }
 0x114   : > { %2174 = vmatprep.subr.bf16.mxu1 %v3049_v22 }
 0x116   : > { %2134 = vmatpush1.bf16.msra.mxu0 %v3044_v23 }
 0x117   : > { %2175 = vmatpush1.bf16.msra.mxu1 %v3047_v24  ;;  %v2206_v24 = vrot.slane (!%p2627_p7), %v2201_v13, %v2205_v15 }
 0x119   : > { %2136 = vmatmul.mubr.bf16.vlgmr.msra.gmra.mrb[12].mxu0 %v3290_v17 }
 0x11a   : > { %2177 = vmatmul.mubr.bf16.vlgmr.msra.gmra.mrb[12].mxu1 %v3294_v18 }
 0x12c   : > { %v1891_v25 = vpop.f32.mrb[0].mxu0 }
 0x12d   : > { %v1932_v26 = vpop.f32.mrb[0].mxu1  ;;  %v1893_v28 = vpop.f32.mrb[1].mxu0 }
 0x12e   : > { %v1933_v27 = vadd.f32 %v1932_v26, %v1891_v25  ;;  %v1934_v29 = vpop.f32.mrb[1].mxu1  ;;  %v1895_v31 = vpop.f32.mrb[2].mxu0  ;;  %v2210_v25 = vrot.slane (!%p2627_p7), %v2201_v13, %v2209_v16  ;;  %v2214_v26 = vrot.slane (!%p2627_p7), %v2201_v13, %v2213_v19 }
 0x12f   : > { %v1935_v30 = vadd.f32 %v1934_v29, %v1893_v28  ;;  %v1936_v32 = vpop.f32.mrb[2].mxu1  ;;  %v1896_v7 = vpop.f32.mrb[3].mxu0 }
 0x130   : > { %v1937_v8 = vpop.f32.mrb[3].mxu1 }
 0x16c   : > { %v1973_v48 = vpop.f32.mrb[4].mxu0 }
 0x16d   : > { %v2014_v52 = vpop.f32.mrb[4].mxu1  ;;  %v1974_v33 = vadd.f32 %v1973_v48, %v1933_v27  ;;  %v1975_v37 = vpop.f32.mrb[5].mxu0  ;;  %v2218_v27 = vrot.slane (!%p2627_p7), %v2201_v13, %v2217_v20 }
 0x16e   : > { %v2016_v38 = vpop.f32.mrb[5].mxu1  ;;  %v1976_v35 = vadd.f32 %v1975_v37, %v1935_v30  ;;  %v1977_v17 = vpop.f32.mrb[6].mxu0 }
 0x16f   : > { %v2018_v36 = vpop.f32.mrb[6].mxu1  ;;  %v2015_v18 = vadd.f32 %v2014_v52, %v1974_v33  ;;  %v1978_v40 = vpop.f32.mrb[7].mxu0 }
 0x170   : > { %v2019_v41 = vpop.f32.mrb[7].mxu1  ;;  %v2017_v42 = vadd.f32 %v2016_v38, %v1976_v35 }
 0x171   : > { %v2185_v43 = vadd.f32 %v2015_v18, %v285_v34 }
 0x172   : > { %v2186_v44 = vadd.f32 %v2017_v42, %v286_v39 }
 0x173   : > { %2189 = vst [vmem:[#allocation2] sm:$0xff] %v2185_v43 }
 0x174   : > { %2190 = vst [vmem:[#allocation2 + $0x8] sm:$0xff] %v2186_v44 }
 0x17a   : > { %v2197_v14 = vld [vmem:[#allocation2] sm:$0xff] (!%p2627_p7) }
 0x17b   : > { %v2198_v21 = vld [vmem:[#allocation2 + $0x8] sm:$0xff] (!%p2627_p7)  ;;  %v2223_v28 = vadd.f32 (!%p2627_p7), %v2206_v24, %v2197_v14 }
 0x17c   : > { %v2224_v29 = vadd.f32 (!%p2627_p7), %v2210_v25, %v2198_v21 }
 0x17d   : > { %v2227_v32 = vmax.f32 (!%p2627_p7), %v2223_v28, 0.0 }
 0x17e   : > { %v2228_v7 = vmax.f32 (!%p2627_p7), %v2224_v29, 0.0 }
 0x17f   : > { %2231 = vst [vmem:[%s3460_s3] sm:$0xff] (!%p2627_p7), %v2227_v32 }
 0x180   : > { %2232 = vst [vmem:[%s3460_s3 + $0x8] sm:$0xff] (!%p2627_p7), %v2228_v7 }
 0x1ac   : > { %v2055_v45 = vpop.f32.mrb[8].mxu0 }
 0x1ad   : > { %v2096_v46 = vpop.f32.mrb[8].mxu1  ;;  %v2057_v49 = vpop.f32.mrb[9].mxu0 }
 0x1ae   : > { %v2097_v47 = vadd.f32 %v2096_v46, %v2055_v45  ;;  %v2098_v50 = vpop.f32.mrb[9].mxu1  ;;  %v2059_v53 = vpop.f32.mrb[10].mxu0 }
 0x1af   : > { %v2099_v51 = vadd.f32 %v2098_v50, %v2057_v49  ;;  %v2100_v54 = vpop.f32.mrb[10].mxu1  ;;  %v2060_v55 = vpop.f32.mrb[11].mxu0 }
 0x1b0   : > { %v2101_v56 = vpop.f32.mrb[11].mxu1 }
 0x1ec   : > { %v2137_v57 = vpop.f32.mrb[12].mxu0 }
 0x1ed   : > { %v2178_v58 = vpop.f32.mrb[12].mxu1  ;;  %v2138_v59 = vadd.f32 %v2137_v57, %v2097_v47  ;;  %v2139_v60 = vpop.f32.mrb[13].mxu0 }
 0x1ee   : > { %v2180_v61 = vpop.f32.mrb[13].mxu1  ;;  %v2140_v63 = vadd.f32 %v2139_v60, %v2099_v51  ;;  %v2141_v0 = vpop.f32.mrb[14].mxu0  ;;  %2196 = sbr.rel (%p2627_p7) target bundleno = 513 (0x201), region = 40 }
 0x1ef   : > { %v2182_v1 = vpop.f32.mrb[14].mxu1  ;;  %v2179_v2 = vadd.f32 %v2178_v58, %v2138_v59  ;;  %v2142_v4 = vpop.f32.mrb[15].mxu0 }
 0x1f0   : > { %v2183_v5 = vpop.f32.mrb[15].mxu1  ;;  %v2181_v6 = vadd.f32 %v2180_v61, %v2140_v63 }
 0x1f1   : > { %v2187_v9 = vadd.f32 %v2179_v2, %v287_v62 }
 0x1f2   : > { %v2188_v10 = vadd.f32 %v2181_v6, %v288_v3 }
 0x1f3   : > { %2191 = vst [vmem:[#allocation2 + $0x10] sm:$0xff] %v2187_v9 }
 0x1f4   : > { %2192 = vst [vmem:[#allocation2 + $0x18] sm:$0xff] %v2188_v10 }
 0x1fa   : > { %v2199_v22 = vld [vmem:[#allocation2 + $0x10] sm:$0xff] }
 0x1fb   : > { %v2200_v23 = vld [vmem:[#allocation2 + $0x18] sm:$0xff]  ;;  %v2225_v30 = vadd.f32 %v2214_v26, %v2199_v22 }
 0x1fc   : > { %v2226_v31 = vadd.f32 %v2218_v27, %v2200_v23 }
 0x1fd   : > { %v2229_v8 = vmax.f32 %v2225_v30, 0.0 }
 0x1fe   : > { %v2230_v48 = vmax.f32 %v2226_v31, 0.0 }
 0x1ff   : > { %2233 = vst [vmem:[%s3460_s3 + $0x10] sm:$0xff] %v2229_v8 }
 0x200   : > { %2234 = vst [vmem:[%s3460_s3 + $0x18] sm:$0xff] %v2230_v48 }
 0x201 PF: > { %s13_s14 = sadd.s32 1, %s3072_s14   ;;  %s3461_s12 = smov %s3068_s13 }
 0x202   : > { %p10_p8 = scmp.ge.s32.totalorder %s13_s14, 4   ;;  %s3462_s13 = smov %s3464_s15 }
 0x204   :  { %12 = sbr.rel (!%p10_p8) target bundleno = 2 (0x2), region = 76 }

</bundles_post_ra>
